<compile_context>
chip_gen: v7x
topology: tpu7x:2x2x1
jax: 0.10.0
libtpu: 0.0.40
codegen_flags: <defaults>
</compile_context>

<pallas_src>
import functools

import jax
import jax.numpy as jnp
import numpy as np
from jax.experimental import pallas as pl
from jax.experimental.pallas import tpu as pltpu

# ------------------------------ static shapes -------------------------------

LANE = 128
K = 5                           # conv kernel size
H0 = 32                         # input spatial (required so fc1 sees 16*5*5)
H1 = 28                         # conv1 output spatial
PH1 = 14                        # pool1 output spatial  (pooled-1 grid width)
Q1 = PH1 * PH1                  # 196 pooled-1 positions
KPATCH = K * K * 3              # 75 conv1 im2col features (padded to 128)
C1, C1P = 30, 32                # conv1 out channels, lane-packed width
H2 = 10                         # conv2 output spatial
PH2 = 5                         # pool2 output spatial
Q2 = PH2 * PH2                  # 25 pooled-2 positions
C2 = 16                         # conv2 out channels

P1_ROWS = 208                   # pooled-1 scratch rows (>= 203 max tap read)
M2 = 144                        # conv2 "wide" output rows (>= 143 needed)
PW2_ROWS = 128                  # pool2-wide rows fed to the selection matmul
FCQ = 32                        # padded pooled-2 row count in the fc scratch


# ------------------------------ Pallas kernel -------------------------------

def _net_kernel(x_ref, w1_ref, b1_ref, w2_ref, b2_ref, s2_ref,
                fw1_ref, fb1_ref, fw2_ref, fb2_ref, fw3_ref, fb3_ref,
                out_ref, p1_scr, c2_scr, fc_scr, *, nb):
    """Whole Net forward for one batch-block of `nb` images.

    x_ref : (nb, 4, 196, 128) bf16  conv1 im2col patches in pooled order
    w1_ref: (128, 32) bf16          conv1 im2col weights (75x30 valid)
    w2_ref: (25, 32, 128) bf16      conv2 tap weights (30x16 valid per tap)
    s2_ref: (32, 128) bf16          exact 0/1 pool2 stride-2 selection
    fw1_ref: (25, 128, 128) bf16    fc1 per-q weights (NCHW flatten folded in)
    fw2/fw3: (128, 128) bf16        fc2 / fc3
    out_ref: (nb, 128) f32          logits (cols >= 10 are zero padding)
    """
    # Zero the halo rows of the pooled-1 scratch (read by conv2 taps only for
    # never-selected output rows; zeroing keeps every intermediate finite).
    p1_scr[pl.ds(Q1, P1_ROWS - Q1), :] = jnp.zeros(
        (P1_ROWS - Q1, C1P), jnp.float32)

    for img in range(nb):
        # ---- conv1: one K=128 bf16 matmul per pool offset, then 2x2 max ----
        pooled1 = None
        for o in range(4):
            y = jnp.dot(x_ref[img, o], w1_ref[...],
                        preferred_element_type=jnp.float32)        # (196, 32)
            pooled1 = y if pooled1 is None else jnp.maximum(pooled1, y)
        pooled1 = jnp.maximum(pooled1 + b1_ref[...], 0.0)           # bias+ReLU
        p1_scr[pl.ds(0, Q1), :] = pooled1

        # ---- conv2: 25 shifted-tap matmuls with K=32 packed channels -------
        acc = jnp.zeros((M2, LANE), jnp.float32)
        for t in range(K * K):
            i, j = divmod(t, K)
            lhs = p1_scr[pl.ds(i * PH1 + j, M2), :].astype(jnp.bfloat16)
            acc = acc + jnp.dot(lhs, w2_ref[t],
                                preferred_element_type=jnp.float32)
        c2_scr[...] = acc                                           # (144,128)

        # ---- 2x2 max pool (4 shifted reads) + bias + ReLU + selection ------
        pw = jnp.maximum(
            jnp.maximum(c2_scr[pl.ds(0, PW2_ROWS), :],
                        c2_scr[pl.ds(1, PW2_ROWS), :]),
            jnp.maximum(c2_scr[pl.ds(PH1, PW2_ROWS), :],
                        c2_scr[pl.ds(PH1 + 1, PW2_ROWS), :]))
        pw = jnp.maximum(pw + b2_ref[...], 0.0).astype(jnp.bfloat16)
        # bias+ReLU applied BEFORE the 0/1 selection => pad rows are exactly 0
        pooled2 = jnp.dot(s2_ref[...], pw,
                          preferred_element_type=jnp.float32)       # (32, 128)
        fc_scr[img] = pooled2

    # ---- fc1(+ReLU) -> fc2(+ReLU) -> fc3 on the whole batch-block ----------
    # fc1 contracts only over the 25 valid q-rows (no padded-K matmul).
    h = jnp.zeros((nb, LANE), jnp.float32)
    for q in range(Q2):
        h = h + jnp.dot(fc_scr[:, q, :].astype(jnp.bfloat16), fw1_ref[q],
                        preferred_element_type=jnp.float32)
    h = jnp.maximum(h + fb1_ref[...], 0.0).astype(jnp.bfloat16)
    h = jnp.maximum(jnp.dot(h, fw2_ref[...],
                            preferred_element_type=jnp.float32) + fb2_ref[...],
                    0.0).astype(jnp.bfloat16)
    out_ref[...] = (jnp.dot(h, fw3_ref[...],
                            preferred_element_type=jnp.float32) + fb3_ref[...])


# --------------------------------- wrapper ----------------------------------

def _im2col_pool_order(x_nchw):
    """(N,3,32,32) f32 -> (N, 4, 196, 128) bf16 conv1 patches in pooled order.

    Index o = oh*2 + ow is the 2x2 pool-window offset, q = ph*14 + pw is the
    pooled position, feature k = (i*5 + j)*3 + ci.  (~0.2 MB/image in bf16.)
    """
    n = x_nchw.shape[0]
    x = jnp.transpose(x_nchw, (0, 2, 3, 1))                      # NHWC
    pats = jnp.stack([x[:, i:i + H1, j:j + H1, :]
                      for i in range(K) for j in range(K)], axis=3)
    pats = pats.reshape(n, H1, H1, KPATCH)                       # (N,28,28,75)
    pats = pats.reshape(n, PH1, 2, PH1, 2, KPATCH)
    pats = pats.transpose(0, 2, 4, 1, 3, 5).reshape(n, 4, Q1, KPATCH)
    pats = jnp.pad(pats, ((0, 0), (0, 0), (0, 0), (0, LANE - KPATCH)))
    return pats.astype(jnp.bfloat16)


def net_forward(x_nchw, pp, *, nb=None):
    n = x_nchw.shape[0]
    if nb is None:
        # >=2 grid steps whenever N>=2 (v7x 2-TC sharding), batch-blocked up
        # to 4 images/step to amortize per-step overhead & weight residency.
        nb = max(1, min(4, -(-n // 2)))
    g = -(-n // nb)
    npad = g * nb

    x = _im2col_pool_order(x_nchw)
    if npad != n:
        x = jnp.pad(x, ((0, npad - n), (0, 0), (0, 0), (0, 0)))

    kernel = functools.partial(_net_kernel, nb=nb)
    out = pl.pallas_call(
        kernel,
        out_shape=jax.ShapeDtypeStruct((g, nb, LANE), jnp.float32),
        grid_spec=pltpu.PrefetchScalarGridSpec(
            num_scalar_prefetch=0,
            grid=(g,),
            in_specs=[
                pl.BlockSpec((nb, 4, Q1, LANE), lambda i: (i, 0, 0, 0)),
                pl.BlockSpec((LANE, C1P), lambda i: (0, 0)),        # w1
                pl.BlockSpec((1, C1P), lambda i: (0, 0)),           # b1
                pl.BlockSpec((K * K, C1P, LANE), lambda i: (0, 0, 0)),  # w2
                pl.BlockSpec((1, LANE), lambda i: (0, 0)),          # b2
                pl.BlockSpec((FCQ, PW2_ROWS), lambda i: (0, 0)),    # s2
                pl.BlockSpec((Q2, LANE, LANE), lambda i: (0, 0, 0)),  # fw1
                pl.BlockSpec((1, LANE), lambda i: (0, 0)),          # fb1
                pl.BlockSpec((LANE, LANE), lambda i: (0, 0)),       # fw2
                pl.BlockSpec((1, LANE), lambda i: (0, 0)),          # fb2
                pl.BlockSpec((LANE, LANE), lambda i: (0, 0)),       # fw3
                pl.BlockSpec((1, LANE), lambda i: (0, 0)),          # fb3
            ],
            out_specs=pl.BlockSpec((None, nb, LANE), lambda i: (i, 0, 0)),
            scratch_shapes=[
                pltpu.VMEM((P1_ROWS, C1P), jnp.float32),   # pooled-1 (+halo)
                pltpu.VMEM((M2, LANE), jnp.float32),       # conv2 wide output
                pltpu.VMEM((nb, FCQ, LANE), jnp.float32),  # pooled-2 per image
            ],
        ),
        compiler_params=pltpu.CompilerParams(
            dimension_semantics=("parallel",),
            # per-step footprint is only a few MiB -> safe on v7x's 64 MiB too
            vmem_limit_bytes=32 * 1024 * 1024,
        ),
    )(x, pp["w1"], pp["b1"], pp["w2"], pp["b2"], pp["s2"],
      pp["fw1"], pp["fb1"], pp["fw2"], pp["fb2"], pp["fw3"], pp["fb3"])
    return out.reshape(npad, LANE)[:n, :10]


# -------------------------- parameter preparation ---------------------------

def prep_params(p):
    """One-time layout work: pad/reshape/transpose weights, build selection."""
    pp = {}
    # conv1 as an im2col matmul: row k=(i*5+j)*3+ci, col = out channel.
    w1 = jnp.transpose(p["conv1_w"], (2, 3, 1, 0)).reshape(KPATCH, C1)
    pp["w1"] = (jnp.zeros((LANE, C1P), jnp.float32)
                .at[:KPATCH, :C1].set(w1).astype(jnp.bfloat16))
    pp["b1"] = jnp.zeros((1, C1P), jnp.float32).at[0, :C1].set(p["conv1_b"])
    # conv2 tap weights (25, 32, 128): w2[t=i*5+j][cin, cout].
    w2 = jnp.transpose(p["conv2_w"], (2, 3, 1, 0)).reshape(K * K, C1, C2)
    pp["w2"] = (jnp.zeros((K * K, C1P, LANE), jnp.float32)
                .at[:, :C1, :C2].set(w2).astype(jnp.bfloat16))
    pp["b2"] = jnp.zeros((1, LANE), jnp.float32).at[0, :C2].set(p["conv2_b"])
    # Exact 0/1 pool2 selection: row q=ph*5+pw picks pool2-wide row 28ph+2pw.
    s2 = np.zeros((FCQ, PW2_ROWS), np.float32)
    for q in range(Q2):
        ph, pw = divmod(q, PH2)
        s2[q, 2 * ph * PH1 + 2 * pw] = 1.0
    pp["s2"] = jnp.asarray(s2, jnp.bfloat16)
    # fc1 with PyTorch's NCHW flatten folded in: fw1[q][c, f] = W1[f, c*25+q].
    w1fc = jnp.transpose(p["fc1_w"].reshape(120, C2, Q2), (2, 1, 0))
    pp["fw1"] = (jnp.zeros((Q2, LANE, LANE), jnp.float32)
                 .at[:, :C2, :120].set(w1fc).astype(jnp.bfloat16))
    pp["fb1"] = jnp.zeros((1, LANE), jnp.float32).at[0, :120].set(p["fc1_b"])
    pp["fw2"] = (jnp.zeros((LANE, LANE), jnp.float32)
                 .at[:120, :84].set(p["fc2_w"].T).astype(jnp.bfloat16))
    pp["fb2"] = jnp.zeros((1, LANE), jnp.float32).at[0, :84].set(p["fc2_b"])
    pp["fw3"] = (jnp.zeros((LANE, LANE), jnp.float32)
                 .at[:84, :10].set(p["fc3_w"].T).astype(jnp.bfloat16))
    pp["fb3"] = jnp.zeros((1, LANE), jnp.float32).at[0, :10].set(p["fc3_b"])
    return pp


# --------------------------- pure-JAX reference -----------------------------

def ref_forward(x_nchw, p):
    dn = ("NCHW", "OIHW", "NCHW")

    def conv(x, w, b):
        y = jax.lax.conv_general_dilated(x, w, (1, 1), "VALID",
                                         dimension_numbers=dn)
        return jax.nn.relu(y + b[None, :, None, None])

    def pool(x):
        return jax.lax.reduce_window(x, -jnp.inf, jax.lax.max,
                                     (1, 1, 2, 2), (1, 1, 2, 2), "VALID")

    x = pool(conv(x_nchw, p["conv1_w"], p["conv1_b"]))
    x = pool(conv(x, p["conv2_w"], p["conv2_b"]))
    x = x.reshape(x.shape[0], -1)
    x = jax.nn.relu(x @ p["fc1_w"].T + p["fc1_b"])
    x = jax.nn.relu(x @ p["fc2_w"].T + p["fc2_b"])
    return x @ p["fc3_w"].T + p["fc3_b"]


# ------------------------------- param init ---------------------------------

def init_params(key):
    def uniform(k, shape, fan_in):
        bound = 1.0 / np.sqrt(fan_in)
        return jax.random.uniform(k, shape, jnp.float32, -bound, bound)

    ks = jax.random.split(key, 10)
    return {
        "conv1_w": uniform(ks[0], (30, 3, 5, 5), 3 * 5 * 5),
        "conv1_b": uniform(ks[1], (30,), 3 * 5 * 5),
        "conv2_w": uniform(ks[2], (16, 30, 5, 5), 30 * 5 * 5),
        "conv2_b": uniform(ks[3], (16,), 30 * 5 * 5),
        "fc1_w": uniform(ks[4], (120, 400), 400),
        "fc1_b": uniform(ks[5], (120,), 400),
        "fc2_w": uniform(ks[6], (84, 120), 120),
        "fc2_b": uniform(ks[7], (84,), 120),
        "fc3_w": uniform(ks[8], (10, 84), 84),
        "fc3_b": uniform(ks[9], (10,), 84),
    }


# ----------------------------------- main -----------------------------------

if __name__ == "__main__":
    key = jax.random.PRNGKey(0)
    k_par, k_x = jax.random.split(key)
    params = init_params(k_par)
    prepped = prep_params(params)          # hoisted once, not per forward pass

    # 32x32 spatial is required by the module (fc1 expects 16*5*5 = 400 feats)
    x = jax.random.normal(k_x, (2, 3, 32, 32), jnp.float32)

    out = jax.block_until_ready(jax.jit(net_forward)(x, prepped))
    ref = jax.block_until_ready(jax.jit(ref_forward)(x, params))

    assert out.shape == (2, 10), out.shape
    # bf16 MXU operands with f32 accumulation -> slightly looser tolerance.
    np.testing.assert_allclose(np.asarray(out), np.asarray(ref),
                               rtol=2e-2, atol=2e-2)
    print("KERNEL_OK")
</pallas_src>

<mosaic_0001>
module attributes {stable_mosaic.version = 11 : i64} {
  func.func @_net_kernel(%arg0: i32, %arg1: memref<1x4x196x128xbf16, #tpu.memory_space<vmem>>, %arg2: memref<128x32xbf16, #tpu.memory_space<vmem>>, %arg3: memref<1x32xf32, #tpu.memory_space<vmem>>, %arg4: memref<25x32x128xbf16, #tpu.memory_space<vmem>>, %arg5: memref<1x128xf32, #tpu.memory_space<vmem>>, %arg6: memref<32x128xbf16, #tpu.memory_space<vmem>>, %arg7: memref<25x128x128xbf16, #tpu.memory_space<vmem>>, %arg8: memref<1x128xf32, #tpu.memory_space<vmem>>, %arg9: memref<128x128xbf16, #tpu.memory_space<vmem>>, %arg10: memref<1x128xf32, #tpu.memory_space<vmem>>, %arg11: memref<128x128xbf16, #tpu.memory_space<vmem>>, %arg12: memref<1x128xf32, #tpu.memory_space<vmem>>, %arg13: memref<1x1x128xf32, #tpu.memory_space<vmem>>, %arg14: memref<208x32xf32, #tpu.memory_space<vmem>>, %arg15: memref<144x128xf32, #tpu.memory_space<vmem>>, %arg16: memref<1x32x128xf32, #tpu.memory_space<vmem>>) attributes {dimension_semantics = [#tpu.dimension_semantics<parallel>], iteration_bounds = array<i64: 2>, scalar_prefetch = 0 : i64, scratch_operands = 3 : i64, tpu.core_type = #tpu.core_type<tc>, window_params = [{transform_indices = @transform_0, window_bounds = array<i64: 1, 4, 196, 128>}, {pipeline_mode = #tpu.pipeline_mode<synchronous>, transform_indices = @transform_1, window_bounds = array<i64: 128, 32>}, {pipeline_mode = #tpu.pipeline_mode<synchronous>, transform_indices = @transform_2, window_bounds = array<i64: 1, 32>}, {pipeline_mode = #tpu.pipeline_mode<synchronous>, transform_indices = @transform_3, window_bounds = array<i64: 25, 32, 128>}, {pipeline_mode = #tpu.pipeline_mode<synchronous>, transform_indices = @transform_4, window_bounds = array<i64: 1, 128>}, {pipeline_mode = #tpu.pipeline_mode<synchronous>, transform_indices = @transform_5, window_bounds = array<i64: 32, 128>}, {pipeline_mode = #tpu.pipeline_mode<synchronous>, transform_indices = @transform_6, window_bounds = array<i64: 25, 128, 128>}, {pipeline_mode = #tpu.pipeline_mode<synchronous>, transform_indices = @transform_7, window_bounds = array<i64: 1, 128>}, {pipeline_mode = #tpu.pipeline_mode<synchronous>, transform_indices = @transform_8, window_bounds = array<i64: 128, 128>}, {pipeline_mode = #tpu.pipeline_mode<synchronous>, transform_indices = @transform_9, window_bounds = array<i64: 1, 128>}, {pipeline_mode = #tpu.pipeline_mode<synchronous>, transform_indices = @transform_10, window_bounds = array<i64: 128, 128>}, {pipeline_mode = #tpu.pipeline_mode<synchronous>, transform_indices = @transform_11, window_bounds = array<i64: 1, 128>}, {transform_indices = @transform_12, window_bounds = array<i64: 1, 1, 128>}]} {
    %cst = arith.constant 0.000000e+00 : f32
    %0 = vector.broadcast %cst : f32 to vector<12x32xf32>
    %c196 = arith.constant 196 : index
    %c0 = arith.constant 0 : index
    %1 = vector.load %arg14[%c196, %c0] : memref<208x32xf32, #tpu.memory_space<vmem>>, vector<12x32xf32>
    tpu.vector_store %arg14[%c196, %c0], %0 {strides = array<i32>} : memref<208x32xf32, #tpu.memory_space<vmem>>, vector<12x32xf32>,
    %c0_0 = arith.constant 0 : index
    %c0_1 = arith.constant 0 : index
    %c0_2 = arith.constant 0 : index
    %c0_3 = arith.constant 0 : index
    %2 = vector.load %arg1[%c0_0, %c0_1, %c0_2, %c0_3] : memref<1x4x196x128xbf16, #tpu.memory_space<vmem>>, vector<1x1x196x128xbf16>
    %3 = vector.shape_cast %2 : vector<1x1x196x128xbf16> to vector<196x128xbf16>
    %c0_4 = arith.constant 0 : index
    %c0_5 = arith.constant 0 : index
    %4 = vector.load %arg2[%c0_4, %c0_5] : memref<128x32xbf16, #tpu.memory_space<vmem>>, vector<128x32xbf16>
    %cst_6 = arith.constant dense<0.000000e+00> : vector<196x32xf32>
    %5 = tpu.matmul %3, %4, %cst_6 {dimension_numbers = #tpu.dot_dimension_numbers<[1], [0], [0], [1], [0, 0, 1, 1], [], []>} : vector<196x128xbf16>, vector<128x32xbf16>, vector<196x32xf32> -> vector<196x32xf32>
    %c0_7 = arith.constant 0 : index
    %c1 = arith.constant 1 : index
    %c0_8 = arith.constant 0 : index
    %c0_9 = arith.constant 0 : index
    %6 = vector.load %arg1[%c0_7, %c1, %c0_8, %c0_9] : memref<1x4x196x128xbf16, #tpu.memory_space<vmem>>, vector<1x1x196x128xbf16>
    %7 = vector.shape_cast %6 : vector<1x1x196x128xbf16> to vector<196x128xbf16>
    %c0_10 = arith.constant 0 : index
    %c0_11 = arith.constant 0 : index
    %8 = vector.load %arg2[%c0_10, %c0_11] : memref<128x32xbf16, #tpu.memory_space<vmem>>, vector<128x32xbf16>
    %cst_12 = arith.constant dense<0.000000e+00> : vector<196x32xf32>
    %9 = tpu.matmul %7, %8, %cst_12 {dimension_numbers = #tpu.dot_dimension_numbers<[1], [0], [0], [1], [0, 0, 1, 1], [], []>} : vector<196x128xbf16>, vector<128x32xbf16>, vector<196x32xf32> -> vector<196x32xf32>
    %10 = arith.maximumf %5, %9 : vector<196x32xf32>
    %c0_13 = arith.constant 0 : index
    %c2 = arith.constant 2 : index
    %c0_14 = arith.constant 0 : index
    %c0_15 = arith.constant 0 : index
    %11 = vector.load %arg1[%c0_13, %c2, %c0_14, %c0_15] : memref<1x4x196x128xbf16, #tpu.memory_space<vmem>>, vector<1x1x196x128xbf16>
    %12 = vector.shape_cast %11 : vector<1x1x196x128xbf16> to vector<196x128xbf16>
    %c0_16 = arith.constant 0 : index
    %c0_17 = arith.constant 0 : index
    %13 = vector.load %arg2[%c0_16, %c0_17] : memref<128x32xbf16, #tpu.memory_space<vmem>>, vector<128x32xbf16>
    %cst_18 = arith.constant dense<0.000000e+00> : vector<196x32xf32>
    %14 = tpu.matmul %12, %13, %cst_18 {dimension_numbers = #tpu.dot_dimension_numbers<[1], [0], [0], [1], [0, 0, 1, 1], [], []>} : vector<196x128xbf16>, vector<128x32xbf16>, vector<196x32xf32> -> vector<196x32xf32>
    %15 = arith.maximumf %10, %14 : vector<196x32xf32>
    %c0_19 = arith.constant 0 : index
    %c3 = arith.constant 3 : index
    %c0_20 = arith.constant 0 : index
    %c0_21 = arith.constant 0 : index
    %16 = vector.load %arg1[%c0_19, %c3, %c0_20, %c0_21] : memref<1x4x196x128xbf16, #tpu.memory_space<vmem>>, vector<1x1x196x128xbf16>
    %17 = vector.shape_cast %16 : vector<1x1x196x128xbf16> to vector<196x128xbf16>
    %c0_22 = arith.constant 0 : index
    %c0_23 = arith.constant 0 : index
    %18 = vector.load %arg2[%c0_22, %c0_23] : memref<128x32xbf16, #tpu.memory_space<vmem>>, vector<128x32xbf16>
    %cst_24 = arith.constant dense<0.000000e+00> : vector<196x32xf32>
    %19 = tpu.matmul %17, %18, %cst_24 {dimension_numbers = #tpu.dot_dimension_numbers<[1], [0], [0], [1], [0, 0, 1, 1], [], []>} : vector<196x128xbf16>, vector<128x32xbf16>, vector<196x32xf32> -> vector<196x32xf32>
    %20 = arith.maximumf %15, %19 : vector<196x32xf32>
    %c0_25 = arith.constant 0 : index
    %c0_26 = arith.constant 0 : index
    %21 = vector.load %arg3[%c0_25, %c0_26] : memref<1x32xf32, #tpu.memory_space<vmem>>, vector<1x32xf32>
    %22 = vector.broadcast %21 : vector<1x32xf32> to vector<196x32xf32>
    %23 = arith.addf %20, %22 : vector<196x32xf32>
    %cst_27 = arith.constant 0.000000e+00 : f32
    %24 = vector.broadcast %cst_27 : f32 to vector<196x32xf32>
    %25 = arith.maximumf %23, %24 : vector<196x32xf32>
    %c0_28 = arith.constant 0 : index
    %c0_29 = arith.constant 0 : index
    %26 = vector.load %arg14[%c0_28, %c0_29] : memref<208x32xf32, #tpu.memory_space<vmem>>, vector<196x32xf32>
    tpu.vector_store %arg14[%c0_28, %c0_29], %25 {strides = array<i32>} : memref<208x32xf32, #tpu.memory_space<vmem>>, vector<196x32xf32>,
    %cst_30 = arith.constant 0.000000e+00 : f32
    %27 = vector.broadcast %cst_30 : f32 to vector<144x128xf32>
    %c0_31 = arith.constant 0 : index
    %c0_32 = arith.constant 0 : index
    %28 = vector.load %arg14[%c0_31, %c0_32] : memref<208x32xf32, #tpu.memory_space<vmem>>, vector<144x32xf32>
    %29 = arith.truncf %28 : vector<144x32xf32> to vector<144x32xbf16>
    %c0_33 = arith.constant 0 : index
    %c0_34 = arith.constant 0 : index
    %c0_35 = arith.constant 0 : index
    %30 = vector.load %arg4[%c0_33, %c0_34, %c0_35] : memref<25x32x128xbf16, #tpu.memory_space<vmem>>, vector<1x32x128xbf16>
    %31 = vector.shape_cast %30 : vector<1x32x128xbf16> to vector<32x128xbf16>
    %cst_36 = arith.constant dense<0.000000e+00> : vector<144x128xf32>
    %32 = tpu.matmul %29, %31, %cst_36 {dimension_numbers = #tpu.dot_dimension_numbers<[1], [0], [0], [1], [0, 0, 1, 1], [], []>} : vector<144x32xbf16>, vector<32x128xbf16>, vector<144x128xf32> -> vector<144x128xf32>
    %33 = arith.addf %27, %32 : vector<144x128xf32>
    %c1_37 = arith.constant 1 : index
    %c0_38 = arith.constant 0 : index
    %34 = vector.load %arg14[%c1_37, %c0_38] : memref<208x32xf32, #tpu.memory_space<vmem>>, vector<144x32xf32>
    %35 = arith.truncf %34 : vector<144x32xf32> to vector<144x32xbf16>
    %c1_39 = arith.constant 1 : index
    %c0_40 = arith.constant 0 : index
    %c0_41 = arith.constant 0 : index
    %36 = vector.load %arg4[%c1_39, %c0_40, %c0_41] : memref<25x32x128xbf16, #tpu.memory_space<vmem>>, vector<1x32x128xbf16>
    %37 = vector.shape_cast %36 : vector<1x32x128xbf16> to vector<32x128xbf16>
    %cst_42 = arith.constant dense<0.000000e+00> : vector<144x128xf32>
    %38 = tpu.matmul %35, %37, %cst_42 {dimension_numbers = #tpu.dot_dimension_numbers<[1], [0], [0], [1], [0, 0, 1, 1], [], []>} : vector<144x32xbf16>, vector<32x128xbf16>, vector<144x128xf32> -> vector<144x128xf32>
    %39 = arith.addf %33, %38 : vector<144x128xf32>
    %c2_43 = arith.constant 2 : index
    %c0_44 = arith.constant 0 : index
    %40 = vector.load %arg14[%c2_43, %c0_44] : memref<208x32xf32, #tpu.memory_space<vmem>>, vector<144x32xf32>
    %41 = arith.truncf %40 : vector<144x32xf32> to vector<144x32xbf16>
    %c2_45 = arith.constant 2 : index
    %c0_46 = arith.constant 0 : index
    %c0_47 = arith.constant 0 : index
    %42 = vector.load %arg4[%c2_45, %c0_46, %c0_47] : memref<25x32x128xbf16, #tpu.memory_space<vmem>>, vector<1x32x128xbf16>
    %43 = vector.shape_cast %42 : vector<1x32x128xbf16> to vector<32x128xbf16>
    %cst_48 = arith.constant dense<0.000000e+00> : vector<144x128xf32>
    %44 = tpu.matmul %41, %43, %cst_48 {dimension_numbers = #tpu.dot_dimension_numbers<[1], [0], [0], [1], [0, 0, 1, 1], [], []>} : vector<144x32xbf16>, vector<32x128xbf16>, vector<144x128xf32> -> vector<144x128xf32>
    %45 = arith.addf %39, %44 : vector<144x128xf32>
    %c3_49 = arith.constant 3 : index
    %c0_50 = arith.constant 0 : index
    %46 = vector.load %arg14[%c3_49, %c0_50] : memref<208x32xf32, #tpu.memory_space<vmem>>, vector<144x32xf32>
    %47 = arith.truncf %46 : vector<144x32xf32> to vector<144x32xbf16>
    %c3_51 = arith.constant 3 : index
    %c0_52 = arith.constant 0 : index
    %c0_53 = arith.constant 0 : index
    %48 = vector.load %arg4[%c3_51, %c0_52, %c0_53] : memref<25x32x128xbf16, #tpu.memory_space<vmem>>, vector<1x32x128xbf16>
    %49 = vector.shape_cast %48 : vector<1x32x128xbf16> to vector<32x128xbf16>
    %cst_54 = arith.constant dense<0.000000e+00> : vector<144x128xf32>
    %50 = tpu.matmul %47, %49, %cst_54 {dimension_numbers = #tpu.dot_dimension_numbers<[1], [0], [0], [1], [0, 0, 1, 1], [], []>} : vector<144x32xbf16>, vector<32x128xbf16>, vector<144x128xf32> -> vector<144x128xf32>
    %51 = arith.addf %45, %50 : vector<144x128xf32>
    %c4 = arith.constant 4 : index
    %c0_55 = arith.constant 0 : index
    %52 = vector.load %arg14[%c4, %c0_55] : memref<208x32xf32, #tpu.memory_space<vmem>>, vector<144x32xf32>
    %53 = arith.truncf %52 : vector<144x32xf32> to vector<144x32xbf16>
    %c4_56 = arith.constant 4 : index
    %c0_57 = arith.constant 0 : index
    %c0_58 = arith.constant 0 : index
    %54 = vector.load %arg4[%c4_56, %c0_57, %c0_58] : memref<25x32x128xbf16, #tpu.memory_space<vmem>>, vector<1x32x128xbf16>
    %55 = vector.shape_cast %54 : vector<1x32x128xbf16> to vector<32x128xbf16>
    %cst_59 = arith.constant dense<0.000000e+00> : vector<144x128xf32>
    %56 = tpu.matmul %53, %55, %cst_59 {dimension_numbers = #tpu.dot_dimension_numbers<[1], [0], [0], [1], [0, 0, 1, 1], [], []>} : vector<144x32xbf16>, vector<32x128xbf16>, vector<144x128xf32> -> vector<144x128xf32>
    %57 = arith.addf %51, %56 : vector<144x128xf32>
    %c14 = arith.constant 14 : index
    %c0_60 = arith.constant 0 : index
    %58 = vector.load %arg14[%c14, %c0_60] : memref<208x32xf32, #tpu.memory_space<vmem>>, vector<144x32xf32>
    %59 = arith.truncf %58 : vector<144x32xf32> to vector<144x32xbf16>
    %c5 = arith.constant 5 : index
    %c0_61 = arith.constant 0 : index
    %c0_62 = arith.constant 0 : index
    %60 = vector.load %arg4[%c5, %c0_61, %c0_62] : memref<25x32x128xbf16, #tpu.memory_space<vmem>>, vector<1x32x128xbf16>
    %61 = vector.shape_cast %60 : vector<1x32x128xbf16> to vector<32x128xbf16>
    %cst_63 = arith.constant dense<0.000000e+00> : vector<144x128xf32>
    %62 = tpu.matmul %59, %61, %cst_63 {dimension_numbers = #tpu.dot_dimension_numbers<[1], [0], [0], [1], [0, 0, 1, 1], [], []>} : vector<144x32xbf16>, vector<32x128xbf16>, vector<144x128xf32> -> vector<144x128xf32>
    %63 = arith.addf %57, %62 : vector<144x128xf32>
    %c15 = arith.constant 15 : index
    %c0_64 = arith.constant 0 : index
    %64 = vector.load %arg14[%c15, %c0_64] : memref<208x32xf32, #tpu.memory_space<vmem>>, vector<144x32xf32>
    %65 = arith.truncf %64 : vector<144x32xf32> to vector<144x32xbf16>
    %c6 = arith.constant 6 : index
    %c0_65 = arith.constant 0 : index
    %c0_66 = arith.constant 0 : index
    %66 = vector.load %arg4[%c6, %c0_65, %c0_66] : memref<25x32x128xbf16, #tpu.memory_space<vmem>>, vector<1x32x128xbf16>
    %67 = vector.shape_cast %66 : vector<1x32x128xbf16> to vector<32x128xbf16>
    %cst_67 = arith.constant dense<0.000000e+00> : vector<144x128xf32>
    %68 = tpu.matmul %65, %67, %cst_67 {dimension_numbers = #tpu.dot_dimension_numbers<[1], [0], [0], [1], [0, 0, 1, 1], [], []>} : vector<144x32xbf16>, vector<32x128xbf16>, vector<144x128xf32> -> vector<144x128xf32>
    %69 = arith.addf %63, %68 : vector<144x128xf32>
    %c16 = arith.constant 16 : index
    %c0_68 = arith.constant 0 : index
    %70 = vector.load %arg14[%c16, %c0_68] : memref<208x32xf32, #tpu.memory_space<vmem>>, vector<144x32xf32>
    %71 = arith.truncf %70 : vector<144x32xf32> to vector<144x32xbf16>
    %c7 = arith.constant 7 : index
    %c0_69 = arith.constant 0 : index
    %c0_70 = arith.constant 0 : index
    %72 = vector.load %arg4[%c7, %c0_69, %c0_70] : memref<25x32x128xbf16, #tpu.memory_space<vmem>>, vector<1x32x128xbf16>
    %73 = vector.shape_cast %72 : vector<1x32x128xbf16> to vector<32x128xbf16>
    %cst_71 = arith.constant dense<0.000000e+00> : vector<144x128xf32>
    %74 = tpu.matmul %71, %73, %cst_71 {dimension_numbers = #tpu.dot_dimension_numbers<[1], [0], [0], [1], [0, 0, 1, 1], [], []>} : vector<144x32xbf16>, vector<32x128xbf16>, vector<144x128xf32> -> vector<144x128xf32>
    %75 = arith.addf %69, %74 : vector<144x128xf32>
    %c17 = arith.constant 17 : index
    %c0_72 = arith.constant 0 : index
    %76 = vector.load %arg14[%c17, %c0_72] : memref<208x32xf32, #tpu.memory_space<vmem>>, vector<144x32xf32>
    %77 = arith.truncf %76 : vector<144x32xf32> to vector<144x32xbf16>
    %c8 = arith.constant 8 : index
    %c0_73 = arith.constant 0 : index
    %c0_74 = arith.constant 0 : index
    %78 = vector.load %arg4[%c8, %c0_73, %c0_74] : memref<25x32x128xbf16, #tpu.memory_space<vmem>>, vector<1x32x128xbf16>
    %79 = vector.shape_cast %78 : vector<1x32x128xbf16> to vector<32x128xbf16>
    %cst_75 = arith.constant dense<0.000000e+00> : vector<144x128xf32>
    %80 = tpu.matmul %77, %79, %cst_75 {dimension_numbers = #tpu.dot_dimension_numbers<[1], [0], [0], [1], [0, 0, 1, 1], [], []>} : vector<144x32xbf16>, vector<32x128xbf16>, vector<144x128xf32> -> vector<144x128xf32>
    %81 = arith.addf %75, %80 : vector<144x128xf32>
    %c18 = arith.constant 18 : index
    %c0_76 = arith.constant 0 : index
    %82 = vector.load %arg14[%c18, %c0_76] : memref<208x32xf32, #tpu.memory_space<vmem>>, vector<144x32xf32>
    %83 = arith.truncf %82 : vector<144x32xf32> to vector<144x32xbf16>
    %c9 = arith.constant 9 : index
    %c0_77 = arith.constant 0 : index
    %c0_78 = arith.constant 0 : index
    %84 = vector.load %arg4[%c9, %c0_77, %c0_78] : memref<25x32x128xbf16, #tpu.memory_space<vmem>>, vector<1x32x128xbf16>
    %85 = vector.shape_cast %84 : vector<1x32x128xbf16> to vector<32x128xbf16>
    %cst_79 = arith.constant dense<0.000000e+00> : vector<144x128xf32>
    %86 = tpu.matmul %83, %85, %cst_79 {dimension_numbers = #tpu.dot_dimension_numbers<[1], [0], [0], [1], [0, 0, 1, 1], [], []>} : vector<144x32xbf16>, vector<32x128xbf16>, vector<144x128xf32> -> vector<144x128xf32>
    %87 = arith.addf %81, %86 : vector<144x128xf32>
    %c28 = arith.constant 28 : index
    %c0_80 = arith.constant 0 : index
    %88 = vector.load %arg14[%c28, %c0_80] : memref<208x32xf32, #tpu.memory_space<vmem>>, vector<144x32xf32>
    %89 = arith.truncf %88 : vector<144x32xf32> to vector<144x32xbf16>
    %c10 = arith.constant 10 : index
    %c0_81 = arith.constant 0 : index
    %c0_82 = arith.constant 0 : index
    %90 = vector.load %arg4[%c10, %c0_81, %c0_82] : memref<25x32x128xbf16, #tpu.memory_space<vmem>>, vector<1x32x128xbf16>
    %91 = vector.shape_cast %90 : vector<1x32x128xbf16> to vector<32x128xbf16>
    %cst_83 = arith.constant dense<0.000000e+00> : vector<144x128xf32>
    %92 = tpu.matmul %89, %91, %cst_83 {dimension_numbers = #tpu.dot_dimension_numbers<[1], [0], [0], [1], [0, 0, 1, 1], [], []>} : vector<144x32xbf16>, vector<32x128xbf16>, vector<144x128xf32> -> vector<144x128xf32>
    %93 = arith.addf %87, %92 : vector<144x128xf32>
    %c29 = arith.constant 29 : index
    %c0_84 = arith.constant 0 : index
    %94 = vector.load %arg14[%c29, %c0_84] : memref<208x32xf32, #tpu.memory_space<vmem>>, vector<144x32xf32>
    %95 = arith.truncf %94 : vector<144x32xf32> to vector<144x32xbf16>
    %c11 = arith.constant 11 : index
    %c0_85 = arith.constant 0 : index
    %c0_86 = arith.constant 0 : index
    %96 = vector.load %arg4[%c11, %c0_85, %c0_86] : memref<25x32x128xbf16, #tpu.memory_space<vmem>>, vector<1x32x128xbf16>
    %97 = vector.shape_cast %96 : vector<1x32x128xbf16> to vector<32x128xbf16>
    %cst_87 = arith.constant dense<0.000000e+00> : vector<144x128xf32>
    %98 = tpu.matmul %95, %97, %cst_87 {dimension_numbers = #tpu.dot_dimension_numbers<[1], [0], [0], [1], [0, 0, 1, 1], [], []>} : vector<144x32xbf16>, vector<32x128xbf16>, vector<144x128xf32> -> vector<144x128xf32>
    %99 = arith.addf %93, %98 : vector<144x128xf32>
    %c30 = arith.constant 30 : index
    %c0_88 = arith.constant 0 : index
    %100 = vector.load %arg14[%c30, %c0_88] : memref<208x32xf32, #tpu.memory_space<vmem>>, vector<144x32xf32>
    %101 = arith.truncf %100 : vector<144x32xf32> to vector<144x32xbf16>
    %c12 = arith.constant 12 : index
    %c0_89 = arith.constant 0 : index
    %c0_90 = arith.constant 0 : index
    %102 = vector.load %arg4[%c12, %c0_89, %c0_90] : memref<25x32x128xbf16, #tpu.memory_space<vmem>>, vector<1x32x128xbf16>
    %103 = vector.shape_cast %102 : vector<1x32x128xbf16> to vector<32x128xbf16>
    %cst_91 = arith.constant dense<0.000000e+00> : vector<144x128xf32>
    %104 = tpu.matmul %101, %103, %cst_91 {dimension_numbers = #tpu.dot_dimension_numbers<[1], [0], [0], [1], [0, 0, 1, 1], [], []>} : vector<144x32xbf16>, vector<32x128xbf16>, vector<144x128xf32> -> vector<144x128xf32>
    %105 = arith.addf %99, %104 : vector<144x128xf32>
    %c31 = arith.constant 31 : index
    %c0_92 = arith.constant 0 : index
    %106 = vector.load %arg14[%c31, %c0_92] : memref<208x32xf32, #tpu.memory_space<vmem>>, vector<144x32xf32>
    %107 = arith.truncf %106 : vector<144x32xf32> to vector<144x32xbf16>
    %c13 = arith.constant 13 : index
    %c0_93 = arith.constant 0 : index
    %c0_94 = arith.constant 0 : index
    %108 = vector.load %arg4[%c13, %c0_93, %c0_94] : memref<25x32x128xbf16, #tpu.memory_space<vmem>>, vector<1x32x128xbf16>
    %109 = vector.shape_cast %108 : vector<1x32x128xbf16> to vector<32x128xbf16>
    %cst_95 = arith.constant dense<0.000000e+00> : vector<144x128xf32>
    %110 = tpu.matmul %107, %109, %cst_95 {dimension_numbers = #tpu.dot_dimension_numbers<[1], [0], [0], [1], [0, 0, 1, 1], [], []>} : vector<144x32xbf16>, vector<32x128xbf16>, vector<144x128xf32> -> vector<144x128xf32>
    %111 = arith.addf %105, %110 : vector<144x128xf32>
    %c32 = arith.constant 32 : index
    %c0_96 = arith.constant 0 : index
    %112 = vector.load %arg14[%c32, %c0_96] : memref<208x32xf32, #tpu.memory_space<vmem>>, vector<144x32xf32>
    %113 = arith.truncf %112 : vector<144x32xf32> to vector<144x32xbf16>
    %c14_97 = arith.constant 14 : index
    %c0_98 = arith.constant 0 : index
    %c0_99 = arith.constant 0 : index
    %114 = vector.load %arg4[%c14_97, %c0_98, %c0_99] : memref<25x32x128xbf16, #tpu.memory_space<vmem>>, vector<1x32x128xbf16>
    %115 = vector.shape_cast %114 : vector<1x32x128xbf16> to vector<32x128xbf16>
    %cst_100 = arith.constant dense<0.000000e+00> : vector<144x128xf32>
    %116 = tpu.matmul %113, %115, %cst_100 {dimension_numbers = #tpu.dot_dimension_numbers<[1], [0], [0], [1], [0, 0, 1, 1], [], []>} : vector<144x32xbf16>, vector<32x128xbf16>, vector<144x128xf32> -> vector<144x128xf32>
    %117 = arith.addf %111, %116 : vector<144x128xf32>
    %c42 = arith.constant 42 : index
    %c0_101 = arith.constant 0 : index
    %118 = vector.load %arg14[%c42, %c0_101] : memref<208x32xf32, #tpu.memory_space<vmem>>, vector<144x32xf32>
    %119 = arith.truncf %118 : vector<144x32xf32> to vector<144x32xbf16>
    %c15_102 = arith.constant 15 : index
    %c0_103 = arith.constant 0 : index
    %c0_104 = arith.constant 0 : index
    %120 = vector.load %arg4[%c15_102, %c0_103, %c0_104] : memref<25x32x128xbf16, #tpu.memory_space<vmem>>, vector<1x32x128xbf16>
    %121 = vector.shape_cast %120 : vector<1x32x128xbf16> to vector<32x128xbf16>
    %cst_105 = arith.constant dense<0.000000e+00> : vector<144x128xf32>
    %122 = tpu.matmul %119, %121, %cst_105 {dimension_numbers = #tpu.dot_dimension_numbers<[1], [0], [0], [1], [0, 0, 1, 1], [], []>} : vector<144x32xbf16>, vector<32x128xbf16>, vector<144x128xf32> -> vector<144x128xf32>
    %123 = arith.addf %117, %122 : vector<144x128xf32>
    %c43 = arith.constant 43 : index
    %c0_106 = arith.constant 0 : index
    %124 = vector.load %arg14[%c43, %c0_106] : memref<208x32xf32, #tpu.memory_space<vmem>>, vector<144x32xf32>
    %125 = arith.truncf %124 : vector<144x32xf32> to vector<144x32xbf16>
    %c16_107 = arith.constant 16 : index
    %c0_108 = arith.constant 0 : index
    %c0_109 = arith.constant 0 : index
    %126 = vector.load %arg4[%c16_107, %c0_108, %c0_109] : memref<25x32x128xbf16, #tpu.memory_space<vmem>>, vector<1x32x128xbf16>
    %127 = vector.shape_cast %126 : vector<1x32x128xbf16> to vector<32x128xbf16>
    %cst_110 = arith.constant dense<0.000000e+00> : vector<144x128xf32>
    %128 = tpu.matmul %125, %127, %cst_110 {dimension_numbers = #tpu.dot_dimension_numbers<[1], [0], [0], [1], [0, 0, 1, 1], [], []>} : vector<144x32xbf16>, vector<32x128xbf16>, vector<144x128xf32> -> vector<144x128xf32>
    %129 = arith.addf %123, %128 : vector<144x128xf32>
    %c44 = arith.constant 44 : index
    %c0_111 = arith.constant 0 : index
    %130 = vector.load %arg14[%c44, %c0_111] : memref<208x32xf32, #tpu.memory_space<vmem>>, vector<144x32xf32>
    %131 = arith.truncf %130 : vector<144x32xf32> to vector<144x32xbf16>
    %c17_112 = arith.constant 17 : index
    %c0_113 = arith.constant 0 : index
    %c0_114 = arith.constant 0 : index
    %132 = vector.load %arg4[%c17_112, %c0_113, %c0_114] : memref<25x32x128xbf16, #tpu.memory_space<vmem>>, vector<1x32x128xbf16>
    %133 = vector.shape_cast %132 : vector<1x32x128xbf16> to vector<32x128xbf16>
    %cst_115 = arith.constant dense<0.000000e+00> : vector<144x128xf32>
    %134 = tpu.matmul %131, %133, %cst_115 {dimension_numbers = #tpu.dot_dimension_numbers<[1], [0], [0], [1], [0, 0, 1, 1], [], []>} : vector<144x32xbf16>, vector<32x128xbf16>, vector<144x128xf32> -> vector<144x128xf32>
    %135 = arith.addf %129, %134 : vector<144x128xf32>
    %c45 = arith.constant 45 : index
    %c0_116 = arith.constant 0 : index
    %136 = vector.load %arg14[%c45, %c0_116] : memref<208x32xf32, #tpu.memory_space<vmem>>, vector<144x32xf32>
    %137 = arith.truncf %136 : vector<144x32xf32> to vector<144x32xbf16>
    %c18_117 = arith.constant 18 : index
    %c0_118 = arith.constant 0 : index
    %c0_119 = arith.constant 0 : index
    %138 = vector.load %arg4[%c18_117, %c0_118, %c0_119] : memref<25x32x128xbf16, #tpu.memory_space<vmem>>, vector<1x32x128xbf16>
    %139 = vector.shape_cast %138 : vector<1x32x128xbf16> to vector<32x128xbf16>
    %cst_120 = arith.constant dense<0.000000e+00> : vector<144x128xf32>
    %140 = tpu.matmul %137, %139, %cst_120 {dimension_numbers = #tpu.dot_dimension_numbers<[1], [0], [0], [1], [0, 0, 1, 1], [], []>} : vector<144x32xbf16>, vector<32x128xbf16>, vector<144x128xf32> -> vector<144x128xf32>
    %141 = arith.addf %135, %140 : vector<144x128xf32>
    %c46 = arith.constant 46 : index
    %c0_121 = arith.constant 0 : index
    %142 = vector.load %arg14[%c46, %c0_121] : memref<208x32xf32, #tpu.memory_space<vmem>>, vector<144x32xf32>
    %143 = arith.truncf %142 : vector<144x32xf32> to vector<144x32xbf16>
    %c19 = arith.constant 19 : index
    %c0_122 = arith.constant 0 : index
    %c0_123 = arith.constant 0 : index
    %144 = vector.load %arg4[%c19, %c0_122, %c0_123] : memref<25x32x128xbf16, #tpu.memory_space<vmem>>, vector<1x32x128xbf16>
    %145 = vector.shape_cast %144 : vector<1x32x128xbf16> to vector<32x128xbf16>
    %cst_124 = arith.constant dense<0.000000e+00> : vector<144x128xf32>
    %146 = tpu.matmul %143, %145, %cst_124 {dimension_numbers = #tpu.dot_dimension_numbers<[1], [0], [0], [1], [0, 0, 1, 1], [], []>} : vector<144x32xbf16>, vector<32x128xbf16>, vector<144x128xf32> -> vector<144x128xf32>
    %147 = arith.addf %141, %146 : vector<144x128xf32>
    %c56 = arith.constant 56 : index
    %c0_125 = arith.constant 0 : index
    %148 = vector.load %arg14[%c56, %c0_125] : memref<208x32xf32, #tpu.memory_space<vmem>>, vector<144x32xf32>
    %149 = arith.truncf %148 : vector<144x32xf32> to vector<144x32xbf16>
    %c20 = arith.constant 20 : index
    %c0_126 = arith.constant 0 : index
    %c0_127 = arith.constant 0 : index
    %150 = vector.load %arg4[%c20, %c0_126, %c0_127] : memref<25x32x128xbf16, #tpu.memory_space<vmem>>, vector<1x32x128xbf16>
    %151 = vector.shape_cast %150 : vector<1x32x128xbf16> to vector<32x128xbf16>
    %cst_128 = arith.constant dense<0.000000e+00> : vector<144x128xf32>
    %152 = tpu.matmul %149, %151, %cst_128 {dimension_numbers = #tpu.dot_dimension_numbers<[1], [0], [0], [1], [0, 0, 1, 1], [], []>} : vector<144x32xbf16>, vector<32x128xbf16>, vector<144x128xf32> -> vector<144x128xf32>
    %153 = arith.addf %147, %152 : vector<144x128xf32>
    %c57 = arith.constant 57 : index
    %c0_129 = arith.constant 0 : index
    %154 = vector.load %arg14[%c57, %c0_129] : memref<208x32xf32, #tpu.memory_space<vmem>>, vector<144x32xf32>
    %155 = arith.truncf %154 : vector<144x32xf32> to vector<144x32xbf16>
    %c21 = arith.constant 21 : index
    %c0_130 = arith.constant 0 : index
    %c0_131 = arith.constant 0 : index
    %156 = vector.load %arg4[%c21, %c0_130, %c0_131] : memref<25x32x128xbf16, #tpu.memory_space<vmem>>, vector<1x32x128xbf16>
    %157 = vector.shape_cast %156 : vector<1x32x128xbf16> to vector<32x128xbf16>
    %cst_132 = arith.constant dense<0.000000e+00> : vector<144x128xf32>
    %158 = tpu.matmul %155, %157, %cst_132 {dimension_numbers = #tpu.dot_dimension_numbers<[1], [0], [0], [1], [0, 0, 1, 1], [], []>} : vector<144x32xbf16>, vector<32x128xbf16>, vector<144x128xf32> -> vector<144x128xf32>
    %159 = arith.addf %153, %158 : vector<144x128xf32>
    %c58 = arith.constant 58 : index
    %c0_133 = arith.constant 0 : index
    %160 = vector.load %arg14[%c58, %c0_133] : memref<208x32xf32, #tpu.memory_space<vmem>>, vector<144x32xf32>
    %161 = arith.truncf %160 : vector<144x32xf32> to vector<144x32xbf16>
    %c22 = arith.constant 22 : index
    %c0_134 = arith.constant 0 : index
    %c0_135 = arith.constant 0 : index
    %162 = vector.load %arg4[%c22, %c0_134, %c0_135] : memref<25x32x128xbf16, #tpu.memory_space<vmem>>, vector<1x32x128xbf16>
    %163 = vector.shape_cast %162 : vector<1x32x128xbf16> to vector<32x128xbf16>
    %cst_136 = arith.constant dense<0.000000e+00> : vector<144x128xf32>
    %164 = tpu.matmul %161, %163, %cst_136 {dimension_numbers = #tpu.dot_dimension_numbers<[1], [0], [0], [1], [0, 0, 1, 1], [], []>} : vector<144x32xbf16>, vector<32x128xbf16>, vector<144x128xf32> -> vector<144x128xf32>
    %165 = arith.addf %159, %164 : vector<144x128xf32>
    %c59 = arith.constant 59 : index
    %c0_137 = arith.constant 0 : index
    %166 = vector.load %arg14[%c59, %c0_137] : memref<208x32xf32, #tpu.memory_space<vmem>>, vector<144x32xf32>
    %167 = arith.truncf %166 : vector<144x32xf32> to vector<144x32xbf16>
    %c23 = arith.constant 23 : index
    %c0_138 = arith.constant 0 : index
    %c0_139 = arith.constant 0 : index
    %168 = vector.load %arg4[%c23, %c0_138, %c0_139] : memref<25x32x128xbf16, #tpu.memory_space<vmem>>, vector<1x32x128xbf16>
    %169 = vector.shape_cast %168 : vector<1x32x128xbf16> to vector<32x128xbf16>
    %cst_140 = arith.constant dense<0.000000e+00> : vector<144x128xf32>
    %170 = tpu.matmul %167, %169, %cst_140 {dimension_numbers = #tpu.dot_dimension_numbers<[1], [0], [0], [1], [0, 0, 1, 1], [], []>} : vector<144x32xbf16>, vector<32x128xbf16>, vector<144x128xf32> -> vector<144x128xf32>
    %171 = arith.addf %165, %170 : vector<144x128xf32>
    %c60 = arith.constant 60 : index
    %c0_141 = arith.constant 0 : index
    %172 = vector.load %arg14[%c60, %c0_141] : memref<208x32xf32, #tpu.memory_space<vmem>>, vector<144x32xf32>
    %173 = arith.truncf %172 : vector<144x32xf32> to vector<144x32xbf16>
    %c24 = arith.constant 24 : index
    %c0_142 = arith.constant 0 : index
    %c0_143 = arith.constant 0 : index
    %174 = vector.load %arg4[%c24, %c0_142, %c0_143] : memref<25x32x128xbf16, #tpu.memory_space<vmem>>, vector<1x32x128xbf16>
    %175 = vector.shape_cast %174 : vector<1x32x128xbf16> to vector<32x128xbf16>
    %cst_144 = arith.constant dense<0.000000e+00> : vector<144x128xf32>
    %176 = tpu.matmul %173, %175, %cst_144 {dimension_numbers = #tpu.dot_dimension_numbers<[1], [0], [0], [1], [0, 0, 1, 1], [], []>} : vector<144x32xbf16>, vector<32x128xbf16>, vector<144x128xf32> -> vector<144x128xf32>
    %177 = arith.addf %171, %176 : vector<144x128xf32>
    %c0_145 = arith.constant 0 : index
    %c0_146 = arith.constant 0 : index
    %178 = vector.load %arg15[%c0_145, %c0_146] : memref<144x128xf32, #tpu.memory_space<vmem>>, vector<144x128xf32>
    tpu.vector_store %arg15[%c0_145, %c0_146], %177 {strides = array<i32>} : memref<144x128xf32, #tpu.memory_space<vmem>>, vector<144x128xf32>,
    %c0_147 = arith.constant 0 : index
    %c0_148 = arith.constant 0 : index
    %179 = vector.load %arg15[%c0_147, %c0_148] : memref<144x128xf32, #tpu.memory_space<vmem>>, vector<128x128xf32>
    %c1_149 = arith.constant 1 : index
    %c0_150 = arith.constant 0 : index
    %180 = vector.load %arg15[%c1_149, %c0_150] : memref<144x128xf32, #tpu.memory_space<vmem>>, vector<128x128xf32>
    %181 = arith.maximumf %179, %180 : vector<128x128xf32>
    %c14_151 = arith.constant 14 : index
    %c0_152 = arith.constant 0 : index
    %182 = vector.load %arg15[%c14_151, %c0_152] : memref<144x128xf32, #tpu.memory_space<vmem>>, vector<128x128xf32>
    %c15_153 = arith.constant 15 : index
    %c0_154 = arith.constant 0 : index
    %183 = vector.load %arg15[%c15_153, %c0_154] : memref<144x128xf32, #tpu.memory_space<vmem>>, vector<128x128xf32>
    %184 = arith.maximumf %182, %183 : vector<128x128xf32>
    %185 = arith.maximumf %181, %184 : vector<128x128xf32>
    %c0_155 = arith.constant 0 : index
    %c0_156 = arith.constant 0 : index
    %186 = vector.load %arg5[%c0_155, %c0_156] : memref<1x128xf32, #tpu.memory_space<vmem>>, vector<1x128xf32>
    %187 = vector.broadcast %186 : vector<1x128xf32> to vector<128x128xf32>
    %188 = arith.addf %185, %187 : vector<128x128xf32>
    %cst_157 = arith.constant 0.000000e+00 : f32
    %189 = vector.broadcast %cst_157 : f32 to vector<128x128xf32>
    %190 = arith.maximumf %188, %189 : vector<128x128xf32>
    %191 = arith.truncf %190 : vector<128x128xf32> to vector<128x128xbf16>
    %c0_158 = arith.constant 0 : index
    %c0_159 = arith.constant 0 : index
    %192 = vector.load %arg6[%c0_158, %c0_159] : memref<32x128xbf16, #tpu.memory_space<vmem>>, vector<32x128xbf16>
    %cst_160 = arith.constant dense<0.000000e+00> : vector<32x128xf32>
    %193 = tpu.matmul %192, %191, %cst_160 {dimension_numbers = #tpu.dot_dimension_numbers<[1], [0], [0], [1], [0, 0, 1, 1], [], []>} : vector<32x128xbf16>, vector<128x128xbf16>, vector<32x128xf32> -> vector<32x128xf32>
    %c0_161 = arith.constant 0 : index
    %c0_162 = arith.constant 0 : index
    %c0_163 = arith.constant 0 : index
    %194 = vector.load %arg16[%c0_161, %c0_162, %c0_163] : memref<1x32x128xf32, #tpu.memory_space<vmem>>, vector<1x32x128xf32>
    %195 = vector.shape_cast %194 : vector<1x32x128xf32> to vector<32x128xf32>
    %196 = vector.shape_cast %193 : vector<32x128xf32> to vector<1x32x128xf32>
    tpu.vector_store %arg16[%c0_161, %c0_162, %c0_163], %196 {strides = array<i32>} : memref<1x32x128xf32, #tpu.memory_space<vmem>>, vector<1x32x128xf32>,
    %cst_164 = arith.constant 0.000000e+00 : f32
    %197 = vector.broadcast %cst_164 : f32 to vector<1x128xf32>
    %c0_165 = arith.constant 0 : index
    %c0_166 = arith.constant 0 : index
    %c0_167 = arith.constant 0 : index
    %198 = vector.load %arg16[%c0_165, %c0_166, %c0_167] : memref<1x32x128xf32, #tpu.memory_space<vmem>>, vector<1x1x128xf32>
    %199 = vector.shape_cast %198 : vector<1x1x128xf32> to vector<1x128xf32>
    %200 = arith.truncf %199 : vector<1x128xf32> to vector<1x128xbf16>
    %c0_168 = arith.constant 0 : index
    %c0_169 = arith.constant 0 : index
    %c0_170 = arith.constant 0 : index
    %201 = vector.load %arg7[%c0_168, %c0_169, %c0_170] : memref<25x128x128xbf16, #tpu.memory_space<vmem>>, vector<1x128x128xbf16>
    %202 = vector.shape_cast %201 : vector<1x128x128xbf16> to vector<128x128xbf16>
    %cst_171 = arith.constant dense<0.000000e+00> : vector<1x128xf32>
    %203 = tpu.matmul %200, %202, %cst_171 {dimension_numbers = #tpu.dot_dimension_numbers<[1], [0], [0], [1], [0, 0, 1, 1], [], []>} : vector<1x128xbf16>, vector<128x128xbf16>, vector<1x128xf32> -> vector<1x128xf32>
    %204 = arith.addf %197, %203 : vector<1x128xf32>
    %c0_172 = arith.constant 0 : index
    %c1_173 = arith.constant 1 : index
    %c0_174 = arith.constant 0 : index
    %205 = vector.load %arg16[%c0_172, %c1_173, %c0_174] : memref<1x32x128xf32, #tpu.memory_space<vmem>>, vector<1x1x128xf32>
    %206 = vector.shape_cast %205 : vector<1x1x128xf32> to vector<1x128xf32>
    %207 = arith.truncf %206 : vector<1x128xf32> to vector<1x128xbf16>
    %c1_175 = arith.constant 1 : index
    %c0_176 = arith.constant 0 : index
    %c0_177 = arith.constant 0 : index
    %208 = vector.load %arg7[%c1_175, %c0_176, %c0_177] : memref<25x128x128xbf16, #tpu.memory_space<vmem>>, vector<1x128x128xbf16>
    %209 = vector.shape_cast %208 : vector<1x128x128xbf16> to vector<128x128xbf16>
    %cst_178 = arith.constant dense<0.000000e+00> : vector<1x128xf32>
    %210 = tpu.matmul %207, %209, %cst_178 {dimension_numbers = #tpu.dot_dimension_numbers<[1], [0], [0], [1], [0, 0, 1, 1], [], []>} : vector<1x128xbf16>, vector<128x128xbf16>, vector<1x128xf32> -> vector<1x128xf32>
    %211 = arith.addf %204, %210 : vector<1x128xf32>
    %c0_179 = arith.constant 0 : index
    %c2_180 = arith.constant 2 : index
    %c0_181 = arith.constant 0 : index
    %212 = vector.load %arg16[%c0_179, %c2_180, %c0_181] : memref<1x32x128xf32, #tpu.memory_space<vmem>>, vector<1x1x128xf32>
    %213 = vector.shape_cast %212 : vector<1x1x128xf32> to vector<1x128xf32>
    %214 = arith.truncf %213 : vector<1x128xf32> to vector<1x128xbf16>
    %c2_182 = arith.constant 2 : index
    %c0_183 = arith.constant 0 : index
    %c0_184 = arith.constant 0 : index
    %215 = vector.load %arg7[%c2_182, %c0_183, %c0_184] : memref<25x128x128xbf16, #tpu.memory_space<vmem>>, vector<1x128x128xbf16>
    %216 = vector.shape_cast %215 : vector<1x128x128xbf16> to vector<128x128xbf16>
    %cst_185 = arith.constant dense<0.000000e+00> : vector<1x128xf32>
    %217 = tpu.matmul %214, %216, %cst_185 {dimension_numbers = #tpu.dot_dimension_numbers<[1], [0], [0], [1], [0, 0, 1, 1], [], []>} : vector<1x128xbf16>, vector<128x128xbf16>, vector<1x128xf32> -> vector<1x128xf32>
    %218 = arith.addf %211, %217 : vector<1x128xf32>
    %c0_186 = arith.constant 0 : index
    %c3_187 = arith.constant 3 : index
    %c0_188 = arith.constant 0 : index
    %219 = vector.load %arg16[%c0_186, %c3_187, %c0_188] : memref<1x32x128xf32, #tpu.memory_space<vmem>>, vector<1x1x128xf32>
    %220 = vector.shape_cast %219 : vector<1x1x128xf32> to vector<1x128xf32>
    %221 = arith.truncf %220 : vector<1x128xf32> to vector<1x128xbf16>
    %c3_189 = arith.constant 3 : index
    %c0_190 = arith.constant 0 : index
    %c0_191 = arith.constant 0 : index
    %222 = vector.load %arg7[%c3_189, %c0_190, %c0_191] : memref<25x128x128xbf16, #tpu.memory_space<vmem>>, vector<1x128x128xbf16>
    %223 = vector.shape_cast %222 : vector<1x128x128xbf16> to vector<128x128xbf16>
    %cst_192 = arith.constant dense<0.000000e+00> : vector<1x128xf32>
    %224 = tpu.matmul %221, %223, %cst_192 {dimension_numbers = #tpu.dot_dimension_numbers<[1], [0], [0], [1], [0, 0, 1, 1], [], []>} : vector<1x128xbf16>, vector<128x128xbf16>, vector<1x128xf32> -> vector<1x128xf32>
    %225 = arith.addf %218, %224 : vector<1x128xf32>
    %c0_193 = arith.constant 0 : index
    %c4_194 = arith.constant 4 : index
    %c0_195 = arith.constant 0 : index
    %226 = vector.load %arg16[%c0_193, %c4_194, %c0_195] : memref<1x32x128xf32, #tpu.memory_space<vmem>>, vector<1x1x128xf32>
    %227 = vector.shape_cast %226 : vector<1x1x128xf32> to vector<1x128xf32>
    %228 = arith.truncf %227 : vector<1x128xf32> to vector<1x128xbf16>
    %c4_196 = arith.constant 4 : index
    %c0_197 = arith.constant 0 : index
    %c0_198 = arith.constant 0 : index
    %229 = vector.load %arg7[%c4_196, %c0_197, %c0_198] : memref<25x128x128xbf16, #tpu.memory_space<vmem>>, vector<1x128x128xbf16>
    %230 = vector.shape_cast %229 : vector<1x128x128xbf16> to vector<128x128xbf16>
    %cst_199 = arith.constant dense<0.000000e+00> : vector<1x128xf32>
    %231 = tpu.matmul %228, %230, %cst_199 {dimension_numbers = #tpu.dot_dimension_numbers<[1], [0], [0], [1], [0, 0, 1, 1], [], []>} : vector<1x128xbf16>, vector<128x128xbf16>, vector<1x128xf32> -> vector<1x128xf32>
    %232 = arith.addf %225, %231 : vector<1x128xf32>
    %c0_200 = arith.constant 0 : index
    %c5_201 = arith.constant 5 : index
    %c0_202 = arith.constant 0 : index
    %233 = vector.load %arg16[%c0_200, %c5_201, %c0_202] : memref<1x32x128xf32, #tpu.memory_space<vmem>>, vector<1x1x128xf32>
    %234 = vector.shape_cast %233 : vector<1x1x128xf32> to vector<1x128xf32>
    %235 = arith.truncf %234 : vector<1x128xf32> to vector<1x128xbf16>
    %c5_203 = arith.constant 5 : index
    %c0_204 = arith.constant 0 : index
    %c0_205 = arith.constant 0 : index
    %236 = vector.load %arg7[%c5_203, %c0_204, %c0_205] : memref<25x128x128xbf16, #tpu.memory_space<vmem>>, vector<1x128x128xbf16>
    %237 = vector.shape_cast %236 : vector<1x128x128xbf16> to vector<128x128xbf16>
    %cst_206 = arith.constant dense<0.000000e+00> : vector<1x128xf32>
    %238 = tpu.matmul %235, %237, %cst_206 {dimension_numbers = #tpu.dot_dimension_numbers<[1], [0], [0], [1], [0, 0, 1, 1], [], []>} : vector<1x128xbf16>, vector<128x128xbf16>, vector<1x128xf32> -> vector<1x128xf32>
    %239 = arith.addf %232, %238 : vector<1x128xf32>
    %c0_207 = arith.constant 0 : index
    %c6_208 = arith.constant 6 : index
    %c0_209 = arith.constant 0 : index
    %240 = vector.load %arg16[%c0_207, %c6_208, %c0_209] : memref<1x32x128xf32, #tpu.memory_space<vmem>>, vector<1x1x128xf32>
    %241 = vector.shape_cast %240 : vector<1x1x128xf32> to vector<1x128xf32>
    %242 = arith.truncf %241 : vector<1x128xf32> to vector<1x128xbf16>
    %c6_210 = arith.constant 6 : index
    %c0_211 = arith.constant 0 : index
    %c0_212 = arith.constant 0 : index
    %243 = vector.load %arg7[%c6_210, %c0_211, %c0_212] : memref<25x128x128xbf16, #tpu.memory_space<vmem>>, vector<1x128x128xbf16>
    %244 = vector.shape_cast %243 : vector<1x128x128xbf16> to vector<128x128xbf16>
    %cst_213 = arith.constant dense<0.000000e+00> : vector<1x128xf32>
    %245 = tpu.matmul %242, %244, %cst_213 {dimension_numbers = #tpu.dot_dimension_numbers<[1], [0], [0], [1], [0, 0, 1, 1], [], []>} : vector<1x128xbf16>, vector<128x128xbf16>, vector<1x128xf32> -> vector<1x128xf32>
    %246 = arith.addf %239, %245 : vector<1x128xf32>
    %c0_214 = arith.constant 0 : index
    %c7_215 = arith.constant 7 : index
    %c0_216 = arith.constant 0 : index
    %247 = vector.load %arg16[%c0_214, %c7_215, %c0_216] : memref<1x32x128xf32, #tpu.memory_space<vmem>>, vector<1x1x128xf32>
    %248 = vector.shape_cast %247 : vector<1x1x128xf32> to vector<1x128xf32>
    %249 = arith.truncf %248 : vector<1x128xf32> to vector<1x128xbf16>
    %c7_217 = arith.constant 7 : index
    %c0_218 = arith.constant 0 : index
    %c0_219 = arith.constant 0 : index
    %250 = vector.load %arg7[%c7_217, %c0_218, %c0_219] : memref<25x128x128xbf16, #tpu.memory_space<vmem>>, vector<1x128x128xbf16>
    %251 = vector.shape_cast %250 : vector<1x128x128xbf16> to vector<128x128xbf16>
    %cst_220 = arith.constant dense<0.000000e+00> : vector<1x128xf32>
    %252 = tpu.matmul %249, %251, %cst_220 {dimension_numbers = #tpu.dot_dimension_numbers<[1], [0], [0], [1], [0, 0, 1, 1], [], []>} : vector<1x128xbf16>, vector<128x128xbf16>, vector<1x128xf32> -> vector<1x128xf32>
    %253 = arith.addf %246, %252 : vector<1x128xf32>
    %c0_221 = arith.constant 0 : index
    %c8_222 = arith.constant 8 : index
    %c0_223 = arith.constant 0 : index
    %254 = vector.load %arg16[%c0_221, %c8_222, %c0_223] : memref<1x32x128xf32, #tpu.memory_space<vmem>>, vector<1x1x128xf32>
    %255 = vector.shape_cast %254 : vector<1x1x128xf32> to vector<1x128xf32>
    %256 = arith.truncf %255 : vector<1x128xf32> to vector<1x128xbf16>
    %c8_224 = arith.constant 8 : index
    %c0_225 = arith.constant 0 : index
    %c0_226 = arith.constant 0 : index
    %257 = vector.load %arg7[%c8_224, %c0_225, %c0_226] : memref<25x128x128xbf16, #tpu.memory_space<vmem>>, vector<1x128x128xbf16>
    %258 = vector.shape_cast %257 : vector<1x128x128xbf16> to vector<128x128xbf16>
    %cst_227 = arith.constant dense<0.000000e+00> : vector<1x128xf32>
    %259 = tpu.matmul %256, %258, %cst_227 {dimension_numbers = #tpu.dot_dimension_numbers<[1], [0], [0], [1], [0, 0, 1, 1], [], []>} : vector<1x128xbf16>, vector<128x128xbf16>, vector<1x128xf32> -> vector<1x128xf32>
    %260 = arith.addf %253, %259 : vector<1x128xf32>
    %c0_228 = arith.constant 0 : index
    %c9_229 = arith.constant 9 : index
    %c0_230 = arith.constant 0 : index
    %261 = vector.load %arg16[%c0_228, %c9_229, %c0_230] : memref<1x32x128xf32, #tpu.memory_space<vmem>>, vector<1x1x128xf32>
    %262 = vector.shape_cast %261 : vector<1x1x128xf32> to vector<1x128xf32>
    %263 = arith.truncf %262 : vector<1x128xf32> to vector<1x128xbf16>
    %c9_231 = arith.constant 9 : index
    %c0_232 = arith.constant 0 : index
    %c0_233 = arith.constant 0 : index
    %264 = vector.load %arg7[%c9_231, %c0_232, %c0_233] : memref<25x128x128xbf16, #tpu.memory_space<vmem>>, vector<1x128x128xbf16>
    %265 = vector.shape_cast %264 : vector<1x128x128xbf16> to vector<128x128xbf16>
    %cst_234 = arith.constant dense<0.000000e+00> : vector<1x128xf32>
    %266 = tpu.matmul %263, %265, %cst_234 {dimension_numbers = #tpu.dot_dimension_numbers<[1], [0], [0], [1], [0, 0, 1, 1], [], []>} : vector<1x128xbf16>, vector<128x128xbf16>, vector<1x128xf32> -> vector<1x128xf32>
    %267 = arith.addf %260, %266 : vector<1x128xf32>
    %c0_235 = arith.constant 0 : index
    %c10_236 = arith.constant 10 : index
    %c0_237 = arith.constant 0 : index
    %268 = vector.load %arg16[%c0_235, %c10_236, %c0_237] : memref<1x32x128xf32, #tpu.memory_space<vmem>>, vector<1x1x128xf32>
    %269 = vector.shape_cast %268 : vector<1x1x128xf32> to vector<1x128xf32>
    %270 = arith.truncf %269 : vector<1x128xf32> to vector<1x128xbf16>
    %c10_238 = arith.constant 10 : index
    %c0_239 = arith.constant 0 : index
    %c0_240 = arith.constant 0 : index
    %271 = vector.load %arg7[%c10_238, %c0_239, %c0_240] : memref<25x128x128xbf16, #tpu.memory_space<vmem>>, vector<1x128x128xbf16>
    %272 = vector.shape_cast %271 : vector<1x128x128xbf16> to vector<128x128xbf16>
    %cst_241 = arith.constant dense<0.000000e+00> : vector<1x128xf32>
    %273 = tpu.matmul %270, %272, %cst_241 {dimension_numbers = #tpu.dot_dimension_numbers<[1], [0], [0], [1], [0, 0, 1, 1], [], []>} : vector<1x128xbf16>, vector<128x128xbf16>, vector<1x128xf32> -> vector<1x128xf32>
    %274 = arith.addf %267, %273 : vector<1x128xf32>
    %c0_242 = arith.constant 0 : index
    %c11_243 = arith.constant 11 : index
    %c0_244 = arith.constant 0 : index
    %275 = vector.load %arg16[%c0_242, %c11_243, %c0_244] : memref<1x32x128xf32, #tpu.memory_space<vmem>>, vector<1x1x128xf32>
    %276 = vector.shape_cast %275 : vector<1x1x128xf32> to vector<1x128xf32>
    %277 = arith.truncf %276 : vector<1x128xf32> to vector<1x128xbf16>
    %c11_245 = arith.constant 11 : index
    %c0_246 = arith.constant 0 : index
    %c0_247 = arith.constant 0 : index
    %278 = vector.load %arg7[%c11_245, %c0_246, %c0_247] : memref<25x128x128xbf16, #tpu.memory_space<vmem>>, vector<1x128x128xbf16>
    %279 = vector.shape_cast %278 : vector<1x128x128xbf16> to vector<128x128xbf16>
    %cst_248 = arith.constant dense<0.000000e+00> : vector<1x128xf32>
    %280 = tpu.matmul %277, %279, %cst_248 {dimension_numbers = #tpu.dot_dimension_numbers<[1], [0], [0], [1], [0, 0, 1, 1], [], []>} : vector<1x128xbf16>, vector<128x128xbf16>, vector<1x128xf32> -> vector<1x128xf32>
    %281 = arith.addf %274, %280 : vector<1x128xf32>
    %c0_249 = arith.constant 0 : index
    %c12_250 = arith.constant 12 : index
    %c0_251 = arith.constant 0 : index
    %282 = vector.load %arg16[%c0_249, %c12_250, %c0_251] : memref<1x32x128xf32, #tpu.memory_space<vmem>>, vector<1x1x128xf32>
    %283 = vector.shape_cast %282 : vector<1x1x128xf32> to vector<1x128xf32>
    %284 = arith.truncf %283 : vector<1x128xf32> to vector<1x128xbf16>
    %c12_252 = arith.constant 12 : index
    %c0_253 = arith.constant 0 : index
    %c0_254 = arith.constant 0 : index
    %285 = vector.load %arg7[%c12_252, %c0_253, %c0_254] : memref<25x128x128xbf16, #tpu.memory_space<vmem>>, vector<1x128x128xbf16>
    %286 = vector.shape_cast %285 : vector<1x128x128xbf16> to vector<128x128xbf16>
    %cst_255 = arith.constant dense<0.000000e+00> : vector<1x128xf32>
    %287 = tpu.matmul %284, %286, %cst_255 {dimension_numbers = #tpu.dot_dimension_numbers<[1], [0], [0], [1], [0, 0, 1, 1], [], []>} : vector<1x128xbf16>, vector<128x128xbf16>, vector<1x128xf32> -> vector<1x128xf32>
    %288 = arith.addf %281, %287 : vector<1x128xf32>
    %c0_256 = arith.constant 0 : index
    %c13_257 = arith.constant 13 : index
    %c0_258 = arith.constant 0 : index
    %289 = vector.load %arg16[%c0_256, %c13_257, %c0_258] : memref<1x32x128xf32, #tpu.memory_space<vmem>>, vector<1x1x128xf32>
    %290 = vector.shape_cast %289 : vector<1x1x128xf32> to vector<1x128xf32>
    %291 = arith.truncf %290 : vector<1x128xf32> to vector<1x128xbf16>
    %c13_259 = arith.constant 13 : index
    %c0_260 = arith.constant 0 : index
    %c0_261 = arith.constant 0 : index
    %292 = vector.load %arg7[%c13_259, %c0_260, %c0_261] : memref<25x128x128xbf16, #tpu.memory_space<vmem>>, vector<1x128x128xbf16>
    %293 = vector.shape_cast %292 : vector<1x128x128xbf16> to vector<128x128xbf16>
    %cst_262 = arith.constant dense<0.000000e+00> : vector<1x128xf32>
    %294 = tpu.matmul %291, %293, %cst_262 {dimension_numbers = #tpu.dot_dimension_numbers<[1], [0], [0], [1], [0, 0, 1, 1], [], []>} : vector<1x128xbf16>, vector<128x128xbf16>, vector<1x128xf32> -> vector<1x128xf32>
    %295 = arith.addf %288, %294 : vector<1x128xf32>
    %c0_263 = arith.constant 0 : index
    %c14_264 = arith.constant 14 : index
    %c0_265 = arith.constant 0 : index
    %296 = vector.load %arg16[%c0_263, %c14_264, %c0_265] : memref<1x32x128xf32, #tpu.memory_space<vmem>>, vector<1x1x128xf32>
    %297 = vector.shape_cast %296 : vector<1x1x128xf32> to vector<1x128xf32>
    %298 = arith.truncf %297 : vector<1x128xf32> to vector<1x128xbf16>
    %c14_266 = arith.constant 14 : index
    %c0_267 = arith.constant 0 : index
    %c0_268 = arith.constant 0 : index
    %299 = vector.load %arg7[%c14_266, %c0_267, %c0_268] : memref<25x128x128xbf16, #tpu.memory_space<vmem>>, vector<1x128x128xbf16>
    %300 = vector.shape_cast %299 : vector<1x128x128xbf16> to vector<128x128xbf16>
    %cst_269 = arith.constant dense<0.000000e+00> : vector<1x128xf32>
    %301 = tpu.matmul %298, %300, %cst_269 {dimension_numbers = #tpu.dot_dimension_numbers<[1], [0], [0], [1], [0, 0, 1, 1], [], []>} : vector<1x128xbf16>, vector<128x128xbf16>, vector<1x128xf32> -> vector<1x128xf32>
    %302 = arith.addf %295, %301 : vector<1x128xf32>
    %c0_270 = arith.constant 0 : index
    %c15_271 = arith.constant 15 : index
    %c0_272 = arith.constant 0 : index
    %303 = vector.load %arg16[%c0_270, %c15_271, %c0_272] : memref<1x32x128xf32, #tpu.memory_space<vmem>>, vector<1x1x128xf32>
    %304 = vector.shape_cast %303 : vector<1x1x128xf32> to vector<1x128xf32>
    %305 = arith.truncf %304 : vector<1x128xf32> to vector<1x128xbf16>
    %c15_273 = arith.constant 15 : index
    %c0_274 = arith.constant 0 : index
    %c0_275 = arith.constant 0 : index
    %306 = vector.load %arg7[%c15_273, %c0_274, %c0_275] : memref<25x128x128xbf16, #tpu.memory_space<vmem>>, vector<1x128x128xbf16>
    %307 = vector.shape_cast %306 : vector<1x128x128xbf16> to vector<128x128xbf16>
    %cst_276 = arith.constant dense<0.000000e+00> : vector<1x128xf32>
    %308 = tpu.matmul %305, %307, %cst_276 {dimension_numbers = #tpu.dot_dimension_numbers<[1], [0], [0], [1], [0, 0, 1, 1], [], []>} : vector<1x128xbf16>, vector<128x128xbf16>, vector<1x128xf32> -> vector<1x128xf32>
    %309 = arith.addf %302, %308 : vector<1x128xf32>
    %c0_277 = arith.constant 0 : index
    %c16_278 = arith.constant 16 : index
    %c0_279 = arith.constant 0 : index
    %310 = vector.load %arg16[%c0_277, %c16_278, %c0_279] : memref<1x32x128xf32, #tpu.memory_space<vmem>>, vector<1x1x128xf32>
    %311 = vector.shape_cast %310 : vector<1x1x128xf32> to vector<1x128xf32>
    %312 = arith.truncf %311 : vector<1x128xf32> to vector<1x128xbf16>
    %c16_280 = arith.constant 16 : index
    %c0_281 = arith.constant 0 : index
    %c0_282 = arith.constant 0 : index
    %313 = vector.load %arg7[%c16_280, %c0_281, %c0_282] : memref<25x128x128xbf16, #tpu.memory_space<vmem>>, vector<1x128x128xbf16>
    %314 = vector.shape_cast %313 : vector<1x128x128xbf16> to vector<128x128xbf16>
    %cst_283 = arith.constant dense<0.000000e+00> : vector<1x128xf32>
    %315 = tpu.matmul %312, %314, %cst_283 {dimension_numbers = #tpu.dot_dimension_numbers<[1], [0], [0], [1], [0, 0, 1, 1], [], []>} : vector<1x128xbf16>, vector<128x128xbf16>, vector<1x128xf32> -> vector<1x128xf32>
    %316 = arith.addf %309, %315 : vector<1x128xf32>
    %c0_284 = arith.constant 0 : index
    %c17_285 = arith.constant 17 : index
    %c0_286 = arith.constant 0 : index
    %317 = vector.load %arg16[%c0_284, %c17_285, %c0_286] : memref<1x32x128xf32, #tpu.memory_space<vmem>>, vector<1x1x128xf32>
    %318 = vector.shape_cast %317 : vector<1x1x128xf32> to vector<1x128xf32>
    %319 = arith.truncf %318 : vector<1x128xf32> to vector<1x128xbf16>
    %c17_287 = arith.constant 17 : index
    %c0_288 = arith.constant 0 : index
    %c0_289 = arith.constant 0 : index
    %320 = vector.load %arg7[%c17_287, %c0_288, %c0_289] : memref<25x128x128xbf16, #tpu.memory_space<vmem>>, vector<1x128x128xbf16>
    %321 = vector.shape_cast %320 : vector<1x128x128xbf16> to vector<128x128xbf16>
    %cst_290 = arith.constant dense<0.000000e+00> : vector<1x128xf32>
    %322 = tpu.matmul %319, %321, %cst_290 {dimension_numbers = #tpu.dot_dimension_numbers<[1], [0], [0], [1], [0, 0, 1, 1], [], []>} : vector<1x128xbf16>, vector<128x128xbf16>, vector<1x128xf32> -> vector<1x128xf32>
    %323 = arith.addf %316, %322 : vector<1x128xf32>
    %c0_291 = arith.constant 0 : index
    %c18_292 = arith.constant 18 : index
    %c0_293 = arith.constant 0 : index
    %324 = vector.load %arg16[%c0_291, %c18_292, %c0_293] : memref<1x32x128xf32, #tpu.memory_space<vmem>>, vector<1x1x128xf32>
    %325 = vector.shape_cast %324 : vector<1x1x128xf32> to vector<1x128xf32>
    %326 = arith.truncf %325 : vector<1x128xf32> to vector<1x128xbf16>
    %c18_294 = arith.constant 18 : index
    %c0_295 = arith.constant 0 : index
    %c0_296 = arith.constant 0 : index
    %327 = vector.load %arg7[%c18_294, %c0_295, %c0_296] : memref<25x128x128xbf16, #tpu.memory_space<vmem>>, vector<1x128x128xbf16>
    %328 = vector.shape_cast %327 : vector<1x128x128xbf16> to vector<128x128xbf16>
    %cst_297 = arith.constant dense<0.000000e+00> : vector<1x128xf32>
    %329 = tpu.matmul %326, %328, %cst_297 {dimension_numbers = #tpu.dot_dimension_numbers<[1], [0], [0], [1], [0, 0, 1, 1], [], []>} : vector<1x128xbf16>, vector<128x128xbf16>, vector<1x128xf32> -> vector<1x128xf32>
    %330 = arith.addf %323, %329 : vector<1x128xf32>
    %c0_298 = arith.constant 0 : index
    %c19_299 = arith.constant 19 : index
    %c0_300 = arith.constant 0 : index
    %331 = vector.load %arg16[%c0_298, %c19_299, %c0_300] : memref<1x32x128xf32, #tpu.memory_space<vmem>>, vector<1x1x128xf32>
    %332 = vector.shape_cast %331 : vector<1x1x128xf32> to vector<1x128xf32>
    %333 = arith.truncf %332 : vector<1x128xf32> to vector<1x128xbf16>
    %c19_301 = arith.constant 19 : index
    %c0_302 = arith.constant 0 : index
    %c0_303 = arith.constant 0 : index
    %334 = vector.load %arg7[%c19_301, %c0_302, %c0_303] : memref<25x128x128xbf16, #tpu.memory_space<vmem>>, vector<1x128x128xbf16>
    %335 = vector.shape_cast %334 : vector<1x128x128xbf16> to vector<128x128xbf16>
    %cst_304 = arith.constant dense<0.000000e+00> : vector<1x128xf32>
    %336 = tpu.matmul %333, %335, %cst_304 {dimension_numbers = #tpu.dot_dimension_numbers<[1], [0], [0], [1], [0, 0, 1, 1], [], []>} : vector<1x128xbf16>, vector<128x128xbf16>, vector<1x128xf32> -> vector<1x128xf32>
    %337 = arith.addf %330, %336 : vector<1x128xf32>
    %c0_305 = arith.constant 0 : index
    %c20_306 = arith.constant 20 : index
    %c0_307 = arith.constant 0 : index
    %338 = vector.load %arg16[%c0_305, %c20_306, %c0_307] : memref<1x32x128xf32, #tpu.memory_space<vmem>>, vector<1x1x128xf32>
    %339 = vector.shape_cast %338 : vector<1x1x128xf32> to vector<1x128xf32>
    %340 = arith.truncf %339 : vector<1x128xf32> to vector<1x128xbf16>
    %c20_308 = arith.constant 20 : index
    %c0_309 = arith.constant 0 : index
    %c0_310 = arith.constant 0 : index
    %341 = vector.load %arg7[%c20_308, %c0_309, %c0_310] : memref<25x128x128xbf16, #tpu.memory_space<vmem>>, vector<1x128x128xbf16>
    %342 = vector.shape_cast %341 : vector<1x128x128xbf16> to vector<128x128xbf16>
    %cst_311 = arith.constant dense<0.000000e+00> : vector<1x128xf32>
    %343 = tpu.matmul %340, %342, %cst_311 {dimension_numbers = #tpu.dot_dimension_numbers<[1], [0], [0], [1], [0, 0, 1, 1], [], []>} : vector<1x128xbf16>, vector<128x128xbf16>, vector<1x128xf32> -> vector<1x128xf32>
    %344 = arith.addf %337, %343 : vector<1x128xf32>
    %c0_312 = arith.constant 0 : index
    %c21_313 = arith.constant 21 : index
    %c0_314 = arith.constant 0 : index
    %345 = vector.load %arg16[%c0_312, %c21_313, %c0_314] : memref<1x32x128xf32, #tpu.memory_space<vmem>>, vector<1x1x128xf32>
    %346 = vector.shape_cast %345 : vector<1x1x128xf32> to vector<1x128xf32>
    %347 = arith.truncf %346 : vector<1x128xf32> to vector<1x128xbf16>
    %c21_315 = arith.constant 21 : index
    %c0_316 = arith.constant 0 : index
    %c0_317 = arith.constant 0 : index
    %348 = vector.load %arg7[%c21_315, %c0_316, %c0_317] : memref<25x128x128xbf16, #tpu.memory_space<vmem>>, vector<1x128x128xbf16>
    %349 = vector.shape_cast %348 : vector<1x128x128xbf16> to vector<128x128xbf16>
    %cst_318 = arith.constant dense<0.000000e+00> : vector<1x128xf32>
    %350 = tpu.matmul %347, %349, %cst_318 {dimension_numbers = #tpu.dot_dimension_numbers<[1], [0], [0], [1], [0, 0, 1, 1], [], []>} : vector<1x128xbf16>, vector<128x128xbf16>, vector<1x128xf32> -> vector<1x128xf32>
    %351 = arith.addf %344, %350 : vector<1x128xf32>
    %c0_319 = arith.constant 0 : index
    %c22_320 = arith.constant 22 : index
    %c0_321 = arith.constant 0 : index
    %352 = vector.load %arg16[%c0_319, %c22_320, %c0_321] : memref<1x32x128xf32, #tpu.memory_space<vmem>>, vector<1x1x128xf32>
    %353 = vector.shape_cast %352 : vector<1x1x128xf32> to vector<1x128xf32>
    %354 = arith.truncf %353 : vector<1x128xf32> to vector<1x128xbf16>
    %c22_322 = arith.constant 22 : index
    %c0_323 = arith.constant 0 : index
    %c0_324 = arith.constant 0 : index
    %355 = vector.load %arg7[%c22_322, %c0_323, %c0_324] : memref<25x128x128xbf16, #tpu.memory_space<vmem>>, vector<1x128x128xbf16>
    %356 = vector.shape_cast %355 : vector<1x128x128xbf16> to vector<128x128xbf16>
    %cst_325 = arith.constant dense<0.000000e+00> : vector<1x128xf32>
    %357 = tpu.matmul %354, %356, %cst_325 {dimension_numbers = #tpu.dot_dimension_numbers<[1], [0], [0], [1], [0, 0, 1, 1], [], []>} : vector<1x128xbf16>, vector<128x128xbf16>, vector<1x128xf32> -> vector<1x128xf32>
    %358 = arith.addf %351, %357 : vector<1x128xf32>
    %c0_326 = arith.constant 0 : index
    %c23_327 = arith.constant 23 : index
    %c0_328 = arith.constant 0 : index
    %359 = vector.load %arg16[%c0_326, %c23_327, %c0_328] : memref<1x32x128xf32, #tpu.memory_space<vmem>>, vector<1x1x128xf32>
    %360 = vector.shape_cast %359 : vector<1x1x128xf32> to vector<1x128xf32>
    %361 = arith.truncf %360 : vector<1x128xf32> to vector<1x128xbf16>
    %c23_329 = arith.constant 23 : index
    %c0_330 = arith.constant 0 : index
    %c0_331 = arith.constant 0 : index
    %362 = vector.load %arg7[%c23_329, %c0_330, %c0_331] : memref<25x128x128xbf16, #tpu.memory_space<vmem>>, vector<1x128x128xbf16>
    %363 = vector.shape_cast %362 : vector<1x128x128xbf16> to vector<128x128xbf16>
    %cst_332 = arith.constant dense<0.000000e+00> : vector<1x128xf32>
    %364 = tpu.matmul %361, %363, %cst_332 {dimension_numbers = #tpu.dot_dimension_numbers<[1], [0], [0], [1], [0, 0, 1, 1], [], []>} : vector<1x128xbf16>, vector<128x128xbf16>, vector<1x128xf32> -> vector<1x128xf32>
    %365 = arith.addf %358, %364 : vector<1x128xf32>
    %c0_333 = arith.constant 0 : index
    %c24_334 = arith.constant 24 : index
    %c0_335 = arith.constant 0 : index
    %366 = vector.load %arg16[%c0_333, %c24_334, %c0_335] : memref<1x32x128xf32, #tpu.memory_space<vmem>>, vector<1x1x128xf32>
    %367 = vector.shape_cast %366 : vector<1x1x128xf32> to vector<1x128xf32>
    %368 = arith.truncf %367 : vector<1x128xf32> to vector<1x128xbf16>
    %c24_336 = arith.constant 24 : index
    %c0_337 = arith.constant 0 : index
    %c0_338 = arith.constant 0 : index
    %369 = vector.load %arg7[%c24_336, %c0_337, %c0_338] : memref<25x128x128xbf16, #tpu.memory_space<vmem>>, vector<1x128x128xbf16>
    %370 = vector.shape_cast %369 : vector<1x128x128xbf16> to vector<128x128xbf16>
    %cst_339 = arith.constant dense<0.000000e+00> : vector<1x128xf32>
    %371 = tpu.matmul %368, %370, %cst_339 {dimension_numbers = #tpu.dot_dimension_numbers<[1], [0], [0], [1], [0, 0, 1, 1], [], []>} : vector<1x128xbf16>, vector<128x128xbf16>, vector<1x128xf32> -> vector<1x128xf32>
    %372 = arith.addf %365, %371 : vector<1x128xf32>
    %c0_340 = arith.constant 0 : index
    %c0_341 = arith.constant 0 : index
    %373 = vector.load %arg8[%c0_340, %c0_341] : memref<1x128xf32, #tpu.memory_space<vmem>>, vector<1x128xf32>
    %374 = arith.addf %372, %373 : vector<1x128xf32>
    %cst_342 = arith.constant 0.000000e+00 : f32
    %375 = vector.broadcast %cst_342 : f32 to vector<1x128xf32>
    %376 = arith.maximumf %374, %375 : vector<1x128xf32>
    %377 = arith.truncf %376 : vector<1x128xf32> to vector<1x128xbf16>
    %c0_343 = arith.constant 0 : index
    %c0_344 = arith.constant 0 : index
    %378 = vector.load %arg9[%c0_343, %c0_344] : memref<128x128xbf16, #tpu.memory_space<vmem>>, vector<128x128xbf16>
    %cst_345 = arith.constant dense<0.000000e+00> : vector<1x128xf32>
    %379 = tpu.matmul %377, %378, %cst_345 {dimension_numbers = #tpu.dot_dimension_numbers<[1], [0], [0], [1], [0, 0, 1, 1], [], []>} : vector<1x128xbf16>, vector<128x128xbf16>, vector<1x128xf32> -> vector<1x128xf32>
    %c0_346 = arith.constant 0 : index
    %c0_347 = arith.constant 0 : index
    %380 = vector.load %arg10[%c0_346, %c0_347] : memref<1x128xf32, #tpu.memory_space<vmem>>, vector<1x128xf32>
    %381 = arith.addf %379, %380 : vector<1x128xf32>
    %cst_348 = arith.constant 0.000000e+00 : f32
    %382 = vector.broadcast %cst_348 : f32 to vector<1x128xf32>
    %383 = arith.maximumf %381, %382 : vector<1x128xf32>
    %384 = arith.truncf %383 : vector<1x128xf32> to vector<1x128xbf16>
    %c0_349 = arith.constant 0 : index
    %c0_350 = arith.constant 0 : index
    %385 = vector.load %arg11[%c0_349, %c0_350] : memref<128x128xbf16, #tpu.memory_space<vmem>>, vector<128x128xbf16>
    %cst_351 = arith.constant dense<0.000000e+00> : vector<1x128xf32>
    %386 = tpu.matmul %384, %385, %cst_351 {dimension_numbers = #tpu.dot_dimension_numbers<[1], [0], [0], [1], [0, 0, 1, 1], [], []>} : vector<1x128xbf16>, vector<128x128xbf16>, vector<1x128xf32> -> vector<1x128xf32>
    %c0_352 = arith.constant 0 : index
    %c0_353 = arith.constant 0 : index
    %387 = vector.load %arg12[%c0_352, %c0_353] : memref<1x128xf32, #tpu.memory_space<vmem>>, vector<1x128xf32>
    %388 = arith.addf %386, %387 : vector<1x128xf32>
    %c0_354 = arith.constant 0 : index
    %c0_355 = arith.constant 0 : index
    %c0_356 = arith.constant 0 : index
    %389 = vector.load %arg13[%c0_354, %c0_355, %c0_356] : memref<1x1x128xf32, #tpu.memory_space<vmem>>, vector<1x1x128xf32>
    %390 = vector.shape_cast %389 : vector<1x1x128xf32> to vector<1x128xf32>
    %391 = vector.shape_cast %388 : vector<1x128xf32> to vector<1x1x128xf32>
    tpu.vector_store %arg13[%c0_354, %c0_355, %c0_356], %391 {strides = array<i32>} : memref<1x1x128xf32, #tpu.memory_space<vmem>>, vector<1x1x128xf32>,
    return
  }
  func.func @transform_0(%arg0: i32) -> (i32, i32, i32, i32) {
    %c0_i32 = arith.constant 0 : i32
    %c0_i32_0 = arith.constant 0 : i32
    %c0_i32_1 = arith.constant 0 : i32
    %c0_i32_2 = arith.constant 0 : i32
    return %arg0, %c0_i32, %c0_i32_0, %c0_i32_1 : i32, i32, i32, i32
  }
  func.func @transform_1(%arg0: i32) -> (i32, i32) {
    %c0_i32 = arith.constant 0 : i32
    %c0_i32_0 = arith.constant 0 : i32
    %c0_i32_1 = arith.constant 0 : i32
    return %c0_i32, %c0_i32_0 : i32, i32
  }
  func.func @transform_2(%arg0: i32) -> (i32, i32) {
    %c0_i32 = arith.constant 0 : i32
    %c0_i32_0 = arith.constant 0 : i32
    %c0_i32_1 = arith.constant 0 : i32
    return %c0_i32, %c0_i32_0 : i32, i32
  }
  func.func @transform_3(%arg0: i32) -> (i32, i32, i32) {
    %c0_i32 = arith.constant 0 : i32
    %c0_i32_0 = arith.constant 0 : i32
    %c0_i32_1 = arith.constant 0 : i32
    %c0_i32_2 = arith.constant 0 : i32
    return %c0_i32, %c0_i32_0, %c0_i32_1 : i32, i32, i32
  }
  func.func @transform_4(%arg0: i32) -> (i32, i32) {
    %c0_i32 = arith.constant 0 : i32
    %c0_i32_0 = arith.constant 0 : i32
    %c0_i32_1 = arith.constant 0 : i32
    return %c0_i32, %c0_i32_0 : i32, i32
  }
  func.func @transform_5(%arg0: i32) -> (i32, i32) {
    %c0_i32 = arith.constant 0 : i32
    %c0_i32_0 = arith.constant 0 : i32
    %c0_i32_1 = arith.constant 0 : i32
    return %c0_i32, %c0_i32_0 : i32, i32
  }
  func.func @transform_6(%arg0: i32) -> (i32, i32, i32) {
    %c0_i32 = arith.constant 0 : i32
    %c0_i32_0 = arith.constant 0 : i32
    %c0_i32_1 = arith.constant 0 : i32
    %c0_i32_2 = arith.constant 0 : i32
    return %c0_i32, %c0_i32_0, %c0_i32_1 : i32, i32, i32
  }
  func.func @transform_7(%arg0: i32) -> (i32, i32) {
    %c0_i32 = arith.constant 0 : i32
    %c0_i32_0 = arith.constant 0 : i32
    %c0_i32_1 = arith.constant 0 : i32
    return %c0_i32, %c0_i32_0 : i32, i32
  }
  func.func @transform_8(%arg0: i32) -> (i32, i32) {
    %c0_i32 = arith.constant 0 : i32
    %c0_i32_0 = arith.constant 0 : i32
    %c0_i32_1 = arith.constant 0 : i32
    return %c0_i32, %c0_i32_0 : i32, i32
  }
  func.func @transform_9(%arg0: i32) -> (i32, i32) {
    %c0_i32 = arith.constant 0 : i32
    %c0_i32_0 = arith.constant 0 : i32
    %c0_i32_1 = arith.constant 0 : i32
    return %c0_i32, %c0_i32_0 : i32, i32
  }
  func.func @transform_10(%arg0: i32) -> (i32, i32) {
    %c0_i32 = arith.constant 0 : i32
    %c0_i32_0 = arith.constant 0 : i32
    %c0_i32_1 = arith.constant 0 : i32
    return %c0_i32, %c0_i32_0 : i32, i32
  }
  func.func @transform_11(%arg0: i32) -> (i32, i32) {
    %c0_i32 = arith.constant 0 : i32
    %c0_i32_0 = arith.constant 0 : i32
    %c0_i32_1 = arith.constant 0 : i32
    return %c0_i32, %c0_i32_0 : i32, i32
  }
  func.func @transform_12(%arg0: i32) -> (i32, i32, i32) {
    %c0_i32 = arith.constant 0 : i32
    %c0_i32_0 = arith.constant 0 : i32
    %c0_i32_1 = arith.constant 0 : i32
    return %arg0, %c0_i32, %c0_i32_0 : i32, i32, i32
  }
}

</mosaic_0001>

<bundles_post_ra>
// kernel: net_forward.1
= control target key start
LH: loop header
LB: loop body
LE: loop exit
PB: predicated region body
PF: predicated region fallthrough
CT: control target
= control target key end

     0   :  { %s17661_s0 = inlined_call_operand.vmem [shape: bf16[2,4,196,128], index: 0, kind: input, shape index: {}]   ;;  %s17662_s1 = inlined_call_operand.vmem [shape: bf16[128,32], index: 1, kind: input, shape index: {}]   ;;  %s17663_s2 = inlined_call_operand.vmem [shape: f32[1,32], index: 2, kind: input, shape index: {}]   ;;  %s17664_s3 = inlined_call_operand.vmem [shape: bf16[25,32,128], index: 3, kind: input, shape index: {}]   ;;  %s17665_s4 = inlined_call_operand.vmem [shape: f32[1,128], index: 4, kind: input, shape index: {}]   ;;  %s17666_s5 = inlined_call_operand.vmem [shape: bf16[32,128], index: 5, kind: input, shape index: {}]   ;;  %s17667_s6 = inlined_call_operand.vmem [shape: bf16[25,128,128], index: 6, kind: input, shape index: {}]   ;;  %s17668_s7 = inlined_call_operand.vmem [shape: f32[1,128], index: 7, kind: input, shape index: {}]   ;;  %s17669_s8 = inlined_call_operand.vmem [shape: bf16[128,128], index: 8, kind: input, shape index: {}]   ;;  %s17670_s9 = inlined_call_operand.vmem [shape: f32[1,128], index: 9, kind: input, shape index: {}]   ;;  %s17671_s10 = inlined_call_operand.vmem [shape: bf16[128,128], index: 10, kind: input, shape index: {}]   ;;  %s17672_s11 = inlined_call_operand.vmem [shape: f32[1,128], index: 11, kind: input, shape index: {}]   ;;  %s17673_s12 = inlined_call_operand.hbm [shape: f32[2,1,128], index: 12, kind: output, shape index: {}]  }
   0x1   :  { %17682 = sst [smem:[#allocation21_spill]] %s17661_s0 }
   0x2   :  { %17 = vsyncpa [#allocation6], 0 }
   0x3   :  { %19 = vsyncpa [#allocation6 + $0x1], 0  ;;  %s14557_s21 = smov 0   ;;  %s14559_s22 = smov 0  }
   0x4   :  { %s14561_s23 = smov 0   ;;  %s14563_s24 = smov 0  }
   0x5 LB: > { %s14578_s25 = sadd.s32 4294967295, %s14487_s24   ;;  %s9629_s26 = sadd.s32 4294967294, %s14487_s24   ;;  %s14487_s24 = sphi %s14563_s24, %s17749_s24   ;;  %s14483_s23 = sphi %s14561_s23, %s17748_s23   ;;  %s14479_s22 = sphi %s14559_s22, %s17747_s22   ;;  %s14475_s21 = sphi %s14557_s21, %s17746_s21  }
   0x6   : > { %s14582_s27 = sadd.s32 1, %s14487_s24   ;;  %s289_s28 = sadd.s32 1, %s14483_s23 }
   0x7   : > { %s286_s29 = ssub.s32 %s14487_s24, %s14582_s27  ;;  %p299_p0 = scmp.ne.s32.totalorder %s14483_s23, %s14479_s22 }
   0x8   : > { %p287_p1 = scmp.eq.s32.totalorder %s286_s29, 0  ;;  %p300_p2 = scmp.eq.s32.totalorder %s14578_s25, 1 }
   0x9   : > { %p305_p3 = scmp.ne.s32.totalorder %s14479_s22, %s14475_s21  ;;  %p306_p4 = scmp.eq.s32.totalorder %s9629_s26, 1 }
   0xa   : > { %s14593_s30 = scalar_select %p287_p1, %s14483_s23, %s289_s28  }
   0xb   : > { %p14595_p5 = por %p300_p2, %p299_p0  ;;  %p14599_p6 = por %p306_p4, %p305_p3 }
   0xc   : > { %p9632_p7 = scmp.ge.s32.totalorder %s14487_s24, 1  ;;  %p365_p8 = scmp.lt.s32.totalorder %s14487_s24, 3 }
   0xe   : > { %p366_p9 = pnand %p9632_p7, %p365_p8 }
  0x10   : > { %369 = sbr.rel (%p366_p9) target bundleno = 4077 (0xfed), region = 68 }
  0x17   : > { %v14608_v0 = vld [vmem:[%s17662_s1] sm:$0xff]   ;;  %v17674_v1 = vmov 0.0   ;;  %v14616_v2 = vld [vmem:[%s17662_s1 + $0x8] sm:$0xff]   ;;  %vm14490_vm0 = vmmov 0   ;;  %p406_p10 = scmp.lt.s32.totalorder %s14578_s25, 1  ;;  %v14629_v3 = vld [vmem:[%s17662_s1 + $0x10] sm:$0xff]  }
  0x18   : > { %11359 = vmatprep.subr.bf16.mxu1 %v17674_v1  ;;  %11751 = vmatprep.subr.bf16.mxu0 %v17674_v1  ;;  %s17685_s0 = sld [smem:[#allocation21_spill]]  ;;  %v14641_v4 = vld [vmem:[%s17662_s1 + $0x18] sm:$0xff]   ;;  %v14648_v5 = vld [vmem:[%s17662_s1 + $0x20] sm:$0xff]   ;;  %v14655_v6 = vld [vmem:[%s17662_s1 + $0x28] sm:$0xff]   ;;  %vm412_vm1 = vcmask 261120   ;;  %vm414_vm2 = vcmask 257024  }
  0x19   : > { %11360 = vmatpush3.bf16.msra.mxu1 %v14608_v0  ;;  %11375 = vmatprep.mubr.msk.bf16.mxu1 %vm14490_vm0, %v17674_v1  ;;  %s407_s19 = scalar_select %p406_p10, %s14578_s25, 1  ;;  %v14661_v7 = vld [vmem:[%s17662_s1 + $0x30] sm:$0xff]   ;;  %v14669_v8 = vld [vmem:[%s17662_s1 + $0x38] sm:$0xff]   ;;  %v14407_v36 = vld [vmem:[%s17662_s1] sm:$0xff]   ;;  %413 = vst.msk [vmem:[#allocation2 + $0xc4] sm:$0xff] %vm412_vm1, %v17674_v1 }
  0x1a   : > { %11361 = vmatprep.subr.bf16.mxu1 %v17674_v1  ;;  %11755 = vmatprep.mubr.msk.bf16.mxu0 %vm14490_vm0, %v17674_v1  ;;  %v14408_v41 = vld [vmem:[%s17662_s1 + $0x8] sm:$0xff]   ;;  %v14409_v43 = vld [vmem:[%s17662_s1 + $0x10] sm:$0xff]   ;;  %v14410_v48 = vld [vmem:[%s17662_s1 + $0x18] sm:$0xff]   ;;  %s10744_s17 = sshll.u32 %s14578_s25, 4  ;;  %s14491_s15 = smov [#allocation5]  }
  0x1b   : > { %s14037_s28 = smul.u32 400, %s407_s19  ;;  %v14411_v50 = vld [vmem:[%s17662_s1 + $0x20] sm:$0xff]   ;;  %v14412_v55 = vld [vmem:[%s17662_s1 + $0x28] sm:$0xff]   ;;  %v14413_v57 = vld [vmem:[%s17662_s1 + $0x30] sm:$0xff]   ;;  %s17619_s26 = scalar_lea.hbm %s17673_s12, %s10744_s17 }
  0x1c   : > { %v14414_v62 = vld [vmem:[%s17662_s1 + $0x38] sm:$0xff]  }
  0x1d   : > { %11362 = vmatpush3.bf16.msra.mxu1 %v14616_v2 }
  0x1e   : > { %11363 = vmatprep.subr.bf16.mxu1 %v17674_v1  ;;  %s14635_s16 = scalar_lea.vmem %s17685_s0, %s14037_s28  ;;  %s404_s28 = sand.u32 1, %s14479_s22  }
  0x1f   : > { %v14087_v9 = vld [vmem:[%s14635_s16] sm:$0xff]   ;;  %v14088_v10 = vld [vmem:[%s14635_s16 + $0x8] sm:$0xff]   ;;  %v14089_v11 = vld [vmem:[%s14635_s16 + $0x10] sm:$0xff]   ;;  %s405_s18 = scalar_lea.vmem [#allocation5], %s404_s28  ;;  %s9562_s29 = scalar_lea.sflag [#allocation6], %s404_s28 }
  0x20   : > { %v14090_v12 = vld [vmem:[%s14635_s16 + $0x18] sm:$0xff]   ;;  %v14091_v13 = vld [vmem:[%s14635_s16 + $0x20] sm:$0xff]   ;;  %v14092_v14 = vld [vmem:[%s14635_s16 + $0x28] sm:$0xff]   ;;  %s9574_s19 = sshll.u32 %s405_s18, 4  ;;  %s14429_s0 = sshll.u32 %s14491_s15, 4  ;;  %s17621_s19 = int_to_ptr.vmem [resolvable:$true] %s9574_s19  ;;  %s14430_s0 = int_to_ptr.vmem [resolvable:$false] %s14429_s0 }
  0x21   : > { %11364 = vmatpush3.bf16.msra.mxu1 %v14629_v3  ;;  %v14093_v15 = vld [vmem:[%s14635_s16 + $0x30] sm:$0xff]   ;;  %v14094_v16 = vld [vmem:[%s14635_s16 + $0x38] sm:$0xff]   ;;  %v14095_v17 = vld [vmem:[%s14635_s16 + $0x40] sm:$0xff]   ;;  %s14425_s25 = scalar_lea.vmem %s17621_s19, 16  ;;  %s14431_s20 = scalar_lea.vmem %s14430_s0, 32 }
  0x22   : > { %11365 = vmatprep.subr.bf16.mxu1 %v17674_v1  ;;  %v14096_v18 = vld [vmem:[%s14635_s16 + $0x48] sm:$0xff]   ;;  %v14097_v19 = vld [vmem:[%s14635_s16 + $0x50] sm:$0xff]   ;;  %v14098_v20 = vld [vmem:[%s14635_s16 + $0x58] sm:$0xff]   ;;  %p14426_p11 = scmp.ne.s32.totalorder %s17621_s19, %s14425_s25  ;;  %p14432_p0 = scmp.lt.s32.totalorder %s17621_s19, %s14430_s0 }
  0x23   : > { %v14099_v21 = vld [vmem:[%s14635_s16 + $0x60] ss:$0 sps:$4 sm:$0x33]   ;;  %v14100_v22 = vld [vmem:[%s14635_s16 + $0x64] sm:$0xff]   ;;  %v14101_v23 = vld [vmem:[%s14635_s16 + $0x6c] sm:$0xff]   ;;  %p14433_p1 = scmp.lt.s32.totalorder %s14431_s20, %s14425_s25 }
  0x24   : > { %v14102_v24 = vld [vmem:[%s14635_s16 + $0x74] sm:$0xff]   ;;  %v14103_v25 = vld [vmem:[%s14635_s16 + $0x7c] sm:$0xff]   ;;  %v14104_v26 = vld [vmem:[%s14635_s16 + $0x84] sm:$0xff]   ;;  %p14427_p12 = pnand %p14426_p11, %p14595_p5 }
  0x25   : > { %11366 = vmatpush3.bf16.msra.mxu1 %v14641_v4  ;;  %v14105_v27 = vld [vmem:[%s14635_s16 + $0x8c] sm:$0xff]   ;;  %v14106_v28 = vld [vmem:[%s14635_s16 + $0x94] sm:$0xff]   ;;  %v14107_v29 = vld [vmem:[%s14635_s16 + $0x9c] sm:$0xff]   ;;  %p14434_p2 = por %p14433_p1, %p14432_p0 }
  0x26   : > { %11367 = vmatprep.subr.bf16.mxu1 %v17674_v1  ;;  %v14108_v30 = vld [vmem:[%s14635_s16 + $0xa4] sm:$0xff]   ;;  %v14109_v31 = vld [vmem:[%s14635_s16 + $0xac] sm:$0xff]   ;;  %v14110_v32 = vld [vmem:[%s14635_s16 + $0xb4] sm:$0xff]   ;;  %p14428_p13 = pneg %p14427_p12 }
  0x27   : > { %v14111_v33 = vld [vmem:[%s14635_s16 + $0xbc] sm:$0xff]   ;;  %v14112_v34 = vld [vmem:[%s14635_s16 + $0xc4] ss:$0 sps:$4 sm:$0x33]   ;;  %v14113_v35 = vld [vmem:[%s14635_s16 + $0xc8] sm:$0xff]  }
  0x28   : > { %v14114_v39 = vld [vmem:[%s14635_s16 + $0xd0] sm:$0xff]   ;;  %v14115_v46 = vld [vmem:[%s14635_s16 + $0xd8] sm:$0xff]   ;;  %v14116_v53 = vld [vmem:[%s14635_s16 + $0xe0] sm:$0xff]   ;;  %p14435_p3 = pnand %p14434_p2, %p14428_p13 }
  0x29   : > { %11368 = vmatpush3.bf16.msra.mxu1 %v14648_v5  ;;  %v14117_v60 = vld [vmem:[%s14635_s16 + $0xe8] sm:$0xff]  }
  0x2a   : > { %11369 = vmatprep.subr.bf16.mxu1 %v17674_v1 }
  0x2d   : > { %11370 = vmatpush3.bf16.msra.mxu1 %v14655_v6 }
  0x2e   : > { %11371 = vmatprep.subr.bf16.mxu1 %v17674_v1 }
  0x31   : > { %11372 = vmatpush3.bf16.msra.mxu1 %v14661_v7 }
  0x32   : > { %11373 = vmatprep.subr.bf16.mxu1 %v17674_v1 }
  0x35   : > { %11374 = vmatpush3.bf16.msra.mxu1 %v14669_v8 }
  0x36   : > { %11427 = vmatprep.subr.bf16.mxu1 %v17674_v1 }
  0x38   : > { %11376 = vmatmul.mubr.bf16.vlgmr.msra.gmra.mrb[0].mxu1 %v14087_v9 }
  0x39   : > { %11379 = vmatprep.mubr.msk.bf16.mxu1 %vm14490_vm0, %v17674_v1  ;;  %11428 = vmatpush3.bf16.msra.mxu1 %v14608_v0 }
  0x3a   : > { %11429 = vmatprep.subr.bf16.mxu1 %v17674_v1 }
  0x3d   : > { %11430 = vmatpush3.bf16.msra.mxu1 %v14616_v2 }
  0x3e   : > { %11431 = vmatprep.subr.bf16.mxu1 %v17674_v1 }
  0x40   : > { %11380 = vmatmul.mubr.bf16.gmra.mrb[4].mxu1 %v14088_v10 }
  0x41   : > { %11383 = vmatprep.mubr.msk.bf16.mxu1 %vm14490_vm0, %v17674_v1  ;;  %11432 = vmatpush3.bf16.msra.mxu1 %v14629_v3 }
  0x42   : > { %11433 = vmatprep.subr.bf16.mxu1 %v17674_v1 }
  0x45   : > { %11434 = vmatpush3.bf16.msra.mxu1 %v14641_v4 }
  0x46   : > { %11435 = vmatprep.subr.bf16.mxu1 %v17674_v1 }
  0x48   : > { %11384 = vmatmul.mubr.bf16.gmra.mrb[8].mxu1 %v14089_v11 }
  0x49   : > { %11387 = vmatprep.mubr.msk.bf16.mxu1 %vm14490_vm0, %v17674_v1  ;;  %11436 = vmatpush3.bf16.msra.mxu1 %v14648_v5 }
  0x4a   : > { %11437 = vmatprep.subr.bf16.mxu1 %v17674_v1 }
  0x4d   : > { %11438 = vmatpush3.bf16.msra.mxu1 %v14655_v6 }
  0x4e   : > { %11439 = vmatprep.subr.bf16.mxu1 %v17674_v1 }
  0x50   : > { %11388 = vmatmul.mubr.bf16.gmra.mrb[12].mxu1 %v14090_v12 }
  0x51   : > { %11391 = vmatprep.mubr.msk.bf16.mxu1 %vm14490_vm0, %v17674_v1  ;;  %11440 = vmatpush3.bf16.msra.mxu1 %v14661_v7 }
  0x52   : > { %11441 = vmatprep.subr.bf16.mxu1 %v17674_v1 }
  0x55   : > { %11442 = vmatpush3.bf16.msra.mxu1 %v14669_v8 }
  0x56   : > { %11495 = vmatprep.subr.bf16.mxu1 %v17674_v1 }
  0x58   : > { %11392 = vmatmul.mubr.bf16.gmra.mrb[16].mxu1 %v14091_v13  ;;  %v14120_v13 = vld [vmem:[%s14635_s16 + $0x100] sm:$0xff]  }
  0x59   : > { %11395 = vmatprep.mubr.msk.bf16.mxu1 %vm14490_vm0, %v17674_v1 }
  0x60   : > { %11396 = vmatmul.mubr.bf16.gmra.mrb[20].mxu1 %v14092_v14 }
  0x61   : > { %11399 = vmatprep.mubr.msk.bf16.mxu1 %vm14490_vm0, %v17674_v1 }
  0x68   : > { %11400 = vmatmul.mubr.bf16.gmra.mrb[24].mxu1 %v14093_v15 }
  0x69   : > { %11403 = vmatprep.mubr.msk.bf16.mxu1 %vm14490_vm0, %v17674_v1 }
  0x70   : > { %11404 = vmatmul.mubr.bf16.gmra.mrb[28].mxu1 %v14094_v16 }
  0x71   : > { %11407 = vmatprep.mubr.msk.bf16.mxu1 %vm14490_vm0, %v17674_v1 }
  0x78   : > { %11408 = vmatmul.mubr.bf16.gmra.mrb[32].mxu1 %v14095_v17 }
  0x79   : > { %11411 = vmatprep.mubr.msk.bf16.mxu1 %vm14490_vm0, %v17674_v1 }
  0x80   : > { %11412 = vmatmul.mubr.bf16.gmra.mrb[36].mxu1 %v14096_v18  ;;  %v14121_v18 = vld [vmem:[%s14635_s16 + $0x108] sm:$0xff]  }
  0x81   : > { %11415 = vmatprep.mubr.msk.bf16.mxu1 %vm14490_vm0, %v17674_v1 }
  0x88   : > { %11416 = vmatmul.mubr.bf16.gmra.mrb[40].mxu1 %v14097_v19 }
  0x89   : > { %11419 = vmatprep.mubr.msk.bf16.mxu1 %vm14490_vm0, %v17674_v1 }
  0x90   : > { %11420 = vmatmul.mubr.bf16.gmra.mrb[44].mxu1 %v14098_v20 }
  0x91   : > { %11423 = vmatprep.mubr.msk.bf16.mxu1 %vm14490_vm0, %v17674_v1 }
  0x98   : > { %11424 = vmatmul.mubr.bf16.gmra.mrb[48].mxu1 %v14099_v21 }
  0x99   : > { %11443 = vmatprep.mubr.msk.bf16.mxu1 %vm14490_vm0, %v17674_v1 }
  0xa0   : > { %11444 = vmatmul.mubr.bf16.vlgmr.msra.gmra.mrb[52].mxu1 %v14100_v22 }
  0xa1   : > { %11447 = vmatprep.mubr.msk.bf16.mxu1 %vm14490_vm0, %v17674_v1  ;;  %11496 = vmatpush3.bf16.msra.mxu1 %v14608_v0 }
  0xa2   : > { %11497 = vmatprep.subr.bf16.mxu1 %v17674_v1 }
  0xa5   : > { %11498 = vmatpush3.bf16.msra.mxu1 %v14616_v2 }
  0xa6   : > { %11499 = vmatprep.subr.bf16.mxu1 %v17674_v1 }
  0xa8   : > { %11448 = vmatmul.mubr.bf16.gmra.mrb[56].mxu1 %v14101_v23  ;;  %v14122_v23 = vld [vmem:[%s14635_s16 + $0x110] sm:$0xff]  }
  0xa9   : > { %11451 = vmatprep.mubr.msk.bf16.mxu1 %vm14490_vm0, %v17674_v1  ;;  %11500 = vmatpush3.bf16.msra.mxu1 %v14629_v3  ;;  %v14118_v3 = vld [vmem:[%s14635_s16 + $0xf0] sm:$0xff]  }
  0xaa   : > { %11501 = vmatprep.subr.bf16.mxu1 %v17674_v1 }
  0xad   : > { %11502 = vmatpush3.bf16.msra.mxu1 %v14641_v4 }
  0xae   : > { %11503 = vmatprep.subr.bf16.mxu1 %v17674_v1 }
  0xb0   : > { %11452 = vmatmul.mubr.bf16.gmra.mrb[60].mxu1 %v14102_v24 }
  0xb1   : > { %11455 = vmatprep.mubr.msk.bf16.mxu1 %vm14490_vm0, %v17674_v1  ;;  %11504 = vmatpush3.bf16.msra.mxu1 %v14648_v5 }
  0xb2   : > { %11505 = vmatprep.subr.bf16.mxu1 %v17674_v1 }
  0xb5   : > { %11506 = vmatpush3.bf16.msra.mxu1 %v14655_v6 }
  0xb6   : > { %11507 = vmatprep.subr.bf16.mxu1 %v17674_v1 }
  0xb8   : > { %11456 = vmatmul.mubr.bf16.gmra.mrb[64].mxu1 %v14103_v25 }
  0xb9   : > { %11459 = vmatprep.mubr.msk.bf16.mxu1 %vm14490_vm0, %v17674_v1  ;;  %11508 = vmatpush3.bf16.msra.mxu1 %v14661_v7 }
  0xba   : > { %11509 = vmatprep.subr.bf16.mxu1 %v17674_v1 }
  0xbd   : > { %11510 = vmatpush3.bf16.msra.mxu1 %v14669_v8  ;;  %v14119_v8 = vld [vmem:[%s14635_s16 + $0xf8] sm:$0xff]  }
  0xbe   : > { %11563 = vmatprep.subr.bf16.mxu1 %v17674_v1 }
  0xc0   : > { %11460 = vmatmul.mubr.bf16.gmra.mrb[68].mxu1 %v14104_v26 }
  0xc1   : > { %11463 = vmatprep.mubr.msk.bf16.mxu1 %vm14490_vm0, %v17674_v1 }
  0xc8   : > { %11464 = vmatmul.mubr.bf16.gmra.mrb[72].mxu1 %v14105_v27 }
  0xc9   : > { %11467 = vmatprep.mubr.msk.bf16.mxu1 %vm14490_vm0, %v17674_v1 }
  0xd0   : > { %11468 = vmatmul.mubr.bf16.gmra.mrb[76].mxu1 %v14106_v28  ;;  %v14123_v28 = vld [vmem:[%s14635_s16 + $0x118] sm:$0xff]  }
  0xd1   : > { %11471 = vmatprep.mubr.msk.bf16.mxu1 %vm14490_vm0, %v17674_v1 }
  0xd8   : > { %11472 = vmatmul.mubr.bf16.gmra.mrb[80].mxu1 %v14107_v29 }
  0xd9   : > { %11475 = vmatprep.mubr.msk.bf16.mxu1 %vm14490_vm0, %v17674_v1 }
  0xe0   : > { %11476 = vmatmul.mubr.bf16.gmra.mrb[84].mxu1 %v14108_v30 }
  0xe1   : > { %11479 = vmatprep.mubr.msk.bf16.mxu1 %vm14490_vm0, %v17674_v1 }
  0xe8   : > { %11480 = vmatmul.mubr.bf16.gmra.mrb[88].mxu1 %v14109_v31 }
  0xe9   : > { %11483 = vmatprep.mubr.msk.bf16.mxu1 %vm14490_vm0, %v17674_v1 }
  0xf0   : > { %11484 = vmatmul.mubr.bf16.gmra.mrb[92].mxu1 %v14110_v32 }
  0xf1   : > { %11487 = vmatprep.mubr.msk.bf16.mxu1 %vm14490_vm0, %v17674_v1 }
  0xf8   : > { %11488 = vmatmul.mubr.bf16.gmra.mrb[96].mxu1 %v14111_v33  ;;  %v14124_v33 = vld [vmem:[%s14635_s16 + $0x120] sm:$0xff]  }
  0xf9   : > { %11491 = vmatprep.mubr.msk.bf16.mxu1 %vm14490_vm0, %v17674_v1 }
 0x100   : > { %11492 = vmatmul.mubr.bf16.gmra.mrb[100].mxu1 %v14112_v34 }
 0x101   : > { %11511 = vmatprep.mubr.msk.bf16.mxu1 %vm14490_vm0, %v17674_v1 }
 0x108   : > { %11512 = vmatmul.mubr.bf16.vlgmr.msra.gmra.mrb[104].mxu1 %v14113_v35 }
 0x109   : > { %11515 = vmatprep.mubr.msk.bf16.mxu1 %vm14490_vm0, %v17674_v1  ;;  %11564 = vmatpush3.bf16.msra.mxu1 %v14407_v36 }
 0x10a   : > { %11565 = vmatprep.subr.bf16.mxu1 %v17674_v1 }
 0x10b   : > { %v14791_v37 = vpop.f32.mrb[0].mxu1 }
 0x10c   : > { %v11377_v38 = vpop.f32.mrb[1].mxu1 }
 0x10d   : > { %v14794_v40 = vpop.f32.mrb[2].mxu1  ;;  %11566 = vmatpush3.bf16.msra.mxu1 %v14408_v41 }
 0x10e   : > { %v11378_v42 = vpop.f32.mrb[3].mxu1  ;;  %11567 = vmatprep.subr.bf16.mxu1 %v17674_v1 }
 0x110   : > { %11516 = vmatmul.mubr.bf16.gmra.mrb[108].mxu1 %v14114_v39  ;;  %v14125_v39 = vld [vmem:[%s14635_s16 + $0x128] ss:$0 sps:$4 sm:$0x33]  }
 0x111   : > { %11519 = vmatprep.mubr.msk.bf16.mxu1 %vm14490_vm0, %v17674_v1  ;;  %11568 = vmatpush3.bf16.msra.mxu1 %v14409_v43 }
 0x112   : > { %11569 = vmatprep.subr.bf16.mxu1 %v17674_v1 }
 0x113   : > { %v14806_v44 = vpop.f32.mrb[4].mxu1 }
 0x114   : > { %v11381_v45 = vpop.f32.mrb[5].mxu1 }
 0x115   : > { %v14809_v47 = vpop.f32.mrb[6].mxu1  ;;  %11570 = vmatpush3.bf16.msra.mxu1 %v14410_v48 }
 0x116   : > { %v11382_v49 = vpop.f32.mrb[7].mxu1  ;;  %11571 = vmatprep.subr.bf16.mxu1 %v17674_v1 }
 0x118   : > { %11520 = vmatmul.mubr.bf16.gmra.mrb[112].mxu1 %v14115_v46  ;;  %v14126_v46 = vld [vmem:[%s14635_s16 + $0x12c] sm:$0xff]  }
 0x119   : > { %11523 = vmatprep.mubr.msk.bf16.mxu1 %vm14490_vm0, %v17674_v1  ;;  %11572 = vmatpush3.bf16.msra.mxu1 %v14411_v50 }
 0x11a   : > { %11573 = vmatprep.subr.bf16.mxu1 %v17674_v1 }
 0x11b   : > { %v14821_v51 = vpop.f32.mrb[8].mxu1 }
 0x11c   : > { %v11385_v52 = vpop.f32.mrb[9].mxu1 }
 0x11d   : > { %v14824_v54 = vpop.f32.mrb[10].mxu1  ;;  %11574 = vmatpush3.bf16.msra.mxu1 %v14412_v55 }
 0x11e   : > { %v11386_v56 = vpop.f32.mrb[11].mxu1  ;;  %11575 = vmatprep.subr.bf16.mxu1 %v17674_v1 }
 0x120   : > { %11524 = vmatmul.mubr.bf16.gmra.mrb[116].mxu1 %v14116_v53  ;;  %v14127_v53 = vld [vmem:[%s14635_s16 + $0x134] sm:$0xff]  }
 0x121   : > { %11527 = vmatprep.mubr.msk.bf16.mxu1 %vm14490_vm0, %v17674_v1  ;;  %11576 = vmatpush3.bf16.msra.mxu1 %v14413_v57 }
 0x122   : > { %11577 = vmatprep.subr.bf16.mxu1 %v17674_v1 }
 0x123   : > { %v14836_v58 = vpop.f32.mrb[12].mxu1 }
 0x124   : > { %v11389_v59 = vpop.f32.mrb[13].mxu1 }
 0x125   : > { %v14839_v61 = vpop.f32.mrb[14].mxu1  ;;  %11578 = vmatpush3.bf16.msra.mxu1 %v14414_v62 }
 0x126   : > { %v11390_v63 = vpop.f32.mrb[15].mxu1  ;;  %11631 = vmatprep.subr.bf16.mxu1 %v17674_v1 }
 0x127   : > { %v14128_v63 = vld [vmem:[%s14635_s16 + $0x13c] sm:$0xff]  }
 0x128   : > { %11528 = vmatmul.mubr.bf16.gmra.mrb[120].mxu1 %v14117_v60 }
 0x129   : > { %11531 = vmatprep.mubr.msk.bf16.mxu1 %vm14490_vm0, %v17674_v1 }
 0x12b   : > { %v14847_v0 = vpop.f32.mrb[16].mxu1 }
 0x12c   : > { %v11393_v2 = vpop.f32.mrb[17].mxu1 }
 0x12d   : > { %v14850_v4 = vpop.f32.mrb[18].mxu1 }
 0x12e   : > { %v11394_v5 = vpop.f32.mrb[19].mxu1 }
 0x130   : > { %11532 = vmatmul.mubr.bf16.gmra.mrb[124].mxu1 %v14118_v3 }
 0x131   : > { %11535 = vmatprep.mubr.msk.bf16.mxu1 %vm14490_vm0, %v17674_v1 }
 0x133   : > { %v14854_v6 = vpop.f32.mrb[20].mxu1 }
 0x134   : > { %v11397_v7 = vpop.f32.mrb[21].mxu1 }
 0x135   : > { %v14857_v9 = vpop.f32.mrb[22].mxu1 }
 0x136   : > { %v11398_v10 = vpop.f32.mrb[23].mxu1 }
 0x138   : > { %11536 = vmatmul.mubr.bf16.gmra.mrb[128].mxu1 %v14119_v8 }
 0x139   : > { %11539 = vmatprep.mubr.msk.bf16.mxu1 %vm14490_vm0, %v17674_v1 }
 0x13b   : > { %v14861_v11 = vpop.f32.mrb[24].mxu1 }
 0x13c   : > { %v11401_v12 = vpop.f32.mrb[25].mxu1 }
 0x13d   : > { %v14864_v14 = vpop.f32.mrb[26].mxu1  ;;  %v14129_v12 = vld [vmem:[%s14635_s16 + $0x144] sm:$0xff]  }
 0x13e   : > { %v11402_v15 = vpop.f32.mrb[27].mxu1 }
 0x140   : > { %11540 = vmatmul.mubr.bf16.gmra.mrb[132].mxu1 %v14120_v13 }
 0x141   : > { %11543 = vmatprep.mubr.msk.bf16.mxu1 %vm14490_vm0, %v17674_v1 }
 0x143   : > { %v14868_v16 = vpop.f32.mrb[28].mxu1 }
 0x144   : > { %v11405_v17 = vpop.f32.mrb[29].mxu1 }
 0x145   : > { %v14871_v19 = vpop.f32.mrb[30].mxu1 }
 0x146   : > { %v11406_v20 = vpop.f32.mrb[31].mxu1 }
 0x148   : > { %11544 = vmatmul.mubr.bf16.gmra.mrb[136].mxu1 %v14121_v18  ;;  %v14142_v18 = vld [vmem:[%s17664_s3 + $0x38] sm:$0xff]  }
 0x149   : > { %11547 = vmatprep.mubr.msk.bf16.mxu1 %vm14490_vm0, %v17674_v1 }
 0x14b   : > { %v14875_v21 = vpop.f32.mrb[32].mxu1 }
 0x14c   : > { %v11409_v22 = vpop.f32.mrb[33].mxu1 }
 0x14d   : > { %v14878_v24 = vpop.f32.mrb[34].mxu1 }
 0x14e   : > { %v11410_v25 = vpop.f32.mrb[35].mxu1 }
 0x150   : > { %11548 = vmatmul.mubr.bf16.gmra.mrb[140].mxu1 %v14122_v23  ;;  %v14130_v23 = vld [vmem:[%s14635_s16 + $0x14c] sm:$0xff]  }
 0x151   : > { %11551 = vmatprep.mubr.msk.bf16.mxu1 %vm14490_vm0, %v17674_v1 }
 0x153   : > { %v14882_v26 = vpop.f32.mrb[36].mxu1 }
 0x154   : > { %v11413_v27 = vpop.f32.mrb[37].mxu1 }
 0x155   : > { %v14885_v29 = vpop.f32.mrb[38].mxu1 }
 0x156   : > { %v11414_v30 = vpop.f32.mrb[39].mxu1 }
 0x158   : > { %11552 = vmatmul.mubr.bf16.gmra.mrb[144].mxu1 %v14123_v28 }
 0x159   : > { %11555 = vmatprep.mubr.msk.bf16.mxu1 %vm14490_vm0, %v17674_v1 }
 0x15b   : > { %v14889_v31 = vpop.f32.mrb[40].mxu1 }
 0x15c   : > { %v11417_v32 = vpop.f32.mrb[41].mxu1 }
 0x15d   : > { %v14892_v34 = vpop.f32.mrb[42].mxu1 }
 0x15e   : > { %v11418_v35 = vpop.f32.mrb[43].mxu1 }
 0x15f   : > { %v14131_v35 = vld [vmem:[%s14635_s16 + $0x154] sm:$0xff]  }
 0x160   : > { %11556 = vmatmul.mubr.bf16.gmra.mrb[148].mxu1 %v14124_v33 }
 0x161   : > { %11559 = vmatprep.mubr.msk.bf16.mxu1 %vm14490_vm0, %v17674_v1 }
 0x163   : > { %v14896_v36 = vpop.f32.mrb[44].mxu1 }
 0x164   : > { %v11421_v38 = vpop.f32.mrb[45].mxu1 }
 0x165   : > { %v14899_v41 = vpop.f32.mrb[46].mxu1  ;;  %v14138_v38 = vld [vmem:[%s14635_s16 + $0x18c] ss:$0 sps:$4 sm:$0x33]  }
 0x166   : > { %v11422_v42 = vpop.f32.mrb[47].mxu1 }
 0x168   : > { %11560 = vmatmul.mubr.bf16.gmra.mrb[152].mxu1 %v14125_v39 }
 0x169   : > { %11579 = vmatprep.mubr.msk.bf16.mxu1 %vm14490_vm0, %v17674_v1 }
 0x16b   : > { %v14903_v43 = vpop.f32.mrb[48].mxu1 }
 0x16c   : > { %v11425_v45 = vpop.f32.mrb[49].mxu1 }
 0x16d   : > { %v714_v48 = vpop.f32.mrb[50].mxu1 }
 0x16e   : > { %v11426_v49 = vpop.f32.mrb[51].mxu1 }
 0x16f   : > { %v14132_v49 = vld [vmem:[%s14635_s16 + $0x15c] sm:$0xff]  }
 0x170   : > { %11580 = vmatmul.mubr.bf16.vlgmr.msra.gmra.mrb[156].mxu1 %v14126_v46 }
 0x171   : > { %11583 = vmatprep.mubr.msk.bf16.mxu1 %vm14490_vm0, %v17674_v1 }
 0x173   : > { %v14908_v50 = vpop.f32.mrb[52].mxu1 }
 0x174   : > { %v11445_v52 = vpop.f32.mrb[53].mxu1  ;;  %v955_v55 = vmax.f32 %v14791_v37, %v14908_v50 }
 0x175   : > { %v14913_v56 = vpop.f32.mrb[54].mxu1 }
 0x176   : > { %v11446_v57 = vpop.f32.mrb[55].mxu1  ;;  %v956_v59 = vmax.f32 %v14794_v40, %v14913_v56 }
 0x178   : > { %11584 = vmatmul.mubr.bf16.gmra.mrb[160].mxu1 %v14127_v53 }
 0x179   : > { %11587 = vmatprep.mubr.msk.bf16.mxu1 %vm14490_vm0, %v17674_v1 }
 0x17b   : > { %v14919_v60 = vpop.f32.mrb[56].mxu1 }
 0x17c   : > { %v11449_v62 = vpop.f32.mrb[57].mxu1  ;;  %v957_v2 = vmax.f32 %v14806_v44, %v14919_v60 }
 0x17d   : > { %v14924_v3 = vpop.f32.mrb[58].mxu1 }
 0x17e   : > { %v11450_v5 = vpop.f32.mrb[59].mxu1  ;;  %v958_v7 = vmax.f32 %v14809_v47, %v14924_v3 }
 0x180   : > { %11588 = vmatmul.mubr.bf16.gmra.mrb[164].mxu1 %v14128_v63 }
 0x181   : > { %11591 = vmatprep.mubr.msk.bf16.mxu1 %vm14490_vm0, %v17674_v1 }
 0x183   : > { %v14930_v8 = vpop.f32.mrb[60].mxu1 }
 0x184   : > { %v11453_v10 = vpop.f32.mrb[61].mxu1  ;;  %v17686_v40 = vmax.f32 %v14821_v51, %v14930_v8 }
 0x185   : > { %v14935_v15 = vpop.f32.mrb[62].mxu1  ;;  %v14133_v10 = vld [vmem:[%s14635_s16 + $0x164] sm:$0xff]  }
 0x186   : > { %v11454_v17 = vpop.f32.mrb[63].mxu1  ;;  %v17687_v44 = vmax.f32 %v14824_v54, %v14935_v15 }
 0x188   : > { %11592 = vmatmul.mubr.bf16.gmra.mrb[168].mxu1 %v14129_v12  ;;  %v14136_v12 = vld [vmem:[%s14635_s16 + $0x17c] sm:$0xff]  }
 0x189   : > { %11595 = vmatprep.mubr.msk.bf16.mxu1 %vm14490_vm0, %v17674_v1 }
 0x18b   : > { %v14941_v20 = vpop.f32.mrb[64].mxu1 }
 0x18c   : > { %v11457_v22 = vpop.f32.mrb[65].mxu1  ;;  %v17688_v47 = vmax.f32 %v14836_v58, %v14941_v20 }
 0x18d   : > { %v14946_v27 = vpop.f32.mrb[66].mxu1 }
 0x18e   : > { %v11458_v28 = vpop.f32.mrb[67].mxu1  ;;  %v17689_v51 = vmax.f32 %v14839_v61, %v14946_v27 }
 0x190   : > { %11596 = vmatmul.mubr.bf16.gmra.mrb[172].mxu1 %v14130_v23 }
 0x191   : > { %11599 = vmatprep.mubr.msk.bf16.mxu1 %vm14490_vm0, %v17674_v1 }
 0x193   : > { %v14952_v32 = vpop.f32.mrb[68].mxu1 }
 0x194   : > { %v11461_v33 = vpop.f32.mrb[69].mxu1  ;;  %v17690_v54 = vmax.f32 %v14847_v0, %v14952_v32 }
 0x195   : > { %v14957_v39 = vpop.f32.mrb[70].mxu1 }
 0x196   : > { %v11462_v42 = vpop.f32.mrb[71].mxu1  ;;  %v17691_v58 = vmax.f32 %v14850_v4, %v14957_v39 }
 0x198   : > { %11600 = vmatmul.mubr.bf16.gmra.mrb[176].mxu1 %v14131_v35  ;;  %v14134_v35 = vld [vmem:[%s14635_s16 + $0x16c] sm:$0xff]  }
 0x199   : > { %11603 = vmatprep.mubr.msk.bf16.mxu1 %vm14490_vm0, %v17674_v1 }
 0x19b   : > { %v14963_v46 = vpop.f32.mrb[72].mxu1 }
 0x19c   : > { %v11465_v48 = vpop.f32.mrb[73].mxu1  ;;  %v17692_v61 = vmax.f32 %v14854_v6, %v14963_v46 }
 0x19d   : > { %v14968_v53 = vpop.f32.mrb[74].mxu1 }
 0x19e   : > { %v11466_v57 = vpop.f32.mrb[75].mxu1  ;;  %v17693_v0 = vmax.f32 %v14857_v9, %v14968_v53 }
 0x1a0   : > { %11604 = vmatmul.mubr.bf16.gmra.mrb[180].mxu1 %v14132_v49 }
 0x1a1   : > { %11607 = vmatprep.mubr.msk.bf16.mxu1 %vm14490_vm0, %v17674_v1 }
 0x1a3   : > { %v14974_v63 = vpop.f32.mrb[76].mxu1 }
 0x1a4   : > { %v11469_v5 = vpop.f32.mrb[77].mxu1  ;;  %v17694_v4 = vmax.f32 %v14861_v11, %v14974_v63 }
 0x1a5   : > { %v14979_v17 = vpop.f32.mrb[78].mxu1 }
 0x1a6   : > { %v11470_v22 = vpop.f32.mrb[79].mxu1  ;;  %v17695_v6 = vmax.f32 %v14864_v14, %v14979_v17 }
 0x1a7   : > { %v14135_v22 = vld [vmem:[%s14635_s16 + $0x174] sm:$0xff]  }
 0x1a8   : > { %11608 = vmatmul.mubr.bf16.gmra.mrb[184].mxu1 %v14133_v10 }
 0x1a9   : > { %11611 = vmatprep.mubr.msk.bf16.mxu1 %vm14490_vm0, %v17674_v1 }
 0x1ab   : > { %v14985_v28 = vpop.f32.mrb[80].mxu1 }
 0x1ac   : > { %v11473_v33 = vpop.f32.mrb[81].mxu1  ;;  %v17696_v9 = vmax.f32 %v14868_v16, %v14985_v28 }
 0x1ad   : > { %v14990_v48 = vpop.f32.mrb[82].mxu1 }
 0x1ae   : > { %v11474_v49 = vpop.f32.mrb[83].mxu1  ;;  %v17697_v11 = vmax.f32 %v14871_v19, %v14990_v48 }
 0x1af   : > { %v14137_v49 = vld [vmem:[%s14635_s16 + $0x184] sm:$0xff]  }
 0x1b0   : > { %11612 = vmatmul.mubr.bf16.gmra.mrb[188].mxu1 %v14134_v35 }
 0x1b1   : > { %11615 = vmatprep.mubr.msk.bf16.mxu1 %vm14490_vm0, %v17674_v1 }
 0x1b3   : > { %v14996_v5 = vpop.f32.mrb[84].mxu1 }
 0x1b4   : > { %v11477_v10 = vpop.f32.mrb[85].mxu1  ;;  %v17698_v14 = vmax.f32 %v14875_v21, %v14996_v5 }
 0x1b5   : > { %v15001_v23 = vpop.f32.mrb[86].mxu1 }
 0x1b6   : > { %v11478_v42 = vpop.f32.mrb[87].mxu1  ;;  %v17699_v16 = vmax.f32 %v14878_v24, %v15001_v23 }
 0x1b8   : > { %11616 = vmatmul.mubr.bf16.gmra.mrb[192].mxu1 %v14135_v22 }
 0x1b9   : > { %11619 = vmatprep.mubr.msk.bf16.mxu1 %vm14490_vm0, %v17674_v1 }
 0x1bb   : > { %v15007_v35 = vpop.f32.mrb[88].mxu1 }
 0x1bc   : > { %v11481_v57 = vpop.f32.mrb[89].mxu1  ;;  %v17700_v19 = vmax.f32 %v14882_v26, %v15007_v35 }
 0x1bd   : > { %v15012_v62 = vpop.f32.mrb[90].mxu1 }
 0x1be   : > { %v11482_v33 = vpop.f32.mrb[91].mxu1  ;;  %v17701_v21 = vmax.f32 %v14885_v29, %v15012_v62 }
 0x1c0   : > { %11620 = vmatmul.mubr.bf16.gmra.mrb[196].mxu1 %v14136_v12 }
 0x1c1   : > { %11623 = vmatprep.mubr.msk.bf16.mxu1 %vm14490_vm0, %v17674_v1 }
 0x1c3   : > { %v15020_v57 = vpop.f32.mrb[92].mxu1 }
 0x1c4   : > { %v11485_v22 = vpop.f32.mrb[93].mxu1  ;;  %v17702_v24 = vmax.f32 %v14889_v31, %v15020_v57 }
 0x1c5   : > { %v15025_v33 = vpop.f32.mrb[94].mxu1  ;;  %v14140_v22 = vld [vmem:[%s17664_s3 + $0x30] sm:$0xff]  }
 0x1c6   : > { %v11486_v52 = vpop.f32.mrb[95].mxu1  ;;  %11752 = vmatpush3.bf16.msra.mxu0 %v14140_v22  ;;  %v17703_v26 = vmax.f32 %v14892_v34, %v15025_v33 }
 0x1c7   : > { %11753 = vmatprep.subr.bf16.mxu0 %v17674_v1  ;;  %v14141_v52 = vld [vmem:[%s17664_s3 + $0x18] sm:$0xff]  }
 0x1c8   : > { %11624 = vmatmul.mubr.bf16.gmra.mrb[200].mxu1 %v14137_v49 }
 0x1c9   : > { %11627 = vmatprep.mubr.msk.bf16.mxu1 %vm14490_vm0, %v17674_v1 }
 0x1ca   : > { %11754 = vmatpush3.bf16.msra.mxu0 %v14142_v18 }
 0x1cb   : > { %v15031_v12 = vpop.f32.mrb[96].mxu1  ;;  %11791 = vmatprep.subr.bf16.mxu0 %v17674_v1 }
 0x1cc   : > { %v11489_v45 = vpop.f32.mrb[97].mxu1  ;;  %v17704_v29 = vmax.f32 %v14896_v36, %v15031_v12  ;;  %v15190_v12 = vld [vmem:[%s17663_s2] ss:$0 sm:$0xff] }
 0x1cd   : > { %v15036_v30 = vpop.f32.mrb[98].mxu1  ;;  %v14139_v45 = vld [vmem:[%s17664_s3 + $0x10] sm:$0xff]  }
 0x1ce   : > { %v11490_v10 = vpop.f32.mrb[99].mxu1  ;;  %11632 = vmatpush3.bf16.msra.mxu1 %v14139_v45  ;;  %v17705_v31 = vmax.f32 %v14899_v41, %v15036_v30 }
 0x1cf   : > { %11633 = vmatprep.subr.bf16.mxu1 %v17674_v1 }
 0x1d0   : > { %11628 = vmatmul.mubr.bf16.gmra.mrb[204].mxu1 %v14138_v38 }
 0x1d1   : > { %11635 = vmatprep.mubr.msk.bf16.mxu1 %vm14490_vm0, %v17674_v1 }
 0x1d2   : > { %11634 = vmatpush3.bf16.msra.mxu1 %v14141_v52 }
 0x1d3   : > { %v15042_v49 = vpop.f32.mrb[100].mxu1  ;;  %11671 = vmatprep.subr.bf16.mxu1 %v17674_v1 }
 0x1d4   : > { %v11493_v42 = vpop.f32.mrb[101].mxu1  ;;  %v17706_v34 = vmax.f32 %v14903_v43, %v15042_v49 }
 0x1d5   : > { %v952_v25 = vpop.f32.mrb[102].mxu1 }
 0x1d6   : > { %v11494_v38 = vpop.f32.mrb[103].mxu1 }
 0x1db   : > { %v1116_v25 = vpop.f32.mrb[104].mxu1 }
 0x1dc   : > { %v15065_v42 = vmax.f32 %v955_v55, %v1116_v25  ;;  %v11513_v22 = vpop.f32.mrb[105].mxu1 }
 0x1dd   : > { %v1119_v45 = vpop.f32.mrb[106].mxu1 }
 0x1de   : > { %v15070_v38 = vmax.f32 %v956_v59, %v1119_v45  ;;  %v11514_v10 = vpop.f32.mrb[107].mxu1 }
 0x1e3   : > { %v1124_v52 = vpop.f32.mrb[108].mxu1 }
 0x1e4   : > { %v15075_v18 = vmax.f32 %v957_v2, %v1124_v52  ;;  %v11517_v1 = vpop.f32.mrb[109].mxu1 }
 0x1e5   : > { %v1127_v13 = vpop.f32.mrb[110].mxu1 }
 0x1e6   : > { %v15080_v37 = vmax.f32 %v958_v7, %v1127_v13  ;;  %v11518_v50 = vpop.f32.mrb[111].mxu1 }
 0x1eb   : > { %v1132_v55 = vpop.f32.mrb[112].mxu1 }
 0x1ec   : > { %v15085_v56 = vmax.f32 %v17686_v40, %v1132_v55  ;;  %v11521_v59 = vpop.f32.mrb[113].mxu1 }
 0x1ed   : > { %v1135_v10 = vpop.f32.mrb[114].mxu1 }
 0x1ee   : > { %v15090_v60 = vmax.f32 %v17687_v44, %v1135_v10  ;;  %v11522_v1 = vpop.f32.mrb[115].mxu1 }
 0x1f3   : > { %v1140_v2 = vpop.f32.mrb[116].mxu1 }
 0x1f4   : > { %v15095_v3 = vmax.f32 %v17688_v47, %v1140_v2  ;;  %v11525_v7 = vpop.f32.mrb[117].mxu1 }
 0x1f5   : > { %v1143_v13 = vpop.f32.mrb[118].mxu1 }
 0x1f6   : > { %v15100_v8 = vmax.f32 %v17689_v51, %v1143_v13  ;;  %v11526_v25 = vpop.f32.mrb[119].mxu1 }
 0x1fb   : > { %v1148_v22 = vpop.f32.mrb[120].mxu1 }
 0x1fc   : > { %v15105_v15 = vmax.f32 %v17690_v54, %v1148_v22  ;;  %v11529_v45 = vpop.f32.mrb[121].mxu1 }
 0x1fd   : > { %v1151_v52 = vpop.f32.mrb[122].mxu1 }
 0x1fe   : > { %v15110_v20 = vmax.f32 %v17691_v58, %v1151_v52  ;;  %v11530_v50 = vpop.f32.mrb[123].mxu1 }
 0x203   : > { %v1156_v55 = vpop.f32.mrb[124].mxu1 }
 0x204   : > { %v15115_v27 = vmax.f32 %v17692_v61, %v1156_v55  ;;  %v11533_v40 = vpop.f32.mrb[125].mxu1 }
 0x205   : > { %v1159_v59 = vpop.f32.mrb[126].mxu1 }
 0x206   : > { %v15120_v32 = vmax.f32 %v17693_v0, %v1159_v59  ;;  %v11534_v10 = vpop.f32.mrb[127].mxu1 }
 0x20b   : > { %v1164_v44 = vpop.f32.mrb[128].mxu1 }
 0x20c   : > { %v15125_v39 = vmax.f32 %v17694_v4, %v1164_v44  ;;  %v11537_v1 = vpop.f32.mrb[129].mxu1 }
 0x20d   : > { %v1167_v2 = vpop.f32.mrb[130].mxu1 }
 0x20e   : > { %v15130_v46 = vmax.f32 %v17695_v6, %v1167_v2  ;;  %v11538_v47 = vpop.f32.mrb[131].mxu1 }
 0x213   : > { %v1172_v7 = vpop.f32.mrb[132].mxu1 }
 0x214   : > { %v15135_v53 = vmax.f32 %v17696_v9, %v1172_v7  ;;  %v11541_v13 = vpop.f32.mrb[133].mxu1 }
 0x215   : > { %v1175_v51 = vpop.f32.mrb[134].mxu1 }
 0x216   : > { %v15140_v63 = vmax.f32 %v17697_v11, %v1175_v51  ;;  %v11542_v25 = vpop.f32.mrb[135].mxu1 }
 0x21b   : > { %v1180_v22 = vpop.f32.mrb[136].mxu1 }
 0x21c   : > { %v15145_v17 = vmax.f32 %v17698_v14, %v1180_v22  ;;  %v11545_v54 = vpop.f32.mrb[137].mxu1 }
 0x21d   : > { %v1183_v45 = vpop.f32.mrb[138].mxu1 }
 0x21e   : > { %v15150_v28 = vmax.f32 %v17699_v16, %v1183_v45  ;;  %v11546_v52 = vpop.f32.mrb[139].mxu1 }
 0x223   : > { %v1188_v58 = vpop.f32.mrb[140].mxu1 }
 0x224   : > { %v15155_v48 = vmax.f32 %v17700_v19, %v1188_v58  ;;  %v11549_v50 = vpop.f32.mrb[141].mxu1 }
 0x225   : > { %v1191_v55 = vpop.f32.mrb[142].mxu1 }
 0x226   : > { %v15160_v5 = vmax.f32 %v17701_v21, %v1191_v55  ;;  %v11550_v61 = vpop.f32.mrb[143].mxu1 }
 0x22b   : > { %v1196_v40 = vpop.f32.mrb[144].mxu1 }
 0x22c   : > { %v15165_v23 = vmax.f32 %v17702_v24, %v1196_v40  ;;  %v11553_v59 = vpop.f32.mrb[145].mxu1 }
 0x22d   : > { %v1199_v0 = vpop.f32.mrb[146].mxu1 }
 0x22e   : > { %v15170_v35 = vmax.f32 %v17703_v26, %v1199_v0  ;;  %v11554_v10 = vpop.f32.mrb[147].mxu1 }
 0x233   : > { %v1204_v44 = vpop.f32.mrb[148].mxu1 }
 0x234   : > { %v15175_v62 = vmax.f32 %v17704_v29, %v1204_v44  ;;  %v11557_v4 = vpop.f32.mrb[149].mxu1 }
 0x235   : > { %v1207_v1 = vpop.f32.mrb[150].mxu1 }
 0x236   : > { %v15180_v57 = vmax.f32 %v17705_v31, %v1207_v1  ;;  %v11558_v2 = vpop.f32.mrb[151].mxu1 }
 0x23b   : > { %v1212_v6 = vpop.f32.mrb[152].mxu1 }
 0x23c   : > { %v15185_v33 = vmax.f32 %v17706_v34, %v1212_v6  ;;  %v11561_v47 = vpop.f32.mrb[153].mxu1 }
 0x23d   : > { %v1215_v7 = vpop.f32.mrb[154].mxu1 }
 0x23e   : > { %v11562_v9 = vpop.f32.mrb[155].mxu1  ;;  %v17707_v7 = vmov 0.0  }
 0x243   : > { %v1379_v36 = vpop.f32.mrb[156].mxu1 }
 0x244   : > { %v1481_v41 = vmax.f32 %v15065_v42, %v1379_v36  ;;  %v11581_v30 = vpop.f32.mrb[157].mxu1 }
 0x245   : > { %v1382_v13 = vpop.f32.mrb[158].mxu1  ;;  %v14146_v30 = vld [vmem:[%s17664_s3 + $0x8] sm:$0xff]  }
 0x246   : > { %v1513_v51 = vadd.f32 %v15190_v12, %v1481_v41  ;;  %v1482_v11 = vmax.f32 %v15070_v38, %v1382_v13  ;;  %v11582_v43 = vpop.f32.mrb[159].mxu1 }
 0x248   : > { %v1538_v49 = vmax.f32 %v1513_v51, 0.0  ;;  %v1514_v25 = vadd.f32 %v15190_v12, %v1482_v11 }
 0x24a   : > { %1563 = vst.msk [vmem:[#allocation2] sm:$0xff] %vm412_vm1, %v1538_v49  ;;  %v1539_v22 = vmax.f32 %v1514_v25, 0.0 }
 0x24b   : > { %v1387_v14 = vpop.f32.mrb[160].mxu1 }
 0x24c   : > { %1564 = vst.msk [vmem:[#allocation2 + $0x8] sm:$0xff] %vm412_vm1, %v1539_v22  ;;  %v1483_v54 = vmax.f32 %v15075_v18, %v1387_v14  ;;  %v11585_v45 = vpop.f32.mrb[161].mxu1 }
 0x24d   : > { %v1390_v42 = vpop.f32.mrb[162].mxu1 }
 0x24e   : > { %v1515_v16 = vadd.f32 %v15190_v12, %v1483_v54  ;;  %v1484_v52 = vmax.f32 %v15080_v37, %v1390_v42  ;;  %v11586_v58 = vpop.f32.mrb[163].mxu1 }
 0x250   : > { %v1540_v38 = vmax.f32 %v1515_v16, 0.0  ;;  %v1516_v19 = vadd.f32 %v15190_v12, %v1484_v52 }
 0x252   : > { %1565 = vst.msk [vmem:[#allocation2 + $0x10] sm:$0xff] %vm412_vm1, %v1540_v38  ;;  %v1541_v50 = vmax.f32 %v1516_v19, 0.0  ;;  %v14153_v38 = vld [vmem:[%s17664_s3 + $0x70] sm:$0xff]  }
 0x253   : > { %v1395_v55 = vpop.f32.mrb[164].mxu1  ;;  %v1619_v26 = vld [vmem:[#allocation2 + $0x1] sm:$0xff] }
 0x254   : > { %1566 = vst.msk [vmem:[#allocation2 + $0x18] sm:$0xff] %vm412_vm1, %v1541_v50  ;;  %v1485_v21 = vmax.f32 %v15085_v56, %v1395_v55  ;;  %v11589_v61 = vpop.f32.mrb[165].mxu1  ;;  %v2133_v44 = vld [vmem:[#allocation2 + $0x3] sm:$0xff] }
 0x255   : > { %v1398_v18 = vpop.f32.mrb[166].mxu1  ;;  %v14143_v56 = vld [vmem:[%s17664_s3 + $0x40] sm:$0xff]  }
 0x256   : > { %v1517_v40 = vadd.f32 %v15190_v12, %v1485_v21  ;;  %v1486_v24 = vmax.f32 %v15090_v60, %v1398_v18  ;;  %v11590_v59 = vpop.f32.mrb[167].mxu1  ;;  %v14145_v60 = vld [vmem:[%s17664_s3] sm:$0xff]  }
 0x258   : > { %v1542_v37 = vmax.f32 %v1517_v40, 0.0  ;;  %v1518_v0 = vadd.f32 %v15190_v12, %v1486_v24 }
 0x259   : > { %v1620_v10 = vld [vmem:[#allocation2 + $0x9] sm:$0xff] }
 0x25a   : > { %v2134_v29 = vld [vmem:[#allocation2 + $0xb] sm:$0xff]  ;;  %1567 = vst.msk [vmem:[#allocation2 + $0x20] sm:$0xff] %vm412_vm1, %v1542_v37  ;;  %v1543_v4 = vmax.f32 %v1518_v0, 0.0  ;;  %v1637_v1 = vpack.c.bf16 %v1620_v10, %v1619_v26 }
 0x25b   : > { %v2151_v31 = vpack.c.bf16 %v2134_v29, %v2133_v44  ;;  %v1403_v2 = vpop.f32.mrb[168].mxu1  ;;  %v1621_v11 = vld [vmem:[#allocation2 + $0x11] sm:$0xff] }
 0x25c   : > { %1568 = vst.msk [vmem:[#allocation2 + $0x28] sm:$0xff] %vm412_vm1, %v1543_v4  ;;  %v1487_v6 = vmax.f32 %v15095_v3, %v1403_v2  ;;  %v11593_v34 = vpop.f32.mrb[169].mxu1  ;;  %11636 = vmatmul.mubr.msk.bf16.vlgmr.msra.gmra.mrb[208].mxu1 %vm412_vm1, %v1637_v1  ;;  %v14144_v3 = vld [vmem:[%s17664_s3 + $0x48] sm:$0xff]   ;;  %v2135_v43 = vld [vmem:[#allocation2 + $0x13] sm:$0xff] }
 0x25d   : > { %11756 = vmatmul.mubr.msk.bf16.vlgmr.msra.gmra.mrb[0].mxu0 %vm412_vm1, %v2151_v31  ;;  %v1406_v47 = vpop.f32.mrb[170].mxu1  ;;  %11639 = vmatprep.mubr.msk.bf16.mxu1 %vm14490_vm0, %v17707_v7 }
 0x25e   : > { %11759 = vmatprep.mubr.msk.bf16.mxu0 %vm14490_vm0, %v17707_v7  ;;  %v1519_v9 = vadd.f32 %v15190_v12, %v1487_v6  ;;  %v1488_v36 = vmax.f32 %v15100_v8, %v1406_v47  ;;  %v11594_v41 = vpop.f32.mrb[171].mxu1  ;;  %11792 = vmatpush3.bf16.msra.mxu0 %v14143_v56 }
 0x25f   : > { %11672 = vmatpush3.bf16.msra.mxu1 %v14145_v60  ;;  %11793 = vmatprep.subr.bf16.mxu0 %v17707_v7 }
 0x260   : > { %11673 = vmatprep.subr.bf16.mxu1 %v17707_v7  ;;  %v1544_v13 = vmax.f32 %v1519_v9, 0.0  ;;  %v1520_v51 = vadd.f32 %v15190_v12, %v1488_v36 }
 0x261   : > { %v1622_v8 = vld [vmem:[#allocation2 + $0x19] sm:$0xff] }
 0x262   : > { %v2136_v49 = vld [vmem:[#allocation2 + $0x1b] sm:$0xff]  ;;  %1569 = vst.msk [vmem:[#allocation2 + $0x30] sm:$0xff] %vm412_vm1, %v1544_v13  ;;  %v1545_v25 = vmax.f32 %v1520_v51, 0.0  ;;  %v1638_v22 = vpack.c.bf16 %v1622_v8, %v1621_v11  ;;  %11794 = vmatpush3.bf16.msra.mxu0 %v14144_v3 }
 0x263   : > { %v2152_v14 = vpack.c.bf16 %v2136_v49, %v2135_v43  ;;  %11674 = vmatpush3.bf16.msra.mxu1 %v14146_v30  ;;  %v1411_v54 = vpop.f32.mrb[172].mxu1  ;;  %11831 = vmatprep.subr.bf16.mxu0 %v17707_v7  ;;  %v15241_v16 = vld [vmem:[#allocation2 + $0x1c] sm:$0xff]  ;;  %v15243_v52 = vld [vmem:[#allocation2 + $0x24] sm:$0xff] }
 0x264   : > { %11711 = vmatprep.subr.bf16.mxu1 %v17707_v7  ;;  %1570 = vst.msk [vmem:[#allocation2 + $0x38] sm:$0xff] %vm412_vm1, %v1545_v25  ;;  %v1489_v45 = vmax.f32 %v15105_v15, %v1411_v54  ;;  %v11597_v42 = vpop.f32.mrb[173].mxu1  ;;  %11640 = vmatmul.mubr.msk.bf16.gmra.mrb[212].mxu1 %vm412_vm1, %v1638_v22  ;;  %v1623_v61 = vld [vmem:[#allocation2 + $0x21] sm:$0xff] }
 0x265   : > { %11760 = vmatmul.mubr.msk.bf16.gmra.mrb[4].mxu0 %vm412_vm1, %v2152_v14  ;;  %v1414_v58 = vpop.f32.mrb[174].mxu1  ;;  %11643 = vmatprep.mubr.msk.bf16.mxu1 %vm14490_vm0, %v17707_v7  ;;  %v2137_v40 = vld [vmem:[#allocation2 + $0x23] sm:$0xff] }
 0x266   : > { %11763 = vmatprep.mubr.msk.bf16.mxu0 %vm14490_vm0, %v17707_v7  ;;  %v1521_v15 = vadd.f32 %v15190_v12, %v1489_v45  ;;  %v1490_v19 = vmax.f32 %v15110_v20, %v1414_v58  ;;  %v11598_v50 = vpop.f32.mrb[175].mxu1 }
 0x268   : > { %v1546_v55 = vmax.f32 %v1521_v15, 0.0  ;;  %v1522_v21 = vadd.f32 %v15190_v12, %v1490_v19 }
 0x269   : > { %v1624_v18 = vld [vmem:[#allocation2 + $0x29] sm:$0xff] }
 0x26a   : > { %v2138_v24 = vld [vmem:[#allocation2 + $0x2b] sm:$0xff]  ;;  %1571 = vst.msk [vmem:[#allocation2 + $0x40] sm:$0xff] %vm412_vm1, %v1546_v55  ;;  %v1547_v59 = vmax.f32 %v1522_v21, 0.0  ;;  %v15255_v37 = vpack.c.bf16 %v1624_v18, %v1623_v61 }
 0x26b   : > { %v2153_v0 = vpack.c.bf16 %v2138_v24, %v2137_v40  ;;  %v1419_v26 = vpop.f32.mrb[176].mxu1  ;;  %v15262_v44 = vld [vmem:[#allocation2 + $0x2c] sm:$0xff]  ;;  %v15264_v29 = vld [vmem:[#allocation2 + $0x34] sm:$0xff] }
 0x26c   : > { %1572 = vst.msk [vmem:[#allocation2 + $0x48] sm:$0xff] %vm412_vm1, %v1547_v59  ;;  %v1491_v10 = vmax.f32 %v15115_v27, %v1419_v26  ;;  %v11601_v20 = vpop.f32.mrb[177].mxu1  ;;  %11644 = vmatmul.mubr.msk.bf16.gmra.mrb[216].mxu1 %vm412_vm1, %v15255_v37  ;;  %v1625_v6 = vld [vmem:[#allocation2 + $0x31] sm:$0xff] }
 0x26d   : > { %11764 = vmatmul.mubr.msk.bf16.gmra.mrb[8].mxu0 %vm412_vm1, %v2153_v0  ;;  %v1422_v4 = vpop.f32.mrb[178].mxu1  ;;  %11647 = vmatprep.mubr.msk.bf16.mxu1 %vm14490_vm0, %v17707_v7  ;;  %v2139_v47 = vld [vmem:[#allocation2 + $0x33] sm:$0xff] }
 0x26e   : > { %11767 = vmatprep.mubr.msk.bf16.mxu0 %vm14490_vm0, %v17707_v7  ;;  %v1523_v1 = vadd.f32 %v15190_v12, %v1491_v10  ;;  %v1492_v31 = vmax.f32 %v15120_v32, %v1422_v4  ;;  %v11602_v56 = vpop.f32.mrb[179].mxu1  ;;  %v15295_v22 = vld [vmem:[#allocation2 + $0x38] sm:$0xff] }
 0x270   : > { %v1548_v60 = vmax.f32 %v1523_v1, 0.0  ;;  %v1524_v2 = vadd.f32 %v15190_v12, %v1492_v31 }
 0x271   : > { %v1626_v34 = vld [vmem:[#allocation2 + $0x39] sm:$0xff] }
 0x272   : > { %v2140_v9 = vld [vmem:[#allocation2 + $0x3b] sm:$0xff]  ;;  %1573 = vst.msk [vmem:[#allocation2 + $0x50] sm:$0xff] %vm412_vm1, %v1548_v60  ;;  %v1549_v36 = vmax.f32 %v1524_v2, 0.0  ;;  %v15276_v41 = vpack.c.bf16 %v1626_v34, %v1625_v6 }
 0x273   : > { %v2154_v3 = vpack.c.bf16 %v2140_v9, %v2139_v47  ;;  %v1427_v30 = vpop.f32.mrb[180].mxu1  ;;  %v15283_v51 = vld [vmem:[#allocation2 + $0x3c] sm:$0xff]  ;;  %v15285_v11 = vld [vmem:[#allocation2 + $0x44] sm:$0xff] }
 0x274   : > { %1574 = vst.msk [vmem:[#allocation2 + $0x58] sm:$0xff] %vm412_vm1, %v1549_v36  ;;  %v1493_v13 = vmax.f32 %v15125_v39, %v1427_v30  ;;  %v11605_v32 = vpop.f32.mrb[181].mxu1  ;;  %11648 = vmatmul.mubr.msk.bf16.gmra.mrb[220].mxu1 %vm412_vm1, %v15276_v41  ;;  %v15297_v14 = vld [vmem:[#allocation2 + $0x40] sm:$0xff]  ;;  %v15322_v4 = vld [vmem:[#allocation2 + $0x48] sm:$0xff] }
 0x275   : > { %11768 = vmatmul.mubr.msk.bf16.gmra.mrb[12].mxu0 %vm412_vm1, %v2154_v3  ;;  %v1430_v8 = vpop.f32.mrb[182].mxu1  ;;  %11651 = vmatprep.mubr.msk.bf16.mxu1 %vm14490_vm0, %v17707_v7  ;;  %v1627_v58 = vld [vmem:[#allocation2 + $0x41] sm:$0xff] }
 0x276   : > { %11771 = vmatprep.mubr.msk.bf16.mxu0 %vm14490_vm0, %v17707_v7  ;;  %v1525_v43 = vadd.f32 %v15190_v12, %v1493_v13  ;;  %v1494_v49 = vmax.f32 %v15130_v46, %v1430_v8  ;;  %v11606_v25 = vpop.f32.mrb[183].mxu1  ;;  %v2141_v19 = vld [vmem:[#allocation2 + $0x43] sm:$0xff] }
 0x278   : > { %v1550_v45 = vmax.f32 %v1525_v43, 0.0  ;;  %v1526_v42 = vadd.f32 %v15190_v12, %v1494_v49 }
 0x279   : > { %v1628_v15 = vld [vmem:[#allocation2 + $0x49] sm:$0xff] }
 0x27a   : > { %v2142_v50 = vld [vmem:[#allocation2 + $0x4b] sm:$0xff]  ;;  %1575 = vst.msk [vmem:[#allocation2 + $0x60] sm:$0xff] %vm412_vm1, %v1550_v45  ;;  %v1551_v55 = vmax.f32 %v1526_v42, 0.0  ;;  %v15303_v21 = vpack.c.bf16 %v1628_v15, %v1627_v58 }
 0x27b   : > { %v2155_v46 = vpack.c.bf16 %v2142_v50, %v2141_v19  ;;  %v1435_v61 = vpop.f32.mrb[184].mxu1  ;;  %v15310_v24 = vld [vmem:[#allocation2 + $0x4c] sm:$0xff]  ;;  %v15312_v59 = vld [vmem:[#allocation2 + $0x54] sm:$0xff] }
 0x27c   : > { %1576 = vst.msk [vmem:[#allocation2 + $0x68] sm:$0xff] %vm412_vm1, %v1551_v55  ;;  %v1495_v18 = vmax.f32 %v15135_v53, %v1435_v61  ;;  %v11609_v40 = vpop.f32.mrb[185].mxu1  ;;  %11652 = vmatmul.mubr.msk.bf16.gmra.mrb[224].mxu1 %vm412_vm1, %v15303_v21  ;;  %v15324_v1 = vld [vmem:[#allocation2 + $0x50] sm:$0xff]  ;;  %v15349_v42 = vld [vmem:[#allocation2 + $0x58] sm:$0xff] }
 0x27d   : > { %11772 = vmatmul.mubr.msk.bf16.gmra.mrb[16].mxu0 %vm412_vm1, %v2155_v46  ;;  %v1438_v0 = vpop.f32.mrb[186].mxu1  ;;  %11655 = vmatprep.mubr.msk.bf16.mxu1 %vm14490_vm0, %v17707_v7  ;;  %v1629_v2 = vld [vmem:[#allocation2 + $0x51] sm:$0xff]  ;;  %17708 = vst [vmem:[#allocation8_spill] sm:$0xff] %v15349_v42 }
 0x27e   : > { %11775 = vmatprep.mubr.msk.bf16.mxu0 %vm14490_vm0, %v17707_v7  ;;  %v1527_v26 = vadd.f32 %v15190_v12, %v1495_v18  ;;  %v1496_v10 = vmax.f32 %v15140_v63, %v1438_v0  ;;  %v11610_v20 = vpop.f32.mrb[187].mxu1  ;;  %v2143_v34 = vld [vmem:[#allocation2 + $0x53] sm:$0xff] }
 0x27f   : > { %v2529_v15 = vld [vmem:[#allocation2 + $0x4e] sm:$0xff] }
 0x280   : > { %v1552_v56 = vmax.f32 %v1527_v26, 0.0  ;;  %v1528_v60 = vadd.f32 %v15190_v12, %v1496_v10  ;;  %v1949_v31 = vld [vmem:[#allocation2 + $0x52] sm:$0xff] }
 0x281   : > { %v1630_v6 = vld [vmem:[#allocation2 + $0x59] sm:$0xff] }
 0x282   : > { %v2144_v47 = vld [vmem:[#allocation2 + $0x5b] sm:$0xff]  ;;  %1577 = vst.msk [vmem:[#allocation2 + $0x70] sm:$0xff] %vm412_vm1, %v1552_v56  ;;  %v1553_v9 = vmax.f32 %v1528_v60, 0.0  ;;  %v15330_v36 = vpack.c.bf16 %v1630_v6, %v1629_v2 }
 0x283   : > { %v2156_v63 = vpack.c.bf16 %v2144_v47, %v2143_v34  ;;  %v1443_v3 = vpop.f32.mrb[188].mxu1  ;;  %v15337_v32 = vld [vmem:[#allocation2 + $0x5c] sm:$0xff]  ;;  %v15339_v8 = vld [vmem:[#allocation2 + $0x64] sm:$0xff] }
 0x284   : > { %1578 = vst.msk [vmem:[#allocation2 + $0x78] sm:$0xff] %vm412_vm1, %v1553_v9  ;;  %v1497_v30 = vmax.f32 %v15145_v17, %v1443_v3  ;;  %v11613_v13 = vpop.f32.mrb[189].mxu1  ;;  %11656 = vmatmul.mubr.msk.bf16.gmra.mrb[228].mxu1 %vm412_vm1, %v15330_v36  ;;  %v15351_v58 = vld [vmem:[#allocation2 + $0x60] sm:$0xff]  ;;  %v15376_v9 = vld [vmem:[#allocation2 + $0x68] sm:$0xff] }
 0x285   : > { %11776 = vmatmul.mubr.msk.bf16.gmra.mrb[20].mxu0 %vm412_vm1, %v2156_v63  ;;  %v1446_v43 = vpop.f32.mrb[190].mxu1  ;;  %11659 = vmatprep.mubr.msk.bf16.mxu1 %vm14490_vm0, %v17707_v7  ;;  %17709 = vst [vmem:[#allocation9_spill] sm:$0xff] %v15351_v58  ;;  %v1631_v55 = vld [vmem:[#allocation2 + $0x61] sm:$0xff]  ;;  %17710 = vst [vmem:[#allocation10_spill] sm:$0xff] %v15376_v9 }
 0x286   : > { %11779 = vmatprep.mubr.msk.bf16.mxu0 %vm14490_vm0, %v17707_v7  ;;  %v1529_v49 = vadd.f32 %v15190_v12, %v1497_v30  ;;  %v1498_v25 = vmax.f32 %v15150_v28, %v1446_v43  ;;  %v11614_v45 = vpop.f32.mrb[191].mxu1  ;;  %v2145_v61 = vld [vmem:[#allocation2 + $0x63] sm:$0xff] }
 0x287   : > { %v1947_v3 = vld [vmem:[#allocation2 + $0x42] sm:$0xff] }
 0x288   : > { %v1554_v19 = vmax.f32 %v1529_v49, 0.0  ;;  %v1530_v50 = vadd.f32 %v15190_v12, %v1498_v25  ;;  %v2531_v54 = vld [vmem:[#allocation2 + $0x5e] sm:$0xff] }
 0x289   : > { %v1632_v46 = vld [vmem:[#allocation2 + $0x69] sm:$0xff]  ;;  %v2725_v9 = vld [vmem:[#allocation2 + $0x5f] sm:$0xff] }
 0x28a   : > { %v2146_v18 = vld [vmem:[#allocation2 + $0x6b] sm:$0xff]  ;;  %1579 = vst.msk [vmem:[#allocation2 + $0x80] sm:$0xff] %vm412_vm1, %v1554_v19  ;;  %v1555_v40 = vmax.f32 %v1530_v50, 0.0  ;;  %v15357_v0 = vpack.c.bf16 %v1632_v46, %v1631_v55 }
 0x28b   : > { %v2157_v28 = vpack.c.bf16 %v2146_v18, %v2145_v61  ;;  %v1451_v26 = vpop.f32.mrb[192].mxu1  ;;  %v15364_v56 = vld [vmem:[#allocation2 + $0x6c] sm:$0xff]  ;;  %v15366_v60 = vld [vmem:[#allocation2 + $0x74] sm:$0xff] }
 0x28c   : > { %1580 = vst.msk [vmem:[#allocation2 + $0x88] sm:$0xff] %vm412_vm1, %v1555_v40  ;;  %v1499_v10 = vmax.f32 %v15155_v48, %v1451_v26  ;;  %v11617_v20 = vpop.f32.mrb[193].mxu1  ;;  %11660 = vmatmul.mubr.msk.bf16.gmra.mrb[232].mxu1 %vm412_vm1, %v15357_v0  ;;  %v15378_v63 = vld [vmem:[#allocation2 + $0x70] sm:$0xff] }
 0x28d   : > { %11780 = vmatmul.mubr.msk.bf16.gmra.mrb[24].mxu0 %vm412_vm1, %v2157_v28  ;;  %v1454_v2 = vpop.f32.mrb[194].mxu1  ;;  %11663 = vmatprep.mubr.msk.bf16.mxu1 %vm14490_vm0, %v17707_v7  ;;  %17711 = vst [vmem:[#allocation11_spill] sm:$0xff] %v15378_v63  ;;  %v1633_v43 = vld [vmem:[#allocation2 + $0x71] sm:$0xff] }
 0x28e   : > { %11783 = vmatprep.mubr.msk.bf16.mxu0 %vm14490_vm0, %v17707_v7  ;;  %v1531_v6 = vadd.f32 %v15190_v12, %v1499_v10  ;;  %v1500_v34 = vmax.f32 %v15160_v5, %v1454_v2  ;;  %v11618_v47 = vpop.f32.mrb[195].mxu1  ;;  %v2147_v25 = vld [vmem:[#allocation2 + $0x73] sm:$0xff] }
 0x28f   : > { %v15403_v2 = vld [vmem:[#allocation2 + $0x78] sm:$0xff]  ;;  %v2533_v48 = vld [vmem:[#allocation2 + $0x6e] sm:$0xff] }
 0x290   : > { %v1556_v30 = vmax.f32 %v1531_v6, 0.0  ;;  %v1532_v13 = vadd.f32 %v15190_v12, %v1500_v34  ;;  %17712 = vst [vmem:[#allocation12_spill] sm:$0xff] %v15403_v2  ;;  %v2527_v34 = vld [vmem:[#allocation2 + $0x3e] sm:$0xff]  ;;  %v1953_v17 = vld [vmem:[#allocation2 + $0x72] sm:$0xff] }
 0x291   : > { %v1634_v49 = vld [vmem:[#allocation2 + $0x79] sm:$0xff]  ;;  %v2727_v63 = vld [vmem:[#allocation2 + $0x6f] sm:$0xff] }
 0x292   : > { %v2148_v45 = vld [vmem:[#allocation2 + $0x7b] sm:$0xff]  ;;  %1581 = vst.msk [vmem:[#allocation2 + $0x90] sm:$0xff] %vm412_vm1, %v1556_v30  ;;  %v1557_v19 = vmax.f32 %v1532_v13, 0.0  ;;  %v15384_v50 = vpack.c.bf16 %v1634_v49, %v1633_v43 }
 0x293   : > { %v2158_v5 = vpack.c.bf16 %v2148_v45, %v2147_v25  ;;  %v1459_v55 = vpop.f32.mrb[196].mxu1  ;;  %v15391_v18 = vld [vmem:[#allocation2 + $0x7c] sm:$0xff]  ;;  %v15393_v40 = vld [vmem:[#allocation2 + $0x84] sm:$0xff] }
 0x294   : > { %1582 = vst.msk [vmem:[#allocation2 + $0x98] sm:$0xff] %vm412_vm1, %v1557_v19  ;;  %v1501_v46 = vmax.f32 %v15165_v23, %v1459_v55  ;;  %v11621_v61 = vpop.f32.mrb[197].mxu1  ;;  %11664 = vmatmul.mubr.msk.bf16.gmra.mrb[236].mxu1 %vm412_vm1, %v15384_v50  ;;  %v15405_v6 = vld [vmem:[#allocation2 + $0x80] sm:$0xff] }
 0x295   : > { %11784 = vmatmul.mubr.msk.bf16.gmra.mrb[28].mxu0 %vm412_vm1, %v2158_v5  ;;  %v1462_v28 = vpop.f32.mrb[198].mxu1  ;;  %11667 = vmatprep.mubr.msk.bf16.mxu1 %vm14490_vm0, %v17707_v7  ;;  %17713 = vst [vmem:[#allocation13_spill] sm:$0xff] %v15405_v6  ;;  %v1635_v13 = vld [vmem:[#allocation2 + $0x81] sm:$0xff]  ;;  %v2723_v6 = vld [vmem:[#allocation2 + $0x4f] sm:$0xff] }
 0x296   : > { %11787 = vmatprep.mubr.msk.bf16.mxu0 %vm14490_vm0, %v17707_v7  ;;  %v1533_v26 = vadd.f32 %v15190_v12, %v1501_v46  ;;  %v1502_v10 = vmax.f32 %v15170_v35, %v1462_v28  ;;  %v11622_v20 = vpop.f32.mrb[199].mxu1  ;;  %v2149_v49 = vld [vmem:[#allocation2 + $0x83] sm:$0xff] }
 0x297   : > { %v1589_v20 = vld [vmem:[#allocation2 + $0x8] sm:$0xff]  ;;  %v2535_v53 = vld [vmem:[#allocation2 + $0x7e] sm:$0xff] }
 0x298   : > { %v1558_v47 = vmax.f32 %v1533_v26, 0.0  ;;  %v1534_v30 = vadd.f32 %v15190_v12, %v1502_v10  ;;  %v1951_v23 = vld [vmem:[#allocation2 + $0x62] sm:$0xff] }
 0x299   : > { %v1636_v43 = vld [vmem:[#allocation2 + $0x89] sm:$0xff]  ;;  %v2729_v42 = vld [vmem:[#allocation2 + $0x7f] sm:$0xff] }
 0x29a   : > { %v2150_v25 = vld [vmem:[#allocation2 + $0x8b] sm:$0xff]  ;;  %1583 = vst.msk [vmem:[#allocation2 + $0xa0] sm:$0xff] %vm412_vm1, %v1558_v47  ;;  %v1559_v45 = vmax.f32 %v1534_v30, 0.0  ;;  %v15411_v19 = vpack.c.bf16 %v1636_v43, %v1635_v13  ;;  %v1588_v13 = vld [vmem:[#allocation2] sm:$0xff] }
 0x29b   : > { %v2159_v35 = vpack.c.bf16 %v2150_v25, %v2149_v49  ;;  %v1467_v5 = vpop.f32.mrb[200].mxu1  ;;  %v2327_v43 = vld [vmem:[#allocation2 + $0x4] sm:$0xff]  ;;  %v1606_v25 = vpack.c.bf16 %v1589_v20, %v1588_v13  ;;  %v1591_v20 = vld [vmem:[#allocation2 + $0x18] sm:$0xff]  ;;  %v2537_v27 = vld [vmem:[#allocation2 + $0x8e] sm:$0xff] }
 0x29c   : > { %1584 = vst.msk [vmem:[#allocation2 + $0xa8] sm:$0xff] %vm412_vm1, %v1559_v45  ;;  %v1503_v55 = vmax.f32 %v15175_v62, %v1467_v5  ;;  %v11625_v46 = vpop.f32.mrb[201].mxu1  ;;  %11668 = vmatmul.mubr.msk.bf16.gmra.mrb[240].mxu1 %vm412_vm1, %v15411_v19  ;;  %v2328_v62 = vld [vmem:[#allocation2 + $0xc] sm:$0xff]  ;;  %v1955_v39 = vld [vmem:[#allocation2 + $0x82] sm:$0xff] }
 0x29d   : > { %11788 = vmatmul.mubr.msk.bf16.gmra.mrb[32].mxu0 %vm412_vm1, %v2159_v35  ;;  %v1470_v61 = vpop.f32.mrb[202].mxu1  ;;  %11675 = vmatprep.mubr.msk.bf16.mxu1 %vm14490_vm0, %v17707_v7  ;;  %v2345_v45 = vpack.c.bf16 %v2328_v62, %v2327_v43  ;;  %v14147_v35 = vld [vmem:[%s17664_s3 + $0x50] sm:$0xff]   ;;  %v1593_v43 = vld [vmem:[#allocation2 + $0x28] sm:$0xff] }
 0x29e   : > { %11795 = vmatprep.mubr.msk.bf16.mxu0 %vm14490_vm0, %v17707_v7  ;;  %v1535_v28 = vadd.f32 %v15190_v12, %v1503_v55  ;;  %v1504_v26 = vmax.f32 %v15180_v57, %v1470_v61  ;;  %v11626_v10 = vpop.f32.mrb[203].mxu1  ;;  %v14149_v57 = vld [vmem:[%s17664_s3 + $0x20] sm:$0xff]   ;;  %v2731_v58 = vld [vmem:[#allocation2 + $0x8f] sm:$0xff] }
 0x2a0   : > { %v1560_v47 = vmax.f32 %v1535_v28, 0.0  ;;  %v1536_v30 = vadd.f32 %v15190_v12, %v1504_v26  ;;  %v14148_v26 = vld [vmem:[%s17664_s3 + $0x58] sm:$0xff]  }
 0x2a2   : > { %1585 = vst.msk [vmem:[#allocation2 + $0xb0] sm:$0xff] %vm412_vm1, %v1560_v47  ;;  %v1561_v49 = vmax.f32 %v1536_v30, 0.0  ;;  %v1590_v47 = vld [vmem:[#allocation2 + $0x10] sm:$0xff] }
 0x2a3   : > { %v1475_v5 = vpop.f32.mrb[204].mxu1  ;;  %v2329_v30 = vld [vmem:[#allocation2 + $0x14] sm:$0xff] }
 0x2a4   : > { %1586 = vst.msk [vmem:[#allocation2 + $0xb8] sm:$0xff] %vm412_vm1, %v1561_v49  ;;  %v1505_v55 = vmax.f32 %v15185_v33, %v1475_v5  ;;  %11676 = vmatmul.mubr.msk.bf16.vlgmr.msra.gmra.mrb[208].mxu1 %vm412_vm1, %v1606_v25  ;;  %v11629_v46 = vpop.f32.mrb[205].mxu1  ;;  %v14150_v33 = vld [vmem:[%s17664_s3 + $0x28] sm:$0xff]   ;;  %v2346_v13 = vpack.c.bf16 %v15241_v16, %v2329_v30  ;;  %v1592_v49 = vld [vmem:[#allocation2 + $0x20] sm:$0xff] }
 0x2a5   : > { %11796 = vmatmul.mubr.msk.bf16.vlgmr.msra.gmra.mrb[0].mxu0 %vm412_vm1, %v2345_v45  ;;  %11679 = vmatprep.mubr.msk.bf16.mxu1 %vm14490_vm0, %v17707_v7  ;;  %v1478_v61 = vpop.f32.mrb[206].mxu1  ;;  %v15461_v25 = vpack.c.bf16 %v1593_v43, %v1592_v49  ;;  %v2347_v45 = vpack.c.bf16 %v15262_v44, %v15243_v52  ;;  %v1597_v46 = vld [vmem:[#allocation2 + $0x48] sm:$0xff]  ;;  %v1600_v30 = vld [vmem:[#allocation2 + $0x60] sm:$0xff]  ;;  %v2351_v43 = vpack.c.bf16 %v15364_v56, %v15339_v8  ;;  %v1603_v49 = vld [vmem:[#allocation2 + $0x78] sm:$0xff] }
 0x2a6   : > { %11799 = vmatprep.mubr.msk.bf16.mxu0 %vm14490_vm0, %v17707_v7  ;;  %v1537_v28 = vadd.f32 %v15190_v12, %v1505_v55  ;;  %11832 = vmatpush3.bf16.msra.mxu0 %v14147_v35  ;;  %v11630_v10 = vpop.f32.mrb[207].mxu1  ;;  %v15450_v12 = vpack.c.bf16 %v1591_v20, %v1590_v47  ;;  %v1595_v35 = vld [vmem:[#allocation2 + $0x38] sm:$0xff]  ;;  %v2348_v55 = vpack.c.bf16 %v15283_v51, %v15264_v29  ;;  %v1596_v61 = vld [vmem:[#allocation2 + $0x40] sm:$0xff]  ;;  %v1601_v47 = vld [vmem:[#allocation2 + $0x68] sm:$0xff] }
 0x2a7   : > { %11712 = vmatpush3.bf16.msra.mxu1 %v14149_v57  ;;  %11833 = vmatprep.subr.bf16.mxu0 %v17707_v7  ;;  %v1594_v57 = vld [vmem:[#allocation2 + $0x30] sm:$0xff] }
 0x2a8   : > { %11713 = vmatprep.subr.bf16.mxu1 %v17707_v7  ;;  %v1562_v62 = vmax.f32 %v1537_v28, 0.0  ;;  %v15472_v5 = vpack.c.bf16 %v1595_v35, %v1594_v57  ;;  %v15483_v28 = vpack.c.bf16 %v1597_v46, %v1596_v61  ;;  %v1598_v10 = vld [vmem:[#allocation2 + $0x50] sm:$0xff]  ;;  %v2352_v57 = vpack.c.bf16 %v15391_v18, %v15366_v60  ;;  %v1604_v61 = vld [vmem:[#allocation2 + $0x80] sm:$0xff] }
 0x2a9   : > { %v15527_v46 = vld [vmem:[#allocation2 + $0x8c] sm:$0xff] }
 0x2aa   : > { %1587 = vst.msk [vmem:[#allocation2 + $0xc0] sm:$0xf] %vm414_vm2, %v1562_v62  ;;  %11834 = vmatpush3.bf16.msra.mxu0 %v14148_v26  ;;  %v2349_v26 = vpack.c.bf16 %v15310_v24, %v15285_v11  ;;  %v2350_v62 = vpack.c.bf16 %v15337_v32, %v15312_v59 }
 0x2ab   : > { %11714 = vmatpush3.bf16.msra.mxu1 %v14150_v33  ;;  %11871 = vmatprep.subr.bf16.mxu0 %v17707_v7  ;;  %v1599_v33 = vld [vmem:[#allocation2 + $0x58] sm:$0xff] }
 0x2ac   : > { %11680 = vmatmul.mubr.msk.bf16.gmra.mrb[212].mxu1 %vm412_vm1, %v15450_v12  ;;  %v15494_v20 = vpack.c.bf16 %v1599_v33, %v1598_v10  ;;  %v2353_v33 = vpack.c.bf16 %v15527_v46, %v15393_v40  ;;  %v1940_v10 = vld [vmem:[#allocation2 + $0xa] sm:$0xff] }
 0x2ad   : > { %11800 = vmatmul.mubr.msk.bf16.gmra.mrb[4].mxu0 %vm412_vm1, %v2346_v13  ;;  %11683 = vmatprep.mubr.msk.bf16.mxu1 %vm14490_vm0, %v17707_v7  ;;  %v15505_v13 = vpack.c.bf16 %v1601_v47, %v1600_v30  ;;  %v1939_v47 = vld [vmem:[#allocation2 + $0x2] sm:$0xff]  ;;  %v2521_v30 = vld [vmem:[#allocation2 + $0xe] sm:$0xff] }
 0x2ae   : > { %11803 = vmatprep.mubr.msk.bf16.mxu0 %vm14490_vm0, %v17707_v7 }
 0x2b4   : > { %11684 = vmatmul.mubr.msk.bf16.gmra.mrb[216].mxu1 %vm412_vm1, %v15461_v25 }
 0x2b5   : > { %11804 = vmatmul.mubr.msk.bf16.gmra.mrb[8].mxu0 %vm412_vm1, %v2347_v45  ;;  %11687 = vmatprep.mubr.msk.bf16.mxu1 %vm14490_vm0, %v17707_v7  ;;  %v1602_v45 = vld [vmem:[#allocation2 + $0x70] sm:$0xff] }
 0x2b6   : > { %11807 = vmatprep.mubr.msk.bf16.mxu0 %vm14490_vm0, %v17707_v7  ;;  %v15516_v35 = vpack.c.bf16 %v1603_v49, %v1602_v45  ;;  %v14151_v45 = vld [vmem:[%s17664_s3 + $0x60] sm:$0xff]  }
 0x2bc   : > { %11688 = vmatmul.mubr.msk.bf16.gmra.mrb[220].mxu1 %vm412_vm1, %v15472_v5 }
 0x2bd   : > { %11808 = vmatmul.mubr.msk.bf16.gmra.mrb[12].mxu0 %vm412_vm1, %v2348_v55  ;;  %11691 = vmatprep.mubr.msk.bf16.mxu1 %vm14490_vm0, %v17707_v7  ;;  %v1605_v55 = vld [vmem:[#allocation2 + $0x88] sm:$0xff] }
 0x2be   : > { %11811 = vmatprep.mubr.msk.bf16.mxu0 %vm14490_vm0, %v17707_v7 }
 0x2c4   : > { %11692 = vmatmul.mubr.msk.bf16.gmra.mrb[224].mxu1 %vm412_vm1, %v15483_v28 }
 0x2c5   : > { %11812 = vmatmul.mubr.msk.bf16.gmra.mrb[16].mxu0 %vm412_vm1, %v2349_v26  ;;  %11695 = vmatprep.mubr.msk.bf16.mxu1 %vm14490_vm0, %v17707_v7  ;;  %v15529_v26 = vpack.c.bf16 %v1605_v55, %v1604_v61  ;;  %v1942_v55 = vld [vmem:[#allocation2 + $0x1a] sm:$0xff]  ;;  %v2524_v61 = vld [vmem:[#allocation2 + $0x26] sm:$0xff] }
 0x2c6   : > { %11815 = vmatprep.mubr.msk.bf16.mxu0 %vm14490_vm0, %v17707_v7 }
 0x2cc   : > { %11696 = vmatmul.mubr.msk.bf16.gmra.mrb[228].mxu1 %vm412_vm1, %v15494_v20 }
 0x2cd   : > { %11816 = vmatmul.mubr.msk.bf16.gmra.mrb[20].mxu0 %vm412_vm1, %v2350_v62  ;;  %11699 = vmatprep.mubr.msk.bf16.mxu1 %vm14490_vm0, %v17707_v7  ;;  %v2522_v62 = vld [vmem:[#allocation2 + $0x16] sm:$0xff] }
 0x2ce   : > { %11819 = vmatprep.mubr.msk.bf16.mxu0 %vm14490_vm0, %v17707_v7  ;;  %v2539_v49 = vpack.c.bf16 %v2522_v62, %v2521_v30  ;;  %v1944_v30 = vld [vmem:[#allocation2 + $0x2a] sm:$0xff] }
 0x2d4   : > { %11700 = vmatmul.mubr.msk.bf16.gmra.mrb[232].mxu1 %vm412_vm1, %v15505_v13 }
 0x2d5   : > { %11820 = vmatmul.mubr.msk.bf16.gmra.mrb[24].mxu0 %vm412_vm1, %v2351_v43  ;;  %11703 = vmatprep.mubr.msk.bf16.mxu1 %vm14490_vm0, %v17707_v7  ;;  %v1957_v43 = vpack.c.bf16 %v1940_v10, %v1939_v47  ;;  %v2523_v10 = vld [vmem:[#allocation2 + $0x1e] sm:$0xff] }
 0x2d6   : > { %11823 = vmatprep.mubr.msk.bf16.mxu0 %vm14490_vm0, %v17707_v7  ;;  %v15555_v47 = vpack.c.bf16 %v2524_v61, %v2523_v10  ;;  %v1946_v61 = vld [vmem:[#allocation2 + $0x3a] sm:$0xff]  ;;  %v1945_v10 = vld [vmem:[#allocation2 + $0x32] sm:$0xff] }
 0x2dc   : > { %11704 = vmatmul.mubr.msk.bf16.gmra.mrb[236].mxu1 %vm412_vm1, %v15516_v35 }
 0x2dd   : > { %11824 = vmatmul.mubr.msk.bf16.gmra.mrb[28].mxu0 %vm412_vm1, %v2352_v57  ;;  %11707 = vmatprep.mubr.msk.bf16.mxu1 %vm14490_vm0, %v17707_v7  ;;  %v14152_v57 = vld [vmem:[%s17664_s3 + $0x68] sm:$0xff]  }
 0x2de   : > { %11827 = vmatprep.mubr.msk.bf16.mxu0 %vm14490_vm0, %v17707_v7 }
 0x2e4   : > { %11708 = vmatmul.mubr.msk.bf16.gmra.mrb[240].mxu1 %vm412_vm1, %v15529_v26 }
 0x2e5   : > { %11828 = vmatmul.mubr.msk.bf16.gmra.mrb[32].mxu0 %vm412_vm1, %v2353_v33  ;;  %11715 = vmatprep.mubr.msk.bf16.mxu1 %vm14490_vm0, %v17707_v7  ;;  %v1941_v33 = vld [vmem:[#allocation2 + $0x12] sm:$0xff] }
 0x2e6   : > { %11835 = vmatprep.mubr.msk.bf16.mxu0 %vm14490_vm0, %v17707_v7  ;;  %v15553_v62 = vpack.c.bf16 %v1942_v55, %v1941_v33  ;;  %v2528_v33 = vld [vmem:[#allocation2 + $0x46] sm:$0xff] }
 0x2ec   : > { %11716 = vmatmul.mubr.msk.bf16.vlgmr.msra.gmra.mrb[208].mxu1 %vm412_vm1, %v1957_v43  ;;  %v2526_v43 = vld [vmem:[#allocation2 + $0x36] sm:$0xff] }
 0x2ed   : > { %11836 = vmatmul.mubr.msk.bf16.vlgmr.msra.gmra.mrb[0].mxu0 %vm412_vm1, %v2539_v49  ;;  %11719 = vmatprep.mubr.msk.bf16.mxu1 %vm14490_vm0, %v17707_v7  ;;  %v1943_v49 = vld [vmem:[#allocation2 + $0x22] sm:$0xff] }
 0x2ee   : > { %11839 = vmatprep.mubr.msk.bf16.mxu0 %vm14490_vm0, %v17707_v7  ;;  %11872 = vmatpush3.bf16.msra.mxu0 %v14151_v45  ;;  %v2525_v45 = vld [vmem:[#allocation2 + $0x2e] sm:$0xff]  ;;  %v15566_v55 = vpack.c.bf16 %v1944_v30, %v1943_v49  ;;  %v15578_v30 = vpack.c.bf16 %v1946_v61, %v1945_v10  ;;  %v2532_v10 = vld [vmem:[#allocation2 + $0x66] sm:$0xff] }
 0x2ef   : > { %11873 = vmatprep.subr.bf16.mxu0 %v17707_v7  ;;  %v1948_v49 = vld [vmem:[#allocation2 + $0x4a] sm:$0xff] }
 0x2f0   : > { %v15590_v61 = vpack.c.bf16 %v1948_v49, %v1947_v3  ;;  %v1952_v49 = vld [vmem:[#allocation2 + $0x6a] sm:$0xff] }
 0x2f2   : > { %11874 = vmatpush3.bf16.msra.mxu0 %v14152_v57  ;;  %v15568_v57 = vpack.c.bf16 %v2526_v43, %v2525_v45  ;;  %v15580_v43 = vpack.c.bf16 %v2528_v33, %v2527_v34  ;;  %v2530_v45 = vld [vmem:[#allocation2 + $0x56] sm:$0xff] }
 0x2f3   : > { %11911 = vmatprep.subr.bf16.mxu0 %v17707_v7  ;;  %v15592_v34 = vpack.c.bf16 %v2530_v45, %v2529_v15  ;;  %v1950_v33 = vld [vmem:[#allocation2 + $0x5a] sm:$0xff]  ;;  %v15604_v15 = vpack.c.bf16 %v2532_v10, %v2531_v54  ;;  %v2536_v10 = vld [vmem:[#allocation2 + $0x86] sm:$0xff] }
 0x2f4   : > { %11720 = vmatmul.mubr.msk.bf16.gmra.mrb[212].mxu1 %vm412_vm1, %v15553_v62  ;;  %v15602_v3 = vpack.c.bf16 %v1950_v33, %v1949_v31  ;;  %v2534_v45 = vld [vmem:[#allocation2 + $0x76] sm:$0xff]  ;;  %v15614_v31 = vpack.c.bf16 %v1952_v49, %v1951_v23  ;;  %v1956_v49 = vld [vmem:[#allocation2 + $0x8a] sm:$0xff] }
 0x2f5   : > { %11840 = vmatmul.mubr.msk.bf16.gmra.mrb[4].mxu0 %vm412_vm1, %v15555_v47  ;;  %11723 = vmatprep.mubr.msk.bf16.mxu1 %vm14490_vm0, %v17707_v7  ;;  %v15616_v54 = vpack.c.bf16 %v2534_v45, %v2533_v48  ;;  %v1954_v33 = vld [vmem:[#allocation2 + $0x7a] sm:$0xff]  ;;  %v15628_v48 = vpack.c.bf16 %v2536_v10, %v2535_v53  ;;  %v2715_v10 = vld [vmem:[#allocation2 + $0xf] sm:$0xff] }
 0x2f6   : > { %11843 = vmatprep.mubr.msk.bf16.mxu0 %vm14490_vm0, %v17707_v7  ;;  %v15626_v23 = vpack.c.bf16 %v1954_v33, %v1953_v17  ;;  %v2538_v45 = vld [vmem:[#allocation2 + $0x96] sm:$0xff]  ;;  %v15638_v17 = vpack.c.bf16 %v1956_v49, %v1955_v39  ;;  %v2718_v39 = vld [vmem:[#allocation2 + $0x27] sm:$0xff]  ;;  %v2717_v49 = vld [vmem:[#allocation2 + $0x1f] sm:$0xff] }
 0x2f7   : > { %v15640_v53 = vpack.c.bf16 %v2538_v45, %v2537_v27  ;;  %v2716_v33 = vld [vmem:[#allocation2 + $0x17] sm:$0xff]  ;;  %v15658_v45 = vpack.c.bf16 %v2718_v39, %v2717_v49 }
 0x2f8   : > { %v2733_v2 = vpack.c.bf16 %v2716_v33, %v2715_v10  ;;  %v14154_v27 = vld [vmem:[%s17664_s3 + $0x78] sm:$0xff]   ;;  %v2722_v10 = vld [vmem:[#allocation2 + $0x47] sm:$0xff] }
 0x2f9   : > { %v2724_v49 = vld [vmem:[#allocation2 + $0x57] sm:$0xff] }
 0x2fc   : > { %11724 = vmatmul.mubr.msk.bf16.gmra.mrb[216].mxu1 %vm412_vm1, %v15566_v55 }
 0x2fd   : > { %11844 = vmatmul.mubr.msk.bf16.gmra.mrb[8].mxu0 %vm412_vm1, %v15568_v57  ;;  %11727 = vmatprep.mubr.msk.bf16.mxu1 %vm14490_vm0, %v17707_v7 }
 0x2fe   : > { %11847 = vmatprep.mubr.msk.bf16.mxu0 %vm14490_vm0, %v17707_v7 }
 0x304   : > { %11728 = vmatmul.mubr.msk.bf16.gmra.mrb[220].mxu1 %vm412_vm1, %v15578_v30 }
 0x305   : > { %11848 = vmatmul.mubr.msk.bf16.gmra.mrb[12].mxu0 %vm412_vm1, %v15580_v43  ;;  %11731 = vmatprep.mubr.msk.bf16.mxu1 %vm14490_vm0, %v17707_v7 }
 0x306   : > { %11851 = vmatprep.mubr.msk.bf16.mxu0 %vm14490_vm0, %v17707_v7 }
 0x30c   : > { %11732 = vmatmul.mubr.msk.bf16.gmra.mrb[224].mxu1 %vm412_vm1, %v15590_v61 }
 0x30d   : > { %11852 = vmatmul.mubr.msk.bf16.gmra.mrb[16].mxu0 %vm412_vm1, %v15592_v34  ;;  %11735 = vmatprep.mubr.msk.bf16.mxu1 %vm14490_vm0, %v17707_v7 }
 0x30e   : > { %11855 = vmatprep.mubr.msk.bf16.mxu0 %vm14490_vm0, %v17707_v7 }
 0x314   : > { %11736 = vmatmul.mubr.msk.bf16.gmra.mrb[228].mxu1 %vm412_vm1, %v15602_v3 }
 0x315   : > { %11856 = vmatmul.mubr.msk.bf16.gmra.mrb[20].mxu0 %vm412_vm1, %v15604_v15  ;;  %11739 = vmatprep.mubr.msk.bf16.mxu1 %vm14490_vm0, %v17707_v7 }
 0x316   : > { %11859 = vmatprep.mubr.msk.bf16.mxu0 %vm14490_vm0, %v17707_v7 }
 0x31c   : > { %11740 = vmatmul.mubr.msk.bf16.gmra.mrb[232].mxu1 %vm412_vm1, %v15614_v31 }
 0x31d   : > { %11860 = vmatmul.mubr.msk.bf16.gmra.mrb[24].mxu0 %vm412_vm1, %v15616_v54  ;;  %11743 = vmatprep.mubr.msk.bf16.mxu1 %vm14490_vm0, %v17707_v7 }
 0x31e   : > { %11863 = vmatprep.mubr.msk.bf16.mxu0 %vm14490_vm0, %v17707_v7 }
 0x324   : > { %11744 = vmatmul.mubr.msk.bf16.gmra.mrb[236].mxu1 %vm412_vm1, %v15626_v23 }
 0x325   : > { %11864 = vmatmul.mubr.msk.bf16.gmra.mrb[28].mxu0 %vm412_vm1, %v15628_v48  ;;  %11747 = vmatprep.mubr.msk.bf16.mxu1 %vm14490_vm0, %v17707_v7 }
 0x326   : > { %11867 = vmatprep.mubr.msk.bf16.mxu0 %vm14490_vm0, %v17707_v7 }
 0x32c   : > { %11748 = vmatmul.mubr.msk.bf16.gmra.mrb[240].mxu1 %vm412_vm1, %v15638_v17 }
 0x32d   : > { %11868 = vmatmul.mubr.msk.bf16.gmra.mrb[32].mxu0 %vm412_vm1, %v15640_v53 }
 0x32e   : > { %11875 = vmatprep.mubr.msk.bf16.mxu0 %vm14490_vm0, %v17707_v7 }
 0x335   : > { %11876 = vmatmul.mubr.msk.bf16.vlgmr.msra.gmra.mrb[0].mxu0 %vm412_vm1, %v2733_v2  ;;  %v2719_v2 = vld [vmem:[#allocation2 + $0x2f] sm:$0xff] }
 0x336   : > { %11879 = vmatprep.mubr.msk.bf16.mxu0 %vm14490_vm0, %v17707_v7  ;;  %11912 = vmatpush3.bf16.msra.mxu0 %v14153_v38  ;;  %v2720_v38 = vld [vmem:[#allocation2 + $0x37] sm:$0xff] }
 0x337   : > { %11913 = vmatprep.subr.bf16.mxu0 %v17707_v7  ;;  %v15665_v33 = vpack.c.bf16 %v2720_v38, %v2719_v2  ;;  %v15677_v38 = vpack.c.bf16 %v2724_v49, %v2723_v6  ;;  %v2726_v2 = vld [vmem:[#allocation2 + $0x67] sm:$0xff] }
 0x338   : > { %v2730_v49 = vld [vmem:[#allocation2 + $0x87] sm:$0xff] }
 0x33a   : > { %11914 = vmatpush3.bf16.msra.mxu0 %v14154_v27  ;;  %v2721_v27 = vld [vmem:[#allocation2 + $0x3f] sm:$0xff] }
 0x33b   : > { %11951 = vmatprep.subr.bf16.mxu0 %v17707_v7  ;;  %v15671_v39 = vpack.c.bf16 %v2722_v10, %v2721_v27  ;;  %v15683_v10 = vpack.c.bf16 %v2726_v2, %v2725_v9  ;;  %v2728_v27 = vld [vmem:[#allocation2 + $0x77] sm:$0xff]  ;;  %v15695_v9 = vpack.c.bf16 %v2730_v49, %v2729_v42  ;;  %v14155_v42 = vld [vmem:[%s17664_s3 + $0x80] sm:$0xff]  }
 0x33c   : > { %v15689_v6 = vpack.c.bf16 %v2728_v27, %v2727_v63  ;;  %v2732_v2 = vld [vmem:[#allocation2 + $0x97] sm:$0xff] }
 0x33d   : > { %11880 = vmatmul.mubr.msk.bf16.gmra.mrb[4].mxu0 %vm412_vm1, %v15658_v45  ;;  %v15701_v63 = vpack.c.bf16 %v2732_v2, %v2731_v58  ;;  %v14156_v58 = vld [vmem:[%s17664_s3 + $0x88] sm:$0xff]   ;;  %v14157_v27 = vld [vmem:[%s17664_s3 + $0x90] sm:$0xff]  }
 0x33e   : > { %11883 = vmatprep.mubr.msk.bf16.mxu0 %vm14490_vm0, %v17707_v7 }
 0x345   : > { %11884 = vmatmul.mubr.msk.bf16.gmra.mrb[8].mxu0 %vm412_vm1, %v15665_v33 }
 0x346   : > { %11887 = vmatprep.mubr.msk.bf16.mxu0 %vm14490_vm0, %v17707_v7 }
 0x34d   : > { %11888 = vmatmul.mubr.msk.bf16.gmra.mrb[12].mxu0 %vm412_vm1, %v15671_v39 }
 0x34e   : > { %11891 = vmatprep.mubr.msk.bf16.mxu0 %vm14490_vm0, %v17707_v7 }
 0x355   : > { %11892 = vmatmul.mubr.msk.bf16.gmra.mrb[16].mxu0 %vm412_vm1, %v15677_v38 }
 0x356   : > { %11895 = vmatprep.mubr.msk.bf16.mxu0 %vm14490_vm0, %v17707_v7 }
 0x35d   : > { %11896 = vmatmul.mubr.msk.bf16.gmra.mrb[20].mxu0 %vm412_vm1, %v15683_v10 }
 0x35e   : > { %11899 = vmatprep.mubr.msk.bf16.mxu0 %vm14490_vm0, %v17707_v7 }
 0x365   : > { %11900 = vmatmul.mubr.msk.bf16.gmra.mrb[24].mxu0 %vm412_vm1, %v15689_v6 }
 0x366   : > { %11903 = vmatprep.mubr.msk.bf16.mxu0 %vm14490_vm0, %v17707_v7 }
 0x36d   : > { %11904 = vmatmul.mubr.msk.bf16.gmra.mrb[28].mxu0 %vm412_vm1, %v15695_v9 }
 0x36e   : > { %11907 = vmatprep.mubr.msk.bf16.mxu0 %vm14490_vm0, %v17707_v7 }
 0x375   : > { %11908 = vmatmul.mubr.msk.bf16.gmra.mrb[32].mxu0 %vm412_vm1, %v15701_v63 }
 0x376   : > { %11915 = vmatprep.mubr.msk.bf16.mxu0 %vm14490_vm0, %v17707_v7 }
 0x37d   : > { %11916 = vmatmul.mubr.msk.bf16.vlgmr.msra.gmra.mrb[0].mxu0 %vm412_vm1, %v15450_v12  ;;  %v2926_v12 = vld [vmem:[#allocation2 + $0x98] sm:$0xff] }
 0x37e   : > { %11919 = vmatprep.mubr.msk.bf16.mxu0 %vm14490_vm0, %v17707_v7  ;;  %11952 = vmatpush3.bf16.msra.mxu0 %v14155_v42  ;;  %v14158_v42 = vld [vmem:[%s17664_s3 + $0x98] sm:$0xff]  }
 0x37f   : > { %11953 = vmatprep.subr.bf16.mxu0 %v17707_v7 }
 0x382   : > { %11954 = vmatpush3.bf16.msra.mxu0 %v14156_v58 }
 0x383   : > { %11991 = vmatprep.subr.bf16.mxu0 %v17707_v7 }
 0x385   : > { %11920 = vmatmul.mubr.msk.bf16.gmra.mrb[4].mxu0 %vm412_vm1, %v15461_v25  ;;  %v2925_v25 = vld [vmem:[#allocation2 + $0x90] sm:$0xff] }
 0x386   : > { %11923 = vmatprep.mubr.msk.bf16.mxu0 %vm14490_vm0, %v17707_v7 }
 0x38d   : > { %11924 = vmatmul.mubr.msk.bf16.gmra.mrb[8].mxu0 %vm412_vm1, %v15472_v5  ;;  %v15747_v5 = vpack.c.bf16 %v2926_v12, %v2925_v25 }
 0x38e   : > { %11927 = vmatprep.mubr.msk.bf16.mxu0 %vm14490_vm0, %v17707_v7 }
 0x395   : > { %11928 = vmatmul.mubr.msk.bf16.gmra.mrb[12].mxu0 %vm412_vm1, %v15483_v28 }
 0x396   : > { %11931 = vmatprep.mubr.msk.bf16.mxu0 %vm14490_vm0, %v17707_v7 }
 0x39d   : > { %11932 = vmatmul.mubr.msk.bf16.gmra.mrb[16].mxu0 %vm412_vm1, %v15494_v20  ;;  %v3104_v20 = vld [vmem:[#allocation2 + $0x19] sm:$0xff] }
 0x39e   : > { %11935 = vmatprep.mubr.msk.bf16.mxu0 %vm14490_vm0, %v17707_v7 }
 0x3a5   : > { %11936 = vmatmul.mubr.msk.bf16.gmra.mrb[20].mxu0 %vm412_vm1, %v15505_v13 }
 0x3a6   : > { %11939 = vmatprep.mubr.msk.bf16.mxu0 %vm14490_vm0, %v17707_v7 }
 0x3ad   : > { %11940 = vmatmul.mubr.msk.bf16.gmra.mrb[24].mxu0 %vm412_vm1, %v15516_v35 }
 0x3ae   : > { %11943 = vmatprep.mubr.msk.bf16.mxu0 %vm14490_vm0, %v17707_v7 }
 0x3b5   : > { %11944 = vmatmul.mubr.msk.bf16.gmra.mrb[28].mxu0 %vm412_vm1, %v15529_v26  ;;  %v3103_v26 = vld [vmem:[#allocation2 + $0x11] sm:$0xff] }
 0x3b6   : > { %11947 = vmatprep.mubr.msk.bf16.mxu0 %vm14490_vm0, %v17707_v7  ;;  %v3121_v2 = vpack.c.bf16 %v3104_v20, %v3103_v26 }
 0x3bd   : > { %11948 = vmatmul.mubr.msk.bf16.gmra.mrb[32].mxu0 %vm412_vm1, %v15747_v5 }
 0x3be   : > { %11955 = vmatprep.mubr.msk.bf16.mxu0 %vm14490_vm0, %v17707_v7 }
 0x3bf   : > { %v15753_v28 = vpop.f32.mrb[208].mxu1 }
 0x3c0   : > { %v11717_v13 = vpop.f32.mrb[209].mxu1 }
 0x3c1   : > { %v15755_v35 = vpop.f32.mrb[210].mxu1 }
 0x3c2   : > { %v11718_v49 = vpop.f32.mrb[211].mxu1 }
 0x3c5   : > { %11956 = vmatmul.mubr.msk.bf16.vlgmr.msra.gmra.mrb[0].mxu0 %vm412_vm1, %v3121_v2 }
 0x3c6   : > { %11959 = vmatprep.mubr.msk.bf16.mxu0 %vm14490_vm0, %v17707_v7  ;;  %11992 = vmatpush3.bf16.msra.mxu0 %v14157_v27 }
 0x3c7   : > { %11993 = vmatprep.subr.bf16.mxu0 %v17707_v7  ;;  %v15767_v58 = vpop.f32.mrb[212].mxu1 }
 0x3c8   : > { %v11721_v12 = vpop.f32.mrb[213].mxu1 }
 0x3c9   : > { %v15769_v25 = vpop.f32.mrb[214].mxu1 }
 0x3ca   : > { %11994 = vmatpush3.bf16.msra.mxu0 %v14158_v42  ;;  %v11722_v13 = vpop.f32.mrb[215].mxu1 }
 0x3cb   : > { %12031 = vmatprep.subr.bf16.mxu0 %v17707_v7 }
 0x3cd   : > { %11960 = vmatmul.mubr.msk.bf16.gmra.mrb[4].mxu0 %vm412_vm1, %v15255_v37 }
 0x3ce   : > { %11963 = vmatprep.mubr.msk.bf16.mxu0 %vm14490_vm0, %v17707_v7 }
 0x3cf   : > { %v15776_v20 = vpop.f32.mrb[216].mxu1 }
 0x3d0   : > { %v11725_v26 = vpop.f32.mrb[217].mxu1 }
 0x3d1   : > { %v15778_v27 = vpop.f32.mrb[218].mxu1 }
 0x3d2   : > { %v11726_v49 = vpop.f32.mrb[219].mxu1 }
 0x3d5   : > { %11964 = vmatmul.mubr.msk.bf16.gmra.mrb[8].mxu0 %vm412_vm1, %v15276_v41 }
 0x3d6   : > { %11967 = vmatprep.mubr.msk.bf16.mxu0 %vm14490_vm0, %v17707_v7 }
 0x3d7   : > { %v15784_v2 = vpop.f32.mrb[220].mxu1 }
 0x3d8   : > { %v11729_v42 = vpop.f32.mrb[221].mxu1 }
 0x3d9   : > { %v15786_v12 = vpop.f32.mrb[222].mxu1 }
 0x3da   : > { %17714 = vst [vmem:[#allocation14_spill] sm:$0xff] %v15786_v12  ;;  %v11730_v37 = vpop.f32.mrb[223].mxu1 }
 0x3dd   : > { %11968 = vmatmul.mubr.msk.bf16.gmra.mrb[12].mxu0 %vm412_vm1, %v15303_v21 }
 0x3de   : > { %11971 = vmatprep.mubr.msk.bf16.mxu0 %vm14490_vm0, %v17707_v7 }
 0x3df   : > { %v15792_v13 = vpop.f32.mrb[224].mxu1 }
 0x3e0   : > { %17715 = vst [vmem:[#allocation15_spill] sm:$0xff] %v15792_v13  ;;  %v11733_v26 = vpop.f32.mrb[225].mxu1 }
 0x3e1   : > { %v15794_v49 = vpop.f32.mrb[226].mxu1 }
 0x3e2   : > { %17716 = vst [vmem:[#allocation16_spill] sm:$0xff] %v15794_v49  ;;  %v11734_v41 = vpop.f32.mrb[227].mxu1 }
 0x3e5   : > { %11972 = vmatmul.mubr.msk.bf16.gmra.mrb[16].mxu0 %vm412_vm1, %v15330_v36 }
 0x3e6   : > { %11975 = vmatprep.mubr.msk.bf16.mxu0 %vm14490_vm0, %v17707_v7 }
 0x3e7   : > { %v15800_v42 = vpop.f32.mrb[228].mxu1 }
 0x3e8   : > { %17717 = vst [vmem:[#allocation17_spill] sm:$0xff] %v15800_v42  ;;  %v11737_v37 = vpop.f32.mrb[229].mxu1 }
 0x3e9   : > { %v15802_v12 = vpop.f32.mrb[230].mxu1 }
 0x3ea   : > { %17718 = vst [vmem:[#allocation18_spill] sm:$0xff] %v15802_v12  ;;  %v11738_v21 = vpop.f32.mrb[231].mxu1 }
 0x3ed   : > { %11976 = vmatmul.mubr.msk.bf16.gmra.mrb[20].mxu0 %vm412_vm1, %v15357_v0 }
 0x3ee   : > { %11979 = vmatprep.mubr.msk.bf16.mxu0 %vm14490_vm0, %v17707_v7 }
 0x3ef   : > { %v15808_v26 = vpop.f32.mrb[232].mxu1 }
 0x3f0   : > { %17719 = vst [vmem:[#allocation19_spill] sm:$0xff] %v15808_v26  ;;  %v11741_v41 = vpop.f32.mrb[233].mxu1  ;;  %v3119_v26 = vld [vmem:[#allocation2 + $0x91] sm:$0xff] }
 0x3f1   : > { %v15810_v49 = vpop.f32.mrb[234].mxu1 }
 0x3f2   : > { %17720 = vst [vmem:[#allocation20_spill] sm:$0xff] %v15810_v49  ;;  %v11742_v36 = vpop.f32.mrb[235].mxu1 }
 0x3f3   : > { %v3120_v36 = vld [vmem:[#allocation2 + $0x99] sm:$0xff] }
 0x3f4   : > { %v3129_v13 = vpack.c.bf16 %v3120_v36, %v3119_v26  ;;  %v3690_v26 = vld [vmem:[#allocation2 + $0x45] sm:$0xff]  ;;  %v3692_v36 = vld [vmem:[#allocation2 + $0x55] sm:$0xff] }
 0x3f5   : > { %11980 = vmatmul.mubr.msk.bf16.gmra.mrb[24].mxu0 %vm412_vm1, %v15384_v50 }
 0x3f6   : > { %11983 = vmatprep.mubr.msk.bf16.mxu0 %vm14490_vm0, %v17707_v7 }
 0x3f7   : > { %v15816_v37 = vpop.f32.mrb[236].mxu1 }
 0x3f8   : > { %v11745_v21 = vpop.f32.mrb[237].mxu1 }
 0x3f9   : > { %v15818_v12 = vpop.f32.mrb[238].mxu1  ;;  %v3689_v21 = vld [vmem:[#allocation2 + $0x3d] sm:$0xff] }
 0x3fa   : > { %v11746_v0 = vpop.f32.mrb[239].mxu1 }
 0x3fb   : > { %v15960_v0 = vpack.c.bf16 %v3690_v26, %v3689_v21  ;;  %v14418_v26 = vld [vmem:[#allocation2 + $0x50] sm:$0xff]  ;;  %v14419_v21 = vld [vmem:[#allocation2 + $0x58] sm:$0xff] }
 0x3fd   : > { %11984 = vmatmul.mubr.msk.bf16.gmra.mrb[28].mxu0 %vm412_vm1, %v15411_v19  ;;  %v14159_v19 = vld [vmem:[%s17664_s3 + $0xa0] sm:$0xff]  }
 0x3fe   : > { %11987 = vmatprep.mubr.msk.bf16.mxu0 %vm14490_vm0, %v17707_v7 }
 0x3ff   : > { %v15824_v41 = vpop.f32.mrb[240].mxu1 }
 0x400   : > { %v11749_v49 = vpop.f32.mrb[241].mxu1 }
 0x401   : > { %v15826_v50 = vpop.f32.mrb[242].mxu1  ;;  %v14160_v49 = vld [vmem:[%s17664_s3 + $0xa8] sm:$0xff]  }
 0x402   : > { %v11750_v42 = vpop.f32.mrb[243].mxu1 }
 0x405   : > { %11988 = vmatmul.mubr.msk.bf16.gmra.mrb[32].mxu0 %vm412_vm1, %v3129_v13  ;;  %v3687_v13 = vld [vmem:[#allocation2 + $0x2d] sm:$0xff] }
 0x406   : > { %11995 = vmatprep.mubr.msk.bf16.mxu0 %vm14490_vm0, %v17707_v7 }
 0x40d   : > { %11996 = vmatmul.mubr.msk.bf16.vlgmr.msra.gmra.mrb[0].mxu0 %vm412_vm1, %v15553_v62  ;;  %v15871_v62 = vld [vmem:[#allocation2 + $0x9a] sm:$0xff] }
 0x40e   : > { %11999 = vmatprep.mubr.msk.bf16.mxu0 %vm14490_vm0, %v17707_v7  ;;  %12032 = vmatpush3.bf16.msra.mxu0 %v14159_v19  ;;  %v3691_v19 = vld [vmem:[#allocation2 + $0x4d] sm:$0xff] }
 0x40f   : > { %12033 = vmatprep.subr.bf16.mxu0 %v17707_v7 }
 0x412   : > { %12034 = vmatpush3.bf16.msra.mxu0 %v14160_v49  ;;  %v15966_v49 = vpack.c.bf16 %v3692_v36, %v3691_v19  ;;  %v4288_v36 = vpack.c.bf16 %v14419_v21, %v14418_v26  ;;  %v14420_v19 = vld [vmem:[#allocation2 + $0x60] sm:$0xff]  ;;  %v16177_v26 = vld [vmem:[#allocation2 + $0x8a] sm:$0xff] }
 0x413   : > { %12071 = vmatprep.subr.bf16.mxu0 %v17707_v7 }
 0x415   : > { %12000 = vmatmul.mubr.msk.bf16.gmra.mrb[4].mxu0 %vm412_vm1, %v15566_v55  ;;  %v15873_v55 = vld [vmem:[#allocation2 + $0x92] sm:$0xff] }
 0x416   : > { %12003 = vmatprep.mubr.msk.bf16.mxu0 %vm14490_vm0, %v17707_v7  ;;  %v4485_v21 = vpack.c.bf16 %v15873_v55, %v16177_v26 }
 0x41d   : > { %12004 = vmatmul.mubr.msk.bf16.gmra.mrb[8].mxu0 %vm412_vm1, %v15578_v30  ;;  %v3323_v30 = vpack.c.bf16 %v15871_v62, %v15873_v55  ;;  %v4656_v55 = vld [vmem:[#allocation2 + $0x33] sm:$0xff] }
 0x41e   : > { %12007 = vmatprep.mubr.msk.bf16.mxu0 %vm14490_vm0, %v17707_v7 }
 0x425   : > { %12008 = vmatmul.mubr.msk.bf16.gmra.mrb[12].mxu0 %vm412_vm1, %v15590_v61  ;;  %v14161_v61 = vld [vmem:[%s17664_s3 + $0xb0] sm:$0xff]  }
 0x426   : > { %12011 = vmatprep.mubr.msk.bf16.mxu0 %vm14490_vm0, %v17707_v7 }
 0x42d   : > { %12012 = vmatmul.mubr.msk.bf16.gmra.mrb[16].mxu0 %vm412_vm1, %v15602_v3  ;;  %v17721_v3 = vpack.c.bf16 %v15243_v52, %v15241_v16  ;;  %v17723_v16 = vpack.c.bf16 %v15285_v11, %v15283_v51  ;;  %v17724_v52 = vpack.c.bf16 %v15312_v59, %v15310_v24  ;;  %v17727_v51 = vpack.c.bf16 %v15393_v40, %v15391_v18  ;;  %v15930_v11 = vld [vmem:[#allocation2 + $0x94] sm:$0xff]  ;;  %v3508_v59 = vld [vmem:[#allocation2 + $0xa4] sm:$0xff] }
 0x42e   : > { %12015 = vmatprep.mubr.msk.bf16.mxu0 %vm14490_vm0, %v17707_v7  ;;  %v3516_v24 = vpack.c.bf16 %v15930_v11, %v15527_v46  ;;  %v14163_v18 = vld [vmem:[%s17664_s3 + $0xc0] sm:$0xff]   ;;  %v14164_v46 = vld [vmem:[%s17664_s3 + $0xc8] sm:$0xff]  }
 0x435   : > { %12016 = vmatmul.mubr.msk.bf16.gmra.mrb[20].mxu0 %vm412_vm1, %v15614_v31  ;;  %v14162_v31 = vld [vmem:[%s17664_s3 + $0xb8] sm:$0xff]  }
 0x436   : > { %12019 = vmatprep.mubr.msk.bf16.mxu0 %vm14490_vm0, %v17707_v7 }
 0x43d   : > { %12020 = vmatmul.mubr.msk.bf16.gmra.mrb[24].mxu0 %vm412_vm1, %v15626_v23  ;;  %v17722_v23 = vpack.c.bf16 %v15264_v29, %v15262_v44  ;;  %v17725_v44 = vpack.c.bf16 %v15339_v8, %v15337_v32  ;;  %v17726_v29 = vpack.c.bf16 %v15366_v60, %v15364_v56  ;;  %v3507_v32 = vld [vmem:[#allocation2 + $0x9c] sm:$0xff]  ;;  %v3686_v56 = vld [vmem:[#allocation2 + $0x25] sm:$0xff] }
 0x43e   : > { %12023 = vmatprep.mubr.msk.bf16.mxu0 %vm14490_vm0, %v17707_v7  ;;  %v15937_v8 = vpack.c.bf16 %v3508_v59, %v3507_v32  ;;  %v3685_v60 = vld [vmem:[#allocation2 + $0x1d] sm:$0xff]  ;;  %v3702_v32 = vld [vmem:[#allocation2 + $0xa5] sm:$0xff] }
 0x43f   : > { %v3703_v40 = vpack.c.bf16 %v3686_v56, %v3685_v60  ;;  %v3701_v56 = vld [vmem:[#allocation2 + $0x9d] sm:$0xff] }
 0x440   : > { %v15996_v60 = vpack.c.bf16 %v3702_v32, %v3701_v56  ;;  %v16127_v32 = vld [vmem:[#allocation2 + $0xa8] sm:$0xff]  ;;  %v16129_v56 = vld [vmem:[#allocation2 + $0xa0] sm:$0xff] }
 0x445   : > { %12024 = vmatmul.mubr.msk.bf16.gmra.mrb[28].mxu0 %vm412_vm1, %v15638_v17  ;;  %v3688_v17 = vld [vmem:[#allocation2 + $0x35] sm:$0xff] }
 0x446   : > { %12027 = vmatprep.mubr.msk.bf16.mxu0 %vm14490_vm0, %v17707_v7  ;;  %v15953_v42 = vpack.c.bf16 %v3688_v17, %v3687_v13  ;;  %v14417_v17 = vld [vmem:[#allocation2 + $0x48] sm:$0xff] }
 0x44d   : > { %12028 = vmatmul.mubr.msk.bf16.gmra.mrb[32].mxu0 %vm412_vm1, %v3323_v30  ;;  %v3694_v30 = vld [vmem:[#allocation2 + $0x65] sm:$0xff] }
 0x44e   : > { %12035 = vmatprep.mubr.msk.bf16.mxu0 %vm14490_vm0, %v17707_v7 }
 0x455   : > { %12036 = vmatmul.mubr.msk.bf16.vlgmr.msra.gmra.mrb[0].mxu0 %vm412_vm1, %v17721_v3 }
 0x456   : > { %12039 = vmatprep.mubr.msk.bf16.mxu0 %vm14490_vm0, %v17707_v7  ;;  %12072 = vmatpush3.bf16.msra.mxu0 %v14161_v61  ;;  %v3693_v61 = vld [vmem:[#allocation2 + $0x5d] sm:$0xff] }
 0x457   : > { %12073 = vmatprep.subr.bf16.mxu0 %v17707_v7  ;;  %v15972_v3 = vpack.c.bf16 %v3694_v30, %v3693_v61  ;;  %v14421_v30 = vld [vmem:[#allocation2 + $0x68] sm:$0xff] }
 0x458   : > { %v4289_v61 = vpack.c.bf16 %v14421_v30, %v14420_v19  ;;  %v4478_v30 = vld [vmem:[#allocation2 + $0xb2] sm:$0xff] }
 0x45a   : > { %12074 = vmatpush3.bf16.msra.mxu0 %v14162_v31  ;;  %v3696_v31 = vld [vmem:[#allocation2 + $0x75] sm:$0xff] }
 0x45b   : > { %12111 = vmatprep.subr.bf16.mxu0 %v17707_v7 }
 0x45d   : > { %12040 = vmatmul.mubr.msk.bf16.gmra.mrb[4].mxu0 %vm412_vm1, %v17722_v23  ;;  %v3695_v23 = vld [vmem:[#allocation2 + $0x6d] sm:$0xff] }
 0x45e   : > { %12043 = vmatprep.mubr.msk.bf16.mxu0 %vm14490_vm0, %v17707_v7 }
 0x465   : > { %12044 = vmatmul.mubr.msk.bf16.gmra.mrb[8].mxu0 %vm412_vm1, %v17723_v16  ;;  %v15978_v16 = vpack.c.bf16 %v3696_v31, %v3695_v23  ;;  %v14422_v31 = vld [vmem:[#allocation2 + $0x70] sm:$0xff]  ;;  %v14423_v23 = vld [vmem:[#allocation2 + $0x78] sm:$0xff] }
 0x466   : > { %12047 = vmatprep.mubr.msk.bf16.mxu0 %vm14490_vm0, %v17707_v7 }
 0x46d   : > { %12048 = vmatmul.mubr.msk.bf16.gmra.mrb[12].mxu0 %vm412_vm1, %v17724_v52  ;;  %v3698_v52 = vld [vmem:[#allocation2 + $0x85] sm:$0xff] }
 0x46e   : > { %12051 = vmatprep.mubr.msk.bf16.mxu0 %vm14490_vm0, %v17707_v7 }
 0x475   : > { %12052 = vmatmul.mubr.msk.bf16.gmra.mrb[16].mxu0 %vm412_vm1, %v17725_v44  ;;  %v3697_v44 = vld [vmem:[#allocation2 + $0x7d] sm:$0xff] }
 0x476   : > { %12055 = vmatprep.mubr.msk.bf16.mxu0 %vm14490_vm0, %v17707_v7 }
 0x47d   : > { %12056 = vmatmul.mubr.msk.bf16.gmra.mrb[20].mxu0 %vm412_vm1, %v17726_v29  ;;  %v15984_v29 = vpack.c.bf16 %v3698_v52, %v3697_v44  ;;  %v4290_v52 = vpack.c.bf16 %v14423_v23, %v14422_v31  ;;  %v16117_v44 = vld [vmem:[#allocation2 + $0x88] sm:$0xff] }
 0x47e   : > { %12059 = vmatprep.mubr.msk.bf16.mxu0 %vm14490_vm0, %v17707_v7  ;;  %v4655_v23 = vld [vmem:[#allocation2 + $0x2b] sm:$0xff] }
 0x485   : > { %12060 = vmatmul.mubr.msk.bf16.gmra.mrb[24].mxu0 %vm412_vm1, %v17727_v51  ;;  %v3700_v51 = vld [vmem:[#allocation2 + $0x95] sm:$0xff] }
 0x486   : > { %12063 = vmatprep.mubr.msk.bf16.mxu0 %vm14490_vm0, %v17707_v7 }
 0x48d   : > { %12064 = vmatmul.mubr.msk.bf16.gmra.mrb[28].mxu0 %vm412_vm1, %v3516_v24  ;;  %v3699_v24 = vld [vmem:[#allocation2 + $0x8d] sm:$0xff] }
 0x48e   : > { %12067 = vmatprep.mubr.msk.bf16.mxu0 %vm14490_vm0, %v17707_v7  ;;  %v15990_v59 = vpack.c.bf16 %v3700_v51, %v3699_v24  ;;  %v14424_v51 = vld [vmem:[#allocation2 + $0x80] sm:$0xff] }
 0x48f   : > { %v4291_v24 = vpack.c.bf16 %v16117_v44, %v14424_v51  ;;  %v14174_v51 = vld [vmem:[%s17664_s3 + $0x118] sm:$0xff]  }
 0x495   : > { %12068 = vmatmul.mubr.msk.bf16.gmra.mrb[32].mxu0 %vm412_vm1, %v15937_v8 }
 0x496   : > { %12075 = vmatprep.mubr.msk.bf16.mxu0 %vm14490_vm0, %v17707_v7 }
 0x49d   : > { %12076 = vmatmul.mubr.msk.bf16.vlgmr.msra.gmra.mrb[0].mxu0 %vm412_vm1, %v3703_v40  ;;  %v14166_v40 = vld [vmem:[%s17664_s3 + $0xd8] sm:$0xff]  }
 0x49e   : > { %12079 = vmatprep.mubr.msk.bf16.mxu0 %vm14490_vm0, %v17707_v7  ;;  %12112 = vmatpush3.bf16.msra.mxu0 %v14163_v18  ;;  %v14165_v18 = vld [vmem:[%s17664_s3 + $0xd0] sm:$0xff]  }
 0x49f   : > { %12113 = vmatprep.subr.bf16.mxu0 %v17707_v7 }
 0x4a2   : > { %12114 = vmatpush3.bf16.msra.mxu0 %v14164_v46  ;;  %v14416_v46 = vld [vmem:[#allocation2 + $0x40] sm:$0xff] }
 0x4a3   : > { %12151 = vmatprep.subr.bf16.mxu0 %v17707_v7  ;;  %v4287_v13 = vpack.c.bf16 %v14417_v17, %v14416_v46  ;;  %v4472_v46 = vld [vmem:[#allocation2 + $0x82] sm:$0xff]  ;;  %v4471_v17 = vld [vmem:[#allocation2 + $0x7a] sm:$0xff] }
 0x4a5   : > { %12080 = vmatmul.mubr.msk.bf16.gmra.mrb[4].mxu0 %vm412_vm1, %v15953_v42 }
 0x4a6   : > { %12083 = vmatprep.mubr.msk.bf16.mxu0 %vm14490_vm0, %v17707_v7 }
 0x4ad   : > { %12084 = vmatmul.mubr.msk.bf16.gmra.mrb[8].mxu0 %vm412_vm1, %v15960_v0 }
 0x4ae   : > { %12087 = vmatprep.mubr.msk.bf16.mxu0 %vm14490_vm0, %v17707_v7 }
 0x4b5   : > { %12088 = vmatmul.mubr.msk.bf16.gmra.mrb[12].mxu0 %vm412_vm1, %v15966_v49 }
 0x4b6   : > { %12091 = vmatprep.mubr.msk.bf16.mxu0 %vm14490_vm0, %v17707_v7 }
 0x4bd   : > { %12092 = vmatmul.mubr.msk.bf16.gmra.mrb[16].mxu0 %vm412_vm1, %v15972_v3 }
 0x4be   : > { %12095 = vmatprep.mubr.msk.bf16.mxu0 %vm14490_vm0, %v17707_v7 }
 0x4c5   : > { %12096 = vmatmul.mubr.msk.bf16.gmra.mrb[20].mxu0 %vm412_vm1, %v15978_v16 }
 0x4c6   : > { %12099 = vmatprep.mubr.msk.bf16.mxu0 %vm14490_vm0, %v17707_v7 }
 0x4cd   : > { %12100 = vmatmul.mubr.msk.bf16.gmra.mrb[24].mxu0 %vm412_vm1, %v15984_v29 }
 0x4ce   : > { %12103 = vmatprep.mubr.msk.bf16.mxu0 %vm14490_vm0, %v17707_v7 }
 0x4d5   : > { %12104 = vmatmul.mubr.msk.bf16.gmra.mrb[28].mxu0 %vm412_vm1, %v15990_v59 }
 0x4d6   : > { %12107 = vmatprep.mubr.msk.bf16.mxu0 %vm14490_vm0, %v17707_v7 }
 0x4dd   : > { %12108 = vmatmul.mubr.msk.bf16.gmra.mrb[32].mxu0 %vm412_vm1, %v15996_v60 }
 0x4de   : > { %12115 = vmatprep.mubr.msk.bf16.mxu0 %vm14490_vm0, %v17707_v7 }
 0x4e5   : > { %12116 = vmatmul.mubr.msk.bf16.vlgmr.msra.gmra.mrb[0].mxu0 %vm412_vm1, %v15555_v47  ;;  %v3896_v47 = vld [vmem:[#allocation2 + $0xa6] sm:$0xff] }
 0x4e6   : > { %12119 = vmatprep.mubr.msk.bf16.mxu0 %vm14490_vm0, %v17707_v7  ;;  %12152 = vmatpush3.bf16.msra.mxu0 %v14165_v18  ;;  %v4293_v18 = vpack.c.bf16 %v16127_v32, %v16129_v56 }
 0x4e7   : > { %12153 = vmatprep.subr.bf16.mxu0 %v17707_v7 }
 0x4ea   : > { %12154 = vmatpush3.bf16.msra.mxu0 %v14166_v40  ;;  %v4462_v40 = vld [vmem:[#allocation2 + $0x32] sm:$0xff] }
 0x4eb   : > { %12191 = vmatprep.subr.bf16.mxu0 %v17707_v7 }
 0x4ed   : > { %12120 = vmatmul.mubr.msk.bf16.gmra.mrb[4].mxu0 %vm412_vm1, %v15568_v57  ;;  %v3895_v57 = vld [vmem:[#allocation2 + $0x9e] sm:$0xff] }
 0x4ee   : > { %12123 = vmatprep.mubr.msk.bf16.mxu0 %vm14490_vm0, %v17707_v7 }
 0x4f5   : > { %12124 = vmatmul.mubr.msk.bf16.gmra.mrb[8].mxu0 %vm412_vm1, %v15580_v43  ;;  %v16042_v43 = vpack.c.bf16 %v3896_v47, %v3895_v57  ;;  %v4461_v47 = vld [vmem:[#allocation2 + $0x2a] sm:$0xff] }
 0x4f6   : > { %12127 = vmatprep.mubr.msk.bf16.mxu0 %vm14490_vm0, %v17707_v7  ;;  %v4479_v57 = vpack.c.bf16 %v4462_v40, %v4461_v47  ;;  %v4660_v47 = vld [vmem:[#allocation2 + $0x53] sm:$0xff] }
 0x4fd   : > { %12128 = vmatmul.mubr.msk.bf16.gmra.mrb[12].mxu0 %vm412_vm1, %v15592_v34  ;;  %v14167_v34 = vld [vmem:[%s17664_s3 + $0xe0] sm:$0xff]  }
 0x4fe   : > { %12131 = vmatprep.mubr.msk.bf16.mxu0 %vm14490_vm0, %v17707_v7 }
 0x505   : > { %12132 = vmatmul.mubr.msk.bf16.gmra.mrb[16].mxu0 %vm412_vm1, %v15604_v15  ;;  %v14168_v15 = vld [vmem:[%s17664_s3 + $0xe8] sm:$0xff]  }
 0x506   : > { %12135 = vmatprep.mubr.msk.bf16.mxu0 %vm14490_vm0, %v17707_v7 }
 0x50d   : > { %12136 = vmatmul.mubr.msk.bf16.gmra.mrb[20].mxu0 %vm412_vm1, %v15616_v54  ;;  %v4090_v54 = vld [vmem:[#allocation2 + $0xa7] sm:$0xff] }
 0x50e   : > { %12139 = vmatprep.mubr.msk.bf16.mxu0 %vm14490_vm0, %v17707_v7 }
 0x515   : > { %12140 = vmatmul.mubr.msk.bf16.gmra.mrb[24].mxu0 %vm412_vm1, %v15628_v48  ;;  %v4089_v48 = vld [vmem:[#allocation2 + $0x9f] sm:$0xff] }
 0x516   : > { %12143 = vmatprep.mubr.msk.bf16.mxu0 %vm14490_vm0, %v17707_v7 }
 0x51d   : > { %12144 = vmatmul.mubr.msk.bf16.gmra.mrb[28].mxu0 %vm412_vm1, %v15640_v53  ;;  %v4099_v53 = vpack.c.bf16 %v4090_v54, %v4089_v48  ;;  %v4463_v54 = vld [vmem:[#allocation2 + $0x3a] sm:$0xff] }
 0x51e   : > { %12147 = vmatprep.mubr.msk.bf16.mxu0 %vm14490_vm0, %v17707_v7 }
 0x525   : > { %12148 = vmatmul.mubr.msk.bf16.gmra.mrb[32].mxu0 %vm412_vm1, %v16042_v43 }
 0x526   : > { %12155 = vmatprep.mubr.msk.bf16.mxu0 %vm14490_vm0, %v17707_v7 }
 0x52d   : > { %12156 = vmatmul.mubr.msk.bf16.vlgmr.msra.gmra.mrb[0].mxu0 %vm412_vm1, %v15658_v45  ;;  %v4268_v45 = vld [vmem:[#allocation2 + $0x28] sm:$0xff] }
 0x52e   : > { %12159 = vmatprep.mubr.msk.bf16.mxu0 %vm14490_vm0, %v17707_v7  ;;  %12192 = vmatpush3.bf16.msra.mxu0 %v14167_v34  ;;  %v14172_v34 = vld [vmem:[%s17664_s3 + $0x108] sm:$0xff]  }
 0x52f   : > { %12193 = vmatprep.subr.bf16.mxu0 %v17707_v7 }
 0x532   : > { %12194 = vmatpush3.bf16.msra.mxu0 %v14168_v15  ;;  %v4464_v15 = vld [vmem:[#allocation2 + $0x42] sm:$0xff] }
 0x533   : > { %12231 = vmatprep.subr.bf16.mxu0 %v17707_v7  ;;  %v16146_v48 = vpack.c.bf16 %v4464_v15, %v4463_v54  ;;  %v4661_v15 = vld [vmem:[#allocation2 + $0x5b] sm:$0xff] }
 0x535   : > { %12160 = vmatmul.mubr.msk.bf16.gmra.mrb[4].mxu0 %vm412_vm1, %v15665_v33  ;;  %v4267_v33 = vld [vmem:[#allocation2 + $0x20] sm:$0xff] }
 0x536   : > { %12163 = vmatprep.mubr.msk.bf16.mxu0 %vm14490_vm0, %v17707_v7 }
 0x53d   : > { %12164 = vmatmul.mubr.msk.bf16.gmra.mrb[8].mxu0 %vm412_vm1, %v15671_v39  ;;  %v14169_v39 = vld [vmem:[%s17664_s3 + $0xf0] sm:$0xff]  }
 0x53e   : > { %12167 = vmatprep.mubr.msk.bf16.mxu0 %vm14490_vm0, %v17707_v7 }
 0x545   : > { %12168 = vmatmul.mubr.msk.bf16.gmra.mrb[12].mxu0 %vm412_vm1, %v15677_v38  ;;  %v4285_v38 = vpack.c.bf16 %v4268_v45, %v4267_v33  ;;  %v4465_v45 = vld [vmem:[#allocation2 + $0x4a] sm:$0xff] }
 0x546   : > { %12171 = vmatprep.mubr.msk.bf16.mxu0 %vm14490_vm0, %v17707_v7 }
 0x54d   : > { %12172 = vmatmul.mubr.msk.bf16.gmra.mrb[16].mxu0 %vm412_vm1, %v15683_v10  ;;  %v14170_v10 = vld [vmem:[%s17664_s3 + $0xf8] sm:$0xff]  }
 0x54e   : > { %12175 = vmatprep.mubr.msk.bf16.mxu0 %vm14490_vm0, %v17707_v7 }
 0x555   : > { %12176 = vmatmul.mubr.msk.bf16.gmra.mrb[20].mxu0 %vm412_vm1, %v15689_v6  ;;  %v4269_v6 = vld [vmem:[#allocation2 + $0x30] sm:$0xff] }
 0x556   : > { %12179 = vmatprep.mubr.msk.bf16.mxu0 %vm14490_vm0, %v17707_v7 }
 0x55d   : > { %12180 = vmatmul.mubr.msk.bf16.gmra.mrb[24].mxu0 %vm412_vm1, %v15695_v9  ;;  %v14415_v9 = vld [vmem:[#allocation2 + $0x38] sm:$0xff] }
 0x55e   : > { %12183 = vmatprep.mubr.msk.bf16.mxu0 %vm14490_vm0, %v17707_v7 }
 0x565   : > { %12184 = vmatmul.mubr.msk.bf16.gmra.mrb[28].mxu0 %vm412_vm1, %v15701_v63  ;;  %v4286_v63 = vpack.c.bf16 %v14415_v9, %v4269_v6  ;;  %v4470_v6 = vld [vmem:[#allocation2 + $0x72] sm:$0xff]  ;;  %v4469_v9 = vld [vmem:[#allocation2 + $0x6a] sm:$0xff] }
 0x566   : > { %12187 = vmatprep.mubr.msk.bf16.mxu0 %vm14490_vm0, %v17707_v7 }
 0x56d   : > { %12188 = vmatmul.mubr.msk.bf16.gmra.mrb[32].mxu0 %vm412_vm1, %v4099_v53  ;;  %v4466_v53 = vld [vmem:[#allocation2 + $0x52] sm:$0xff] }
 0x56e   : > { %12195 = vmatprep.mubr.msk.bf16.mxu0 %vm14490_vm0, %v17707_v7  ;;  %v16153_v33 = vpack.c.bf16 %v4466_v53, %v4465_v45  ;;  %v4664_v53 = vld [vmem:[#allocation2 + $0x73] sm:$0xff]  ;;  %v4663_v45 = vld [vmem:[#allocation2 + $0x6b] sm:$0xff] }
 0x575   : > { %12196 = vmatmul.mubr.msk.bf16.vlgmr.msra.gmra.mrb[0].mxu0 %vm412_vm1, %v4285_v38  ;;  %v4467_v38 = vld [vmem:[#allocation2 + $0x5a] sm:$0xff] }
 0x576   : > { %12199 = vmatprep.mubr.msk.bf16.mxu0 %vm14490_vm0, %v17707_v7  ;;  %12232 = vmatpush3.bf16.msra.mxu0 %v14169_v39  ;;  %v4468_v39 = vld [vmem:[#allocation2 + $0x62] sm:$0xff] }
 0x577   : > { %12233 = vmatprep.subr.bf16.mxu0 %v17707_v7 }
 0x57a   : > { %12234 = vmatpush3.bf16.msra.mxu0 %v14170_v10  ;;  %v16159_v10 = vpack.c.bf16 %v4468_v39, %v4467_v38  ;;  %v16226_v39 = vpack.c.bf16 %v4664_v53, %v4663_v45  ;;  %v4666_v38 = vld [vmem:[#allocation2 + $0x83] sm:$0xff]  ;;  %v4854_v53 = vld [vmem:[#allocation2 + $0x54] sm:$0xff]  ;;  %v4853_v45 = vld [vmem:[#allocation2 + $0x4c] sm:$0xff] }
 0x57b   : > { %12271 = vmatprep.subr.bf16.mxu0 %v17707_v7 }
 0x57d   : > { %12200 = vmatmul.mubr.msk.bf16.gmra.mrb[4].mxu0 %vm412_vm1, %v4286_v63  ;;  %v16165_v63 = vpack.c.bf16 %v4470_v6, %v4469_v9  ;;  %v4665_v6 = vld [vmem:[#allocation2 + $0x7b] sm:$0xff] }
 0x57e   : > { %12203 = vmatprep.mubr.msk.bf16.mxu0 %vm14490_vm0, %v17707_v7  ;;  %v16232_v9 = vpack.c.bf16 %v4666_v38, %v4665_v6  ;;  %v16273_v38 = vpack.c.bf16 %v4854_v53, %v4853_v45  ;;  %v4856_v6 = vld [vmem:[#allocation2 + $0x64] sm:$0xff] }
 0x57f   : > { %v5240_v53 = vld [vmem:[#allocation2 + $0x46] sm:$0xff]  ;;  %v5239_v45 = vld [vmem:[#allocation2 + $0x3e] sm:$0xff] }
 0x585   : > { %12204 = vmatmul.mubr.msk.bf16.gmra.mrb[8].mxu0 %vm412_vm1, %v4287_v13  ;;  %v16171_v13 = vpack.c.bf16 %v4472_v46, %v4471_v17  ;;  %v4668_v46 = vld [vmem:[#allocation2 + $0x93] sm:$0xff]  ;;  %v4667_v17 = vld [vmem:[#allocation2 + $0x8b] sm:$0xff] }
 0x586   : > { %12207 = vmatprep.mubr.msk.bf16.mxu0 %vm14490_vm0, %v17707_v7 }
 0x58d   : > { %12208 = vmatmul.mubr.msk.bf16.gmra.mrb[12].mxu0 %vm412_vm1, %v4288_v36  ;;  %v16184_v36 = vld [vmem:[#allocation2 + $0xa2] sm:$0xff] }
 0x58e   : > { %12211 = vmatprep.mubr.msk.bf16.mxu0 %vm14490_vm0, %v17707_v7  ;;  %v4486_v19 = vpack.c.bf16 %v16184_v36, %v15871_v62  ;;  %v14173_v62 = vld [vmem:[%s17664_s3 + $0x110] sm:$0xff]  }
 0x595   : > { %12212 = vmatmul.mubr.msk.bf16.gmra.mrb[16].mxu0 %vm412_vm1, %v4289_v61  ;;  %v4477_v61 = vld [vmem:[#allocation2 + $0xaa] sm:$0xff] }
 0x596   : > { %12215 = vmatprep.mubr.msk.bf16.mxu0 %vm14490_vm0, %v17707_v7  ;;  %v16191_v31 = vpack.c.bf16 %v4478_v30, %v4477_v61  ;;  %v4669_v30 = vld [vmem:[#allocation2 + $0x9b] sm:$0xff] }
 0x59d   : > { %12216 = vmatmul.mubr.msk.bf16.gmra.mrb[20].mxu0 %vm412_vm1, %v4290_v52  ;;  %v4673_v52 = vpack.c.bf16 %v4656_v55, %v4655_v23  ;;  %v4672_v55 = vld [vmem:[#allocation2 + $0xb3] sm:$0xff]  ;;  %v4671_v23 = vld [vmem:[#allocation2 + $0xab] sm:$0xff] }
 0x59e   : > { %12219 = vmatprep.mubr.msk.bf16.mxu0 %vm14490_vm0, %v17707_v7 }
 0x5a5   : > { %12220 = vmatmul.mubr.msk.bf16.gmra.mrb[24].mxu0 %vm412_vm1, %v4291_v24  ;;  %v4658_v24 = vld [vmem:[#allocation2 + $0x43] sm:$0xff] }
 0x5a6   : > { %12223 = vmatprep.mubr.msk.bf16.mxu0 %vm14490_vm0, %v17707_v7 }
 0x5ad   : > { %12224 = vmatmul.mubr.msk.bf16.gmra.mrb[28].mxu0 %vm412_vm1, %v15747_v5  ;;  %v14171_v5 = vld [vmem:[%s17664_s3 + $0x100] sm:$0xff]  }
 0x5ae   : > { %12227 = vmatprep.mubr.msk.bf16.mxu0 %vm14490_vm0, %v17707_v7 }
 0x5b5   : > { %12228 = vmatmul.mubr.msk.bf16.gmra.mrb[32].mxu0 %vm412_vm1, %v4293_v18  ;;  %v4657_v18 = vld [vmem:[#allocation2 + $0x3b] sm:$0xff] }
 0x5b6   : > { %12235 = vmatprep.mubr.msk.bf16.mxu0 %vm14490_vm0, %v17707_v7  ;;  %v16207_v40 = vpack.c.bf16 %v4658_v24, %v4657_v18  ;;  %v14175_v24 = vld [vmem:[%s17664_s3 + $0x120] sm:$0xff]  }
 0x5bd   : > { %12236 = vmatmul.mubr.msk.bf16.vlgmr.msra.gmra.mrb[0].mxu0 %vm412_vm1, %v4479_v57 }
 0x5be   : > { %12239 = vmatprep.mubr.msk.bf16.mxu0 %vm14490_vm0, %v17707_v7  ;;  %12272 = vmatpush3.bf16.msra.mxu0 %v14171_v5  ;;  %v4659_v5 = vld [vmem:[#allocation2 + $0x4b] sm:$0xff] }
 0x5bf   : > { %12273 = vmatprep.subr.bf16.mxu0 %v17707_v7  ;;  %v16214_v57 = vpack.c.bf16 %v4660_v47, %v4659_v5  ;;  %v14176_v47 = vld [vmem:[%s17664_s3 + $0x128] sm:$0xff]  }
 0x5c0   : > { %v4852_v5 = vld [vmem:[#allocation2 + $0x44] sm:$0xff] }
 0x5c2   : > { %12274 = vmatpush3.bf16.msra.mxu0 %v14172_v34  ;;  %v4662_v34 = vld [vmem:[#allocation2 + $0x63] sm:$0xff] }
 0x5c3   : > { %12311 = vmatprep.subr.bf16.mxu0 %v17707_v7  ;;  %v16220_v54 = vpack.c.bf16 %v4662_v34, %v4661_v15  ;;  %v4851_v34 = vld [vmem:[#allocation2 + $0x3c] sm:$0xff] }
 0x5c4   : > { %v16266_v15 = vpack.c.bf16 %v4852_v5, %v4851_v34  ;;  %v4865_v5 = vld [vmem:[#allocation2 + $0xac] sm:$0xff] }
 0x5c5   : > { %12240 = vmatmul.mubr.msk.bf16.gmra.mrb[4].mxu0 %vm412_vm1, %v16146_v48 }
 0x5c6   : > { %12243 = vmatprep.mubr.msk.bf16.mxu0 %vm14490_vm0, %v17707_v7 }
 0x5cd   : > { %12244 = vmatmul.mubr.msk.bf16.gmra.mrb[8].mxu0 %vm412_vm1, %v16153_v33 }
 0x5ce   : > { %12247 = vmatprep.mubr.msk.bf16.mxu0 %vm14490_vm0, %v17707_v7 }
 0x5d5   : > { %12248 = vmatmul.mubr.msk.bf16.gmra.mrb[12].mxu0 %vm412_vm1, %v16159_v10 }
 0x5d6   : > { %12251 = vmatprep.mubr.msk.bf16.mxu0 %vm14490_vm0, %v17707_v7 }
 0x5dd   : > { %12252 = vmatmul.mubr.msk.bf16.gmra.mrb[16].mxu0 %vm412_vm1, %v16165_v63 }
 0x5de   : > { %12255 = vmatprep.mubr.msk.bf16.mxu0 %vm14490_vm0, %v17707_v7 }
 0x5e5   : > { %12256 = vmatmul.mubr.msk.bf16.gmra.mrb[20].mxu0 %vm412_vm1, %v16171_v13 }
 0x5e6   : > { %12259 = vmatprep.mubr.msk.bf16.mxu0 %vm14490_vm0, %v17707_v7 }
 0x5ed   : > { %12260 = vmatmul.mubr.msk.bf16.gmra.mrb[24].mxu0 %vm412_vm1, %v4485_v21  ;;  %v16238_v21 = vpack.c.bf16 %v4668_v46, %v4667_v17  ;;  %v4855_v46 = vld [vmem:[#allocation2 + $0x5c] sm:$0xff] }
 0x5ee   : > { %12263 = vmatprep.mubr.msk.bf16.mxu0 %vm14490_vm0, %v17707_v7  ;;  %v16279_v17 = vpack.c.bf16 %v4856_v6, %v4855_v46  ;;  %v5256_v6 = vpack.c.bf16 %v5240_v53, %v5239_v45  ;;  %v5242_v46 = vld [vmem:[#allocation2 + $0x56] sm:$0xff]  ;;  %v17728_v45 = vpack.c.bf16 %v15297_v14, %v15295_v22  ;;  %v17730_v22 = vld [vmem:[#allocation9_spill] sm:$0xff]  ;;  %v17731_v14 = vld [vmem:[#allocation8_spill] sm:$0xff] }
 0x5ef   : > { %v14181_v53 = vld [vmem:[%s17664_s3 + $0x150] sm:$0xff]  }
 0x5f5   : > { %12264 = vmatmul.mubr.msk.bf16.gmra.mrb[28].mxu0 %vm412_vm1, %v4486_v19  ;;  %v4670_v19 = vld [vmem:[#allocation2 + $0xa3] sm:$0xff] }
 0x5f6   : > { %12267 = vmatprep.mubr.msk.bf16.mxu0 %vm14490_vm0, %v17707_v7  ;;  %v16244_v61 = vpack.c.bf16 %v4670_v19, %v4669_v30  ;;  %v4858_v19 = vld [vmem:[#allocation2 + $0x74] sm:$0xff]  ;;  %v4857_v30 = vld [vmem:[#allocation2 + $0x6c] sm:$0xff] }
 0x5fd   : > { %12268 = vmatmul.mubr.msk.bf16.gmra.mrb[32].mxu0 %vm412_vm1, %v16191_v31 }
 0x5fe   : > { %12275 = vmatprep.mubr.msk.bf16.mxu0 %vm14490_vm0, %v17707_v7 }
 0x605   : > { %12276 = vmatmul.mubr.msk.bf16.vlgmr.msra.gmra.mrb[0].mxu0 %vm412_vm1, %v4673_v52  ;;  %v4850_v52 = vld [vmem:[#allocation2 + $0x34] sm:$0xff] }
 0x606   : > { %12279 = vmatprep.mubr.msk.bf16.mxu0 %vm14490_vm0, %v17707_v7  ;;  %12312 = vmatpush3.bf16.msra.mxu0 %v14173_v62  ;;  %v16250_v62 = vpack.c.bf16 %v4672_v55, %v4671_v23  ;;  %v16285_v55 = vpack.c.bf16 %v4858_v19, %v4857_v30  ;;  %v4860_v23 = vld [vmem:[#allocation2 + $0x84] sm:$0xff]  ;;  %v5241_v19 = vld [vmem:[#allocation2 + $0x4e] sm:$0xff] }
 0x607   : > { %12313 = vmatprep.subr.bf16.mxu0 %v17707_v7  ;;  %v5257_v30 = vpack.c.bf16 %v5242_v46, %v5241_v19  ;;  %v17732_v46 = vpack.c.bf16 %v17730_v22, %v17731_v14  ;;  %v17733_v19 = vld [vmem:[#allocation11_spill] sm:$0xff]  ;;  %v5632_v22 = vld [vmem:[#allocation2 + $0x71] sm:$0xff]  ;;  %v5631_v14 = vld [vmem:[#allocation2 + $0x69] sm:$0xff] }
 0x60a   : > { %12314 = vmatpush3.bf16.msra.mxu0 %v14174_v51  ;;  %v4849_v51 = vld [vmem:[#allocation2 + $0x2c] sm:$0xff] }
 0x60b   : > { %12351 = vmatprep.subr.bf16.mxu0 %v17707_v7  ;;  %v4867_v18 = vpack.c.bf16 %v4850_v52, %v4849_v51  ;;  %v4859_v52 = vld [vmem:[#allocation2 + $0x7c] sm:$0xff] }
 0x60c   : > { %v16291_v51 = vpack.c.bf16 %v4860_v23, %v4859_v52  ;;  %v5244_v23 = vld [vmem:[#allocation2 + $0x66] sm:$0xff]  ;;  %v5243_v52 = vld [vmem:[#allocation2 + $0x5e] sm:$0xff] }
 0x60d   : > { %12280 = vmatmul.mubr.msk.bf16.gmra.mrb[4].mxu0 %vm412_vm1, %v16207_v40 }
 0x60e   : > { %12283 = vmatprep.mubr.msk.bf16.mxu0 %vm14490_vm0, %v17707_v7 }
 0x615   : > { %12284 = vmatmul.mubr.msk.bf16.gmra.mrb[8].mxu0 %vm412_vm1, %v16214_v57 }
 0x616   : > { %12287 = vmatprep.mubr.msk.bf16.mxu0 %vm14490_vm0, %v17707_v7 }
 0x61d   : > { %12288 = vmatmul.mubr.msk.bf16.gmra.mrb[12].mxu0 %vm412_vm1, %v16220_v54 }
 0x61e   : > { %12291 = vmatprep.mubr.msk.bf16.mxu0 %vm14490_vm0, %v17707_v7 }
 0x625   : > { %12292 = vmatmul.mubr.msk.bf16.gmra.mrb[16].mxu0 %vm412_vm1, %v16226_v39 }
 0x626   : > { %12295 = vmatprep.mubr.msk.bf16.mxu0 %vm14490_vm0, %v17707_v7 }
 0x62d   : > { %12296 = vmatmul.mubr.msk.bf16.gmra.mrb[20].mxu0 %vm412_vm1, %v16232_v9 }
 0x62e   : > { %12299 = vmatprep.mubr.msk.bf16.mxu0 %vm14490_vm0, %v17707_v7 }
 0x635   : > { %12300 = vmatmul.mubr.msk.bf16.gmra.mrb[24].mxu0 %vm412_vm1, %v16238_v21 }
 0x636   : > { %12303 = vmatprep.mubr.msk.bf16.mxu0 %vm14490_vm0, %v17707_v7 }
 0x63d   : > { %12304 = vmatmul.mubr.msk.bf16.gmra.mrb[28].mxu0 %vm412_vm1, %v16244_v61 }
 0x63e   : > { %12307 = vmatprep.mubr.msk.bf16.mxu0 %vm14490_vm0, %v17707_v7 }
 0x645   : > { %12308 = vmatmul.mubr.msk.bf16.gmra.mrb[32].mxu0 %vm412_vm1, %v16250_v62 }
 0x646   : > { %12315 = vmatprep.mubr.msk.bf16.mxu0 %vm14490_vm0, %v17707_v7 }
 0x64d   : > { %12316 = vmatmul.mubr.msk.bf16.vlgmr.msra.gmra.mrb[0].mxu0 %vm412_vm1, %v4867_v18 }
 0x64e   : > { %12319 = vmatprep.mubr.msk.bf16.mxu0 %vm14490_vm0, %v17707_v7  ;;  %12352 = vmatpush3.bf16.msra.mxu0 %v14175_v24  ;;  %v16297_v24 = vld [vmem:[#allocation2 + $0x8c] sm:$0xff] }
 0x64f   : > { %12353 = vmatprep.subr.bf16.mxu0 %v17707_v7  ;;  %v4873_v18 = vpack.c.bf16 %v15930_v11, %v16297_v24  ;;  %v14177_v11 = vld [vmem:[%s17664_s3 + $0x130] sm:$0xff]  }
 0x652   : > { %12354 = vmatpush3.bf16.msra.mxu0 %v14176_v47  ;;  %v4866_v47 = vld [vmem:[#allocation2 + $0xb4] sm:$0xff] }
 0x653   : > { %12391 = vmatprep.subr.bf16.mxu0 %v17707_v7  ;;  %v16308_v34 = vpack.c.bf16 %v4866_v47, %v4865_v5  ;;  %v5246_v47 = vld [vmem:[#allocation2 + $0x76] sm:$0xff]  ;;  %v5245_v5 = vld [vmem:[#allocation2 + $0x6e] sm:$0xff] }
 0x655   : > { %12320 = vmatmul.mubr.msk.bf16.gmra.mrb[4].mxu0 %vm412_vm1, %v16266_v15 }
 0x656   : > { %12323 = vmatprep.mubr.msk.bf16.mxu0 %vm14490_vm0, %v17707_v7 }
 0x65d   : > { %12324 = vmatmul.mubr.msk.bf16.gmra.mrb[8].mxu0 %vm412_vm1, %v16273_v38 }
 0x65e   : > { %12327 = vmatprep.mubr.msk.bf16.mxu0 %vm14490_vm0, %v17707_v7 }
 0x665   : > { %12328 = vmatmul.mubr.msk.bf16.gmra.mrb[12].mxu0 %vm412_vm1, %v16279_v17 }
 0x666   : > { %12331 = vmatprep.mubr.msk.bf16.mxu0 %vm14490_vm0, %v17707_v7 }
 0x66d   : > { %12332 = vmatmul.mubr.msk.bf16.gmra.mrb[16].mxu0 %vm412_vm1, %v16285_v55 }
 0x66e   : > { %12335 = vmatprep.mubr.msk.bf16.mxu0 %vm14490_vm0, %v17707_v7 }
 0x675   : > { %12336 = vmatmul.mubr.msk.bf16.gmra.mrb[20].mxu0 %vm412_vm1, %v16291_v51 }
 0x676   : > { %12339 = vmatprep.mubr.msk.bf16.mxu0 %vm14490_vm0, %v17707_v7 }
 0x67d   : > { %12340 = vmatmul.mubr.msk.bf16.gmra.mrb[24].mxu0 %vm412_vm1, %v4873_v18  ;;  %v5258_v18 = vpack.c.bf16 %v5244_v23, %v5243_v52 }
 0x67e   : > { %12343 = vmatprep.mubr.msk.bf16.mxu0 %vm14490_vm0, %v17707_v7 }
 0x685   : > { %12344 = vmatmul.mubr.msk.bf16.gmra.mrb[28].mxu0 %vm412_vm1, %v15937_v8  ;;  %v14178_v8 = vld [vmem:[%s17664_s3 + $0x138] sm:$0xff]  }
 0x686   : > { %12347 = vmatprep.mubr.msk.bf16.mxu0 %vm14490_vm0, %v17707_v7 }
 0x68d   : > { %12348 = vmatmul.mubr.msk.bf16.gmra.mrb[32].mxu0 %vm412_vm1, %v16308_v34 }
 0x68e   : > { %12355 = vmatprep.mubr.msk.bf16.mxu0 %vm14490_vm0, %v17707_v7 }
 0x695   : > { %12356 = vmatmul.mubr.msk.bf16.vlgmr.msra.gmra.mrb[0].mxu0 %vm412_vm1, %v15953_v42  ;;  %v5060_v42 = vld [vmem:[#allocation2 + $0xb5] sm:$0xff] }
 0x696   : > { %12359 = vmatprep.mubr.msk.bf16.mxu0 %vm14490_vm0, %v17707_v7  ;;  %12392 = vmatpush3.bf16.msra.mxu0 %v14177_v11  ;;  %v5259_v11 = vpack.c.bf16 %v5246_v47, %v5245_v5  ;;  %v5443_v5 = vld [vmem:[#allocation2 + $0x98] sm:$0xff] }
 0x697   : > { %12393 = vmatprep.subr.bf16.mxu0 %v17707_v7 }
 0x69a   : > { %12394 = vmatpush3.bf16.msra.mxu0 %v14178_v8  ;;  %v5248_v8 = vld [vmem:[#allocation2 + $0x86] sm:$0xff] }
 0x69b   : > { %12431 = vmatprep.subr.bf16.mxu0 %v17707_v7 }
 0x69d   : > { %12360 = vmatmul.mubr.msk.bf16.gmra.mrb[4].mxu0 %vm412_vm1, %v15960_v0  ;;  %v5059_v0 = vld [vmem:[#allocation2 + $0xad] sm:$0xff] }
 0x69e   : > { %12363 = vmatprep.mubr.msk.bf16.mxu0 %vm14490_vm0, %v17707_v7 }
 0x6a5   : > { %12364 = vmatmul.mubr.msk.bf16.gmra.mrb[8].mxu0 %vm412_vm1, %v15966_v49  ;;  %v5069_v49 = vpack.c.bf16 %v5060_v42, %v5059_v0  ;;  %v5247_v42 = vld [vmem:[#allocation2 + $0x7e] sm:$0xff] }
 0x6a6   : > { %12367 = vmatprep.mubr.msk.bf16.mxu0 %vm14490_vm0, %v17707_v7  ;;  %v5260_v0 = vpack.c.bf16 %v5248_v8, %v5247_v42  ;;  %v5446_v8 = vld [vmem:[#allocation2 + $0xb0] sm:$0xff] }
 0x6a7   : > { %v5456_v42 = vpack.c.bf16 %v5446_v8, %v16127_v32  ;;  %v5639_v8 = vld [vmem:[#allocation2 + $0xa9] sm:$0xff] }
 0x6ad   : > { %12368 = vmatmul.mubr.msk.bf16.gmra.mrb[12].mxu0 %vm412_vm1, %v15972_v3  ;;  %v5238_v3 = vld [vmem:[#allocation2 + $0x36] sm:$0xff] }
 0x6ae   : > { %12371 = vmatprep.mubr.msk.bf16.mxu0 %vm14490_vm0, %v17707_v7 }
 0x6b5   : > { %12372 = vmatmul.mubr.msk.bf16.gmra.mrb[16].mxu0 %vm412_vm1, %v15978_v16  ;;  %v5237_v16 = vld [vmem:[#allocation2 + $0x2e] sm:$0xff] }
 0x6b6   : > { %12375 = vmatprep.mubr.msk.bf16.mxu0 %vm14490_vm0, %v17707_v7 }
 0x6bd   : > { %12376 = vmatmul.mubr.msk.bf16.gmra.mrb[20].mxu0 %vm412_vm1, %v15984_v29  ;;  %v14179_v29 = vld [vmem:[%s17664_s3 + $0x140] sm:$0xff]  }
 0x6be   : > { %12379 = vmatprep.mubr.msk.bf16.mxu0 %vm14490_vm0, %v17707_v7 }
 0x6c5   : > { %12380 = vmatmul.mubr.msk.bf16.gmra.mrb[24].mxu0 %vm412_vm1, %v15990_v59  ;;  %v5255_v59 = vpack.c.bf16 %v5238_v3, %v5237_v16  ;;  %v5249_v3 = vld [vmem:[#allocation2 + $0x8e] sm:$0xff] }
 0x6c6   : > { %12383 = vmatprep.mubr.msk.bf16.mxu0 %vm14490_vm0, %v17707_v7 }
 0x6cd   : > { %12384 = vmatmul.mubr.msk.bf16.gmra.mrb[28].mxu0 %vm412_vm1, %v15996_v60  ;;  %v14180_v60 = vld [vmem:[%s17664_s3 + $0x148] sm:$0xff]  }
 0x6ce   : > { %12387 = vmatprep.mubr.msk.bf16.mxu0 %vm14490_vm0, %v17707_v7 }
 0x6d5   : > { %12388 = vmatmul.mubr.msk.bf16.gmra.mrb[32].mxu0 %vm412_vm1, %v5069_v49  ;;  %v5250_v49 = vld [vmem:[#allocation2 + $0x96] sm:$0xff] }
 0x6d6   : > { %12395 = vmatprep.mubr.msk.bf16.mxu0 %vm14490_vm0, %v17707_v7  ;;  %v5261_v16 = vpack.c.bf16 %v5250_v49, %v5249_v3  ;;  %v5625_v3 = vld [vmem:[#allocation2 + $0x39] sm:$0xff] }
 0x6dd   : > { %12396 = vmatmul.mubr.msk.bf16.vlgmr.msra.gmra.mrb[0].mxu0 %vm412_vm1, %v5255_v59  ;;  %v5253_v59 = vld [vmem:[#allocation2 + $0xae] sm:$0xff] }
 0x6de   : > { %12399 = vmatprep.mubr.msk.bf16.mxu0 %vm14490_vm0, %v17707_v7  ;;  %12432 = vmatpush3.bf16.msra.mxu0 %v14179_v29  ;;  %v5254_v29 = vld [vmem:[#allocation2 + $0xb6] sm:$0xff] }
 0x6df   : > { %12433 = vmatprep.subr.bf16.mxu0 %v17707_v7 }
 0x6e2   : > { %12434 = vmatpush3.bf16.msra.mxu0 %v14180_v60  ;;  %v5263_v60 = vpack.c.bf16 %v5254_v29, %v5253_v59  ;;  %v14184_v29 = vld [vmem:[%s17664_s3 + $0x168] sm:$0xff]   ;;  %v5628_v59 = vld [vmem:[#allocation2 + $0x51] sm:$0xff] }
 0x6e3   : > { %12471 = vmatprep.subr.bf16.mxu0 %v17707_v7 }
 0x6e5   : > { %12400 = vmatmul.mubr.msk.bf16.gmra.mrb[4].mxu0 %vm412_vm1, %v5256_v6  ;;  %v17729_v6 = vpack.c.bf16 %v15324_v1, %v15322_v4  ;;  %v17736_v4 = vld [vmem:[#allocation13_spill] sm:$0xff]  ;;  %v17737_v1 = vld [vmem:[#allocation12_spill] sm:$0xff] }
 0x6e6   : > { %12403 = vmatprep.mubr.msk.bf16.mxu0 %vm14490_vm0, %v17707_v7  ;;  %v17738_v52 = vpack.c.bf16 %v17736_v4, %v17737_v1  ;;  %v5636_v4 = vld [vmem:[#allocation2 + $0x91] sm:$0xff]  ;;  %v5635_v1 = vld [vmem:[#allocation2 + $0x89] sm:$0xff] }
 0x6ed   : > { %12404 = vmatmul.mubr.msk.bf16.gmra.mrb[8].mxu0 %vm412_vm1, %v5257_v30  ;;  %v17734_v30 = vld [vmem:[#allocation10_spill] sm:$0xff] }
 0x6ee   : > { %12407 = vmatprep.mubr.msk.bf16.mxu0 %vm14490_vm0, %v17707_v7  ;;  %v17735_v23 = vpack.c.bf16 %v17733_v19, %v17734_v30  ;;  %v5634_v19 = vld [vmem:[#allocation2 + $0x81] sm:$0xff]  ;;  %v5633_v30 = vld [vmem:[#allocation2 + $0x79] sm:$0xff] }
 0x6f5   : > { %12408 = vmatmul.mubr.msk.bf16.gmra.mrb[12].mxu0 %vm412_vm1, %v5258_v18  ;;  %v5442_v18 = vld [vmem:[#allocation2 + $0x90] sm:$0xff] }
 0x6f6   : > { %12411 = vmatprep.mubr.msk.bf16.mxu0 %vm14490_vm0, %v17707_v7  ;;  %v5454_v47 = vpack.c.bf16 %v5442_v18, %v16117_v44  ;;  %v5448_v44 = vld [vmem:[#allocation2 + $0xc0] sm:$0xff] }
 0x6f7   : > { %v5638_v18 = vld [vmem:[#allocation2 + $0xa1] sm:$0xff] }
 0x6fd   : > { %12412 = vmatmul.mubr.msk.bf16.gmra.mrb[16].mxu0 %vm412_vm1, %v5259_v11  ;;  %v5455_v11 = vpack.c.bf16 %v16129_v56, %v5443_v5  ;;  %v5626_v56 = vld [vmem:[#allocation2 + $0x41] sm:$0xff] }
 0x6fe   : > { %12415 = vmatprep.mubr.msk.bf16.mxu0 %vm14490_vm0, %v17707_v7  ;;  %v5643_v32 = vpack.c.bf16 %v5626_v56, %v5625_v3  ;;  %v14185_v56 = vld [vmem:[%s17664_s3 + $0x170] sm:$0xff]   ;;  %v14186_v3 = vld [vmem:[%s17664_s3 + $0x178] sm:$0xff]  }
 0x705   : > { %12416 = vmatmul.mubr.msk.bf16.gmra.mrb[20].mxu0 %vm412_vm1, %v5260_v0  ;;  %v5447_v0 = vld [vmem:[#allocation2 + $0xb8] sm:$0xff] }
 0x706   : > { %12419 = vmatprep.mubr.msk.bf16.mxu0 %vm14490_vm0, %v17707_v7  ;;  %v5457_v49 = vpack.c.bf16 %v5448_v44, %v5447_v0  ;;  %v5641_v44 = vld [vmem:[#allocation2 + $0xb9] sm:$0xff]  ;;  %v5642_v0 = vld [vmem:[#allocation2 + $0xc1] sm:$0xff] }
 0x70d   : > { %12420 = vmatmul.mubr.msk.bf16.gmra.mrb[24].mxu0 %vm412_vm1, %v5261_v16  ;;  %v14183_v16 = vld [vmem:[%s17664_s3 + $0x160] sm:$0xff]  }
 0x70e   : > { %12423 = vmatprep.mubr.msk.bf16.mxu0 %vm14490_vm0, %v17707_v7 }
 0x715   : > { %12424 = vmatmul.mubr.msk.bf16.gmra.mrb[28].mxu0 %vm412_vm1, %v16042_v43  ;;  %v14182_v43 = vld [vmem:[%s17664_s3 + $0x158] sm:$0xff]  }
 0x716   : > { %12427 = vmatprep.mubr.msk.bf16.mxu0 %vm14490_vm0, %v17707_v7 }
 0x71d   : > { %12428 = vmatmul.mubr.msk.bf16.gmra.mrb[32].mxu0 %vm412_vm1, %v5263_v60  ;;  %v5627_v60 = vld [vmem:[#allocation2 + $0x49] sm:$0xff] }
 0x71e   : > { %12435 = vmatprep.mubr.msk.bf16.mxu0 %vm14490_vm0, %v17707_v7 }
 0x725   : > { %12436 = vmatmul.mubr.msk.bf16.vlgmr.msra.gmra.mrb[0].mxu0 %vm412_vm1, %v17728_v45  ;;  %v5630_v45 = vld [vmem:[#allocation2 + $0x61] sm:$0xff] }
 0x726   : > { %12439 = vmatprep.mubr.msk.bf16.mxu0 %vm14490_vm0, %v17707_v7  ;;  %12472 = vmatpush3.bf16.msra.mxu0 %v14181_v53  ;;  %v5644_v53 = vpack.c.bf16 %v5628_v59, %v5627_v60 }
 0x727   : > { %12473 = vmatprep.subr.bf16.mxu0 %v17707_v7 }
 0x72a   : > { %12474 = vmatpush3.bf16.msra.mxu0 %v14182_v43  ;;  %v5629_v43 = vld [vmem:[#allocation2 + $0x59] sm:$0xff] }
 0x72b   : > { %12511 = vmatprep.subr.bf16.mxu0 %v17707_v7 }
 0x72d   : > { %12440 = vmatmul.mubr.msk.bf16.gmra.mrb[4].mxu0 %vm412_vm1, %v17729_v6  ;;  %v5645_v6 = vpack.c.bf16 %v5630_v45, %v5629_v43 }
 0x72e   : > { %12443 = vmatprep.mubr.msk.bf16.mxu0 %vm14490_vm0, %v17707_v7 }
 0x735   : > { %12444 = vmatmul.mubr.msk.bf16.gmra.mrb[8].mxu0 %vm412_vm1, %v17732_v46  ;;  %v5646_v46 = vpack.c.bf16 %v5632_v22, %v5631_v14 }
 0x736   : > { %12447 = vmatprep.mubr.msk.bf16.mxu0 %vm14490_vm0, %v17707_v7 }
 0x73d   : > { %12448 = vmatmul.mubr.msk.bf16.gmra.mrb[12].mxu0 %vm412_vm1, %v17735_v23  ;;  %v5647_v23 = vpack.c.bf16 %v5634_v19, %v5633_v30 }
 0x73e   : > { %12451 = vmatprep.mubr.msk.bf16.mxu0 %vm14490_vm0, %v17707_v7 }
 0x745   : > { %12452 = vmatmul.mubr.msk.bf16.gmra.mrb[16].mxu0 %vm412_vm1, %v17738_v52  ;;  %v5648_v52 = vpack.c.bf16 %v5636_v4, %v5635_v1 }
 0x746   : > { %12455 = vmatprep.mubr.msk.bf16.mxu0 %vm14490_vm0, %v17707_v7 }
 0x74d   : > { %12456 = vmatmul.mubr.msk.bf16.gmra.mrb[20].mxu0 %vm412_vm1, %v5454_v47  ;;  %v5637_v47 = vld [vmem:[#allocation2 + $0x99] sm:$0xff] }
 0x74e   : > { %12459 = vmatprep.mubr.msk.bf16.mxu0 %vm14490_vm0, %v17707_v7  ;;  %v5649_v5 = vpack.c.bf16 %v5638_v18, %v5637_v47 }
 0x755   : > { %12460 = vmatmul.mubr.msk.bf16.gmra.mrb[24].mxu0 %vm412_vm1, %v5455_v11  ;;  %v5640_v11 = vld [vmem:[#allocation2 + $0xb1] sm:$0xff] }
 0x756   : > { %12463 = vmatprep.mubr.msk.bf16.mxu0 %vm14490_vm0, %v17707_v7 }
 0x75d   : > { %12464 = vmatmul.mubr.msk.bf16.gmra.mrb[28].mxu0 %vm412_vm1, %v5456_v42  ;;  %v5650_v42 = vpack.c.bf16 %v5640_v11, %v5639_v8 }
 0x75e   : > { %12467 = vmatprep.mubr.msk.bf16.mxu0 %vm14490_vm0, %v17707_v7 }
 0x765   : > { %12468 = vmatmul.mubr.msk.bf16.gmra.mrb[32].mxu0 %vm412_vm1, %v5457_v49  ;;  %v5651_v49 = vpack.c.bf16 %v5642_v0, %v5641_v44 }
 0x766   : > { %12475 = vmatprep.mubr.msk.bf16.mxu0 %vm14490_vm0, %v17707_v7 }
 0x76d   : > { %12476 = vmatmul.mubr.msk.bf16.vlgmr.msra.gmra.mrb[0].mxu0 %vm412_vm1, %v5643_v32 }
 0x76e   : > { %12479 = vmatprep.mubr.msk.bf16.mxu0 %vm14490_vm0, %v17707_v7  ;;  %12512 = vmatpush3.bf16.msra.mxu0 %v14183_v16 }
 0x76f   : > { %12513 = vmatprep.subr.bf16.mxu0 %v17707_v7 }
 0x772   : > { %12514 = vmatpush3.bf16.msra.mxu0 %v14184_v29 }
 0x773   : > { %12551 = vmatprep.subr.bf16.mxu0 %v17707_v7 }
 0x775   : > { %12480 = vmatmul.mubr.msk.bf16.gmra.mrb[4].mxu0 %vm412_vm1, %v5644_v53 }
 0x776   : > { %12483 = vmatprep.mubr.msk.bf16.mxu0 %vm14490_vm0, %v17707_v7 }
 0x77d   : > { %12484 = vmatmul.mubr.msk.bf16.gmra.mrb[8].mxu0 %vm412_vm1, %v5645_v6 }
 0x77e   : > { %12487 = vmatprep.mubr.msk.bf16.mxu0 %vm14490_vm0, %v17707_v7 }
 0x785   : > { %12488 = vmatmul.mubr.msk.bf16.gmra.mrb[12].mxu0 %vm412_vm1, %v5646_v46 }
 0x786   : > { %12491 = vmatprep.mubr.msk.bf16.mxu0 %vm14490_vm0, %v17707_v7 }
 0x78d   : > { %12492 = vmatmul.mubr.msk.bf16.gmra.mrb[16].mxu0 %vm412_vm1, %v5647_v23 }
 0x78e   : > { %12495 = vmatprep.mubr.msk.bf16.mxu0 %vm14490_vm0, %v17707_v7 }
 0x795   : > { %12496 = vmatmul.mubr.msk.bf16.gmra.mrb[20].mxu0 %vm412_vm1, %v5648_v52 }
 0x796   : > { %12499 = vmatprep.mubr.msk.bf16.mxu0 %vm14490_vm0, %v17707_v7 }
 0x79d   : > { %12500 = vmatmul.mubr.msk.bf16.gmra.mrb[24].mxu0 %vm412_vm1, %v5649_v5 }
 0x79e   : > { %12503 = vmatprep.mubr.msk.bf16.mxu0 %vm14490_vm0, %v17707_v7 }
 0x7a5   : > { %12504 = vmatmul.mubr.msk.bf16.gmra.mrb[28].mxu0 %vm412_vm1, %v5650_v42 }
 0x7a6   : > { %12507 = vmatprep.mubr.msk.bf16.mxu0 %vm14490_vm0, %v17707_v7 }
 0x7ad   : > { %12508 = vmatmul.mubr.msk.bf16.gmra.mrb[32].mxu0 %vm412_vm1, %v5651_v49 }
 0x7ae   : > { %12515 = vmatprep.mubr.msk.bf16.mxu0 %vm14490_vm0, %v17707_v7 }
 0x7b5   : > { %12516 = vmatmul.mubr.msk.bf16.vlgmr.msra.gmra.mrb[0].mxu0 %vm412_vm1, %v16146_v48  ;;  %v5830_v48 = vld [vmem:[#allocation2 + $0x92] sm:$0xff] }
 0x7b6   : > { %12519 = vmatprep.mubr.msk.bf16.mxu0 %vm14490_vm0, %v17707_v7  ;;  %12552 = vmatpush3.bf16.msra.mxu0 %v14185_v56 }
 0x7b7   : > { %12553 = vmatprep.subr.bf16.mxu0 %v17707_v7 }
 0x7ba   : > { %12554 = vmatpush3.bf16.msra.mxu0 %v14186_v3 }
 0x7bb   : > { %12591 = vmatprep.subr.bf16.mxu0 %v17707_v7 }
 0x7bd   : > { %12520 = vmatmul.mubr.msk.bf16.gmra.mrb[4].mxu0 %vm412_vm1, %v16153_v33  ;;  %v5842_v33 = vpack.c.bf16 %v5830_v48, %v16177_v26  ;;  %v5836_v26 = vld [vmem:[#allocation2 + $0xc2] sm:$0xff] }
 0x7be   : > { %12523 = vmatprep.mubr.msk.bf16.mxu0 %vm14490_vm0, %v17707_v7 }
 0x7c5   : > { %12524 = vmatmul.mubr.msk.bf16.gmra.mrb[8].mxu0 %vm412_vm1, %v16159_v10  ;;  %v5831_v10 = vld [vmem:[#allocation2 + $0x9a] sm:$0xff] }
 0x7c6   : > { %12527 = vmatprep.mubr.msk.bf16.mxu0 %vm14490_vm0, %v17707_v7 }
 0x7cd   : > { %12528 = vmatmul.mubr.msk.bf16.gmra.mrb[12].mxu0 %vm412_vm1, %v16165_v63  ;;  %v5843_v63 = vpack.c.bf16 %v16184_v36, %v5831_v10  ;;  %v14187_v36 = vld [vmem:[%s17664_s3 + $0x180] sm:$0xff]  }
 0x7ce   : > { %12531 = vmatprep.mubr.msk.bf16.mxu0 %vm14490_vm0, %v17707_v7 }
 0x7d5   : > { %12532 = vmatmul.mubr.msk.bf16.gmra.mrb[16].mxu0 %vm412_vm1, %v16171_v13  ;;  %v5835_v13 = vld [vmem:[#allocation2 + $0xba] sm:$0xff] }
 0x7d6   : > { %12535 = vmatprep.mubr.msk.bf16.mxu0 %vm14490_vm0, %v17707_v7  ;;  %v5845_v16 = vpack.c.bf16 %v5836_v26, %v5835_v13  ;;  %v17739_v26 = vld [vmem:[#allocation14_spill] sm:$0xff] }
 0x7dd   : > { %12536 = vmatmul.mubr.msk.bf16.gmra.mrb[20].mxu0 %vm412_vm1, %v5842_v33 }
 0x7de   : > { %12539 = vmatprep.mubr.msk.bf16.mxu0 %vm14490_vm0, %v17707_v7 }
 0x7e5   : > { %12540 = vmatmul.mubr.msk.bf16.gmra.mrb[24].mxu0 %vm412_vm1, %v5843_v63 }
 0x7e6   : > { %12543 = vmatprep.mubr.msk.bf16.mxu0 %vm14490_vm0, %v17707_v7 }
 0x7ed   : > { %12544 = vmatmul.mubr.msk.bf16.gmra.mrb[28].mxu0 %vm412_vm1, %v16191_v31  ;;  %v14188_v31 = vld [vmem:[%s17664_s3 + $0x188] sm:$0xff]  }
 0x7ee   : > { %12547 = vmatprep.mubr.msk.bf16.mxu0 %vm14490_vm0, %v17707_v7 }
 0x7f5   : > { %12548 = vmatmul.mubr.msk.bf16.gmra.mrb[32].mxu0 %vm412_vm1, %v5845_v16 }
 0x7f6   : > { %12555 = vmatprep.mubr.msk.bf16.mxu0 %vm14490_vm0, %v17707_v7 }
 0x7fd   : > { %12556 = vmatmul.mubr.msk.bf16.vlgmr.msra.gmra.mrb[0].mxu0 %vm412_vm1, %v16207_v40  ;;  %v6029_v40 = vld [vmem:[#allocation2 + $0xbb] sm:$0xff] }
 0x7fe   : > { %12559 = vmatprep.mubr.msk.bf16.mxu0 %vm14490_vm0, %v17707_v7  ;;  %12592 = vmatpush3.bf16.msra.mxu0 %v14187_v36 }
 0x7ff   : > { %12593 = vmatprep.subr.bf16.mxu0 %v17707_v7 }
 0x802   : > { %12594 = vmatpush3.bf16.msra.mxu0 %v14188_v31 }
 0x805   : > { %12560 = vmatmul.mubr.msk.bf16.gmra.mrb[4].mxu0 %vm412_vm1, %v16214_v57  ;;  %v6030_v57 = vld [vmem:[#allocation2 + $0xc3] sm:$0xff] }
 0x806   : > { %12563 = vmatprep.mubr.msk.bf16.mxu0 %vm14490_vm0, %v17707_v7 }
 0x80d   : > { %12564 = vmatmul.mubr.msk.bf16.gmra.mrb[8].mxu0 %vm412_vm1, %v16220_v54  ;;  %v6039_v54 = vpack.c.bf16 %v6030_v57, %v6029_v40 }
 0x80e   : > { %12567 = vmatprep.mubr.msk.bf16.mxu0 %vm14490_vm0, %v17707_v7 }
 0x815   : > { %12568 = vmatmul.mubr.msk.bf16.gmra.mrb[12].mxu0 %vm412_vm1, %v16226_v39  ;;  %v6218_v39 = vld [vmem:[#allocation2 + $0x94] sm:$0xff] }
 0x816   : > { %12571 = vmatprep.mubr.msk.bf16.mxu0 %vm14490_vm0, %v17707_v7 }
 0x81d   : > { %12572 = vmatmul.mubr.msk.bf16.gmra.mrb[16].mxu0 %vm412_vm1, %v16232_v9  ;;  %v6230_v9 = vpack.c.bf16 %v6218_v39, %v16297_v24 }
 0x81e   : > { %12575 = vmatprep.mubr.msk.bf16.mxu0 %vm14490_vm0, %v17707_v7 }
 0x825   : > { %12576 = vmatmul.mubr.msk.bf16.gmra.mrb[20].mxu0 %vm412_vm1, %v16238_v21  ;;  %v6220_v21 = vld [vmem:[#allocation2 + $0xa4] sm:$0xff] }
 0x826   : > { %12579 = vmatprep.mubr.msk.bf16.mxu0 %vm14490_vm0, %v17707_v7 }
 0x82d   : > { %12580 = vmatmul.mubr.msk.bf16.gmra.mrb[24].mxu0 %vm412_vm1, %v16244_v61  ;;  %v6219_v61 = vld [vmem:[#allocation2 + $0x9c] sm:$0xff] }
 0x82e   : > { %12583 = vmatprep.mubr.msk.bf16.mxu0 %vm14490_vm0, %v17707_v7 }
 0x835   : > { %12584 = vmatmul.mubr.msk.bf16.gmra.mrb[28].mxu0 %vm412_vm1, %v16250_v62  ;;  %v6231_v62 = vpack.c.bf16 %v6220_v21, %v6219_v61 }
 0x836   : > { %12587 = vmatprep.mubr.msk.bf16.mxu0 %vm14490_vm0, %v17707_v7 }
 0x83d   : > { %12588 = vmatmul.mubr.msk.bf16.gmra.mrb[32].mxu0 %vm412_vm1, %v6039_v54 }
 0x83e   : > { %12595 = vmatprep.mubr.msk.bf16.mxu0 %vm14490_vm0, %v17707_v7 }
 0x845   : > { %12596 = vmatmul.mubr.msk.bf16.vlgmr.msra.gmra.mrb[0].mxu0 %vm412_vm1, %v16266_v15  ;;  %v6223_v15 = vld [vmem:[#allocation2 + $0xbc] sm:$0xff] }
 0x846   : > { %12599 = vmatprep.mubr.msk.bf16.mxu0 %vm14490_vm0, %v17707_v7 }
 0x84d   : > { %12600 = vmatmul.mubr.msk.bf16.gmra.mrb[4].mxu0 %vm412_vm1, %v16273_v38  ;;  %v6224_v38 = vld [vmem:[#allocation2 + $0xc4] sm:$0xff] }
 0x84e   : > { %12603 = vmatprep.mubr.msk.bf16.mxu0 %vm14490_vm0, %v17707_v7 }
 0x855   : > { %12604 = vmatmul.mubr.msk.bf16.gmra.mrb[8].mxu0 %vm412_vm1, %v16279_v17  ;;  %v6233_v17 = vpack.c.bf16 %v6224_v38, %v6223_v15 }
 0x856   : > { %12607 = vmatprep.mubr.msk.bf16.mxu0 %vm14490_vm0, %v17707_v7 }
 0x85d   : > { %12608 = vmatmul.mubr.msk.bf16.gmra.mrb[12].mxu0 %vm412_vm1, %v16285_v55  ;;  %v14189_v55 = vld [vmem:[%s17666_s5] sm:$0xff]  }
 0x85e   : > { %12611 = vmatprep.mubr.msk.bf16.mxu0 %vm14490_vm0, %v17707_v7  ;;  %12647 = vmatprep.mubr.bf16.mxu1 %v14189_v55  ;;  %v17740_v55 = vld [vmem:[#allocation15_spill] sm:$0xff] }
 0x865   : > { %12612 = vmatmul.mubr.msk.bf16.gmra.mrb[16].mxu0 %vm412_vm1, %v16291_v51 }
 0x866   : > { %12615 = vmatprep.mubr.msk.bf16.mxu0 %vm14490_vm0, %v17707_v7 }
 0x86d   : > { %12616 = vmatmul.mubr.msk.bf16.gmra.mrb[20].mxu0 %vm412_vm1, %v6230_v9 }
 0x86e   : > { %12619 = vmatprep.mubr.msk.bf16.mxu0 %vm14490_vm0, %v17707_v7 }
 0x875   : > { %12620 = vmatmul.mubr.msk.bf16.gmra.mrb[24].mxu0 %vm412_vm1, %v6231_v62 }
 0x876   : > { %12623 = vmatprep.mubr.msk.bf16.mxu0 %vm14490_vm0, %v17707_v7 }
 0x87d   : > { %12624 = vmatmul.mubr.msk.bf16.gmra.mrb[28].mxu0 %vm412_vm1, %v16308_v34 }
 0x87e   : > { %12627 = vmatprep.mubr.msk.bf16.mxu0 %vm14490_vm0, %v17707_v7 }
 0x885   : > { %12628 = vmatmul.mubr.msk.bf16.gmra.mrb[32].mxu0 %vm412_vm1, %v6233_v17 }
 0x918   : > { %v6312_v51 = vpop.f32.mrb[0].mxu0 }
 0x919   : > { %v13191_v24 = vadd.f32 %v6312_v51, %v15753_v28  ;;  %v12597_v32 = vpop.f32.mrb[1].mxu0 }
 0x91a   : > { %v6315_v29 = vpop.f32.mrb[2].mxu0 }
 0x91b   : > { %6401 = vst [vmem:[#allocation3] sm:$0xff] %v13191_v24  ;;  %v13192_v34 = vadd.f32 %v6315_v29, %v15755_v35  ;;  %v12598_v59 = vpop.f32.mrb[3].mxu0 }
 0x91d   : > { %6402 = vst [vmem:[#allocation3 + $0x8] sm:$0xff] %v13192_v34 }
 0x920   : > { %v6320_v60 = vpop.f32.mrb[4].mxu0 }
 0x921   : > { %v13193_v53 = vadd.f32 %v6320_v60, %v15767_v58  ;;  %v12601_v45 = vpop.f32.mrb[5].mxu0 }
 0x922   : > { %v6323_v43 = vpop.f32.mrb[6].mxu0  ;;  %v17741_v45 = vld [vmem:[#allocation16_spill] sm:$0xff] }
 0x923   : > { %6403 = vst [vmem:[#allocation3 + $0x10] sm:$0xff] %v13193_v53  ;;  %v13194_v6 = vadd.f32 %v6323_v43, %v15769_v25  ;;  %v12602_v22 = vpop.f32.mrb[7].mxu0 }
 0x924   : > { %v6435_v46 = vld [vmem:[#allocation3 + $0x1] sm:$0xff] }
 0x925   : > { %6404 = vst [vmem:[#allocation3 + $0x18] sm:$0xff] %v13194_v6  ;;  %v6451_v52 = vmax.f32 %v13191_v24, %v6435_v46 }
 0x928   : > { %v6328_v14 = vpop.f32.mrb[8].mxu0 }
 0x929   : > { %v16606_v28 = vadd.f32 %v6328_v14, %v15776_v20  ;;  %v12605_v19 = vpop.f32.mrb[9].mxu0  ;;  %v16615_v20 = vld [vmem:[%s17665_s4] ss:$0 sm:$0xff] }
 0x92a   : > { %v6331_v30 = vpop.f32.mrb[10].mxu0  ;;  %v6436_v35 = vld [vmem:[#allocation3 + $0x9] sm:$0xff] }
 0x92b   : > { %v6467_v23 = vld [vmem:[#allocation3 + $0xe] sm:$0xff]  ;;  %6405 = vst [vmem:[#allocation3 + $0x20] sm:$0xff] %v16606_v28  ;;  %v16610_v58 = vadd.f32 %v6331_v30, %v15778_v27  ;;  %v12606_v1 = vpop.f32.mrb[11].mxu0  ;;  %v6452_v5 = vmax.f32 %v13192_v34, %v6436_v35 }
 0x92c   : > { %v6483_v4 = vld [vmem:[#allocation3 + $0xf] sm:$0xff]  ;;  %v6484_v47 = vld [vmem:[#allocation3 + $0x17] sm:$0xff] }
 0x92d   : > { %v6499_v25 = vmax.f32 %v6467_v23, %v6483_v4  ;;  %v6468_v18 = vld [vmem:[#allocation3 + $0x16] sm:$0xff]  ;;  %6406 = vst [vmem:[#allocation3 + $0x28] sm:$0xff] %v16610_v58 }
 0x92e   : > { %v6500_v11 = vmax.f32 %v6468_v18, %v6484_v47  ;;  %v6437_v27 = vld [vmem:[#allocation3 + $0x11] sm:$0xff]  ;;  %v17742_v47 = vld [vmem:[#allocation17_spill] sm:$0xff] }
 0x92f   : > { %v6515_v8 = vmax.f32 %v6451_v52, %v6499_v25  ;;  %v6453_v10 = vmax.f32 %v13193_v53, %v6437_v27 }
 0x930   : > { %v6516_v42 = vmax.f32 %v6452_v5, %v6500_v11  ;;  %v6336_v0 = vpop.f32.mrb[12].mxu0 }
 0x931   : > { %v6538_v44 = vadd.f32 %v16615_v20, %v6515_v8  ;;  %v16620_v49 = vadd.f32 %v6336_v0, %v15784_v2  ;;  %v12609_v56 = vpop.f32.mrb[13].mxu0 }
 0x932   : > { %v6539_v3 = vadd.f32 %v16615_v20, %v6516_v42  ;;  %v6339_v48 = vpop.f32.mrb[14].mxu0  ;;  %v6438_v33 = vld [vmem:[#allocation3 + $0x19] sm:$0xff]  ;;  %v17743_v56 = vld [vmem:[#allocation18_spill] sm:$0xff] }
 0x933   : > { %v6469_v63 = vld [vmem:[#allocation3 + $0x1e] sm:$0xff]  ;;  %6407 = vst [vmem:[#allocation3 + $0x30] sm:$0xff] %v16620_v49  ;;  %v16625_v16 = vadd.f32 %v6339_v48, %v17739_v26  ;;  %v12610_v36 = vpop.f32.mrb[15].mxu0  ;;  %v6554_v31 = vmax.f32 %v6538_v44, 0.0  ;;  %v6454_v9 = vmax.f32 %v13194_v6, %v6438_v33 }
 0x934   : > { %v6485_v13 = vld [vmem:[#allocation3 + $0x1f] sm:$0xff]  ;;  %v6555_v40 = vmax.f32 %v6539_v3, 0.0  ;;  %v6486_v2 = vld [vmem:[#allocation3 + $0x27] sm:$0xff] }
 0x935   : > { %v6501_v57 = vmax.f32 %v6469_v63, %v6485_v13  ;;  %v6470_v54 = vld [vmem:[#allocation3 + $0x26] sm:$0xff]  ;;  %6408 = vst [vmem:[#allocation3 + $0x38] sm:$0xff] %v16625_v16 }
 0x936   : > { %v6570_v39 = vpack.c.bf16 %v6555_v40, %v6554_v31  ;;  %v6502_v21 = vmax.f32 %v6470_v54, %v6486_v2  ;;  %v6439_v38 = vld [vmem:[#allocation3 + $0x21] sm:$0xff] }
 0x937   : > { %v6517_v61 = vmax.f32 %v6453_v10, %v6501_v57  ;;  %v6455_v59 = vmax.f32 %v16606_v28, %v6439_v38 }
 0x938   : > { %12631 = vmatprep.subr.bf16.mxu1 %v6570_v39  ;;  %v6518_v62 = vmax.f32 %v6454_v9, %v6502_v21  ;;  %v6344_v17 = vpop.f32.mrb[16].mxu0  ;;  %v17744_v9 = vld [vmem:[#allocation19_spill] sm:$0xff] }
 0x939   : > { %v6540_v15 = vadd.f32 %v16615_v20, %v6517_v61  ;;  %12632 = vmatpush3.bf16.msra.mxu1 %v6570_v39  ;;  %v16630_v51 = vadd.f32 %v6344_v17, %v17740_v55  ;;  %v12613_v24 = vpop.f32.mrb[17].mxu0 }
 0x93a   : > { %v6541_v32 = vadd.f32 %v16615_v20, %v6518_v62  ;;  %v6347_v29 = vpop.f32.mrb[18].mxu0  ;;  %v6440_v34 = vld [vmem:[#allocation3 + $0x29] sm:$0xff]  ;;  %v17745_v24 = vld [vmem:[#allocation20_spill] sm:$0xff] }
 0x93b   : > { %v6471_v60 = vld [vmem:[#allocation3 + $0x2e] sm:$0xff]  ;;  %6409 = vst [vmem:[#allocation3 + $0x40] sm:$0xff] %v16630_v51  ;;  %v16636_v43 = vadd.f32 %v6347_v29, %v17741_v45  ;;  %v12614_v6 = vpop.f32.mrb[19].mxu0  ;;  %v6556_v22 = vmax.f32 %v6540_v15, 0.0  ;;  %v6456_v23 = vmax.f32 %v16610_v58, %v6440_v34 }
 0x93c   : > { %v6487_v53 = vld [vmem:[#allocation3 + $0x2f] sm:$0xff]  ;;  %v6557_v14 = vmax.f32 %v6541_v32, 0.0  ;;  %v6488_v30 = vld [vmem:[#allocation3 + $0x37] sm:$0xff] }
 0x93d   : > { %v6503_v46 = vmax.f32 %v6471_v60, %v6487_v53  ;;  %v6472_v19 = vld [vmem:[#allocation3 + $0x36] sm:$0xff]  ;;  %6410 = vst [vmem:[#allocation3 + $0x48] sm:$0xff] %v16636_v43 }
 0x93e   : > { %v6571_v35 = vpack.c.bf16 %v6557_v14, %v6556_v22  ;;  %v6504_v4 = vmax.f32 %v6472_v19, %v6488_v30  ;;  %v6441_v25 = vld [vmem:[#allocation3 + $0x31] sm:$0xff] }
 0x93f   : > { %v6519_v28 = vmax.f32 %v6455_v59, %v6503_v46  ;;  %v6457_v27 = vmax.f32 %v16620_v49, %v6441_v25 }
 0x940   : > { %12633 = vmatprep.subr.bf16.mxu1 %v6571_v35  ;;  %v6520_v1 = vmax.f32 %v6456_v23, %v6504_v4  ;;  %v6352_v18 = vpop.f32.mrb[20].mxu0 }
 0x941   : > { %v6542_v52 = vadd.f32 %v16615_v20, %v6519_v28  ;;  %12634 = vmatpush3.bf16.msra.mxu1 %v6571_v35  ;;  %v16642_v5 = vadd.f32 %v6352_v18, %v17742_v47  ;;  %v12617_v11 = vpop.f32.mrb[21].mxu0 }
 0x942   : > { %v6543_v8 = vadd.f32 %v16615_v20, %v6520_v1  ;;  %v6355_v42 = vpop.f32.mrb[22].mxu0  ;;  %v6442_v44 = vld [vmem:[#allocation3 + $0x39] sm:$0xff] }
 0x943   : > { %v6473_v58 = vld [vmem:[#allocation3 + $0x3e] sm:$0xff]  ;;  %6411 = vst [vmem:[#allocation3 + $0x50] sm:$0xff] %v16642_v5  ;;  %v16648_v3 = vadd.f32 %v6355_v42, %v17743_v56  ;;  %v12618_v48 = vpop.f32.mrb[23].mxu0  ;;  %v6558_v33 = vmax.f32 %v6542_v52, 0.0  ;;  %v6458_v31 = vmax.f32 %v16625_v16, %v6442_v44 }
 0x944   : > { %v6489_v0 = vld [vmem:[#allocation3 + $0x3f] sm:$0xff]  ;;  %v6559_v10 = vmax.f32 %v6543_v8, 0.0  ;;  %v6490_v26 = vld [vmem:[#allocation3 + $0x47] sm:$0xff] }
 0x945   : > { %v6505_v63 = vmax.f32 %v6473_v58, %v6489_v0  ;;  %v6474_v13 = vld [vmem:[#allocation3 + $0x46] sm:$0xff]  ;;  %6412 = vst [vmem:[#allocation3 + $0x58] sm:$0xff] %v16648_v3 }
 0x946   : > { %v6572_v36 = vpack.c.bf16 %v6559_v10, %v6558_v33  ;;  %v6506_v40 = vmax.f32 %v6474_v13, %v6490_v26  ;;  %v6443_v2 = vld [vmem:[#allocation3 + $0x41] sm:$0xff] }
 0x947   : > { %v6521_v49 = vmax.f32 %v6457_v27, %v6505_v63  ;;  %v6459_v17 = vmax.f32 %v16630_v51, %v6443_v2 }
 0x948   : > { %12635 = vmatprep.subr.bf16.mxu1 %v6572_v36  ;;  %v6522_v57 = vmax.f32 %v6458_v31, %v6506_v40  ;;  %v6360_v39 = vpop.f32.mrb[24].mxu0 }
 0x949   : > { %v6544_v54 = vadd.f32 %v16615_v20, %v6521_v49  ;;  %12636 = vmatpush3.bf16.msra.mxu1 %v6572_v36  ;;  %v16654_v21 = vadd.f32 %v6360_v39, %v17744_v9  ;;  %v12621_v61 = vpop.f32.mrb[25].mxu0 }
 0x94a   : > { %v6545_v62 = vadd.f32 %v16615_v20, %v6522_v57  ;;  %v6363_v15 = vpop.f32.mrb[26].mxu0  ;;  %v6444_v38 = vld [vmem:[#allocation3 + $0x49] sm:$0xff] }
 0x94b   : > { %v6475_v16 = vld [vmem:[#allocation3 + $0x4e] sm:$0xff]  ;;  %6413 = vst [vmem:[#allocation3 + $0x60] sm:$0xff] %v16654_v21  ;;  %v16660_v32 = vadd.f32 %v6363_v15, %v17745_v24  ;;  %v12622_v29 = vpop.f32.mrb[27].mxu0  ;;  %v6560_v34 = vmax.f32 %v6544_v54, 0.0  ;;  %v6460_v22 = vmax.f32 %v16636_v43, %v6444_v38 }
 0x94c   : > { %v6491_v55 = vld [vmem:[#allocation3 + $0x4f] sm:$0xff]  ;;  %v6561_v59 = vmax.f32 %v6545_v62, 0.0  ;;  %v6492_v45 = vld [vmem:[#allocation3 + $0x57] sm:$0xff] }
 0x94d   : > { %v6507_v60 = vmax.f32 %v6475_v16, %v6491_v55  ;;  %v6476_v53 = vld [vmem:[#allocation3 + $0x56] sm:$0xff]  ;;  %6414 = vst [vmem:[#allocation3 + $0x68] sm:$0xff] %v16660_v32 }
 0x94e   : > { %v6573_v6 = vpack.c.bf16 %v6561_v59, %v6560_v34  ;;  %v6508_v14 = vmax.f32 %v6476_v53, %v6492_v45  ;;  %v6445_v30 = vld [vmem:[#allocation3 + $0x51] sm:$0xff] }
 0x94f   : > { %v6523_v51 = vmax.f32 %v6459_v17, %v6507_v60  ;;  %v6461_v25 = vmax.f32 %v16642_v5, %v6445_v30 }
 0x950   : > { %12637 = vmatprep.subr.bf16.mxu1 %v6573_v6  ;;  %v6524_v46 = vmax.f32 %v6460_v22, %v6508_v14  ;;  %v6368_v35 = vpop.f32.mrb[28].mxu0 }
 0x951   : > { %v6546_v19 = vadd.f32 %v16615_v20, %v6523_v51  ;;  %12638 = vmatpush3.bf16.msra.mxu1 %v6573_v6  ;;  %v16666_v23 = vadd.f32 %v6368_v35, %v15816_v37  ;;  %v12625_v4 = vpop.f32.mrb[29].mxu0 }
 0x952   : > { %v6547_v28 = vadd.f32 %v16615_v20, %v6524_v46  ;;  %v6371_v1 = vpop.f32.mrb[30].mxu0  ;;  %v6446_v52 = vld [vmem:[#allocation3 + $0x59] sm:$0xff] }
 0x953   : > { %v6477_v43 = vld [vmem:[#allocation3 + $0x5e] sm:$0xff]  ;;  %6415 = vst [vmem:[#allocation3 + $0x70] sm:$0xff] %v16666_v23  ;;  %v13206_v47 = vadd.f32 %v6371_v1, %v15818_v12  ;;  %v12626_v11 = vpop.f32.mrb[31].mxu0  ;;  %v6562_v8 = vmax.f32 %v6546_v19, 0.0  ;;  %v6462_v0 = vmax.f32 %v16648_v3, %v6446_v52  ;;  %v14191_v52 = vld [vmem:[%s17667_s6 + $0x40] sm:$0xff]  }
 0x954   : > { %v6493_v18 = vld [vmem:[#allocation3 + $0x5f] sm:$0xff]  ;;  %v6563_v42 = vmax.f32 %v6547_v28, 0.0  ;;  %v6494_v37 = vld [vmem:[#allocation3 + $0x67] sm:$0xff] }
 0x955   : > { %v6509_v44 = vmax.f32 %v6477_v43, %v6493_v18  ;;  %v6478_v27 = vld [vmem:[#allocation3 + $0x66] sm:$0xff]  ;;  %6416 = vst [vmem:[#allocation3 + $0x78] sm:$0xff] %v13206_v47  ;;  %v14195_v18 = vld [vmem:[%s17667_s6 + $0x60] sm:$0xff]  }
 0x956   : > { %v6574_v58 = vpack.c.bf16 %v6563_v42, %v6562_v8  ;;  %v6510_v56 = vmax.f32 %v6478_v27, %v6494_v37  ;;  %v6447_v10 = vld [vmem:[#allocation3 + $0x61] sm:$0xff] }
 0x957   : > { %v6525_v48 = vmax.f32 %v6461_v25, %v6509_v44  ;;  %v6463_v40 = vmax.f32 %v16654_v21, %v6447_v10  ;;  %v14193_v25 = vld [vmem:[%s17667_s6 + $0x50] sm:$0xff]   ;;  %v14194_v43 = vld [vmem:[%s17667_s6 + $0x58] sm:$0xff]   ;;  %v14203_v10 = vld [vmem:[%s17667_s6 + $0x20] sm:$0xff]  }
 0x958   : > { %12639 = vmatprep.subr.bf16.mxu1 %v6574_v58  ;;  %v6526_v5 = vmax.f32 %v6462_v0, %v6510_v56  ;;  %v6376_v63 = vpop.f32.mrb[32].mxu0  ;;  %v14197_v11 = vld [vmem:[%s17667_s6 + $0x70] sm:$0xff]   ;;  %v14198_v8 = vld [vmem:[%s17667_s6 + $0x78] sm:$0xff]   ;;  %v14199_v0 = vld [vmem:[%s17667_s6] sm:$0xff]  }
 0x959   : > { %v6548_v33 = vadd.f32 %v16615_v20, %v6525_v48  ;;  %12640 = vmatpush3.bf16.msra.mxu1 %v6574_v58  ;;  %v13207_v12 = vadd.f32 %v6376_v63, %v15824_v41  ;;  %v12629_v13 = vpop.f32.mrb[33].mxu0  ;;  %v14200_v48 = vld [vmem:[%s17667_s6 + $0x8] sm:$0xff]  }
 0x95a   : > { %v6549_v26 = vadd.f32 %v16615_v20, %v6526_v5  ;;  %v6379_v36 = vpop.f32.mrb[34].mxu0  ;;  %v6448_v31 = vld [vmem:[#allocation3 + $0x69] sm:$0xff]  ;;  %v14201_v5 = vld [vmem:[%s17667_s6 + $0x10] sm:$0xff]   ;;  %v14204_v63 = vld [vmem:[%s17667_s6 + $0x28] sm:$0xff]  }
 0x95b   : > { %v6479_v49 = vld [vmem:[#allocation3 + $0x6e] sm:$0xff]  ;;  %6417 = vst [vmem:[#allocation3 + $0x80] sm:$0xff] %v13207_v12  ;;  %v13208_v57 = vadd.f32 %v6379_v36, %v15826_v50  ;;  %v12630_v54 = vpop.f32.mrb[35].mxu0  ;;  %v6564_v2 = vmax.f32 %v6548_v33, 0.0  ;;  %v6464_v15 = vmax.f32 %v16660_v32, %v6448_v31  ;;  %v14205_v12 = vld [vmem:[%s17667_s6 + $0x30] sm:$0xff]  }
 0x95c   : > { %v6495_v3 = vld [vmem:[#allocation3 + $0x6f] sm:$0xff]  ;;  %v6565_v39 = vmax.f32 %v6549_v26, 0.0  ;;  %v6496_v62 = vld [vmem:[#allocation3 + $0x77] sm:$0xff] }
 0x95d   : > { %v6511_v9 = vmax.f32 %v6479_v49, %v6495_v3  ;;  %v6480_v61 = vld [vmem:[#allocation3 + $0x76] sm:$0xff]  ;;  %6418 = vst [vmem:[#allocation3 + $0x88] sm:$0xff] %v13208_v57  ;;  %v14202_v33 = vld [vmem:[%s17667_s6 + $0x18] sm:$0xff]   ;;  %v14209_v49 = vld [vmem:[%s17667_s6 + $0x90] sm:$0xff]  }
 0x95e   : > { %v6575_v41 = vpack.c.bf16 %v6565_v39, %v6564_v2  ;;  %v6512_v38 = vmax.f32 %v6480_v61, %v6496_v62  ;;  %v6449_v55 = vld [vmem:[#allocation3 + $0x71] sm:$0xff]  ;;  %v14206_v13 = vld [vmem:[%s17667_s6 + $0x38] sm:$0xff]   ;;  %v14213_v2 = vld [vmem:[%s17667_s6 + $0xb0] sm:$0xff]  }
 0x95f   : > { %v6527_v17 = vmax.f32 %v6463_v40, %v6511_v9  ;;  %v6465_v53 = vmax.f32 %v16666_v23, %v6449_v55  ;;  %v14190_v23 = vld [vmem:[%s17666_s5 + $0x8] sm:$0xff]   ;;  %v14207_v36 = vld [vmem:[%s17667_s6 + $0x80] sm:$0xff]   ;;  %v14210_v3 = vld [vmem:[%s17667_s6 + $0x98] sm:$0xff]  }
 0x960   : > { %12641 = vmatprep.subr.bf16.mxu1 %v6575_v41  ;;  %v6528_v16 = vmax.f32 %v6464_v15, %v6512_v38  ;;  %v14208_v40 = vld [vmem:[%s17667_s6 + $0x88] sm:$0xff]   ;;  %v14211_v57 = vld [vmem:[%s17667_s6 + $0xa0] sm:$0xff]   ;;  %v14214_v39 = vld [vmem:[%s17667_s6 + $0xb8] sm:$0xff]  }
 0x961   : > { %v6550_v21 = vadd.f32 %v16615_v20, %v6527_v17  ;;  %12642 = vmatpush3.bf16.msra.mxu1 %v6575_v41  ;;  %v14212_v54 = vld [vmem:[%s17667_s6 + $0xa8] sm:$0xff]   ;;  %v14215_v61 = vld [vmem:[%s17667_s6 + $0xc0] sm:$0xff]   ;;  %v14217_v15 = vld [vmem:[%s17667_s6 + $0xd0] sm:$0xff]  }
 0x962   : > { %v6551_v50 = vadd.f32 %v16615_v20, %v6528_v16  ;;  %v6450_v24 = vld [vmem:[#allocation3 + $0x79] sm:$0xff]  ;;  %v14218_v38 = vld [vmem:[%s17667_s6 + $0xd8] sm:$0xff]   ;;  %v14219_v17 = vld [vmem:[%s17667_s6 + $0xe0] sm:$0xff]  }
 0x963   : > { %v6481_v29 = vld [vmem:[#allocation3 + $0x7e] sm:$0xff]  ;;  %v6566_v59 = vmax.f32 %v6550_v21, 0.0  ;;  %v6466_v14 = vmax.f32 %v13206_v47, %v6450_v24  ;;  %v14222_v55 = vld [vmem:[%s17667_s6 + $0xf8] sm:$0xff]   ;;  %v14223_v24 = vld [vmem:[%s17667_s6 + $0x100] sm:$0xff]  }
 0x964   : > { %v6497_v34 = vld [vmem:[#allocation3 + $0x7f] sm:$0xff]  ;;  %v6567_v60 = vmax.f32 %v6551_v50, 0.0  ;;  %v6498_v32 = vld [vmem:[#allocation3 + $0x87] sm:$0xff] }
 0x965   : > { %v6513_v45 = vmax.f32 %v6481_v29, %v6497_v34  ;;  %v6482_v6 = vld [vmem:[#allocation3 + $0x86] sm:$0xff]  ;;  %v14196_v47 = vld [vmem:[%s17667_s6 + $0x68] sm:$0xff]  }
 0x966   : > { %v6576_v22 = vpack.c.bf16 %v6567_v60, %v6566_v59  ;;  %v6514_v51 = vmax.f32 %v6482_v6, %v6498_v32  ;;  %v14216_v41 = vld [vmem:[%s17667_s6 + $0xc8] sm:$0xff]   ;;  %v14221_v21 = vld [vmem:[%s17667_s6 + $0xf0] sm:$0xff]   ;;  %v14226_v60 = vld [vmem:[%s17667_s6 + $0x118] sm:$0xff]  }
 0x967   : > { %v6529_v46 = vmax.f32 %v6465_v53, %v6513_v45  ;;  %v14220_v16 = vld [vmem:[%s17667_s6 + $0xe8] sm:$0xff]   ;;  %v14225_v59 = vld [vmem:[%s17667_s6 + $0x110] sm:$0xff]   ;;  %v14227_v53 = vld [vmem:[%s17667_s6 + $0x120] sm:$0xff]  }
 0x968   : > { %12643 = vmatprep.subr.bf16.mxu1 %v6576_v22  ;;  %v6530_v19 = vmax.f32 %v6466_v14, %v6514_v51  ;;  %v14224_v34 = vld [vmem:[%s17667_s6 + $0x108] sm:$0xff]   ;;  %v14229_v6 = vld [vmem:[%s17667_s6 + $0x130] sm:$0xff]   ;;  %v14230_v32 = vld [vmem:[%s17667_s6 + $0x138] sm:$0xff]  }
 0x969   : > { %v6552_v30 = vadd.f32 %v16615_v20, %v6529_v46  ;;  %12644 = vmatpush3.bf16.msra.mxu1 %v6576_v22  ;;  %v14228_v45 = vld [vmem:[%s17667_s6 + $0x128] sm:$0xff]   ;;  %v14231_v14 = vld [vmem:[%s17667_s6 + $0x140] sm:$0xff]  }
 0x96a   : > { %v6553_v35 = vadd.f32 %v16615_v20, %v6530_v19  ;;  %v14192_v20 = vld [vmem:[%s17667_s6 + $0x48] sm:$0xff]   ;;  %v14233_v19 = vld [vmem:[%s17667_s6 + $0x150] sm:$0xff]  }
 0x96b   : > { %v6568_v4 = vmax.f32 %v6552_v30, 0.0  ;;  %v14232_v46 = vld [vmem:[%s17667_s6 + $0x148] sm:$0xff]   ;;  %v14234_v30 = vld [vmem:[%s17667_s6 + $0x158] sm:$0xff]  }
 0x96c   : > { %v6569_v28 = vmax.f32 %v6553_v35, 0.0  ;;  %v14235_v35 = vld [vmem:[%s17667_s6 + $0x160] sm:$0xff]  }
 0x96e   : > { %v6577_v1 = vpack.c.bf16 %v6569_v28, %v6568_v4  ;;  %v14236_v4 = vld [vmem:[%s17667_s6 + $0x168] sm:$0xff]   ;;  %v14237_v28 = vld [vmem:[%s17667_s6 + $0x170] sm:$0xff]  }
 0x970   : > { %12645 = vmatprep.subr.bf16.mxu1 %v6577_v1 }
 0x971   : > { %12646 = vmatpush3.bf16.msra.mxu1 %v6577_v1  ;;  %v14238_v1 = vld [vmem:[%s17667_s6 + $0x178] sm:$0xff]  }
 0x972   : > { %12651 = vmatprep.subr.bf16.mxu1 %v17707_v7 }
 0x974   : > { %12648 = vmatmul.mubr.bf16.vlgmr.msra.gmra.mrb[244].mxu1 %v14190_v23 }
 0x975   : > { %12652 = vmatpush3.bf16.msra.mxu1 %v14191_v52  ;;  %12667 = vmatprep.mubr.msk.bf16.mxu1 %vm14490_vm0, %v17707_v7  ;;  %v14239_v52 = vld [vmem:[%s17667_s6 + $0x180] sm:$0xff]  }
 0x976   : > { %12653 = vmatprep.subr.bf16.mxu1 %v17707_v7 }
 0x979   : > { %12654 = vmatpush3.bf16.msra.mxu1 %v14192_v20 }
 0x97a   : > { %12655 = vmatprep.subr.bf16.mxu1 %v17707_v7 }
 0x97d   : > { %12656 = vmatpush3.bf16.msra.mxu1 %v14193_v25  ;;  %v14240_v25 = vld [vmem:[%s17667_s6 + $0x188] sm:$0xff]  }
 0x97e   : > { %12657 = vmatprep.subr.bf16.mxu1 %v17707_v7 }
 0x981   : > { %12658 = vmatpush3.bf16.msra.mxu1 %v14194_v43  ;;  %v14241_v43 = vld [vmem:[%s17667_s6 + $0x190] sm:$0xff]  }
 0x982   : > { %12659 = vmatprep.subr.bf16.mxu1 %v17707_v7 }
 0x985   : > { %12660 = vmatpush3.bf16.msra.mxu1 %v14195_v18  ;;  %v14242_v18 = vld [vmem:[%s17667_s6 + $0x198] sm:$0xff]  }
 0x986   : > { %12661 = vmatprep.subr.bf16.mxu1 %v17707_v7 }
 0x989   : > { %12662 = vmatpush3.bf16.msra.mxu1 %v14196_v47  ;;  %v14243_v47 = vld [vmem:[%s17667_s6 + $0x1a0] sm:$0xff]  }
 0x98a   : > { %12663 = vmatprep.subr.bf16.mxu1 %v17707_v7 }
 0x98d   : > { %12664 = vmatpush3.bf16.msra.mxu1 %v14197_v11  ;;  %v14244_v11 = vld [vmem:[%s17667_s6 + $0x1a8] sm:$0xff]  }
 0x98e   : > { %12665 = vmatprep.subr.bf16.mxu1 %v17707_v7 }
 0x991   : > { %12666 = vmatpush3.bf16.msra.mxu1 %v14198_v8  ;;  %v14245_v8 = vld [vmem:[%s17667_s6 + $0x1b0] sm:$0xff]  }
 0x992   : > { %12671 = vmatprep.subr.bf16.mxu1 %v17707_v7 }
 0xa47   : > { %v12649_v42 = vpop.f32.mrb[244].mxu1 }
 0xa48   : > { %6645 = vst [vmem:[#allocation4 + $0x10] sm:$0xff] %v12649_v42  ;;  %v6628_v44 = vpop.f32.mrb[245].mxu1  ;;  %v14246_v42 = vld [vmem:[%s17667_s6 + $0x1b8] sm:$0xff]  }
 0xa49   : > { %6643 = vst [vmem:[#allocation4] sm:$0xff] %v6628_v44  ;;  %v12650_v27 = vpop.f32.mrb[246].mxu1 }
 0xa4a   : > { %6646 = vst [vmem:[#allocation4 + $0x18] sm:$0xff] %v12650_v27  ;;  %v6631_v37 = vpop.f32.mrb[247].mxu1  ;;  %v14247_v27 = vld [vmem:[%s17667_s6 + $0x1c0] sm:$0xff]  }
 0xa4b   : > { %6644 = vst [vmem:[#allocation4 + $0x8] sm:$0xff] %v6631_v37 }
 0xa50   : > { %v6665_v58 = vld [vmem:[#allocation4 + $0x1] sm:$0x1]  ;;  %v6647_v26 = vld [vmem:[#allocation4] sm:$0x1]  ;;  %v6860_v9 = vld [vmem:[#allocation4 + $0x2] sm:$0x1] }
 0xa51   : > { %v6666_v56 = vpack.c.bf16 %v6665_v58, %v6665_v58  ;;  %v6648_v31 = vpack.c.bf16 %v6647_v26, %v6647_v26  ;;  %v6861_v62 = vpack.c.bf16 %v6860_v9, %v6860_v9  ;;  %v6968_v50 = vld [vmem:[#allocation4 + $0x3] sm:$0x1]  ;;  %v7076_v22 = vld [vmem:[#allocation4 + $0x4] sm:$0x1]  ;;  %v7184_v23 = vld [vmem:[#allocation4 + $0x5] sm:$0x1] }
 0xa52   : > { %v6969_v29 = vpack.c.bf16 %v6968_v50, %v6968_v50  ;;  %v7077_v51 = vpack.c.bf16 %v7076_v22, %v7076_v22  ;;  %v7185_v20 = vpack.c.bf16 %v7184_v23, %v7184_v23  ;;  %v7292_v44 = vld [vmem:[#allocation4 + $0x6] sm:$0x1]  ;;  %v14248_v58 = vld [vmem:[%s17667_s6 + $0x1c8] sm:$0xff]   ;;  %v14254_v26 = vld [vmem:[%s17667_s6 + $0x1f8] sm:$0xff]  }
 0xa53   : > { %12668 = vmatmul.mubr.bf16.vlgmr.msra.gmra.mrb[248].mxu1 %v6666_v56  ;;  %v7293_v37 = vpack.c.bf16 %v7292_v44, %v7292_v44  ;;  %v14250_v56 = vld [vmem:[%s17667_s6 + $0x1d8] sm:$0xff]   ;;  %v14265_v50 = vld [vmem:[%s17667_s6 + $0x250] sm:$0xff]  }
 0xa54   : > { %12672 = vmatpush3.bf16.msra.mxu1 %v14199_v0  ;;  %12687 = vmatprep.mubr.msk.bf16.mxu1 %vm14490_vm0, %v17707_v7  ;;  %v14249_v0 = vld [vmem:[%s17667_s6 + $0x1d0] sm:$0xff]   ;;  %v14270_v22 = vld [vmem:[%s17667_s6 + $0x278] sm:$0xff]  }
 0xa55   : > { %12673 = vmatprep.subr.bf16.mxu1 %v17707_v7  ;;  %v14281_v44 = vld [vmem:[%s17667_s6 + $0x2d0] sm:$0xff]  }
 0xa58   : > { %12674 = vmatpush3.bf16.msra.mxu1 %v14200_v48  ;;  %v14251_v48 = vld [vmem:[%s17667_s6 + $0x1e0] sm:$0xff]  }
 0xa59   : > { %12675 = vmatprep.subr.bf16.mxu1 %v17707_v7 }
 0xa5c   : > { %12676 = vmatpush3.bf16.msra.mxu1 %v14201_v5  ;;  %v14252_v5 = vld [vmem:[%s17667_s6 + $0x1e8] sm:$0xff]  }
 0xa5d   : > { %12677 = vmatprep.subr.bf16.mxu1 %v17707_v7 }
 0xa60   : > { %12678 = vmatpush3.bf16.msra.mxu1 %v14202_v33 }
 0xa61   : > { %12679 = vmatprep.subr.bf16.mxu1 %v17707_v7 }
 0xa64   : > { %12680 = vmatpush3.bf16.msra.mxu1 %v14203_v10 }
 0xa65   : > { %12681 = vmatprep.subr.bf16.mxu1 %v17707_v7 }
 0xa68   : > { %12682 = vmatpush3.bf16.msra.mxu1 %v14204_v63  ;;  %v14253_v63 = vld [vmem:[%s17667_s6 + $0x1f0] sm:$0xff]  }
 0xa69   : > { %12683 = vmatprep.subr.bf16.mxu1 %v17707_v7 }
 0xa6c   : > { %12684 = vmatpush3.bf16.msra.mxu1 %v14205_v12 }
 0xa6d   : > { %12685 = vmatprep.subr.bf16.mxu1 %v17707_v7 }
 0xa70   : > { %12686 = vmatpush3.bf16.msra.mxu1 %v14206_v13 }
 0xa71   : > { %12691 = vmatprep.subr.bf16.mxu1 %v17707_v7 }
 0xa73   : > { %12688 = vmatmul.mubr.bf16.vlgmr.msra.gmra.mrb[252].mxu1 %v6648_v31  ;;  %v14255_v31 = vld [vmem:[%s17667_s6 + $0x200] sm:$0xff]  }
 0xa74   : > { %12692 = vmatpush3.bf16.msra.mxu1 %v14207_v36  ;;  %12707 = vmatprep.mubr.msk.bf16.mxu1 %vm14490_vm0, %v17707_v7  ;;  %v7400_v36 = vld [vmem:[#allocation4 + $0x7] sm:$0x1] }
 0xa75   : > { %12693 = vmatprep.subr.bf16.mxu1 %v17707_v7 }
 0xa78   : > { %12694 = vmatpush3.bf16.msra.mxu1 %v14208_v40  ;;  %v7401_v40 = vpack.c.bf16 %v7400_v36, %v7400_v36  ;;  %v14288_v36 = vld [vmem:[%s17667_s6 + $0x308] sm:$0xff]  }
 0xa79   : > { %12695 = vmatprep.subr.bf16.mxu1 %v17707_v7 }
 0xa7c   : > { %12696 = vmatpush3.bf16.msra.mxu1 %v14209_v49  ;;  %v14256_v49 = vld [vmem:[%s17667_s6 + $0x208] sm:$0xff]  }
 0xa7d   : > { %12697 = vmatprep.subr.bf16.mxu1 %v17707_v7 }
 0xa80   : > { %12698 = vmatpush3.bf16.msra.mxu1 %v14210_v3  ;;  %v14257_v3 = vld [vmem:[%s17667_s6 + $0x210] sm:$0xff]  }
 0xa81   : > { %12699 = vmatprep.subr.bf16.mxu1 %v17707_v7 }
 0xa84   : > { %12700 = vmatpush3.bf16.msra.mxu1 %v14211_v57  ;;  %v14258_v57 = vld [vmem:[%s17667_s6 + $0x218] sm:$0xff]  }
 0xa85   : > { %12701 = vmatprep.subr.bf16.mxu1 %v17707_v7 }
 0xa88   : > { %12702 = vmatpush3.bf16.msra.mxu1 %v14212_v54  ;;  %v14259_v54 = vld [vmem:[%s17667_s6 + $0x220] sm:$0xff]  }
 0xa89   : > { %12703 = vmatprep.subr.bf16.mxu1 %v17707_v7 }
 0xa8c   : > { %12704 = vmatpush3.bf16.msra.mxu1 %v14213_v2  ;;  %v14260_v2 = vld [vmem:[%s17667_s6 + $0x228] sm:$0xff]  }
 0xa8d   : > { %12705 = vmatprep.subr.bf16.mxu1 %v17707_v7 }
 0xa90   : > { %12706 = vmatpush3.bf16.msra.mxu1 %v14214_v39 }
 0xa91   : > { %12711 = vmatprep.subr.bf16.mxu1 %v17707_v7 }
 0xa93   : > { %12708 = vmatmul.mubr.bf16.vlgmr.msra.gmra.mrb[0].mxu1 %v6861_v62 }
 0xa94   : > { %12712 = vmatpush3.bf16.msra.mxu1 %v14215_v61  ;;  %12727 = vmatprep.mubr.msk.bf16.mxu1 %vm14490_vm0, %v17707_v7 }
 0xa95   : > { %12713 = vmatprep.subr.bf16.mxu1 %v17707_v7 }
 0xa98   : > { %12714 = vmatpush3.bf16.msra.mxu1 %v14216_v41  ;;  %v14261_v41 = vld [vmem:[%s17667_s6 + $0x230] sm:$0xff]  }
 0xa99   : > { %12715 = vmatprep.subr.bf16.mxu1 %v17707_v7 }
 0xa9c   : > { %12716 = vmatpush3.bf16.msra.mxu1 %v14217_v15 }
 0xa9d   : > { %12717 = vmatprep.subr.bf16.mxu1 %v17707_v7 }
 0xaa0   : > { %12718 = vmatpush3.bf16.msra.mxu1 %v14218_v38  ;;  %v14262_v38 = vld [vmem:[%s17667_s6 + $0x238] sm:$0xff]  }
 0xaa1   : > { %12719 = vmatprep.subr.bf16.mxu1 %v17707_v7 }
 0xaa4   : > { %12720 = vmatpush3.bf16.msra.mxu1 %v14219_v17  ;;  %v7508_v17 = vld [vmem:[#allocation4 + $0x8] sm:$0x1] }
 0xaa5   : > { %12721 = vmatprep.subr.bf16.mxu1 %v17707_v7 }
 0xaa8   : > { %12722 = vmatpush3.bf16.msra.mxu1 %v14220_v16  ;;  %v14263_v16 = vld [vmem:[%s17667_s6 + $0x240] sm:$0xff]  }
 0xaa9   : > { %12723 = vmatprep.subr.bf16.mxu1 %v17707_v7 }
 0xaac   : > { %12724 = vmatpush3.bf16.msra.mxu1 %v14221_v21  ;;  %v7509_v21 = vpack.c.bf16 %v7508_v17, %v7508_v17  ;;  %v14296_v17 = vld [vmem:[%s17667_s6 + $0x348] sm:$0xff]  }
 0xaad   : > { %12725 = vmatprep.subr.bf16.mxu1 %v17707_v7 }
 0xab0   : > { %12726 = vmatpush3.bf16.msra.mxu1 %v14222_v55  ;;  %v14264_v55 = vld [vmem:[%s17667_s6 + $0x248] sm:$0xff]  }
 0xab1   : > { %12731 = vmatprep.subr.bf16.mxu1 %v17707_v7 }
 0xab3   : > { %12728 = vmatmul.mubr.bf16.vlgmr.msra.gmra.mrb[4].mxu1 %v6969_v29  ;;  %v14267_v29 = vld [vmem:[%s17667_s6 + $0x260] sm:$0xff]  }
 0xab4   : > { %12732 = vmatpush3.bf16.msra.mxu1 %v14223_v24  ;;  %12747 = vmatprep.mubr.msk.bf16.mxu1 %vm14490_vm0, %v17707_v7  ;;  %v14266_v24 = vld [vmem:[%s17667_s6 + $0x258] sm:$0xff]  }
 0xab5   : > { %12733 = vmatprep.subr.bf16.mxu1 %v17707_v7 }
 0xab8   : > { %12734 = vmatpush3.bf16.msra.mxu1 %v14224_v34  ;;  %v14268_v34 = vld [vmem:[%s17667_s6 + $0x268] sm:$0xff]  }
 0xab9   : > { %12735 = vmatprep.subr.bf16.mxu1 %v17707_v7 }
 0xabc   : > { %12736 = vmatpush3.bf16.msra.mxu1 %v14225_v59 }
 0xabd   : > { %12737 = vmatprep.subr.bf16.mxu1 %v17707_v7 }
 0xac0   : > { %12738 = vmatpush3.bf16.msra.mxu1 %v14226_v60 }
 0xac1   : > { %12739 = vmatprep.subr.bf16.mxu1 %v17707_v7 }
 0xac4   : > { %12740 = vmatpush3.bf16.msra.mxu1 %v14227_v53 }
 0xac5   : > { %12741 = vmatprep.subr.bf16.mxu1 %v17707_v7 }
 0xac8   : > { %12742 = vmatpush3.bf16.msra.mxu1 %v14228_v45 }
 0xac9   : > { %12743 = vmatprep.subr.bf16.mxu1 %v17707_v7 }
 0xacc   : > { %12744 = vmatpush3.bf16.msra.mxu1 %v14229_v6  ;;  %v14269_v6 = vld [vmem:[%s17667_s6 + $0x270] sm:$0xff]  }
 0xacd   : > { %12745 = vmatprep.subr.bf16.mxu1 %v17707_v7 }
 0xad0   : > { %12746 = vmatpush3.bf16.msra.mxu1 %v14230_v32 }
 0xad1   : > { %12751 = vmatprep.subr.bf16.mxu1 %v17707_v7 }
 0xad3   : > { %12748 = vmatmul.mubr.bf16.vlgmr.msra.gmra.mrb[8].mxu1 %v7077_v51  ;;  %v14271_v51 = vld [vmem:[%s17667_s6 + $0x280] sm:$0xff]  }
 0xad4   : > { %12752 = vmatpush3.bf16.msra.mxu1 %v14231_v14  ;;  %12767 = vmatprep.mubr.msk.bf16.mxu1 %vm14490_vm0, %v17707_v7  ;;  %v7616_v14 = vld [vmem:[#allocation4 + $0x9] sm:$0x1] }
 0xad5   : > { %12753 = vmatprep.subr.bf16.mxu1 %v17707_v7 }
 0xad8   : > { %12754 = vmatpush3.bf16.msra.mxu1 %v14232_v46  ;;  %v7617_v46 = vpack.c.bf16 %v7616_v14, %v7616_v14  ;;  %v14304_v14 = vld [vmem:[%s17667_s6 + $0x388] sm:$0xff]  }
 0xad9   : > { %12755 = vmatprep.subr.bf16.mxu1 %v17707_v7 }
 0xadc   : > { %12756 = vmatpush3.bf16.msra.mxu1 %v14233_v19  ;;  %v14272_v19 = vld [vmem:[%s17667_s6 + $0x288] sm:$0xff]  }
 0xadd   : > { %12757 = vmatprep.subr.bf16.mxu1 %v17707_v7 }
 0xae0   : > { %12758 = vmatpush3.bf16.msra.mxu1 %v14234_v30  ;;  %v14273_v30 = vld [vmem:[%s17667_s6 + $0x290] sm:$0xff]  }
 0xae1   : > { %12759 = vmatprep.subr.bf16.mxu1 %v17707_v7 }
 0xae4   : > { %12760 = vmatpush3.bf16.msra.mxu1 %v14235_v35  ;;  %v14274_v35 = vld [vmem:[%s17667_s6 + $0x298] sm:$0xff]  }
 0xae5   : > { %12761 = vmatprep.subr.bf16.mxu1 %v17707_v7 }
 0xae8   : > { %12762 = vmatpush3.bf16.msra.mxu1 %v14236_v4  ;;  %v14275_v4 = vld [vmem:[%s17667_s6 + $0x2a0] sm:$0xff]  }
 0xae9   : > { %12763 = vmatprep.subr.bf16.mxu1 %v17707_v7 }
 0xaec   : > { %12764 = vmatpush3.bf16.msra.mxu1 %v14237_v28  ;;  %v14276_v28 = vld [vmem:[%s17667_s6 + $0x2a8] sm:$0xff]  }
 0xaed   : > { %12765 = vmatprep.subr.bf16.mxu1 %v17707_v7 }
 0xaf0   : > { %12766 = vmatpush3.bf16.msra.mxu1 %v14238_v1 }
 0xaf1   : > { %12771 = vmatprep.subr.bf16.mxu1 %v17707_v7 }
 0xaf3   : > { %12768 = vmatmul.mubr.bf16.vlgmr.msra.gmra.mrb[12].mxu1 %v7185_v20 }
 0xaf4   : > { %12772 = vmatpush3.bf16.msra.mxu1 %v14239_v52  ;;  %12787 = vmatprep.mubr.msk.bf16.mxu1 %vm14490_vm0, %v17707_v7 }
 0xaf5   : > { %12773 = vmatprep.subr.bf16.mxu1 %v17707_v7 }
 0xaf8   : > { %12774 = vmatpush3.bf16.msra.mxu1 %v14240_v25  ;;  %v14277_v25 = vld [vmem:[%s17667_s6 + $0x2b0] sm:$0xff]  }
 0xaf9   : > { %12775 = vmatprep.subr.bf16.mxu1 %v17707_v7 }
 0xafc   : > { %12776 = vmatpush3.bf16.msra.mxu1 %v14241_v43 }
 0xafd   : > { %12777 = vmatprep.subr.bf16.mxu1 %v17707_v7 }
 0xb00   : > { %12778 = vmatpush3.bf16.msra.mxu1 %v14242_v18  ;;  %v14278_v18 = vld [vmem:[%s17667_s6 + $0x2b8] sm:$0xff]  }
 0xb01   : > { %12779 = vmatprep.subr.bf16.mxu1 %v17707_v7 }
 0xb04   : > { %12780 = vmatpush3.bf16.msra.mxu1 %v14243_v47  ;;  %v7724_v47 = vld [vmem:[#allocation4 + $0xa] sm:$0x1] }
 0xb05   : > { %12781 = vmatprep.subr.bf16.mxu1 %v17707_v7 }
 0xb08   : > { %12782 = vmatpush3.bf16.msra.mxu1 %v14244_v11  ;;  %v14279_v11 = vld [vmem:[%s17667_s6 + $0x2c0] sm:$0xff]  }
 0xb09   : > { %12783 = vmatprep.subr.bf16.mxu1 %v17707_v7 }
 0xb0c   : > { %12784 = vmatpush3.bf16.msra.mxu1 %v14245_v8  ;;  %v7725_v8 = vpack.c.bf16 %v7724_v47, %v7724_v47  ;;  %v14312_v47 = vld [vmem:[%s17667_s6 + $0x3c8] sm:$0xff]  }
 0xb0d   : > { %12785 = vmatprep.subr.bf16.mxu1 %v17707_v7 }
 0xb10   : > { %12786 = vmatpush3.bf16.msra.mxu1 %v14246_v42  ;;  %v14280_v42 = vld [vmem:[%s17667_s6 + $0x2c8] sm:$0xff]  }
 0xb11   : > { %12791 = vmatprep.subr.bf16.mxu1 %v17707_v7 }
 0xb13   : > { %12788 = vmatmul.mubr.bf16.vlgmr.msra.gmra.mrb[16].mxu1 %v7293_v37  ;;  %v14283_v37 = vld [vmem:[%s17667_s6 + $0x2e0] sm:$0xff]  }
 0xb14   : > { %12792 = vmatpush3.bf16.msra.mxu1 %v14247_v27  ;;  %12807 = vmatprep.mubr.msk.bf16.mxu1 %vm14490_vm0, %v17707_v7  ;;  %v14282_v27 = vld [vmem:[%s17667_s6 + $0x2d8] sm:$0xff]  }
 0xb15   : > { %12793 = vmatprep.subr.bf16.mxu1 %v17707_v7 }
 0xb18   : > { %12794 = vmatpush3.bf16.msra.mxu1 %v14248_v58  ;;  %v14284_v58 = vld [vmem:[%s17667_s6 + $0x2e8] sm:$0xff]  }
 0xb19   : > { %12795 = vmatprep.subr.bf16.mxu1 %v17707_v7 }
 0xb1c   : > { %12796 = vmatpush3.bf16.msra.mxu1 %v14249_v0 }
 0xb1d   : > { %12797 = vmatprep.subr.bf16.mxu1 %v17707_v7 }
 0xb20   : > { %12798 = vmatpush3.bf16.msra.mxu1 %v14250_v56 }
 0xb21   : > { %12799 = vmatprep.subr.bf16.mxu1 %v17707_v7 }
 0xb24   : > { %12800 = vmatpush3.bf16.msra.mxu1 %v14251_v48 }
 0xb25   : > { %12801 = vmatprep.subr.bf16.mxu1 %v17707_v7 }
 0xb26   : > { %v6766_v33 = vpop.f32.mrb[248].mxu1 }
 0xb27   : > { %v12669_v10 = vpop.f32.mrb[249].mxu1 }
 0xb28   : > { %12802 = vmatpush3.bf16.msra.mxu1 %v14252_v5  ;;  %v6769_v12 = vpop.f32.mrb[250].mxu1 }
 0xb29   : > { %12803 = vmatprep.subr.bf16.mxu1 %v17707_v7  ;;  %v12670_v13 = vpop.f32.mrb[251].mxu1  ;;  %v7832_v12 = vld [vmem:[#allocation4 + $0xb] sm:$0x1] }
 0xb2a   : > { %v14287_v13 = vld [vmem:[%s17667_s6 + $0x300] sm:$0xff]  }
 0xb2c   : > { %12804 = vmatpush3.bf16.msra.mxu1 %v14253_v63  ;;  %v14286_v63 = vld [vmem:[%s17667_s6 + $0x2f8] sm:$0xff]  }
 0xb2d   : > { %12805 = vmatprep.subr.bf16.mxu1 %v17707_v7 }
 0xb30   : > { %12806 = vmatpush3.bf16.msra.mxu1 %v14254_v26  ;;  %v7833_v26 = vpack.c.bf16 %v7832_v12, %v7832_v12  ;;  %v14320_v12 = vld [vmem:[%s17667_s6 + $0x408] sm:$0xff]  }
 0xb31   : > { %12811 = vmatprep.subr.bf16.mxu1 %v17707_v7 }
 0xb33   : > { %12808 = vmatmul.mubr.bf16.vlgmr.msra.gmra.mrb[20].mxu1 %v7401_v40  ;;  %v14290_v40 = vld [vmem:[%s17667_s6 + $0x318] sm:$0xff]  }
 0xb34   : > { %12812 = vmatpush3.bf16.msra.mxu1 %v14255_v31  ;;  %12827 = vmatprep.mubr.msk.bf16.mxu1 %vm14490_vm0, %v17707_v7  ;;  %v14289_v31 = vld [vmem:[%s17667_s6 + $0x310] sm:$0xff]  }
 0xb35   : > { %12813 = vmatprep.subr.bf16.mxu1 %v17707_v7 }
 0xb38   : > { %12814 = vmatpush3.bf16.msra.mxu1 %v14256_v49  ;;  %v14291_v49 = vld [vmem:[%s17667_s6 + $0x320] sm:$0xff]  }
 0xb39   : > { %12815 = vmatprep.subr.bf16.mxu1 %v17707_v7 }
 0xb3c   : > { %12816 = vmatpush3.bf16.msra.mxu1 %v14257_v3  ;;  %v14292_v3 = vld [vmem:[%s17667_s6 + $0x328] sm:$0xff]  }
 0xb3d   : > { %12817 = vmatprep.subr.bf16.mxu1 %v17707_v7 }
 0xb40   : > { %12818 = vmatpush3.bf16.msra.mxu1 %v14258_v57 }
 0xb41   : > { %12819 = vmatprep.subr.bf16.mxu1 %v17707_v7 }
 0xb44   : > { %12820 = vmatpush3.bf16.msra.mxu1 %v14259_v54 }
 0xb45   : > { %12821 = vmatprep.subr.bf16.mxu1 %v17707_v7 }
 0xb46   : > { %v6854_v39 = vpop.f32.mrb[252].mxu1 }
 0xb47   : > { %v6855_v9 = vadd.f32 %v6854_v39, %v6766_v33  ;;  %v12689_v61 = vpop.f32.mrb[253].mxu1  ;;  %v14285_v33 = vld [vmem:[%s17667_s6 + $0x2f0] sm:$0xff]  }
 0xb48   : > { %v6857_v62 = vpop.f32.mrb[254].mxu1  ;;  %12822 = vmatpush3.bf16.msra.mxu1 %v14260_v2 }
 0xb49   : > { %v12690_v15 = vpop.f32.mrb[255].mxu1  ;;  %12823 = vmatprep.subr.bf16.mxu1 %v17707_v7  ;;  %v14294_v62 = vld [vmem:[%s17667_s6 + $0x338] sm:$0xff]  }
 0xb4a   : > { %v14295_v15 = vld [vmem:[%s17667_s6 + $0x340] sm:$0xff]  }
 0xb4c   : > { %12824 = vmatpush3.bf16.msra.mxu1 %v14261_v41  ;;  %v7940_v41 = vld [vmem:[#allocation4 + $0xc] sm:$0x1] }
 0xb4d   : > { %12825 = vmatprep.subr.bf16.mxu1 %v17707_v7 }
 0xb50   : > { %12826 = vmatpush3.bf16.msra.mxu1 %v14262_v38  ;;  %v7941_v38 = vpack.c.bf16 %v7940_v41, %v7940_v41  ;;  %v14328_v41 = vld [vmem:[%s17667_s6 + $0x448] sm:$0xff]  }
 0xb51   : > { %12831 = vmatprep.subr.bf16.mxu1 %v17707_v7 }
 0xb53   : > { %12828 = vmatmul.mubr.bf16.vlgmr.msra.gmra.mrb[24].mxu1 %v7509_v21  ;;  %v14298_v21 = vld [vmem:[%s17667_s6 + $0x358] sm:$0xff]  }
 0xb54   : > { %12832 = vmatpush3.bf16.msra.mxu1 %v14263_v16  ;;  %12847 = vmatprep.mubr.msk.bf16.mxu1 %vm14490_vm0, %v17707_v7  ;;  %v14297_v16 = vld [vmem:[%s17667_s6 + $0x350] sm:$0xff]  }
 0xb55   : > { %12833 = vmatprep.subr.bf16.mxu1 %v17707_v7 }
 0xb58   : > { %12834 = vmatpush3.bf16.msra.mxu1 %v14264_v55  ;;  %v14299_v55 = vld [vmem:[%s17667_s6 + $0x360] sm:$0xff]  }
 0xb59   : > { %12835 = vmatprep.subr.bf16.mxu1 %v17707_v7 }
 0xb5c   : > { %12836 = vmatpush3.bf16.msra.mxu1 %v14265_v50  ;;  %v14300_v50 = vld [vmem:[%s17667_s6 + $0x368] sm:$0xff]  }
 0xb5d   : > { %12837 = vmatprep.subr.bf16.mxu1 %v17707_v7 }
 0xb60   : > { %12838 = vmatpush3.bf16.msra.mxu1 %v14266_v24 }
 0xb61   : > { %12839 = vmatprep.subr.bf16.mxu1 %v17707_v7 }
 0xb64   : > { %12840 = vmatpush3.bf16.msra.mxu1 %v14267_v29 }
 0xb65   : > { %12841 = vmatprep.subr.bf16.mxu1 %v17707_v7 }
 0xb66   : > { %v6961_v59 = vpop.f32.mrb[0].mxu1 }
 0xb67   : > { %v6967_v60 = vadd.f32 %v6961_v59, %v6855_v9  ;;  %v12709_v53 = vpop.f32.mrb[1].mxu1  ;;  %v14293_v9 = vld [vmem:[%s17667_s6 + $0x330] sm:$0xff]  }
 0xb68   : > { %v6964_v45 = vpop.f32.mrb[2].mxu1  ;;  %12842 = vmatpush3.bf16.msra.mxu1 %v14268_v34 }
 0xb69   : > { %v12710_v32 = vpop.f32.mrb[3].mxu1  ;;  %12843 = vmatprep.subr.bf16.mxu1 %v17707_v7  ;;  %v14302_v45 = vld [vmem:[%s17667_s6 + $0x378] sm:$0xff]  }
 0xb6a   : > { %v14303_v32 = vld [vmem:[%s17667_s6 + $0x380] sm:$0xff]  }
 0xb6c   : > { %12844 = vmatpush3.bf16.msra.mxu1 %v14269_v6  ;;  %v8048_v6 = vld [vmem:[#allocation4 + $0xd] sm:$0x1] }
 0xb6d   : > { %12845 = vmatprep.subr.bf16.mxu1 %v17707_v7 }
 0xb70   : > { %12846 = vmatpush3.bf16.msra.mxu1 %v14270_v22  ;;  %v8049_v22 = vpack.c.bf16 %v8048_v6, %v8048_v6  ;;  %v14336_v6 = vld [vmem:[%s17667_s6 + $0x488] sm:$0xff]  }
 0xb71   : > { %12851 = vmatprep.subr.bf16.mxu1 %v17707_v7 }
 0xb73   : > { %12848 = vmatmul.mubr.bf16.vlgmr.msra.gmra.mrb[28].mxu1 %v7617_v46  ;;  %v14306_v46 = vld [vmem:[%s17667_s6 + $0x398] sm:$0xff]  }
 0xb74   : > { %12852 = vmatpush3.bf16.msra.mxu1 %v14271_v51  ;;  %12867 = vmatprep.mubr.msk.bf16.mxu1 %vm14490_vm0, %v17707_v7  ;;  %v14305_v51 = vld [vmem:[%s17667_s6 + $0x390] sm:$0xff]  }
 0xb75   : > { %12853 = vmatprep.subr.bf16.mxu1 %v17707_v7 }
 0xb78   : > { %12854 = vmatpush3.bf16.msra.mxu1 %v14272_v19  ;;  %v14307_v19 = vld [vmem:[%s17667_s6 + $0x3a0] sm:$0xff]  }
 0xb79   : > { %12855 = vmatprep.subr.bf16.mxu1 %v17707_v7 }
 0xb7c   : > { %12856 = vmatpush3.bf16.msra.mxu1 %v14273_v30  ;;  %v14308_v30 = vld [vmem:[%s17667_s6 + $0x3a8] sm:$0xff]  }
 0xb7d   : > { %12857 = vmatprep.subr.bf16.mxu1 %v17707_v7 }
 0xb80   : > { %12858 = vmatpush3.bf16.msra.mxu1 %v14274_v35 }
 0xb81   : > { %12859 = vmatprep.subr.bf16.mxu1 %v17707_v7 }
 0xb84   : > { %12860 = vmatpush3.bf16.msra.mxu1 %v14275_v4 }
 0xb85   : > { %12861 = vmatprep.subr.bf16.mxu1 %v17707_v7 }
 0xb86   : > { %v7069_v1 = vpop.f32.mrb[4].mxu1 }
 0xb87   : > { %v7075_v23 = vadd.f32 %v7069_v1, %v6967_v60  ;;  %v12729_v52 = vpop.f32.mrb[5].mxu1  ;;  %v14301_v60 = vld [vmem:[%s17667_s6 + $0x370] sm:$0xff]  }
 0xb88   : > { %v7072_v20 = vpop.f32.mrb[6].mxu1  ;;  %12862 = vmatpush3.bf16.msra.mxu1 %v14276_v28 }
 0xb89   : > { %v12730_v43 = vpop.f32.mrb[7].mxu1  ;;  %12863 = vmatprep.subr.bf16.mxu1 %v17707_v7  ;;  %v14310_v20 = vld [vmem:[%s17667_s6 + $0x3b8] sm:$0xff]  }
 0xb8a   : > { %v14311_v43 = vld [vmem:[%s17667_s6 + $0x3c0] sm:$0xff]  }
 0xb8c   : > { %12864 = vmatpush3.bf16.msra.mxu1 %v14277_v25  ;;  %v8156_v25 = vld [vmem:[#allocation4 + $0xe] sm:$0x1] }
 0xb8d   : > { %12865 = vmatprep.subr.bf16.mxu1 %v17707_v7 }
 0xb90   : > { %12866 = vmatpush3.bf16.msra.mxu1 %v14278_v18  ;;  %v8157_v18 = vpack.c.bf16 %v8156_v25, %v8156_v25  ;;  %v14344_v25 = vld [vmem:[%s17667_s6 + $0x4c8] sm:$0xff]  }
 0xb91   : > { %12871 = vmatprep.subr.bf16.mxu1 %v17707_v7 }
 0xb93   : > { %12868 = vmatmul.mubr.bf16.vlgmr.msra.gmra.mrb[32].mxu1 %v7725_v8  ;;  %v14314_v8 = vld [vmem:[%s17667_s6 + $0x3d8] sm:$0xff]  }
 0xb94   : > { %12872 = vmatpush3.bf16.msra.mxu1 %v14279_v11  ;;  %12887 = vmatprep.mubr.msk.bf16.mxu1 %vm14490_vm0, %v17707_v7  ;;  %v14313_v11 = vld [vmem:[%s17667_s6 + $0x3d0] sm:$0xff]  }
 0xb95   : > { %12873 = vmatprep.subr.bf16.mxu1 %v17707_v7 }
 0xb98   : > { %12874 = vmatpush3.bf16.msra.mxu1 %v14280_v42  ;;  %v14315_v42 = vld [vmem:[%s17667_s6 + $0x3e0] sm:$0xff]  }
 0xb99   : > { %12875 = vmatprep.subr.bf16.mxu1 %v17707_v7 }
 0xb9c   : > { %12876 = vmatpush3.bf16.msra.mxu1 %v14281_v44  ;;  %v14316_v44 = vld [vmem:[%s17667_s6 + $0x3e8] sm:$0xff]  }
 0xb9d   : > { %12877 = vmatprep.subr.bf16.mxu1 %v17707_v7 }
 0xba0   : > { %12878 = vmatpush3.bf16.msra.mxu1 %v14282_v27 }
 0xba1   : > { %12879 = vmatprep.subr.bf16.mxu1 %v17707_v7 }
 0xba4   : > { %12880 = vmatpush3.bf16.msra.mxu1 %v14283_v37 }
 0xba5   : > { %12881 = vmatprep.subr.bf16.mxu1 %v17707_v7 }
 0xba6   : > { %v7177_v0 = vpop.f32.mrb[8].mxu1 }
 0xba7   : > { %v7183_v56 = vadd.f32 %v7177_v0, %v7075_v23  ;;  %v12749_v48 = vpop.f32.mrb[9].mxu1  ;;  %v14309_v23 = vld [vmem:[%s17667_s6 + $0x3b0] sm:$0xff]  }
 0xba8   : > { %v7180_v5 = vpop.f32.mrb[10].mxu1  ;;  %12882 = vmatpush3.bf16.msra.mxu1 %v14284_v58 }
 0xba9   : > { %v12750_v10 = vpop.f32.mrb[11].mxu1  ;;  %12883 = vmatprep.subr.bf16.mxu1 %v17707_v7  ;;  %v14318_v5 = vld [vmem:[%s17667_s6 + $0x3f8] sm:$0xff]  }
 0xbaa   : > { %v14319_v10 = vld [vmem:[%s17667_s6 + $0x400] sm:$0xff]  }
 0xbac   : > { %12884 = vmatpush3.bf16.msra.mxu1 %v14285_v33  ;;  %v8264_v33 = vld [vmem:[#allocation4 + $0xf] sm:$0x1] }
 0xbad   : > { %12885 = vmatprep.subr.bf16.mxu1 %v17707_v7 }
 0xbb0   : > { %12886 = vmatpush3.bf16.msra.mxu1 %v14286_v63  ;;  %v8265_v63 = vpack.c.bf16 %v8264_v33, %v8264_v33  ;;  %v14352_v33 = vld [vmem:[%s17667_s6 + $0x508] sm:$0xff]  }
 0xbb1   : > { %12891 = vmatprep.subr.bf16.mxu1 %v17707_v7 }
 0xbb3   : > { %12888 = vmatmul.mubr.bf16.vlgmr.msra.gmra.mrb[36].mxu1 %v7833_v26  ;;  %v14322_v26 = vld [vmem:[%s17667_s6 + $0x418] sm:$0xff]  }
 0xbb4   : > { %12892 = vmatpush3.bf16.msra.mxu1 %v14287_v13  ;;  %12907 = vmatprep.mubr.msk.bf16.mxu1 %vm14490_vm0, %v17707_v7  ;;  %v14321_v13 = vld [vmem:[%s17667_s6 + $0x410] sm:$0xff]  }
 0xbb5   : > { %12893 = vmatprep.subr.bf16.mxu1 %v17707_v7 }
 0xbb8   : > { %12894 = vmatpush3.bf16.msra.mxu1 %v14288_v36  ;;  %v14323_v36 = vld [vmem:[%s17667_s6 + $0x420] sm:$0xff]  }
 0xbb9   : > { %12895 = vmatprep.subr.bf16.mxu1 %v17707_v7 }
 0xbbc   : > { %12896 = vmatpush3.bf16.msra.mxu1 %v14289_v31  ;;  %v14324_v31 = vld [vmem:[%s17667_s6 + $0x428] sm:$0xff]  }
 0xbbd   : > { %12897 = vmatprep.subr.bf16.mxu1 %v17707_v7 }
 0xbc0   : > { %12898 = vmatpush3.bf16.msra.mxu1 %v14290_v40 }
 0xbc1   : > { %12899 = vmatprep.subr.bf16.mxu1 %v17707_v7 }
 0xbc4   : > { %12900 = vmatpush3.bf16.msra.mxu1 %v14291_v49 }
 0xbc5   : > { %12901 = vmatprep.subr.bf16.mxu1 %v17707_v7 }
 0xbc6   : > { %v7285_v57 = vpop.f32.mrb[12].mxu1 }
 0xbc7   : > { %v7291_v54 = vadd.f32 %v7285_v57, %v7183_v56  ;;  %v12769_v2 = vpop.f32.mrb[13].mxu1  ;;  %v14317_v56 = vld [vmem:[%s17667_s6 + $0x3f0] sm:$0xff]  }
 0xbc8   : > { %v7288_v39 = vpop.f32.mrb[14].mxu1  ;;  %12902 = vmatpush3.bf16.msra.mxu1 %v14292_v3 }
 0xbc9   : > { %v12770_v61 = vpop.f32.mrb[15].mxu1  ;;  %12903 = vmatprep.subr.bf16.mxu1 %v17707_v7  ;;  %v14326_v39 = vld [vmem:[%s17667_s6 + $0x438] sm:$0xff]  }
 0xbca   : > { %v14327_v61 = vld [vmem:[%s17667_s6 + $0x440] sm:$0xff]  }
 0xbcc   : > { %12904 = vmatpush3.bf16.msra.mxu1 %v14293_v9  ;;  %v8372_v9 = vld [vmem:[#allocation4 + $0x10] sm:$0x1] }
 0xbcd   : > { %12905 = vmatprep.subr.bf16.mxu1 %v17707_v7 }
 0xbd0   : > { %12906 = vmatpush3.bf16.msra.mxu1 %v14294_v62  ;;  %v8373_v62 = vpack.c.bf16 %v8372_v9, %v8372_v9  ;;  %v14360_v9 = vld [vmem:[%s17667_s6 + $0x548] sm:$0xff]  }
 0xbd1   : > { %12911 = vmatprep.subr.bf16.mxu1 %v17707_v7 }
 0xbd3   : > { %12908 = vmatmul.mubr.bf16.vlgmr.msra.gmra.mrb[40].mxu1 %v7941_v38  ;;  %v14330_v38 = vld [vmem:[%s17667_s6 + $0x458] sm:$0xff]  }
 0xbd4   : > { %12912 = vmatpush3.bf16.msra.mxu1 %v14295_v15  ;;  %12927 = vmatprep.mubr.msk.bf16.mxu1 %vm14490_vm0, %v17707_v7  ;;  %v14329_v15 = vld [vmem:[%s17667_s6 + $0x450] sm:$0xff]  }
 0xbd5   : > { %12913 = vmatprep.subr.bf16.mxu1 %v17707_v7 }
 0xbd8   : > { %12914 = vmatpush3.bf16.msra.mxu1 %v14296_v17  ;;  %v14331_v17 = vld [vmem:[%s17667_s6 + $0x460] sm:$0xff]  }
 0xbd9   : > { %12915 = vmatprep.subr.bf16.mxu1 %v17707_v7 }
 0xbdc   : > { %12916 = vmatpush3.bf16.msra.mxu1 %v14297_v16  ;;  %v14332_v16 = vld [vmem:[%s17667_s6 + $0x468] sm:$0xff]  }
 0xbdd   : > { %12917 = vmatprep.subr.bf16.mxu1 %v17707_v7 }
 0xbe0   : > { %12918 = vmatpush3.bf16.msra.mxu1 %v14298_v21 }
 0xbe1   : > { %12919 = vmatprep.subr.bf16.mxu1 %v17707_v7 }
 0xbe4   : > { %12920 = vmatpush3.bf16.msra.mxu1 %v14299_v55 }
 0xbe5   : > { %12921 = vmatprep.subr.bf16.mxu1 %v17707_v7 }
 0xbe6   : > { %v7393_v24 = vpop.f32.mrb[16].mxu1 }
 0xbe7   : > { %v7399_v29 = vadd.f32 %v7393_v24, %v7291_v54  ;;  %v12789_v34 = vpop.f32.mrb[17].mxu1  ;;  %v14325_v54 = vld [vmem:[%s17667_s6 + $0x430] sm:$0xff]  }
 0xbe8   : > { %v7396_v59 = vpop.f32.mrb[18].mxu1  ;;  %12922 = vmatpush3.bf16.msra.mxu1 %v14300_v50 }
 0xbe9   : > { %v12790_v53 = vpop.f32.mrb[19].mxu1  ;;  %12923 = vmatprep.subr.bf16.mxu1 %v17707_v7  ;;  %v14334_v59 = vld [vmem:[%s17667_s6 + $0x478] sm:$0xff]  }
 0xbea   : > { %v14335_v53 = vld [vmem:[%s17667_s6 + $0x480] sm:$0xff]  }
 0xbec   : > { %12924 = vmatpush3.bf16.msra.mxu1 %v14301_v60  ;;  %v8480_v60 = vld [vmem:[#allocation4 + $0x11] sm:$0x1] }
 0xbed   : > { %12925 = vmatprep.subr.bf16.mxu1 %v17707_v7 }
 0xbf0   : > { %12926 = vmatpush3.bf16.msra.mxu1 %v14302_v45  ;;  %v8481_v45 = vpack.c.bf16 %v8480_v60, %v8480_v60  ;;  %v14368_v60 = vld [vmem:[%s17667_s6 + $0x588] sm:$0xff]  }
 0xbf1   : > { %12931 = vmatprep.subr.bf16.mxu1 %v17707_v7 }
 0xbf3   : > { %12928 = vmatmul.mubr.bf16.vlgmr.msra.gmra.mrb[44].mxu1 %v8049_v22  ;;  %v14338_v22 = vld [vmem:[%s17667_s6 + $0x498] sm:$0xff]  }
 0xbf4   : > { %12932 = vmatpush3.bf16.msra.mxu1 %v14303_v32  ;;  %12947 = vmatprep.mubr.msk.bf16.mxu1 %vm14490_vm0, %v17707_v7  ;;  %v14337_v32 = vld [vmem:[%s17667_s6 + $0x490] sm:$0xff]  }
 0xbf5   : > { %12933 = vmatprep.subr.bf16.mxu1 %v17707_v7 }
 0xbf8   : > { %12934 = vmatpush3.bf16.msra.mxu1 %v14304_v14  ;;  %v14339_v14 = vld [vmem:[%s17667_s6 + $0x4a0] sm:$0xff]  }
 0xbf9   : > { %12935 = vmatprep.subr.bf16.mxu1 %v17707_v7 }
 0xbfc   : > { %12936 = vmatpush3.bf16.msra.mxu1 %v14305_v51  ;;  %v14340_v51 = vld [vmem:[%s17667_s6 + $0x4a8] sm:$0xff]  }
 0xbfd   : > { %12937 = vmatprep.subr.bf16.mxu1 %v17707_v7 }
 0xc00   : > { %12938 = vmatpush3.bf16.msra.mxu1 %v14306_v46 }
 0xc01   : > { %12939 = vmatprep.subr.bf16.mxu1 %v17707_v7 }
 0xc04   : > { %12940 = vmatpush3.bf16.msra.mxu1 %v14307_v19 }
 0xc05   : > { %12941 = vmatprep.subr.bf16.mxu1 %v17707_v7 }
 0xc06   : > { %v7501_v35 = vpop.f32.mrb[20].mxu1 }
 0xc07   : > { %v7507_v4 = vadd.f32 %v7501_v35, %v7399_v29  ;;  %v12809_v28 = vpop.f32.mrb[21].mxu1  ;;  %v14333_v29 = vld [vmem:[%s17667_s6 + $0x470] sm:$0xff]  }
 0xc08   : > { %v7504_v1 = vpop.f32.mrb[22].mxu1  ;;  %12942 = vmatpush3.bf16.msra.mxu1 %v14308_v30 }
 0xc09   : > { %v12810_v52 = vpop.f32.mrb[23].mxu1  ;;  %12943 = vmatprep.subr.bf16.mxu1 %v17707_v7  ;;  %v14342_v1 = vld [vmem:[%s17667_s6 + $0x4b8] sm:$0xff]  }
 0xc0a   : > { %v14343_v52 = vld [vmem:[%s17667_s6 + $0x4c0] sm:$0xff]  }
 0xc0c   : > { %12944 = vmatpush3.bf16.msra.mxu1 %v14309_v23  ;;  %v8588_v23 = vld [vmem:[#allocation4 + $0x12] sm:$0x1] }
 0xc0d   : > { %12945 = vmatprep.subr.bf16.mxu1 %v17707_v7 }
 0xc10   : > { %12946 = vmatpush3.bf16.msra.mxu1 %v14310_v20  ;;  %v8589_v20 = vpack.c.bf16 %v8588_v23, %v8588_v23  ;;  %v14376_v23 = vld [vmem:[%s17667_s6 + $0x5c8] sm:$0xff]  }
 0xc11   : > { %12951 = vmatprep.subr.bf16.mxu1 %v17707_v7 }
 0xc13   : > { %12948 = vmatmul.mubr.bf16.vlgmr.msra.gmra.mrb[48].mxu1 %v8157_v18  ;;  %v14346_v18 = vld [vmem:[%s17667_s6 + $0x4d8] sm:$0xff]  }
 0xc14   : > { %12952 = vmatpush3.bf16.msra.mxu1 %v14311_v43  ;;  %12967 = vmatprep.mubr.msk.bf16.mxu1 %vm14490_vm0, %v17707_v7  ;;  %v14345_v43 = vld [vmem:[%s17667_s6 + $0x4d0] sm:$0xff]  }
 0xc15   : > { %12953 = vmatprep.subr.bf16.mxu1 %v17707_v7 }
 0xc18   : > { %12954 = vmatpush3.bf16.msra.mxu1 %v14312_v47  ;;  %v14347_v47 = vld [vmem:[%s17667_s6 + $0x4e0] sm:$0xff]  }
 0xc19   : > { %12955 = vmatprep.subr.bf16.mxu1 %v17707_v7 }
 0xc1c   : > { %12956 = vmatpush3.bf16.msra.mxu1 %v14313_v11  ;;  %v14348_v11 = vld [vmem:[%s17667_s6 + $0x4e8] sm:$0xff]  }
 0xc1d   : > { %12957 = vmatprep.subr.bf16.mxu1 %v17707_v7 }
 0xc20   : > { %12958 = vmatpush3.bf16.msra.mxu1 %v14314_v8 }
 0xc21   : > { %12959 = vmatprep.subr.bf16.mxu1 %v17707_v7 }
 0xc24   : > { %12960 = vmatpush3.bf16.msra.mxu1 %v14315_v42 }
 0xc25   : > { %12961 = vmatprep.subr.bf16.mxu1 %v17707_v7 }
 0xc26   : > { %v7609_v27 = vpop.f32.mrb[24].mxu1 }
 0xc27   : > { %v7615_v37 = vadd.f32 %v7609_v27, %v7507_v4  ;;  %v12829_v58 = vpop.f32.mrb[25].mxu1  ;;  %v14341_v4 = vld [vmem:[%s17667_s6 + $0x4b0] sm:$0xff]  }
 0xc28   : > { %v7612_v0 = vpop.f32.mrb[26].mxu1  ;;  %12962 = vmatpush3.bf16.msra.mxu1 %v14316_v44 }
 0xc29   : > { %v12830_v48 = vpop.f32.mrb[27].mxu1  ;;  %12963 = vmatprep.subr.bf16.mxu1 %v17707_v7  ;;  %v14350_v0 = vld [vmem:[%s17667_s6 + $0x4f8] sm:$0xff]  }
 0xc2a   : > { %v14351_v48 = vld [vmem:[%s17667_s6 + $0x500] sm:$0xff]  }
 0xc2c   : > { %12964 = vmatpush3.bf16.msra.mxu1 %v14317_v56  ;;  %v8696_v56 = vld [vmem:[#allocation4 + $0x13] sm:$0x1] }
 0xc2d   : > { %12965 = vmatprep.subr.bf16.mxu1 %v17707_v7 }
 0xc30   : > { %12966 = vmatpush3.bf16.msra.mxu1 %v14318_v5  ;;  %v8697_v5 = vpack.c.bf16 %v8696_v56, %v8696_v56  ;;  %v14384_v56 = vld [vmem:[%s17667_s6 + $0x608] sm:$0xff]  }
 0xc31   : > { %12971 = vmatprep.subr.bf16.mxu1 %v17707_v7 }
 0xc33   : > { %12968 = vmatmul.mubr.bf16.vlgmr.msra.gmra.mrb[52].mxu1 %v8265_v63  ;;  %v14354_v63 = vld [vmem:[%s17667_s6 + $0x518] sm:$0xff]  }
 0xc34   : > { %12972 = vmatpush3.bf16.msra.mxu1 %v14319_v10  ;;  %12987 = vmatprep.mubr.msk.bf16.mxu1 %vm14490_vm0, %v17707_v7  ;;  %v14353_v10 = vld [vmem:[%s17667_s6 + $0x510] sm:$0xff]  }
 0xc35   : > { %12973 = vmatprep.subr.bf16.mxu1 %v17707_v7 }
 0xc38   : > { %12974 = vmatpush3.bf16.msra.mxu1 %v14320_v12  ;;  %v14355_v12 = vld [vmem:[%s17667_s6 + $0x520] sm:$0xff]  }
 0xc39   : > { %12975 = vmatprep.subr.bf16.mxu1 %v17707_v7 }
 0xc3c   : > { %12976 = vmatpush3.bf16.msra.mxu1 %v14321_v13  ;;  %v14356_v13 = vld [vmem:[%s17667_s6 + $0x528] sm:$0xff]  }
 0xc3d   : > { %12977 = vmatprep.subr.bf16.mxu1 %v17707_v7 }
 0xc40   : > { %12978 = vmatpush3.bf16.msra.mxu1 %v14322_v26 }
 0xc41   : > { %12979 = vmatprep.subr.bf16.mxu1 %v17707_v7 }
 0xc44   : > { %12980 = vmatpush3.bf16.msra.mxu1 %v14323_v36 }
 0xc45   : > { %12981 = vmatprep.subr.bf16.mxu1 %v17707_v7 }
 0xc46   : > { %v7717_v40 = vpop.f32.mrb[28].mxu1 }
 0xc47   : > { %v7723_v49 = vadd.f32 %v7717_v40, %v7615_v37  ;;  %v12849_v3 = vpop.f32.mrb[29].mxu1  ;;  %v14349_v37 = vld [vmem:[%s17667_s6 + $0x4f0] sm:$0xff]  }
 0xc48   : > { %v7720_v57 = vpop.f32.mrb[30].mxu1  ;;  %12982 = vmatpush3.bf16.msra.mxu1 %v14324_v31 }
 0xc49   : > { %v12850_v2 = vpop.f32.mrb[31].mxu1  ;;  %12983 = vmatprep.subr.bf16.mxu1 %v17707_v7  ;;  %v14358_v57 = vld [vmem:[%s17667_s6 + $0x538] sm:$0xff]  }
 0xc4a   : > { %v14359_v2 = vld [vmem:[%s17667_s6 + $0x540] sm:$0xff]  }
 0xc4c   : > { %12984 = vmatpush3.bf16.msra.mxu1 %v14325_v54  ;;  %v8804_v54 = vld [vmem:[#allocation4 + $0x14] sm:$0x1] }
 0xc4d   : > { %12985 = vmatprep.subr.bf16.mxu1 %v17707_v7 }
 0xc50   : > { %12986 = vmatpush3.bf16.msra.mxu1 %v14326_v39  ;;  %v8805_v39 = vpack.c.bf16 %v8804_v54, %v8804_v54 }
 0xc51   : > { %12991 = vmatprep.subr.bf16.mxu1 %v17707_v7 }
 0xc53   : > { %12988 = vmatmul.mubr.bf16.vlgmr.msra.gmra.mrb[56].mxu1 %v8373_v62  ;;  %v14362_v62 = vld [vmem:[%s17667_s6 + $0x558] sm:$0xff]  }
 0xc54   : > { %12992 = vmatpush3.bf16.msra.mxu1 %v14327_v61  ;;  %13007 = vmatprep.mubr.msk.bf16.mxu1 %vm14490_vm0, %v17707_v7  ;;  %v14361_v61 = vld [vmem:[%s17667_s6 + $0x550] sm:$0xff]  }
 0xc55   : > { %12993 = vmatprep.subr.bf16.mxu1 %v17707_v7 }
 0xc58   : > { %12994 = vmatpush3.bf16.msra.mxu1 %v14328_v41  ;;  %v14363_v41 = vld [vmem:[%s17667_s6 + $0x560] sm:$0xff]  }
 0xc59   : > { %12995 = vmatprep.subr.bf16.mxu1 %v17707_v7 }
 0xc5c   : > { %12996 = vmatpush3.bf16.msra.mxu1 %v14329_v15  ;;  %v14364_v15 = vld [vmem:[%s17667_s6 + $0x568] sm:$0xff]  }
 0xc5d   : > { %12997 = vmatprep.subr.bf16.mxu1 %v17707_v7 }
 0xc60   : > { %12998 = vmatpush3.bf16.msra.mxu1 %v14330_v38 }
 0xc61   : > { %12999 = vmatprep.subr.bf16.mxu1 %v17707_v7 }
 0xc64   : > { %13000 = vmatpush3.bf16.msra.mxu1 %v14331_v17 }
 0xc65   : > { %13001 = vmatprep.subr.bf16.mxu1 %v17707_v7 }
 0xc66   : > { %v7825_v21 = vpop.f32.mrb[32].mxu1 }
 0xc67   : > { %v7831_v55 = vadd.f32 %v7825_v21, %v7723_v49  ;;  %v12869_v50 = vpop.f32.mrb[33].mxu1  ;;  %v14357_v49 = vld [vmem:[%s17667_s6 + $0x530] sm:$0xff]  }
 0xc68   : > { %v7828_v24 = vpop.f32.mrb[34].mxu1  ;;  %13002 = vmatpush3.bf16.msra.mxu1 %v14332_v16 }
 0xc69   : > { %v12870_v34 = vpop.f32.mrb[35].mxu1  ;;  %13003 = vmatprep.subr.bf16.mxu1 %v17707_v7  ;;  %v14366_v24 = vld [vmem:[%s17667_s6 + $0x578] sm:$0xff]  }
 0xc6a   : > { %v14367_v34 = vld [vmem:[%s17667_s6 + $0x580] sm:$0xff]  }
 0xc6c   : > { %13004 = vmatpush3.bf16.msra.mxu1 %v14333_v29  ;;  %v8912_v29 = vld [vmem:[#allocation4 + $0x15] sm:$0x1] }
 0xc6d   : > { %13005 = vmatprep.subr.bf16.mxu1 %v17707_v7 }
 0xc70   : > { %13006 = vmatpush3.bf16.msra.mxu1 %v14334_v59  ;;  %v8913_v59 = vpack.c.bf16 %v8912_v29, %v8912_v29 }
 0xc71   : > { %13011 = vmatprep.subr.bf16.mxu1 %v17707_v7 }
 0xc73   : > { %13008 = vmatmul.mubr.bf16.vlgmr.msra.gmra.mrb[60].mxu1 %v8481_v45  ;;  %v14370_v45 = vld [vmem:[%s17667_s6 + $0x598] sm:$0xff]  }
 0xc74   : > { %13012 = vmatpush3.bf16.msra.mxu1 %v14335_v53  ;;  %13027 = vmatprep.mubr.msk.bf16.mxu1 %vm14490_vm0, %v17707_v7  ;;  %v14369_v53 = vld [vmem:[%s17667_s6 + $0x590] sm:$0xff]  }
 0xc75   : > { %13013 = vmatprep.subr.bf16.mxu1 %v17707_v7 }
 0xc78   : > { %13014 = vmatpush3.bf16.msra.mxu1 %v14336_v6  ;;  %v14371_v6 = vld [vmem:[%s17667_s6 + $0x5a0] sm:$0xff]  }
 0xc79   : > { %13015 = vmatprep.subr.bf16.mxu1 %v17707_v7 }
 0xc7c   : > { %13016 = vmatpush3.bf16.msra.mxu1 %v14337_v32  ;;  %v14372_v32 = vld [vmem:[%s17667_s6 + $0x5a8] sm:$0xff]  }
 0xc7d   : > { %13017 = vmatprep.subr.bf16.mxu1 %v17707_v7 }
 0xc80   : > { %13018 = vmatpush3.bf16.msra.mxu1 %v14338_v22 }
 0xc81   : > { %13019 = vmatprep.subr.bf16.mxu1 %v17707_v7 }
 0xc84   : > { %13020 = vmatpush3.bf16.msra.mxu1 %v14339_v14 }
 0xc85   : > { %13021 = vmatprep.subr.bf16.mxu1 %v17707_v7 }
 0xc86   : > { %v7933_v46 = vpop.f32.mrb[36].mxu1 }
 0xc87   : > { %v7939_v19 = vadd.f32 %v7933_v46, %v7831_v55  ;;  %v12889_v30 = vpop.f32.mrb[37].mxu1  ;;  %v14365_v55 = vld [vmem:[%s17667_s6 + $0x570] sm:$0xff]  }
 0xc88   : > { %v7936_v35 = vpop.f32.mrb[38].mxu1  ;;  %13022 = vmatpush3.bf16.msra.mxu1 %v14340_v51 }
 0xc89   : > { %v12890_v28 = vpop.f32.mrb[39].mxu1  ;;  %13023 = vmatprep.subr.bf16.mxu1 %v17707_v7  ;;  %v14374_v35 = vld [vmem:[%s17667_s6 + $0x5b8] sm:$0xff]  }
 0xc8a   : > { %v14375_v28 = vld [vmem:[%s17667_s6 + $0x5c0] sm:$0xff]  }
 0xc8c   : > { %13024 = vmatpush3.bf16.msra.mxu1 %v14341_v4  ;;  %v9020_v4 = vld [vmem:[#allocation4 + $0x16] sm:$0x1] }
 0xc8d   : > { %13025 = vmatprep.subr.bf16.mxu1 %v17707_v7 }
 0xc90   : > { %13026 = vmatpush3.bf16.msra.mxu1 %v14342_v1  ;;  %v9021_v1 = vpack.c.bf16 %v9020_v4, %v9020_v4 }
 0xc91   : > { %13031 = vmatprep.subr.bf16.mxu1 %v17707_v7 }
 0xc93   : > { %13028 = vmatmul.mubr.bf16.vlgmr.msra.gmra.mrb[64].mxu1 %v8589_v20  ;;  %v14378_v20 = vld [vmem:[%s17667_s6 + $0x5d8] sm:$0xff]  }
 0xc94   : > { %13032 = vmatpush3.bf16.msra.mxu1 %v14343_v52  ;;  %13047 = vmatprep.mubr.msk.bf16.mxu1 %vm14490_vm0, %v17707_v7  ;;  %v14377_v52 = vld [vmem:[%s17667_s6 + $0x5d0] sm:$0xff]  }
 0xc95   : > { %13033 = vmatprep.subr.bf16.mxu1 %v17707_v7 }
 0xc98   : > { %13034 = vmatpush3.bf16.msra.mxu1 %v14344_v25  ;;  %v14379_v25 = vld [vmem:[%s17667_s6 + $0x5e0] sm:$0xff]  }
 0xc99   : > { %13035 = vmatprep.subr.bf16.mxu1 %v17707_v7 }
 0xc9c   : > { %13036 = vmatpush3.bf16.msra.mxu1 %v14345_v43  ;;  %v14380_v43 = vld [vmem:[%s17667_s6 + $0x5e8] sm:$0xff]  }
 0xc9d   : > { %13037 = vmatprep.subr.bf16.mxu1 %v17707_v7 }
 0xca0   : > { %13038 = vmatpush3.bf16.msra.mxu1 %v14346_v18 }
 0xca1   : > { %13039 = vmatprep.subr.bf16.mxu1 %v17707_v7 }
 0xca4   : > { %13040 = vmatpush3.bf16.msra.mxu1 %v14347_v47 }
 0xca5   : > { %13041 = vmatprep.subr.bf16.mxu1 %v17707_v7 }
 0xca6   : > { %v8041_v8 = vpop.f32.mrb[40].mxu1 }
 0xca7   : > { %v8047_v42 = vadd.f32 %v8041_v8, %v7939_v19  ;;  %v12909_v44 = vpop.f32.mrb[41].mxu1  ;;  %v14373_v19 = vld [vmem:[%s17667_s6 + $0x5b0] sm:$0xff]  }
 0xca8   : > { %v8044_v27 = vpop.f32.mrb[42].mxu1  ;;  %13042 = vmatpush3.bf16.msra.mxu1 %v14348_v11 }
 0xca9   : > { %v12910_v58 = vpop.f32.mrb[43].mxu1  ;;  %13043 = vmatprep.subr.bf16.mxu1 %v17707_v7  ;;  %v14382_v27 = vld [vmem:[%s17667_s6 + $0x5f8] sm:$0xff]  }
 0xcaa   : > { %v14383_v58 = vld [vmem:[%s17667_s6 + $0x600] sm:$0xff]  }
 0xcac   : > { %13044 = vmatpush3.bf16.msra.mxu1 %v14349_v37  ;;  %v9128_v37 = vld [vmem:[#allocation4 + $0x17] sm:$0x1] }
 0xcad   : > { %13045 = vmatprep.subr.bf16.mxu1 %v17707_v7 }
 0xcb0   : > { %13046 = vmatpush3.bf16.msra.mxu1 %v14350_v0  ;;  %v9129_v0 = vpack.c.bf16 %v9128_v37, %v9128_v37  ;;  %v14399_v37 = vld [vmem:[%s17671_s10] sm:$0xff]  }
 0xcb1   : > { %13051 = vmatprep.subr.bf16.mxu1 %v17707_v7 }
 0xcb3   : > { %13048 = vmatmul.mubr.bf16.vlgmr.msra.gmra.mrb[68].mxu1 %v8697_v5  ;;  %v14386_v5 = vld [vmem:[%s17667_s6 + $0x618] sm:$0xff]  }
 0xcb4   : > { %13052 = vmatpush3.bf16.msra.mxu1 %v14351_v48  ;;  %13067 = vmatprep.mubr.msk.bf16.mxu1 %vm14490_vm0, %v17707_v7  ;;  %v14385_v48 = vld [vmem:[%s17667_s6 + $0x610] sm:$0xff]  }
 0xcb5   : > { %13053 = vmatprep.subr.bf16.mxu1 %v17707_v7 }
 0xcb8   : > { %13054 = vmatpush3.bf16.msra.mxu1 %v14352_v33  ;;  %v14387_v33 = vld [vmem:[%s17667_s6 + $0x620] sm:$0xff]  }
 0xcb9   : > { %13055 = vmatprep.subr.bf16.mxu1 %v17707_v7 }
 0xcbc   : > { %13056 = vmatpush3.bf16.msra.mxu1 %v14353_v10  ;;  %v14388_v10 = vld [vmem:[%s17667_s6 + $0x628] sm:$0xff]  }
 0xcbd   : > { %13057 = vmatprep.subr.bf16.mxu1 %v17707_v7 }
 0xcc0   : > { %13058 = vmatpush3.bf16.msra.mxu1 %v14354_v63 }
 0xcc1   : > { %13059 = vmatprep.subr.bf16.mxu1 %v17707_v7 }
 0xcc4   : > { %13060 = vmatpush3.bf16.msra.mxu1 %v14355_v12 }
 0xcc5   : > { %13061 = vmatprep.subr.bf16.mxu1 %v17707_v7 }
 0xcc6   : > { %v8149_v26 = vpop.f32.mrb[44].mxu1 }
 0xcc7   : > { %v8155_v36 = vadd.f32 %v8149_v26, %v8047_v42  ;;  %v12929_v31 = vpop.f32.mrb[45].mxu1  ;;  %v14381_v42 = vld [vmem:[%s17667_s6 + $0x5f0] sm:$0xff]  }
 0xcc8   : > { %v8152_v40 = vpop.f32.mrb[46].mxu1  ;;  %13062 = vmatpush3.bf16.msra.mxu1 %v14356_v13 }
 0xcc9   : > { %v12930_v3 = vpop.f32.mrb[47].mxu1  ;;  %13063 = vmatprep.subr.bf16.mxu1 %v17707_v7  ;;  %v14390_v40 = vld [vmem:[%s17667_s6 + $0x638] sm:$0xff]  }
 0xccc   : > { %13064 = vmatpush3.bf16.msra.mxu1 %v14357_v49  ;;  %v9236_v49 = vld [vmem:[#allocation4 + $0x18] sm:$0x1] }
 0xccd   : > { %13065 = vmatprep.subr.bf16.mxu1 %v17707_v7  ;;  %v9237_v3 = vpack.c.bf16 %v9236_v49, %v9236_v49 }
 0xcd0   : > { %13066 = vmatpush3.bf16.msra.mxu1 %v14358_v57 }
 0xcd1   : > { %13071 = vmatprep.subr.bf16.mxu1 %v17707_v7 }
 0xcd3   : > { %13068 = vmatmul.mubr.bf16.vlgmr.msra.gmra.mrb[72].mxu1 %v8805_v39 }
 0xcd4   : > { %13072 = vmatpush3.bf16.msra.mxu1 %v14359_v2  ;;  %13087 = vmatprep.mubr.msk.bf16.mxu1 %vm14490_vm0, %v17707_v7 }
 0xcd5   : > { %13073 = vmatprep.subr.bf16.mxu1 %v17707_v7 }
 0xcd8   : > { %13074 = vmatpush3.bf16.msra.mxu1 %v14360_v9 }
 0xcd9   : > { %13075 = vmatprep.subr.bf16.mxu1 %v17707_v7 }
 0xcdc   : > { %13076 = vmatpush3.bf16.msra.mxu1 %v14361_v61 }
 0xcdd   : > { %13077 = vmatprep.subr.bf16.mxu1 %v17707_v7 }
 0xce0   : > { %13078 = vmatpush3.bf16.msra.mxu1 %v14362_v62 }
 0xce1   : > { %13079 = vmatprep.subr.bf16.mxu1 %v17707_v7 }
 0xce4   : > { %13080 = vmatpush3.bf16.msra.mxu1 %v14363_v41 }
 0xce5   : > { %13081 = vmatprep.subr.bf16.mxu1 %v17707_v7 }
 0xce6   : > { %v8257_v38 = vpop.f32.mrb[48].mxu1 }
 0xce7   : > { %v8263_v17 = vadd.f32 %v8257_v38, %v8155_v36  ;;  %v12949_v16 = vpop.f32.mrb[49].mxu1  ;;  %v14389_v36 = vld [vmem:[%s17667_s6 + $0x630] sm:$0xff]  }
 0xce8   : > { %v8260_v21 = vpop.f32.mrb[50].mxu1  ;;  %13082 = vmatpush3.bf16.msra.mxu1 %v14364_v15  ;;  %v14392_v16 = vld [vmem:[%s17669_s8 + $0x8] sm:$0xff]  }
 0xce9   : > { %v12950_v50 = vpop.f32.mrb[51].mxu1  ;;  %13083 = vmatprep.subr.bf16.mxu1 %v17707_v7  ;;  %v14393_v21 = vld [vmem:[%s17669_s8 + $0x10] sm:$0xff]  }
 0xcea   : > { %v14395_v50 = vld [vmem:[%s17669_s8 + $0x20] sm:$0xff]  }
 0xcec   : > { %13084 = vmatpush3.bf16.msra.mxu1 %v14365_v55  ;;  %v14394_v55 = vld [vmem:[%s17669_s8 + $0x18] sm:$0xff]  }
 0xced   : > { %13085 = vmatprep.subr.bf16.mxu1 %v17707_v7 }
 0xcf0   : > { %13086 = vmatpush3.bf16.msra.mxu1 %v14366_v24  ;;  %v14396_v24 = vld [vmem:[%s17669_s8 + $0x28] sm:$0xff]  }
 0xcf1   : > { %13091 = vmatprep.subr.bf16.mxu1 %v17707_v7 }
 0xcf3   : > { %13088 = vmatmul.mubr.bf16.vlgmr.msra.gmra.mrb[76].mxu1 %v8913_v59 }
 0xcf4   : > { %13092 = vmatpush3.bf16.msra.mxu1 %v14367_v34  ;;  %13107 = vmatprep.mubr.msk.bf16.mxu1 %vm14490_vm0, %v17707_v7 }
 0xcf5   : > { %13093 = vmatprep.subr.bf16.mxu1 %v17707_v7 }
 0xcf8   : > { %13094 = vmatpush3.bf16.msra.mxu1 %v14368_v60 }
 0xcf9   : > { %13095 = vmatprep.subr.bf16.mxu1 %v17707_v7 }
 0xcfc   : > { %13096 = vmatpush3.bf16.msra.mxu1 %v14369_v53 }
 0xcfd   : > { %13097 = vmatprep.subr.bf16.mxu1 %v17707_v7 }
 0xd00   : > { %13098 = vmatpush3.bf16.msra.mxu1 %v14370_v45  ;;  %v14397_v45 = vld [vmem:[%s17669_s8 + $0x30] sm:$0xff]  }
 0xd01   : > { %13099 = vmatprep.subr.bf16.mxu1 %v17707_v7 }
 0xd04   : > { %13100 = vmatpush3.bf16.msra.mxu1 %v14371_v6  ;;  %v14398_v6 = vld [vmem:[%s17669_s8 + $0x38] sm:$0xff]  }
 0xd05   : > { %13101 = vmatprep.subr.bf16.mxu1 %v17707_v7 }
 0xd06   : > { %v8365_v22 = vpop.f32.mrb[52].mxu1 }
 0xd07   : > { %v8371_v14 = vadd.f32 %v8365_v22, %v8263_v17  ;;  %v12969_v51 = vpop.f32.mrb[53].mxu1  ;;  %v14391_v17 = vld [vmem:[%s17669_s8] sm:$0xff]  }
 0xd08   : > { %v8368_v46 = vpop.f32.mrb[54].mxu1  ;;  %13102 = vmatpush3.bf16.msra.mxu1 %v14372_v32 }
 0xd09   : > { %v12970_v30 = vpop.f32.mrb[55].mxu1  ;;  %13103 = vmatprep.subr.bf16.mxu1 %v17707_v7 }
 0xd0c   : > { %13104 = vmatpush3.bf16.msra.mxu1 %v14373_v19 }
 0xd0d   : > { %13105 = vmatprep.subr.bf16.mxu1 %v17707_v7 }
 0xd10   : > { %13106 = vmatpush3.bf16.msra.mxu1 %v14374_v35 }
 0xd11   : > { %13111 = vmatprep.subr.bf16.mxu1 %v17707_v7 }
 0xd13   : > { %13108 = vmatmul.mubr.bf16.vlgmr.msra.gmra.mrb[80].mxu1 %v9021_v1 }
 0xd14   : > { %13112 = vmatpush3.bf16.msra.mxu1 %v14375_v28  ;;  %13127 = vmatprep.mubr.msk.bf16.mxu1 %vm14490_vm0, %v17707_v7 }
 0xd15   : > { %13113 = vmatprep.subr.bf16.mxu1 %v17707_v7 }
 0xd18   : > { %13114 = vmatpush3.bf16.msra.mxu1 %v14376_v23 }
 0xd19   : > { %13115 = vmatprep.subr.bf16.mxu1 %v17707_v7 }
 0xd1c   : > { %13116 = vmatpush3.bf16.msra.mxu1 %v14377_v52 }
 0xd1d   : > { %13117 = vmatprep.subr.bf16.mxu1 %v17707_v7 }
 0xd20   : > { %13118 = vmatpush3.bf16.msra.mxu1 %v14378_v20 }
 0xd21   : > { %13119 = vmatprep.subr.bf16.mxu1 %v17707_v7 }
 0xd24   : > { %13120 = vmatpush3.bf16.msra.mxu1 %v14379_v25 }
 0xd25   : > { %13121 = vmatprep.subr.bf16.mxu1 %v17707_v7 }
 0xd26   : > { %v8473_v18 = vpop.f32.mrb[56].mxu1 }
 0xd27   : > { %v8479_v47 = vadd.f32 %v8473_v18, %v8371_v14  ;;  %v12989_v11 = vpop.f32.mrb[57].mxu1  ;;  %v9344_v18 = vld [vmem:[%s17668_s7] sm:$0x1] }
 0xd28   : > { %v8476_v8 = vpop.f32.mrb[58].mxu1  ;;  %13122 = vmatpush3.bf16.msra.mxu1 %v14380_v43 }
 0xd29   : > { %v12990_v44 = vpop.f32.mrb[59].mxu1  ;;  %13123 = vmatprep.subr.bf16.mxu1 %v17707_v7 }
 0xd2c   : > { %13124 = vmatpush3.bf16.msra.mxu1 %v14381_v42 }
 0xd2d   : > { %13125 = vmatprep.subr.bf16.mxu1 %v17707_v7 }
 0xd30   : > { %13126 = vmatpush3.bf16.msra.mxu1 %v14382_v27 }
 0xd31   : > { %13131 = vmatprep.subr.bf16.mxu1 %v17707_v7 }
 0xd33   : > { %13128 = vmatmul.mubr.bf16.vlgmr.msra.gmra.mrb[84].mxu1 %v9129_v0  ;;  %v14400_v0 = vld [vmem:[%s17671_s10 + $0x8] sm:$0xff]  }
 0xd34   : > { %13132 = vmatpush3.bf16.msra.mxu1 %v14383_v58  ;;  %13147 = vmatprep.mubr.msk.bf16.mxu1 %vm14490_vm0, %v17707_v7 }
 0xd35   : > { %13133 = vmatprep.subr.bf16.mxu1 %v17707_v7 }
 0xd38   : > { %13134 = vmatpush3.bf16.msra.mxu1 %v14384_v56  ;;  %v14401_v56 = vld [vmem:[%s17671_s10 + $0x10] sm:$0xff]  }
 0xd39   : > { %13135 = vmatprep.subr.bf16.mxu1 %v17707_v7 }
 0xd3c   : > { %13136 = vmatpush3.bf16.msra.mxu1 %v14385_v48  ;;  %v14402_v48 = vld [vmem:[%s17671_s10 + $0x18] sm:$0xff]  }
 0xd3d   : > { %13137 = vmatprep.subr.bf16.mxu1 %v17707_v7 }
 0xd40   : > { %13138 = vmatpush3.bf16.msra.mxu1 %v14386_v5  ;;  %v14403_v5 = vld [vmem:[%s17671_s10 + $0x20] sm:$0xff]  }
 0xd41   : > { %13139 = vmatprep.subr.bf16.mxu1 %v17707_v7 }
 0xd44   : > { %13140 = vmatpush3.bf16.msra.mxu1 %v14387_v33  ;;  %v14404_v33 = vld [vmem:[%s17671_s10 + $0x28] sm:$0xff]  }
 0xd45   : > { %13141 = vmatprep.subr.bf16.mxu1 %v17707_v7 }
 0xd46   : > { %v8581_v63 = vpop.f32.mrb[60].mxu1 }
 0xd47   : > { %v8587_v12 = vadd.f32 %v8581_v63, %v8479_v47  ;;  %v13009_v13 = vpop.f32.mrb[61].mxu1  ;;  %v14406_v63 = vld [vmem:[%s17671_s10 + $0x38] sm:$0xff]  }
 0xd48   : > { %v8584_v26 = vpop.f32.mrb[62].mxu1  ;;  %13142 = vmatpush3.bf16.msra.mxu1 %v14388_v10  ;;  %v14405_v10 = vld [vmem:[%s17671_s10 + $0x30] sm:$0xff]  }
 0xd49   : > { %v13010_v31 = vpop.f32.mrb[63].mxu1  ;;  %13143 = vmatprep.subr.bf16.mxu1 %v17707_v7 }
 0xd4c   : > { %13144 = vmatpush3.bf16.msra.mxu1 %v14389_v36 }
 0xd4d   : > { %13145 = vmatprep.subr.bf16.mxu1 %v17707_v7 }
 0xd50   : > { %13146 = vmatpush3.bf16.msra.mxu1 %v14390_v40 }
 0xd51   : > { %13151 = vmatprep.subr.bf16.mxu1 %v17707_v7 }
 0xd53   : > { %13148 = vmatmul.mubr.bf16.vlgmr.msra.gmra.mrb[88].mxu1 %v9237_v3 }
 0xd54   : > { %13167 = vmatprep.mubr.msk.bf16.mxu1 %vm14490_vm0, %v17707_v7  ;;  %13152 = vmatpush3.bf16.msra.mxu1 %v14391_v17 }
 0xd55   : > { %13153 = vmatprep.subr.bf16.mxu1 %v17707_v7 }
 0xd58   : > { %13154 = vmatpush3.bf16.msra.mxu1 %v14392_v16 }
 0xd59   : > { %13155 = vmatprep.subr.bf16.mxu1 %v17707_v7 }
 0xd5c   : > { %13156 = vmatpush3.bf16.msra.mxu1 %v14393_v21 }
 0xd5d   : > { %13157 = vmatprep.subr.bf16.mxu1 %v17707_v7 }
 0xd60   : > { %13158 = vmatpush3.bf16.msra.mxu1 %v14394_v55 }
 0xd61   : > { %13159 = vmatprep.subr.bf16.mxu1 %v17707_v7 }
 0xd64   : > { %13160 = vmatpush3.bf16.msra.mxu1 %v14395_v50 }
 0xd65   : > { %13161 = vmatprep.subr.bf16.mxu1 %v17707_v7 }
 0xd66   : > { %v8689_v57 = vpop.f32.mrb[64].mxu1 }
 0xd67   : > { %v8695_v54 = vadd.f32 %v8689_v57, %v8587_v12  ;;  %v13029_v2 = vpop.f32.mrb[65].mxu1  ;;  %v9364_v12 = vld [vmem:[%s17670_s9] sm:$0x1] }
 0xd68   : > { %v8692_v39 = vpop.f32.mrb[66].mxu1  ;;  %13162 = vmatpush3.bf16.msra.mxu1 %v14396_v24  ;;  %v9471_v57 = vld [vmem:[%s17672_s11] sm:$0x1] }
 0xd69   : > { %v13030_v9 = vpop.f32.mrb[67].mxu1  ;;  %13163 = vmatprep.subr.bf16.mxu1 %v17707_v7 }
 0xd6c   : > { %13164 = vmatpush3.bf16.msra.mxu1 %v14397_v45 }
 0xd6d   : > { %13165 = vmatprep.subr.bf16.mxu1 %v17707_v7 }
 0xd70   : > { %13166 = vmatpush3.bf16.msra.mxu1 %v14398_v6 }
 0xd71   : > { %13171 = vmatprep.subr.bf16.mxu1 %v17707_v7 }
 0xd86   : > { %v8797_v61 = vpop.f32.mrb[68].mxu1 }
 0xd87   : > { %v8803_v62 = vadd.f32 %v8797_v61, %v8695_v54  ;;  %v13049_v41 = vpop.f32.mrb[69].mxu1 }
 0xd88   : > { %v8800_v15 = vpop.f32.mrb[70].mxu1 }
 0xd89   : > { %v13050_v38 = vpop.f32.mrb[71].mxu1 }
 0xda6   : > { %v8905_v29 = vpop.f32.mrb[72].mxu1 }
 0xda7   : > { %v8911_v34 = vadd.f32 %v8905_v29, %v8803_v62  ;;  %v13069_v59 = vpop.f32.mrb[73].mxu1 }
 0xda8   : > { %v8908_v60 = vpop.f32.mrb[74].mxu1 }
 0xda9   : > { %v13070_v53 = vpop.f32.mrb[75].mxu1 }
 0xdc6   : > { %v9013_v32 = vpop.f32.mrb[76].mxu1 }
 0xdc7   : > { %v9019_v22 = vadd.f32 %v9013_v32, %v8911_v34  ;;  %v13089_v14 = vpop.f32.mrb[77].mxu1 }
 0xdc8   : > { %v9016_v51 = vpop.f32.mrb[78].mxu1 }
 0xdc9   : > { %v13090_v46 = vpop.f32.mrb[79].mxu1 }
 0xde6   : > { %v9121_v19 = vpop.f32.mrb[80].mxu1 }
 0xde7   : > { %v9127_v30 = vadd.f32 %v9121_v19, %v9019_v22  ;;  %v13109_v35 = vpop.f32.mrb[81].mxu1 }
 0xde8   : > { %v9124_v4 = vpop.f32.mrb[82].mxu1 }
 0xde9   : > { %v13110_v28 = vpop.f32.mrb[83].mxu1 }
 0xe06   : > { %v9229_v1 = vpop.f32.mrb[84].mxu1 }
 0xe07   : > { %v9235_v23 = vadd.f32 %v9229_v1, %v9127_v30  ;;  %v13129_v52 = vpop.f32.mrb[85].mxu1 }
 0xe08   : > { %v9232_v20 = vpop.f32.mrb[86].mxu1 }
 0xe09   : > { %v13130_v25 = vpop.f32.mrb[87].mxu1 }
 0xe26   : > { %v9337_v43 = vpop.f32.mrb[88].mxu1 }
 0xe27   : > { %v9343_v47 = vadd.f32 %v9337_v43, %v9235_v23  ;;  %v13149_v11 = vpop.f32.mrb[89].mxu1 }
 0xe28   : > { %v9340_v8 = vpop.f32.mrb[90].mxu1 }
 0xe29   : > { %v9345_v42 = vadd.f32 %v9344_v18, %v9343_v47  ;;  %v13150_v44 = vpop.f32.mrb[91].mxu1 }
 0xe2b   : > { %v9346_v27 = vmax.f32 %v9345_v42, 0.0 }
 0xe2d   : > { %v9347_v58 = vpack.c.bf16 %v9346_v27, %v9346_v27 }
 0xe2f   : > { %13168 = vmatmul.mubr.bf16.vlgmr.msra.gmra.mrb[92].mxu1 %v9347_v58 }
 0xe30   : > { %13172 = vmatpush3.bf16.msra.mxu1 %v14399_v37  ;;  %13187 = vmatprep.mubr.msk.bf16.mxu1 %vm14490_vm0, %v17707_v7 }
 0xe31   : > { %13173 = vmatprep.subr.bf16.mxu1 %v17707_v7 }
 0xe34   : > { %13174 = vmatpush3.bf16.msra.mxu1 %v14400_v0 }
 0xe35   : > { %13175 = vmatprep.subr.bf16.mxu1 %v17707_v7 }
 0xe38   : > { %13176 = vmatpush3.bf16.msra.mxu1 %v14401_v56 }
 0xe39   : > { %13177 = vmatprep.subr.bf16.mxu1 %v17707_v7 }
 0xe3c   : > { %13178 = vmatpush3.bf16.msra.mxu1 %v14402_v48 }
 0xe3d   : > { %13179 = vmatprep.subr.bf16.mxu1 %v17707_v7 }
 0xe40   : > { %13180 = vmatpush3.bf16.msra.mxu1 %v14403_v5 }
 0xe41   : > { %13181 = vmatprep.subr.bf16.mxu1 %v17707_v7 }
 0xe44   : > { %13182 = vmatpush3.bf16.msra.mxu1 %v14404_v33 }
 0xe45   : > { %13183 = vmatprep.subr.bf16.mxu1 %v17707_v7 }
 0xe48   : > { %13184 = vmatpush3.bf16.msra.mxu1 %v14405_v10 }
 0xe49   : > { %13185 = vmatprep.subr.bf16.mxu1 %v17707_v7 }
 0xe4c   : > { %13186 = vmatpush3.bf16.msra.mxu1 %v14406_v63 }
 0xf02   : > { %v9447_v13 = vpop.f32.mrb[92].mxu1 }
 0xf03   : > { %v9448_v26 = vadd.f32 %v9447_v13, %v9364_v12  ;;  %v13169_v36 = vpop.f32.mrb[93].mxu1 }
 0xf04   : > { %v9450_v31 = vpop.f32.mrb[94].mxu1 }
 0xf05   : > { %v9453_v40 = vmax.f32 %v9448_v26, 0.0  ;;  %v13170_v49 = vpop.f32.mrb[95].mxu1 }
 0xf07   : > { %v9454_v3 = vpack.c.bf16 %v9453_v40, %v9453_v40 }
 0xf09   : > { %13188 = vmatmul.mubr.bf16.vlgmr.msra.gmra.mrb[96].mxu1 %v9454_v3 }
 0xfdc   : > { %v9554_v7 = vpop.f32.mrb[96].mxu1 }
 0xfdd   : > { %v9555_v54 = vadd.f32 %v9554_v7, %v9471_v57  ;;  %v13189_v2 = vpop.f32.mrb[97].mxu1 }
 0xfde   : > { %v9557_v39 = vpop.f32.mrb[98].mxu1 }
 0xfdf   : > { %9560 = vst [vmem:[%s405_s18] sm:$0x1] %v9555_v54  ;;  %v13190_v9 = vpop.f32.mrb[99].mxu1 }
 0xfe0   : > { %14438 = shalt.err (!%p14435_p3)
}
 0xfe1   : > { %s14439_s28 = scalar_lea.hbm %s17619_s26, 16  ;;  %s14443_s16 = scalar_lea.hbm %s17673_s12, 32 }
 0xfe2   : > { %p14440_p4 = scmp.ne.s32.totalorder %s17619_s26, %s14439_s28  ;;  %p14444_p9 = scmp.lt.u32.totalorder %s17619_s26, %s17673_s12 }
 0xfe3   : > { %p14445_p10 = scmp.lt.u32.totalorder %s14443_s16, %s14439_s28  ;;  %p14447_p12 = scmp.lt.u32.totalorder %s14439_s28, %s17619_s26 }
 0xfe4   : > { %p14441_p7 = pnand %p14440_p4, %p14595_p5 }
 0xfe5   : > { %p14446_p11 = por %p14445_p10, %p14444_p9 }
 0xfe6   : > { %p14442_p8 = pneg %p14441_p7 }
 0xfe7   : > { %p14448_p13 = por %p14447_p12, %p14446_p11 }
 0xfe9   : > { %p14449_p0 = pnand %p14448_p13, %p14442_p8 }
 0xfeb   : > { %14452 = shalt.err (!%p14449_p0)
}
 0xfec   : > { %14038 = dma.vmem_to_hbm [thread:$0]  (%p14595_p5), %s17621_s19, 16, %s17619_s26, %s9562_s29  }
 0xfed PF: > { %p14044_p1 = scmp.ge.s32.totalorder %s14487_s24, 2  ;;  %s9586_s25 = sand.u32 1, %s14475_s21  }
 0xfee   : > { %s9587_s20 = scalar_lea.sflag [#allocation6], %s9586_s25 }
 0xfef   : > { %p14041_p2 = pnand %p14044_p1, %p14599_p6 }
 0xff1   : > { %14470 = dma.done.wait (!%p14041_p2), %s9587_s20, 16  }
 0xff2   : > { %14472 = vsyncadd (!%p14041_p2), %s9587_s20, 4294967280  ;;  %p22_p3 = scmp.ge.s32.totalorder %s14582_s27, 4   ;;  %s17746_s21 = smov %s14479_s22 }
 0xff3   : > { %s17747_s22 = smov %s14483_s23  ;;  %s17748_s23 = smov %s14593_s30 }
 0xff4   : > { %s17749_s24 = smov %s14582_s27  ;;  %24 = sbr.rel (!%p22_p3) target bundleno = 5 (0x5), region = 154 }
 0xffb   :  { %9591 = vsyncpa [#allocation6], 1 }
 0xffc   :  { %9593 = vsyncpa [#allocation6 + $0x1], 1 }

</bundles_post_ra>
